<compile_context>
chip_gen: v5e
topology: v5e:2x2
jax: 0.10.0
libtpu: 0.0.40
codegen_flags: <defaults>
</compile_context>

<pallas_src>
import math

import jax
import jax.numpy as jnp
from jax import lax
from jax.experimental import pallas as pl
from jax.experimental.pallas import tpu as pltpu


NUM_LABELS = 2
NL_PAD = 128                       # lane-dense padding of the 2-wide QA head output
VMEM_LIMIT_BYTES = 48 * 1024 * 1024  # portable across v5e/v6e (128 MiB) and v7x (64 MiB)
TIME_TILE_TARGET = 128             # max timesteps resident per grid step


def _largest_divisor_leq(n, cap):
    d = max(1, min(n, cap))
    while n % d:
        d -= 1
    return d


# ----------------------------------------------------------------------------
# Fused BiGRU-layer kernel (input projection + fwd/bwd recurrence [+ QA head])
# ----------------------------------------------------------------------------
def make_bigru_kernel(num_halves, tile_t, hidden, fuse_qa):
    """Builds the per-time-tile BiGRU kernel.

    Ref order (matches wrapper):
      inputs : x_fwd[0..nh), x_rev[0..nh),
               wih_f[0..nh), wih_b[0..nh),
               bih_f, bih_b, whh_f, whh_b, bhh_f, bhh_b, [wqa_f, wqa_b, bqa]
      outputs: out_f, out_b            (hidden halves, or lane-padded logits if fuse_qa)
      scratch: xgf_sc, xgb_sc, hf_sc, hb_sc, [hsf_sc, hsb_sc]

    x_fwd tiles are time tile i (ascending time); x_rev tiles are time tile NT-1-i,
    processed in descending local order, so the bwd recurrence sees time T-1 .. 0.
    PyTorch nn.GRU gate order (r, z, n) with r * (W_hn h + b_hn).
    """
    H = hidden
    TT = tile_t

    def kernel(*refs):
        it = iter(refs)
        x_f = [next(it) for _ in range(num_halves)]
        x_r = [next(it) for _ in range(num_halves)]
        wih_f = [next(it) for _ in range(num_halves)]
        wih_b = [next(it) for _ in range(num_halves)]
        bih_f_ref = next(it)
        bih_b_ref = next(it)
        whh_f_ref = next(it)
        whh_b_ref = next(it)
        bhh_f_ref = next(it)
        bhh_b_ref = next(it)
        if fuse_qa:
            wqa_f_ref = next(it)
            wqa_b_ref = next(it)
            bqa_ref = next(it)
        out_f_ref = next(it)
        out_b_ref = next(it)
        xgf_sc = next(it)
        xgb_sc = next(it)
        hf_sc = next(it)
        hb_sc = next(it)
        if fuse_qa:
            hsf_sc = next(it)
            hsb_sc = next(it)

        TB = x_f[0].shape[1]

        # Reset the recurrent carries at the first time tile of each batch tile.
        @pl.when(pl.program_id(1) == 0)
        def _():
            hf_sc[...] = jnp.zeros_like(hf_sc)
            hb_sc[...] = jnp.zeros_like(hb_sc)

        # ---- Hoisted input->gate projection for the whole time tile (f32 acc) ----
        def proj(x_tiles, w_tiles, b_ref):
            acc = jnp.zeros((TT * TB, 3 * H), jnp.float32)
            for xr, wr in zip(x_tiles, w_tiles):
                d = xr.shape[-1]
                acc = acc + jnp.dot(xr[...].reshape(TT * TB, d), wr[...],
                                    preferred_element_type=jnp.float32)
            acc = acc + b_ref[...]                       # (1, 3H) broadcasts over rows
            return acc.reshape(TT, TB, 3 * H)

        xgf_sc[...] = proj(x_f, wih_f, bih_f_ref)        # gates for the fwd direction
        xgb_sc[...] = proj(x_r, wih_b, bih_b_ref)        # gates for the bwd direction

        # Hoist weight / bias loads out of the scan.
        whh_f = whh_f_ref[...]
        whh_b = whh_b_ref[...]
        bhh_f = bhh_f_ref[...]
        bhh_b = bhh_b_ref[...]

        def step(tt, carry):
            tr = TT - 1 - tt                              # local index of the reverse stream
            hf = hf_sc[...]                               # f32 carries
            hb = hb_sc[...]
            hg_f = jnp.dot(hf.astype(whh_f.dtype), whh_f,
                           preferred_element_type=jnp.float32) + bhh_f
            hg_b = jnp.dot(hb.astype(whh_b.dtype), whh_b,
                           preferred_element_type=jnp.float32) + bhh_b
            xg_f = xgf_sc[tt]                             # (TB, 3H) f32
            xg_b = xgb_sc[tr]
            # forward direction
            rf = jax.nn.sigmoid(xg_f[:, 0:H] + hg_f[:, 0:H])
            zf = jax.nn.sigmoid(xg_f[:, H:2 * H] + hg_f[:, H:2 * H])
            nf = jnp.tanh(xg_f[:, 2 * H:3 * H] + rf * hg_f[:, 2 * H:3 * H])
            hf_new = (1.0 - zf) * nf + zf * hf
            # backward direction
            rb = jax.nn.sigmoid(xg_b[:, 0:H] + hg_b[:, 0:H])
            zb = jax.nn.sigmoid(xg_b[:, H:2 * H] + hg_b[:, H:2 * H])
            nb = jnp.tanh(xg_b[:, 2 * H:3 * H] + rb * hg_b[:, 2 * H:3 * H])
            hb_new = (1.0 - zb) * nb + zb * hb
            hf_sc[...] = hf_new
            hb_sc[...] = hb_new
            if fuse_qa:
                hsf_sc[tt] = hf_new.astype(hsf_sc.dtype)
                hsb_sc[tr] = hb_new.astype(hsb_sc.dtype)
            else:
                out_f_ref[tt] = hf_new.astype(out_f_ref.dtype)
                out_b_ref[tr] = hb_new.astype(out_b_ref.dtype)
            return carry

        lax.fori_loop(0, TT, step, 0, unroll=min(TT, 8))

        if fuse_qa:
            # QA head on the VMEM-resident tile hidden states: one big lane-dense store
            # per direction per tile; fwd / bwd contributions are summed outside.
            hsf = hsf_sc[...].reshape(TT * TB, H)
            hsb = hsb_sc[...].reshape(TT * TB, H)
            out_f_ref[...] = jnp.dot(hsf, wqa_f_ref[...],
                                     preferred_element_type=jnp.float32
                                     ).reshape(TT, TB, NL_PAD).astype(out_f_ref.dtype)
            out_b_ref[...] = (jnp.dot(hsb, wqa_b_ref[...],
                                      preferred_element_type=jnp.float32)
                              + bqa_ref[...]).reshape(TT, TB, NL_PAD).astype(out_b_ref.dtype)

    return kernel


# ----------------------------------------------------------------------------
# Wrapper: one pallas_call per BiGRU layer
# ----------------------------------------------------------------------------
def bigru_layer(x_halves, p, *, tile_t, tile_b, qa=None):
    """x_halves: tuple of (T, B, Dj) bf16 time-major feature halves.

    Returns (out_f, out_b) as (T, B, H) bf16, or lane-padded logits contributions
    (T, B, NL_PAD) f32 if `qa = (wqa_f, wqa_b, bqa)` is given (last layer).
    """
    T, B = x_halves[0].shape[:2]
    H = p["whh_f"].shape[0]
    nh = len(x_halves)
    nt = T // tile_t
    nb = B // tile_b

    def fwd_spec(d):
        return pl.BlockSpec((tile_t, tile_b, d), lambda b, i: (i, b, 0))

    def rev_spec(d):
        return pl.BlockSpec((tile_t, tile_b, d), lambda b, i: (nt - 1 - i, b, 0))

    def full_spec(a):
        return pl.BlockSpec(a.shape, lambda b, i: (0,) * a.ndim)

    in_specs = ([fwd_spec(x.shape[-1]) for x in x_halves]
                + [rev_spec(x.shape[-1]) for x in x_halves]
                + [full_spec(w) for w in p["wih_f"]]
                + [full_spec(w) for w in p["wih_b"]]
                + [full_spec(p["bih_f"]), full_spec(p["bih_b"]),
                   full_spec(p["whh_f"]), full_spec(p["whh_b"]),
                   full_spec(p["bhh_f"]), full_spec(p["bhh_b"])])
    args = (list(x_halves) + list(x_halves)
            + list(p["wih_f"]) + list(p["wih_b"])
            + [p["bih_f"], p["bih_b"], p["whh_f"], p["whh_b"], p["bhh_f"], p["bhh_b"]])

    scratch = [pltpu.VMEM((tile_t, tile_b, 3 * H), jnp.float32),   # xg fwd
               pltpu.VMEM((tile_t, tile_b, 3 * H), jnp.float32),   # xg bwd
               pltpu.VMEM((tile_b, H), jnp.float32),               # h fwd carry
               pltpu.VMEM((tile_b, H), jnp.float32)]               # h bwd carry

    if qa is None:
        out_shape = (jax.ShapeDtypeStruct((T, B, H), jnp.bfloat16),
                     jax.ShapeDtypeStruct((T, B, H), jnp.bfloat16))
        out_specs = (pl.BlockSpec((tile_t, tile_b, H), lambda b, i: (i, b, 0)),
                     pl.BlockSpec((tile_t, tile_b, H), lambda b, i: (nt - 1 - i, b, 0)))
        out_width_bytes = 2 * H * 2
    else:
        wqa_f, wqa_b, bqa = qa
        in_specs += [full_spec(wqa_f), full_spec(wqa_b), full_spec(bqa)]
        args += [wqa_f, wqa_b, bqa]
        out_shape = (jax.ShapeDtypeStruct((T, B, NL_PAD), jnp.float32),
                     jax.ShapeDtypeStruct((T, B, NL_PAD), jnp.float32))
        out_specs = (pl.BlockSpec((tile_t, tile_b, NL_PAD), lambda b, i: (i, b, 0)),
                     pl.BlockSpec((tile_t, tile_b, NL_PAD), lambda b, i: (nt - 1 - i, b, 0)))
        scratch += [pltpu.VMEM((tile_t, tile_b, H), jnp.bfloat16),
                    pltpu.VMEM((tile_t, tile_b, H), jnp.bfloat16)]
        out_width_bytes = 2 * NL_PAD * 4

    din = sum(int(x.shape[-1]) for x in x_halves)
    cost = pl.CostEstimate(
        flops=int(4 * T * B * 3 * H * (din + H)),
        transcendentals=int(6 * T * B * H),
        bytes_accessed=int(T * B * (2 * din * 2 + out_width_bytes)),
    )

    kernel = make_bigru_kernel(nh, tile_t, H, qa is not None)
    return pl.pallas_call(
        kernel,
        grid=(nb, nt),
        out_shape=out_shape,
        in_specs=in_specs,
        out_specs=out_specs,
        scratch_shapes=scratch,
        compiler_params=pltpu.CompilerParams(
            dimension_semantics=("parallel", "arbitrary"),
            vmem_limit_bytes=VMEM_LIMIT_BYTES),
        cost_estimate=cost,
    )(*args)


# ----------------------------------------------------------------------------
# Parameter construction (deterministic synthetic init, PyTorch-style ranges)
# ----------------------------------------------------------------------------
def init_gru_params(key, in_dims, hidden):
    """in_dims: widths of the input feature halves (1 half for layer 1, 2 after)."""
    k = 1.0 / math.sqrt(hidden)
    keys = jax.random.split(key, 2 * len(in_dims) + 6)

    def u(kk, shape):
        return jax.random.uniform(kk, shape, jnp.float32, -k, k)

    wih_f = [u(keys[2 * j], (d, 3 * hidden)).astype(jnp.bfloat16)
             for j, d in enumerate(in_dims)]
    wih_b = [u(keys[2 * j + 1], (d, 3 * hidden)).astype(jnp.bfloat16)
             for j, d in enumerate(in_dims)]
    o = 2 * len(in_dims)
    return {
        "wih_f": wih_f, "wih_b": wih_b,                       # per-half (Dj, 3H) bf16
        "bih_f": u(keys[o + 0], (1, 3 * hidden)),             # f32
        "bih_b": u(keys[o + 1], (1, 3 * hidden)),
        "whh_f": u(keys[o + 2], (hidden, 3 * hidden)).astype(jnp.bfloat16),
        "whh_b": u(keys[o + 3], (hidden, 3 * hidden)).astype(jnp.bfloat16),
        "bhh_f": u(keys[o + 4], (1, 3 * hidden)),
        "bhh_b": u(keys[o + 5], (1, 3 * hidden)),
    }


def init_model_params(key, vocab_size, hidden_dim, num_labels=NUM_LABELS):
    k_emb, k1, k2, k3, k_w, k_b = jax.random.split(key, 6)
    h3 = hidden_dim // 2
    klin = 1.0 / math.sqrt(hidden_dim)
    w_qa = jax.random.uniform(k_w, (hidden_dim, num_labels), jnp.float32, -klin, klin)
    b_qa = jax.random.uniform(k_b, (num_labels,), jnp.float32, -klin, klin)
    # Row-split the QA head to match the fwd/bwd halves; lane-pad columns to 128.
    wqa_f = jnp.zeros((h3, NL_PAD), jnp.float32).at[:, :num_labels].set(w_qa[:h3])
    wqa_b = jnp.zeros((h3, NL_PAD), jnp.float32).at[:, :num_labels].set(w_qa[h3:])
    bqa = jnp.zeros((1, NL_PAD), jnp.float32).at[:, :num_labels].set(b_qa)
    return {
        "embedding": jax.random.normal(
            k_emb, (vocab_size, hidden_dim), jnp.float32).astype(jnp.bfloat16),
        "gru1": init_gru_params(k1, (hidden_dim,), hidden_dim),
        "gru2": init_gru_params(k2, (hidden_dim, hidden_dim), hidden_dim),
        "gru3": init_gru_params(k3, (hidden_dim, hidden_dim), h3),
        "qa_wf": wqa_f.astype(jnp.bfloat16),
        "qa_wb": wqa_b.astype(jnp.bfloat16),
        "qa_b": bqa,                                            # f32
    }


# ----------------------------------------------------------------------------
# Forward pass (inference path of BiRNNForQuestionAnswering.forward)
# ----------------------------------------------------------------------------
def forward(params, input_ids, num_labels=NUM_LABELS):
    B, T = input_ids.shape
    # Pad batch to full sublanes (>= 8 rows per recurrent matmul); padded rows discarded.
    b_pad = -(-B // 8) * 8
    if b_pad != B:
        input_ids = jnp.pad(input_ids, ((0, b_pad - B), (0, 0)))
    # bf16 embedding gather, then the single (B,T,.)->(T,B,.) transpose for the network.
    emb = jnp.take(params["embedding"], input_ids, axis=0)          # (Bp, T, H) bf16
    x = jnp.transpose(emb, (1, 0, 2))                                # (T, Bp, H) bf16

    tile_t = _largest_divisor_leq(T, TIME_TILE_TARGET)
    tile_b = b_pad // 2 if (b_pad % 16 == 0 and b_pad >= 16) else b_pad  # 2 tiles -> 2 TCs

    h1f, h1b = bigru_layer((x,), params["gru1"], tile_t=tile_t, tile_b=tile_b)
    h2f, h2b = bigru_layer((h1f, h1b), params["gru2"], tile_t=tile_t, tile_b=tile_b)
    lf, lb = bigru_layer((h2f, h2b), params["gru3"], tile_t=tile_t, tile_b=tile_b,
                         qa=(params["qa_wf"], params["qa_wb"], params["qa_b"]))

    logits_pad = lf + lb                                             # (T, Bp, NL_PAD) f32
    logits = jnp.transpose(logits_pad[:, :B, :num_labels], (1, 0, 2))  # (B, T, NL)
    start_logits = logits[..., 0]
    end_logits = logits[..., 1]
    # TODO(synk): training-time CrossEntropyLoss branch (start/end positions) not
    # exercised here; inference forward only.
    return {"logits": logits, "start_logits": start_logits, "end_logits": end_logits}


if __name__ == "__main__":
    VOCAB = 100
    HIDDEN = 32
    B, T = 2, 8

    root = jax.random.PRNGKey(0)
    k_params, k_ids = jax.random.split(root)
    params = init_model_params(k_params, VOCAB, HIDDEN, NUM_LABELS)
    input_ids = jax.random.randint(k_ids, (B, T), 0, VOCAB, dtype=jnp.int32)

    out = jax.jit(forward)(params, input_ids)
    jax.block_until_ready(out)

    assert out["logits"].shape == (B, T, NUM_LABELS)
    assert out["start_logits"].shape == (B, T)
    assert out["end_logits"].shape == (B, T)
    assert bool(jnp.all(jnp.isfinite(out["logits"])))
    print("KERNEL_OK")
</pallas_src>

<mosaic_0001>
module attributes {stable_mosaic.version = 11 : i64} {
  func.func @kernel(%arg0: i32, %arg1: i32, %arg2: memref<8x8x32xbf16, #tpu.memory_space<vmem>>, %arg3: memref<8x8x32xbf16, #tpu.memory_space<vmem>>, %arg4: memref<8x8x32xbf16, #tpu.memory_space<vmem>>, %arg5: memref<8x8x32xbf16, #tpu.memory_space<vmem>>, %arg6: memref<32x96xbf16, #tpu.memory_space<vmem>>, %arg7: memref<32x96xbf16, #tpu.memory_space<vmem>>, %arg8: memref<32x96xbf16, #tpu.memory_space<vmem>>, %arg9: memref<32x96xbf16, #tpu.memory_space<vmem>>, %arg10: memref<1x96xf32, #tpu.memory_space<vmem>>, %arg11: memref<1x96xf32, #tpu.memory_space<vmem>>, %arg12: memref<32x96xbf16, #tpu.memory_space<vmem>>, %arg13: memref<32x96xbf16, #tpu.memory_space<vmem>>, %arg14: memref<1x96xf32, #tpu.memory_space<vmem>>, %arg15: memref<1x96xf32, #tpu.memory_space<vmem>>, %arg16: memref<8x8x32xbf16, #tpu.memory_space<vmem>>, %arg17: memref<8x8x32xbf16, #tpu.memory_space<vmem>>, %arg18: memref<8x8x96xf32, #tpu.memory_space<vmem>>, %arg19: memref<8x8x96xf32, #tpu.memory_space<vmem>>, %arg20: memref<8x32xf32, #tpu.memory_space<vmem>>, %arg21: memref<8x32xf32, #tpu.memory_space<vmem>>) attributes {dimension_semantics = [#tpu.dimension_semantics<parallel>, #tpu.dimension_semantics<arbitrary>], iteration_bounds = array<i64: 1, 1>, scalar_prefetch = 0 : i64, scratch_operands = 4 : i64, tpu.core_type = #tpu.core_type<tc>, window_params = [{transform_indices = @transform_0, window_bounds = array<i64: 8, 8, 32>}, {transform_indices = @transform_1, window_bounds = array<i64: 8, 8, 32>}, {transform_indices = @transform_2, window_bounds = array<i64: 8, 8, 32>}, {transform_indices = @transform_3, window_bounds = array<i64: 8, 8, 32>}, {pipeline_mode = #tpu.pipeline_mode<synchronous>, transform_indices = @transform_4, window_bounds = array<i64: 32, 96>}, {pipeline_mode = #tpu.pipeline_mode<synchronous>, transform_indices = @transform_5, window_bounds = array<i64: 32, 96>}, {pipeline_mode = #tpu.pipeline_mode<synchronous>, transform_indices = @transform_6, window_bounds = array<i64: 32, 96>}, {pipeline_mode = #tpu.pipeline_mode<synchronous>, transform_indices = @transform_7, window_bounds = array<i64: 32, 96>}, {pipeline_mode = #tpu.pipeline_mode<synchronous>, transform_indices = @transform_8, window_bounds = array<i64: 1, 96>}, {pipeline_mode = #tpu.pipeline_mode<synchronous>, transform_indices = @transform_9, window_bounds = array<i64: 1, 96>}, {pipeline_mode = #tpu.pipeline_mode<synchronous>, transform_indices = @transform_10, window_bounds = array<i64: 32, 96>}, {pipeline_mode = #tpu.pipeline_mode<synchronous>, transform_indices = @transform_11, window_bounds = array<i64: 32, 96>}, {pipeline_mode = #tpu.pipeline_mode<synchronous>, transform_indices = @transform_12, window_bounds = array<i64: 1, 96>}, {pipeline_mode = #tpu.pipeline_mode<synchronous>, transform_indices = @transform_13, window_bounds = array<i64: 1, 96>}, {transform_indices = @transform_14, window_bounds = array<i64: 8, 8, 32>}, {transform_indices = @transform_15, window_bounds = array<i64: 8, 8, 32>}]} {
    %c0_i32 = arith.constant 0 : i32
    %0 = arith.cmpi eq, %arg1, %c0_i32 : i32
    %1 = arith.extui %0 : i1 to i32
    %c0_i32_0 = arith.constant 0 : i32
    %2 = arith.cmpi ne, %1, %c0_i32_0 : i32
    scf.if %2 {
      %cst_244 = arith.constant 0.000000e+00 : f32
      %687 = vector.broadcast %cst_244 : f32 to vector<8x32xf32>
      %c0_245 = arith.constant 0 : index
      %c0_246 = arith.constant 0 : index
      %688 = vector.load %arg20[%c0_245, %c0_246] : memref<8x32xf32, #tpu.memory_space<vmem>>, vector<8x32xf32>
      tpu.vector_store %arg20[%c0_245, %c0_246], %687 {strides = array<i32>} : memref<8x32xf32, #tpu.memory_space<vmem>>, vector<8x32xf32>,
      %cst_247 = arith.constant 0.000000e+00 : f32
      %689 = vector.broadcast %cst_247 : f32 to vector<8x32xf32>
      %c0_248 = arith.constant 0 : index
      %c0_249 = arith.constant 0 : index
      %690 = vector.load %arg21[%c0_248, %c0_249] : memref<8x32xf32, #tpu.memory_space<vmem>>, vector<8x32xf32>
      tpu.vector_store %arg21[%c0_248, %c0_249], %689 {strides = array<i32>} : memref<8x32xf32, #tpu.memory_space<vmem>>, vector<8x32xf32>,
    } else {
    }
    %cst = arith.constant 0.000000e+00 : f32
    %3 = vector.broadcast %cst : f32 to vector<64x96xf32>
    %c0 = arith.constant 0 : index
    %c0_1 = arith.constant 0 : index
    %c0_2 = arith.constant 0 : index
    %4 = vector.load %arg2[%c0, %c0_1, %c0_2] : memref<8x8x32xbf16, #tpu.memory_space<vmem>>, vector<8x8x32xbf16>
    %5 = vector.shape_cast %4 : vector<8x8x32xbf16> to vector<64x32xbf16>
    %c0_3 = arith.constant 0 : index
    %c0_4 = arith.constant 0 : index
    %6 = vector.load %arg6[%c0_3, %c0_4] : memref<32x96xbf16, #tpu.memory_space<vmem>>, vector<32x96xbf16>
    %cst_5 = arith.constant dense<0.000000e+00> : vector<64x96xf32>
    %7 = tpu.matmul %5, %6, %cst_5 {dimension_numbers = #tpu.dot_dimension_numbers<[1], [0], [0], [1], [0, 0, 1, 1], [], []>} : vector<64x32xbf16>, vector<32x96xbf16>, vector<64x96xf32> -> vector<64x96xf32>
    %8 = arith.addf %3, %7 : vector<64x96xf32>
    %c0_6 = arith.constant 0 : index
    %c0_7 = arith.constant 0 : index
    %c0_8 = arith.constant 0 : index
    %9 = vector.load %arg3[%c0_6, %c0_7, %c0_8] : memref<8x8x32xbf16, #tpu.memory_space<vmem>>, vector<8x8x32xbf16>
    %10 = vector.shape_cast %9 : vector<8x8x32xbf16> to vector<64x32xbf16>
    %c0_9 = arith.constant 0 : index
    %c0_10 = arith.constant 0 : index
    %11 = vector.load %arg7[%c0_9, %c0_10] : memref<32x96xbf16, #tpu.memory_space<vmem>>, vector<32x96xbf16>
    %cst_11 = arith.constant dense<0.000000e+00> : vector<64x96xf32>
    %12 = tpu.matmul %10, %11, %cst_11 {dimension_numbers = #tpu.dot_dimension_numbers<[1], [0], [0], [1], [0, 0, 1, 1], [], []>} : vector<64x32xbf16>, vector<32x96xbf16>, vector<64x96xf32> -> vector<64x96xf32>
    %13 = arith.addf %8, %12 : vector<64x96xf32>
    %c0_12 = arith.constant 0 : index
    %c0_13 = arith.constant 0 : index
    %14 = vector.load %arg10[%c0_12, %c0_13] : memref<1x96xf32, #tpu.memory_space<vmem>>, vector<1x96xf32>
    %15 = vector.broadcast %14 : vector<1x96xf32> to vector<64x96xf32>
    %16 = arith.addf %13, %15 : vector<64x96xf32>
    %17 = vector.shape_cast %16 : vector<64x96xf32> to vector<8x8x96xf32>
    %c0_14 = arith.constant 0 : index
    %c0_15 = arith.constant 0 : index
    %c0_16 = arith.constant 0 : index
    %18 = vector.load %arg18[%c0_14, %c0_15, %c0_16] : memref<8x8x96xf32, #tpu.memory_space<vmem>>, vector<8x8x96xf32>
    tpu.vector_store %arg18[%c0_14, %c0_15, %c0_16], %17 {strides = array<i32>} : memref<8x8x96xf32, #tpu.memory_space<vmem>>, vector<8x8x96xf32>,
    %cst_17 = arith.constant 0.000000e+00 : f32
    %19 = vector.broadcast %cst_17 : f32 to vector<64x96xf32>
    %c0_18 = arith.constant 0 : index
    %c0_19 = arith.constant 0 : index
    %c0_20 = arith.constant 0 : index
    %20 = vector.load %arg4[%c0_18, %c0_19, %c0_20] : memref<8x8x32xbf16, #tpu.memory_space<vmem>>, vector<8x8x32xbf16>
    %21 = vector.shape_cast %20 : vector<8x8x32xbf16> to vector<64x32xbf16>
    %c0_21 = arith.constant 0 : index
    %c0_22 = arith.constant 0 : index
    %22 = vector.load %arg8[%c0_21, %c0_22] : memref<32x96xbf16, #tpu.memory_space<vmem>>, vector<32x96xbf16>
    %cst_23 = arith.constant dense<0.000000e+00> : vector<64x96xf32>
    %23 = tpu.matmul %21, %22, %cst_23 {dimension_numbers = #tpu.dot_dimension_numbers<[1], [0], [0], [1], [0, 0, 1, 1], [], []>} : vector<64x32xbf16>, vector<32x96xbf16>, vector<64x96xf32> -> vector<64x96xf32>
    %24 = arith.addf %19, %23 : vector<64x96xf32>
    %c0_24 = arith.constant 0 : index
    %c0_25 = arith.constant 0 : index
    %c0_26 = arith.constant 0 : index
    %25 = vector.load %arg5[%c0_24, %c0_25, %c0_26] : memref<8x8x32xbf16, #tpu.memory_space<vmem>>, vector<8x8x32xbf16>
    %26 = vector.shape_cast %25 : vector<8x8x32xbf16> to vector<64x32xbf16>
    %c0_27 = arith.constant 0 : index
    %c0_28 = arith.constant 0 : index
    %27 = vector.load %arg9[%c0_27, %c0_28] : memref<32x96xbf16, #tpu.memory_space<vmem>>, vector<32x96xbf16>
    %cst_29 = arith.constant dense<0.000000e+00> : vector<64x96xf32>
    %28 = tpu.matmul %26, %27, %cst_29 {dimension_numbers = #tpu.dot_dimension_numbers<[1], [0], [0], [1], [0, 0, 1, 1], [], []>} : vector<64x32xbf16>, vector<32x96xbf16>, vector<64x96xf32> -> vector<64x96xf32>
    %29 = arith.addf %24, %28 : vector<64x96xf32>
    %c0_30 = arith.constant 0 : index
    %c0_31 = arith.constant 0 : index
    %30 = vector.load %arg11[%c0_30, %c0_31] : memref<1x96xf32, #tpu.memory_space<vmem>>, vector<1x96xf32>
    %31 = vector.broadcast %30 : vector<1x96xf32> to vector<64x96xf32>
    %32 = arith.addf %29, %31 : vector<64x96xf32>
    %33 = vector.shape_cast %32 : vector<64x96xf32> to vector<8x8x96xf32>
    %c0_32 = arith.constant 0 : index
    %c0_33 = arith.constant 0 : index
    %c0_34 = arith.constant 0 : index
    %34 = vector.load %arg19[%c0_32, %c0_33, %c0_34] : memref<8x8x96xf32, #tpu.memory_space<vmem>>, vector<8x8x96xf32>
    tpu.vector_store %arg19[%c0_32, %c0_33, %c0_34], %33 {strides = array<i32>} : memref<8x8x96xf32, #tpu.memory_space<vmem>>, vector<8x8x96xf32>,
    %c0_35 = arith.constant 0 : index
    %c0_36 = arith.constant 0 : index
    %35 = vector.load %arg12[%c0_35, %c0_36] : memref<32x96xbf16, #tpu.memory_space<vmem>>, vector<32x96xbf16>
    %c0_37 = arith.constant 0 : index
    %c0_38 = arith.constant 0 : index
    %36 = vector.load %arg13[%c0_37, %c0_38] : memref<32x96xbf16, #tpu.memory_space<vmem>>, vector<32x96xbf16>
    %c0_39 = arith.constant 0 : index
    %c0_40 = arith.constant 0 : index
    %37 = vector.load %arg14[%c0_39, %c0_40] : memref<1x96xf32, #tpu.memory_space<vmem>>, vector<1x96xf32>
    %c0_41 = arith.constant 0 : index
    %c0_42 = arith.constant 0 : index
    %38 = vector.load %arg15[%c0_41, %c0_42] : memref<1x96xf32, #tpu.memory_space<vmem>>, vector<1x96xf32>
    %c0_i32_43 = arith.constant 0 : i32
    %c7_i32 = arith.constant 7 : i32
    %39 = arith.subi %c7_i32, %c0_i32_43 : i32
    %c0_44 = arith.constant 0 : index
    %c0_45 = arith.constant 0 : index
    %40 = vector.load %arg20[%c0_44, %c0_45] : memref<8x32xf32, #tpu.memory_space<vmem>>, vector<8x32xf32>
    %c0_46 = arith.constant 0 : index
    %c0_47 = arith.constant 0 : index
    %41 = vector.load %arg21[%c0_46, %c0_47] : memref<8x32xf32, #tpu.memory_space<vmem>>, vector<8x32xf32>
    %42 = arith.truncf %40 : vector<8x32xf32> to vector<8x32xbf16>
    %cst_48 = arith.constant dense<0.000000e+00> : vector<8x96xf32>
    %43 = tpu.matmul %42, %35, %cst_48 {dimension_numbers = #tpu.dot_dimension_numbers<[1], [0], [0], [1], [0, 0, 1, 1], [], []>} : vector<8x32xbf16>, vector<32x96xbf16>, vector<8x96xf32> -> vector<8x96xf32>
    %44 = vector.broadcast %37 : vector<1x96xf32> to vector<8x96xf32>
    %45 = arith.addf %43, %44 : vector<8x96xf32>
    %46 = arith.truncf %41 : vector<8x32xf32> to vector<8x32xbf16>
    %cst_49 = arith.constant dense<0.000000e+00> : vector<8x96xf32>
    %47 = tpu.matmul %46, %36, %cst_49 {dimension_numbers = #tpu.dot_dimension_numbers<[1], [0], [0], [1], [0, 0, 1, 1], [], []>} : vector<8x32xbf16>, vector<32x96xbf16>, vector<8x96xf32> -> vector<8x96xf32>
    %48 = vector.broadcast %38 : vector<1x96xf32> to vector<8x96xf32>
    %49 = arith.addf %47, %48 : vector<8x96xf32>
    %50 = arith.index_cast %c0_i32_43 : i32 to index
    %c0_50 = arith.constant 0 : index
    %c0_51 = arith.constant 0 : index
    %51 = vector.load %arg18[%50, %c0_50, %c0_51] : memref<8x8x96xf32, #tpu.memory_space<vmem>>, vector<1x8x96xf32>
    %52 = vector.shape_cast %51 : vector<1x8x96xf32> to vector<8x96xf32>
    %53 = arith.index_cast %39 : i32 to index
    %c0_52 = arith.constant 0 : index
    %c0_53 = arith.constant 0 : index
    %54 = vector.load %arg19[%53, %c0_52, %c0_53] : memref<8x8x96xf32, #tpu.memory_space<vmem>>, vector<1x8x96xf32>
    %55 = vector.shape_cast %54 : vector<1x8x96xf32> to vector<8x96xf32>
    %56 = vector.extract_strided_slice %52 {offsets = [0, 0], sizes = [8, 32], strides = [1, 1]} : vector<8x96xf32> to vector<8x32xf32>
    %57 = vector.extract_strided_slice %45 {offsets = [0, 0], sizes = [8, 32], strides = [1, 1]} : vector<8x96xf32> to vector<8x32xf32>
    %58 = arith.addf %56, %57 : vector<8x32xf32>
    %59 = arith.negf %58 : vector<8x32xf32>
    %60 = math.exp %59 : vector<8x32xf32>
    %cst_54 = arith.constant 1.000000e+00 : f32
    %61 = vector.broadcast %cst_54 : f32 to vector<8x32xf32>
    %62 = arith.addf %61, %60 : vector<8x32xf32>
    %63 = arith.divf %61, %62 : vector<8x32xf32>
    %64 = vector.extract_strided_slice %52 {offsets = [0, 32], sizes = [8, 32], strides = [1, 1]} : vector<8x96xf32> to vector<8x32xf32>
    %65 = vector.extract_strided_slice %45 {offsets = [0, 32], sizes = [8, 32], strides = [1, 1]} : vector<8x96xf32> to vector<8x32xf32>
    %66 = arith.addf %64, %65 : vector<8x32xf32>
    %67 = arith.negf %66 : vector<8x32xf32>
    %68 = math.exp %67 : vector<8x32xf32>
    %cst_55 = arith.constant 1.000000e+00 : f32
    %69 = vector.broadcast %cst_55 : f32 to vector<8x32xf32>
    %70 = arith.addf %69, %68 : vector<8x32xf32>
    %71 = arith.divf %69, %70 : vector<8x32xf32>
    %72 = vector.extract_strided_slice %52 {offsets = [0, 64], sizes = [8, 32], strides = [1, 1]} : vector<8x96xf32> to vector<8x32xf32>
    %73 = vector.extract_strided_slice %45 {offsets = [0, 64], sizes = [8, 32], strides = [1, 1]} : vector<8x96xf32> to vector<8x32xf32>
    %74 = arith.mulf %63, %73 : vector<8x32xf32>
    %75 = arith.addf %72, %74 : vector<8x32xf32>
    %76 = math.tanh %75 : vector<8x32xf32>
    %cst_56 = arith.constant 1.000000e+00 : f32
    %77 = vector.broadcast %cst_56 : f32 to vector<8x32xf32>
    %78 = arith.subf %77, %71 : vector<8x32xf32>
    %79 = arith.mulf %78, %76 : vector<8x32xf32>
    %80 = arith.mulf %71, %40 : vector<8x32xf32>
    %81 = arith.addf %79, %80 : vector<8x32xf32>
    %82 = vector.extract_strided_slice %55 {offsets = [0, 0], sizes = [8, 32], strides = [1, 1]} : vector<8x96xf32> to vector<8x32xf32>
    %83 = vector.extract_strided_slice %49 {offsets = [0, 0], sizes = [8, 32], strides = [1, 1]} : vector<8x96xf32> to vector<8x32xf32>
    %84 = arith.addf %82, %83 : vector<8x32xf32>
    %85 = arith.negf %84 : vector<8x32xf32>
    %86 = math.exp %85 : vector<8x32xf32>
    %cst_57 = arith.constant 1.000000e+00 : f32
    %87 = vector.broadcast %cst_57 : f32 to vector<8x32xf32>
    %88 = arith.addf %87, %86 : vector<8x32xf32>
    %89 = arith.divf %87, %88 : vector<8x32xf32>
    %90 = vector.extract_strided_slice %55 {offsets = [0, 32], sizes = [8, 32], strides = [1, 1]} : vector<8x96xf32> to vector<8x32xf32>
    %91 = vector.extract_strided_slice %49 {offsets = [0, 32], sizes = [8, 32], strides = [1, 1]} : vector<8x96xf32> to vector<8x32xf32>
    %92 = arith.addf %90, %91 : vector<8x32xf32>
    %93 = arith.negf %92 : vector<8x32xf32>
    %94 = math.exp %93 : vector<8x32xf32>
    %cst_58 = arith.constant 1.000000e+00 : f32
    %95 = vector.broadcast %cst_58 : f32 to vector<8x32xf32>
    %96 = arith.addf %95, %94 : vector<8x32xf32>
    %97 = arith.divf %95, %96 : vector<8x32xf32>
    %98 = vector.extract_strided_slice %55 {offsets = [0, 64], sizes = [8, 32], strides = [1, 1]} : vector<8x96xf32> to vector<8x32xf32>
    %99 = vector.extract_strided_slice %49 {offsets = [0, 64], sizes = [8, 32], strides = [1, 1]} : vector<8x96xf32> to vector<8x32xf32>
    %100 = arith.mulf %89, %99 : vector<8x32xf32>
    %101 = arith.addf %98, %100 : vector<8x32xf32>
    %102 = math.tanh %101 : vector<8x32xf32>
    %cst_59 = arith.constant 1.000000e+00 : f32
    %103 = vector.broadcast %cst_59 : f32 to vector<8x32xf32>
    %104 = arith.subf %103, %97 : vector<8x32xf32>
    %105 = arith.mulf %104, %102 : vector<8x32xf32>
    %106 = arith.mulf %97, %41 : vector<8x32xf32>
    %107 = arith.addf %105, %106 : vector<8x32xf32>
    %c0_60 = arith.constant 0 : index
    %c0_61 = arith.constant 0 : index
    %108 = vector.load %arg20[%c0_60, %c0_61] : memref<8x32xf32, #tpu.memory_space<vmem>>, vector<8x32xf32>
    tpu.vector_store %arg20[%c0_60, %c0_61], %81 {strides = array<i32>} : memref<8x32xf32, #tpu.memory_space<vmem>>, vector<8x32xf32>,
    %c0_62 = arith.constant 0 : index
    %c0_63 = arith.constant 0 : index
    %109 = vector.load %arg21[%c0_62, %c0_63] : memref<8x32xf32, #tpu.memory_space<vmem>>, vector<8x32xf32>
    tpu.vector_store %arg21[%c0_62, %c0_63], %107 {strides = array<i32>} : memref<8x32xf32, #tpu.memory_space<vmem>>, vector<8x32xf32>,
    %110 = arith.truncf %81 : vector<8x32xf32> to vector<8x32xbf16>
    %111 = arith.index_cast %c0_i32_43 : i32 to index
    %c0_64 = arith.constant 0 : index
    %c0_65 = arith.constant 0 : index
    %112 = vector.load %arg16[%111, %c0_64, %c0_65] : memref<8x8x32xbf16, #tpu.memory_space<vmem>>, vector<1x8x32xbf16>
    %113 = vector.shape_cast %112 : vector<1x8x32xbf16> to vector<8x32xbf16>
    %114 = vector.shape_cast %110 : vector<8x32xbf16> to vector<1x8x32xbf16>
    tpu.vector_store %arg16[%111, %c0_64, %c0_65], %114 {strides = array<i32>} : memref<8x8x32xbf16, #tpu.memory_space<vmem>>, vector<1x8x32xbf16>,
    %115 = arith.truncf %107 : vector<8x32xf32> to vector<8x32xbf16>
    %116 = arith.index_cast %39 : i32 to index
    %c0_66 = arith.constant 0 : index
    %c0_67 = arith.constant 0 : index
    %117 = vector.load %arg17[%116, %c0_66, %c0_67] : memref<8x8x32xbf16, #tpu.memory_space<vmem>>, vector<1x8x32xbf16>
    %118 = vector.shape_cast %117 : vector<1x8x32xbf16> to vector<8x32xbf16>
    %119 = vector.shape_cast %115 : vector<8x32xbf16> to vector<1x8x32xbf16>
    tpu.vector_store %arg17[%116, %c0_66, %c0_67], %119 {strides = array<i32>} : memref<8x8x32xbf16, #tpu.memory_space<vmem>>, vector<1x8x32xbf16>,
    %c1_i32 = arith.constant 1 : i32
    %c7_i32_68 = arith.constant 7 : i32
    %120 = arith.subi %c7_i32_68, %c1_i32 : i32
    %c0_69 = arith.constant 0 : index
    %c0_70 = arith.constant 0 : index
    %121 = vector.load %arg20[%c0_69, %c0_70] : memref<8x32xf32, #tpu.memory_space<vmem>>, vector<8x32xf32>
    %c0_71 = arith.constant 0 : index
    %c0_72 = arith.constant 0 : index
    %122 = vector.load %arg21[%c0_71, %c0_72] : memref<8x32xf32, #tpu.memory_space<vmem>>, vector<8x32xf32>
    %123 = arith.truncf %121 : vector<8x32xf32> to vector<8x32xbf16>
    %cst_73 = arith.constant dense<0.000000e+00> : vector<8x96xf32>
    %124 = tpu.matmul %123, %35, %cst_73 {dimension_numbers = #tpu.dot_dimension_numbers<[1], [0], [0], [1], [0, 0, 1, 1], [], []>} : vector<8x32xbf16>, vector<32x96xbf16>, vector<8x96xf32> -> vector<8x96xf32>
    %125 = vector.broadcast %37 : vector<1x96xf32> to vector<8x96xf32>
    %126 = arith.addf %124, %125 : vector<8x96xf32>
    %127 = arith.truncf %122 : vector<8x32xf32> to vector<8x32xbf16>
    %cst_74 = arith.constant dense<0.000000e+00> : vector<8x96xf32>
    %128 = tpu.matmul %127, %36, %cst_74 {dimension_numbers = #tpu.dot_dimension_numbers<[1], [0], [0], [1], [0, 0, 1, 1], [], []>} : vector<8x32xbf16>, vector<32x96xbf16>, vector<8x96xf32> -> vector<8x96xf32>
    %129 = vector.broadcast %38 : vector<1x96xf32> to vector<8x96xf32>
    %130 = arith.addf %128, %129 : vector<8x96xf32>
    %131 = arith.index_cast %c1_i32 : i32 to index
    %c0_75 = arith.constant 0 : index
    %c0_76 = arith.constant 0 : index
    %132 = vector.load %arg18[%131, %c0_75, %c0_76] : memref<8x8x96xf32, #tpu.memory_space<vmem>>, vector<1x8x96xf32>
    %133 = vector.shape_cast %132 : vector<1x8x96xf32> to vector<8x96xf32>
    %134 = arith.index_cast %120 : i32 to index
    %c0_77 = arith.constant 0 : index
    %c0_78 = arith.constant 0 : index
    %135 = vector.load %arg19[%134, %c0_77, %c0_78] : memref<8x8x96xf32, #tpu.memory_space<vmem>>, vector<1x8x96xf32>
    %136 = vector.shape_cast %135 : vector<1x8x96xf32> to vector<8x96xf32>
    %137 = vector.extract_strided_slice %133 {offsets = [0, 0], sizes = [8, 32], strides = [1, 1]} : vector<8x96xf32> to vector<8x32xf32>
    %138 = vector.extract_strided_slice %126 {offsets = [0, 0], sizes = [8, 32], strides = [1, 1]} : vector<8x96xf32> to vector<8x32xf32>
    %139 = arith.addf %137, %138 : vector<8x32xf32>
    %140 = arith.negf %139 : vector<8x32xf32>
    %141 = math.exp %140 : vector<8x32xf32>
    %cst_79 = arith.constant 1.000000e+00 : f32
    %142 = vector.broadcast %cst_79 : f32 to vector<8x32xf32>
    %143 = arith.addf %142, %141 : vector<8x32xf32>
    %144 = arith.divf %142, %143 : vector<8x32xf32>
    %145 = vector.extract_strided_slice %133 {offsets = [0, 32], sizes = [8, 32], strides = [1, 1]} : vector<8x96xf32> to vector<8x32xf32>
    %146 = vector.extract_strided_slice %126 {offsets = [0, 32], sizes = [8, 32], strides = [1, 1]} : vector<8x96xf32> to vector<8x32xf32>
    %147 = arith.addf %145, %146 : vector<8x32xf32>
    %148 = arith.negf %147 : vector<8x32xf32>
    %149 = math.exp %148 : vector<8x32xf32>
    %cst_80 = arith.constant 1.000000e+00 : f32
    %150 = vector.broadcast %cst_80 : f32 to vector<8x32xf32>
    %151 = arith.addf %150, %149 : vector<8x32xf32>
    %152 = arith.divf %150, %151 : vector<8x32xf32>
    %153 = vector.extract_strided_slice %133 {offsets = [0, 64], sizes = [8, 32], strides = [1, 1]} : vector<8x96xf32> to vector<8x32xf32>
    %154 = vector.extract_strided_slice %126 {offsets = [0, 64], sizes = [8, 32], strides = [1, 1]} : vector<8x96xf32> to vector<8x32xf32>
    %155 = arith.mulf %144, %154 : vector<8x32xf32>
    %156 = arith.addf %153, %155 : vector<8x32xf32>
    %157 = math.tanh %156 : vector<8x32xf32>
    %cst_81 = arith.constant 1.000000e+00 : f32
    %158 = vector.broadcast %cst_81 : f32 to vector<8x32xf32>
    %159 = arith.subf %158, %152 : vector<8x32xf32>
    %160 = arith.mulf %159, %157 : vector<8x32xf32>
    %161 = arith.mulf %152, %121 : vector<8x32xf32>
    %162 = arith.addf %160, %161 : vector<8x32xf32>
    %163 = vector.extract_strided_slice %136 {offsets = [0, 0], sizes = [8, 32], strides = [1, 1]} : vector<8x96xf32> to vector<8x32xf32>
    %164 = vector.extract_strided_slice %130 {offsets = [0, 0], sizes = [8, 32], strides = [1, 1]} : vector<8x96xf32> to vector<8x32xf32>
    %165 = arith.addf %163, %164 : vector<8x32xf32>
    %166 = arith.negf %165 : vector<8x32xf32>
    %167 = math.exp %166 : vector<8x32xf32>
    %cst_82 = arith.constant 1.000000e+00 : f32
    %168 = vector.broadcast %cst_82 : f32 to vector<8x32xf32>
    %169 = arith.addf %168, %167 : vector<8x32xf32>
    %170 = arith.divf %168, %169 : vector<8x32xf32>
    %171 = vector.extract_strided_slice %136 {offsets = [0, 32], sizes = [8, 32], strides = [1, 1]} : vector<8x96xf32> to vector<8x32xf32>
    %172 = vector.extract_strided_slice %130 {offsets = [0, 32], sizes = [8, 32], strides = [1, 1]} : vector<8x96xf32> to vector<8x32xf32>
    %173 = arith.addf %171, %172 : vector<8x32xf32>
    %174 = arith.negf %173 : vector<8x32xf32>
    %175 = math.exp %174 : vector<8x32xf32>
    %cst_83 = arith.constant 1.000000e+00 : f32
    %176 = vector.broadcast %cst_83 : f32 to vector<8x32xf32>
    %177 = arith.addf %176, %175 : vector<8x32xf32>
    %178 = arith.divf %176, %177 : vector<8x32xf32>
    %179 = vector.extract_strided_slice %136 {offsets = [0, 64], sizes = [8, 32], strides = [1, 1]} : vector<8x96xf32> to vector<8x32xf32>
    %180 = vector.extract_strided_slice %130 {offsets = [0, 64], sizes = [8, 32], strides = [1, 1]} : vector<8x96xf32> to vector<8x32xf32>
    %181 = arith.mulf %170, %180 : vector<8x32xf32>
    %182 = arith.addf %179, %181 : vector<8x32xf32>
    %183 = math.tanh %182 : vector<8x32xf32>
    %cst_84 = arith.constant 1.000000e+00 : f32
    %184 = vector.broadcast %cst_84 : f32 to vector<8x32xf32>
    %185 = arith.subf %184, %178 : vector<8x32xf32>
    %186 = arith.mulf %185, %183 : vector<8x32xf32>
    %187 = arith.mulf %178, %122 : vector<8x32xf32>
    %188 = arith.addf %186, %187 : vector<8x32xf32>
    %c0_85 = arith.constant 0 : index
    %c0_86 = arith.constant 0 : index
    %189 = vector.load %arg20[%c0_85, %c0_86] : memref<8x32xf32, #tpu.memory_space<vmem>>, vector<8x32xf32>
    tpu.vector_store %arg20[%c0_85, %c0_86], %162 {strides = array<i32>} : memref<8x32xf32, #tpu.memory_space<vmem>>, vector<8x32xf32>,
    %c0_87 = arith.constant 0 : index
    %c0_88 = arith.constant 0 : index
    %190 = vector.load %arg21[%c0_87, %c0_88] : memref<8x32xf32, #tpu.memory_space<vmem>>, vector<8x32xf32>
    tpu.vector_store %arg21[%c0_87, %c0_88], %188 {strides = array<i32>} : memref<8x32xf32, #tpu.memory_space<vmem>>, vector<8x32xf32>,
    %191 = arith.truncf %162 : vector<8x32xf32> to vector<8x32xbf16>
    %192 = arith.index_cast %c1_i32 : i32 to index
    %c0_89 = arith.constant 0 : index
    %c0_90 = arith.constant 0 : index
    %193 = vector.load %arg16[%192, %c0_89, %c0_90] : memref<8x8x32xbf16, #tpu.memory_space<vmem>>, vector<1x8x32xbf16>
    %194 = vector.shape_cast %193 : vector<1x8x32xbf16> to vector<8x32xbf16>
    %195 = vector.shape_cast %191 : vector<8x32xbf16> to vector<1x8x32xbf16>
    tpu.vector_store %arg16[%192, %c0_89, %c0_90], %195 {strides = array<i32>} : memref<8x8x32xbf16, #tpu.memory_space<vmem>>, vector<1x8x32xbf16>,
    %196 = arith.truncf %188 : vector<8x32xf32> to vector<8x32xbf16>
    %197 = arith.index_cast %120 : i32 to index
    %c0_91 = arith.constant 0 : index
    %c0_92 = arith.constant 0 : index
    %198 = vector.load %arg17[%197, %c0_91, %c0_92] : memref<8x8x32xbf16, #tpu.memory_space<vmem>>, vector<1x8x32xbf16>
    %199 = vector.shape_cast %198 : vector<1x8x32xbf16> to vector<8x32xbf16>
    %200 = vector.shape_cast %196 : vector<8x32xbf16> to vector<1x8x32xbf16>
    tpu.vector_store %arg17[%197, %c0_91, %c0_92], %200 {strides = array<i32>} : memref<8x8x32xbf16, #tpu.memory_space<vmem>>, vector<1x8x32xbf16>,
    %c2_i32 = arith.constant 2 : i32
    %c7_i32_93 = arith.constant 7 : i32
    %201 = arith.subi %c7_i32_93, %c2_i32 : i32
    %c0_94 = arith.constant 0 : index
    %c0_95 = arith.constant 0 : index
    %202 = vector.load %arg20[%c0_94, %c0_95] : memref<8x32xf32, #tpu.memory_space<vmem>>, vector<8x32xf32>
    %c0_96 = arith.constant 0 : index
    %c0_97 = arith.constant 0 : index
    %203 = vector.load %arg21[%c0_96, %c0_97] : memref<8x32xf32, #tpu.memory_space<vmem>>, vector<8x32xf32>
    %204 = arith.truncf %202 : vector<8x32xf32> to vector<8x32xbf16>
    %cst_98 = arith.constant dense<0.000000e+00> : vector<8x96xf32>
    %205 = tpu.matmul %204, %35, %cst_98 {dimension_numbers = #tpu.dot_dimension_numbers<[1], [0], [0], [1], [0, 0, 1, 1], [], []>} : vector<8x32xbf16>, vector<32x96xbf16>, vector<8x96xf32> -> vector<8x96xf32>
    %206 = vector.broadcast %37 : vector<1x96xf32> to vector<8x96xf32>
    %207 = arith.addf %205, %206 : vector<8x96xf32>
    %208 = arith.truncf %203 : vector<8x32xf32> to vector<8x32xbf16>
    %cst_99 = arith.constant dense<0.000000e+00> : vector<8x96xf32>
    %209 = tpu.matmul %208, %36, %cst_99 {dimension_numbers = #tpu.dot_dimension_numbers<[1], [0], [0], [1], [0, 0, 1, 1], [], []>} : vector<8x32xbf16>, vector<32x96xbf16>, vector<8x96xf32> -> vector<8x96xf32>
    %210 = vector.broadcast %38 : vector<1x96xf32> to vector<8x96xf32>
    %211 = arith.addf %209, %210 : vector<8x96xf32>
    %212 = arith.index_cast %c2_i32 : i32 to index
    %c0_100 = arith.constant 0 : index
    %c0_101 = arith.constant 0 : index
    %213 = vector.load %arg18[%212, %c0_100, %c0_101] : memref<8x8x96xf32, #tpu.memory_space<vmem>>, vector<1x8x96xf32>
    %214 = vector.shape_cast %213 : vector<1x8x96xf32> to vector<8x96xf32>
    %215 = arith.index_cast %201 : i32 to index
    %c0_102 = arith.constant 0 : index
    %c0_103 = arith.constant 0 : index
    %216 = vector.load %arg19[%215, %c0_102, %c0_103] : memref<8x8x96xf32, #tpu.memory_space<vmem>>, vector<1x8x96xf32>
    %217 = vector.shape_cast %216 : vector<1x8x96xf32> to vector<8x96xf32>
    %218 = vector.extract_strided_slice %214 {offsets = [0, 0], sizes = [8, 32], strides = [1, 1]} : vector<8x96xf32> to vector<8x32xf32>
    %219 = vector.extract_strided_slice %207 {offsets = [0, 0], sizes = [8, 32], strides = [1, 1]} : vector<8x96xf32> to vector<8x32xf32>
    %220 = arith.addf %218, %219 : vector<8x32xf32>
    %221 = arith.negf %220 : vector<8x32xf32>
    %222 = math.exp %221 : vector<8x32xf32>
    %cst_104 = arith.constant 1.000000e+00 : f32
    %223 = vector.broadcast %cst_104 : f32 to vector<8x32xf32>
    %224 = arith.addf %223, %222 : vector<8x32xf32>
    %225 = arith.divf %223, %224 : vector<8x32xf32>
    %226 = vector.extract_strided_slice %214 {offsets = [0, 32], sizes = [8, 32], strides = [1, 1]} : vector<8x96xf32> to vector<8x32xf32>
    %227 = vector.extract_strided_slice %207 {offsets = [0, 32], sizes = [8, 32], strides = [1, 1]} : vector<8x96xf32> to vector<8x32xf32>
    %228 = arith.addf %226, %227 : vector<8x32xf32>
    %229 = arith.negf %228 : vector<8x32xf32>
    %230 = math.exp %229 : vector<8x32xf32>
    %cst_105 = arith.constant 1.000000e+00 : f32
    %231 = vector.broadcast %cst_105 : f32 to vector<8x32xf32>
    %232 = arith.addf %231, %230 : vector<8x32xf32>
    %233 = arith.divf %231, %232 : vector<8x32xf32>
    %234 = vector.extract_strided_slice %214 {offsets = [0, 64], sizes = [8, 32], strides = [1, 1]} : vector<8x96xf32> to vector<8x32xf32>
    %235 = vector.extract_strided_slice %207 {offsets = [0, 64], sizes = [8, 32], strides = [1, 1]} : vector<8x96xf32> to vector<8x32xf32>
    %236 = arith.mulf %225, %235 : vector<8x32xf32>
    %237 = arith.addf %234, %236 : vector<8x32xf32>
    %238 = math.tanh %237 : vector<8x32xf32>
    %cst_106 = arith.constant 1.000000e+00 : f32
    %239 = vector.broadcast %cst_106 : f32 to vector<8x32xf32>
    %240 = arith.subf %239, %233 : vector<8x32xf32>
    %241 = arith.mulf %240, %238 : vector<8x32xf32>
    %242 = arith.mulf %233, %202 : vector<8x32xf32>
    %243 = arith.addf %241, %242 : vector<8x32xf32>
    %244 = vector.extract_strided_slice %217 {offsets = [0, 0], sizes = [8, 32], strides = [1, 1]} : vector<8x96xf32> to vector<8x32xf32>
    %245 = vector.extract_strided_slice %211 {offsets = [0, 0], sizes = [8, 32], strides = [1, 1]} : vector<8x96xf32> to vector<8x32xf32>
    %246 = arith.addf %244, %245 : vector<8x32xf32>
    %247 = arith.negf %246 : vector<8x32xf32>
    %248 = math.exp %247 : vector<8x32xf32>
    %cst_107 = arith.constant 1.000000e+00 : f32
    %249 = vector.broadcast %cst_107 : f32 to vector<8x32xf32>
    %250 = arith.addf %249, %248 : vector<8x32xf32>
    %251 = arith.divf %249, %250 : vector<8x32xf32>
    %252 = vector.extract_strided_slice %217 {offsets = [0, 32], sizes = [8, 32], strides = [1, 1]} : vector<8x96xf32> to vector<8x32xf32>
    %253 = vector.extract_strided_slice %211 {offsets = [0, 32], sizes = [8, 32], strides = [1, 1]} : vector<8x96xf32> to vector<8x32xf32>
    %254 = arith.addf %252, %253 : vector<8x32xf32>
    %255 = arith.negf %254 : vector<8x32xf32>
    %256 = math.exp %255 : vector<8x32xf32>
    %cst_108 = arith.constant 1.000000e+00 : f32
    %257 = vector.broadcast %cst_108 : f32 to vector<8x32xf32>
    %258 = arith.addf %257, %256 : vector<8x32xf32>
    %259 = arith.divf %257, %258 : vector<8x32xf32>
    %260 = vector.extract_strided_slice %217 {offsets = [0, 64], sizes = [8, 32], strides = [1, 1]} : vector<8x96xf32> to vector<8x32xf32>
    %261 = vector.extract_strided_slice %211 {offsets = [0, 64], sizes = [8, 32], strides = [1, 1]} : vector<8x96xf32> to vector<8x32xf32>
    %262 = arith.mulf %251, %261 : vector<8x32xf32>
    %263 = arith.addf %260, %262 : vector<8x32xf32>
    %264 = math.tanh %263 : vector<8x32xf32>
    %cst_109 = arith.constant 1.000000e+00 : f32
    %265 = vector.broadcast %cst_109 : f32 to vector<8x32xf32>
    %266 = arith.subf %265, %259 : vector<8x32xf32>
    %267 = arith.mulf %266, %264 : vector<8x32xf32>
    %268 = arith.mulf %259, %203 : vector<8x32xf32>
    %269 = arith.addf %267, %268 : vector<8x32xf32>
    %c0_110 = arith.constant 0 : index
    %c0_111 = arith.constant 0 : index
    %270 = vector.load %arg20[%c0_110, %c0_111] : memref<8x32xf32, #tpu.memory_space<vmem>>, vector<8x32xf32>
    tpu.vector_store %arg20[%c0_110, %c0_111], %243 {strides = array<i32>} : memref<8x32xf32, #tpu.memory_space<vmem>>, vector<8x32xf32>,
    %c0_112 = arith.constant 0 : index
    %c0_113 = arith.constant 0 : index
    %271 = vector.load %arg21[%c0_112, %c0_113] : memref<8x32xf32, #tpu.memory_space<vmem>>, vector<8x32xf32>
    tpu.vector_store %arg21[%c0_112, %c0_113], %269 {strides = array<i32>} : memref<8x32xf32, #tpu.memory_space<vmem>>, vector<8x32xf32>,
    %272 = arith.truncf %243 : vector<8x32xf32> to vector<8x32xbf16>
    %273 = arith.index_cast %c2_i32 : i32 to index
    %c0_114 = arith.constant 0 : index
    %c0_115 = arith.constant 0 : index
    %274 = vector.load %arg16[%273, %c0_114, %c0_115] : memref<8x8x32xbf16, #tpu.memory_space<vmem>>, vector<1x8x32xbf16>
    %275 = vector.shape_cast %274 : vector<1x8x32xbf16> to vector<8x32xbf16>
    %276 = vector.shape_cast %272 : vector<8x32xbf16> to vector<1x8x32xbf16>
    tpu.vector_store %arg16[%273, %c0_114, %c0_115], %276 {strides = array<i32>} : memref<8x8x32xbf16, #tpu.memory_space<vmem>>, vector<1x8x32xbf16>,
    %277 = arith.truncf %269 : vector<8x32xf32> to vector<8x32xbf16>
    %278 = arith.index_cast %201 : i32 to index
    %c0_116 = arith.constant 0 : index
    %c0_117 = arith.constant 0 : index
    %279 = vector.load %arg17[%278, %c0_116, %c0_117] : memref<8x8x32xbf16, #tpu.memory_space<vmem>>, vector<1x8x32xbf16>
    %280 = vector.shape_cast %279 : vector<1x8x32xbf16> to vector<8x32xbf16>
    %281 = vector.shape_cast %277 : vector<8x32xbf16> to vector<1x8x32xbf16>
    tpu.vector_store %arg17[%278, %c0_116, %c0_117], %281 {strides = array<i32>} : memref<8x8x32xbf16, #tpu.memory_space<vmem>>, vector<1x8x32xbf16>,
    %c3_i32 = arith.constant 3 : i32
    %c7_i32_118 = arith.constant 7 : i32
    %282 = arith.subi %c7_i32_118, %c3_i32 : i32
    %c0_119 = arith.constant 0 : index
    %c0_120 = arith.constant 0 : index
    %283 = vector.load %arg20[%c0_119, %c0_120] : memref<8x32xf32, #tpu.memory_space<vmem>>, vector<8x32xf32>
    %c0_121 = arith.constant 0 : index
    %c0_122 = arith.constant 0 : index
    %284 = vector.load %arg21[%c0_121, %c0_122] : memref<8x32xf32, #tpu.memory_space<vmem>>, vector<8x32xf32>
    %285 = arith.truncf %283 : vector<8x32xf32> to vector<8x32xbf16>
    %cst_123 = arith.constant dense<0.000000e+00> : vector<8x96xf32>
    %286 = tpu.matmul %285, %35, %cst_123 {dimension_numbers = #tpu.dot_dimension_numbers<[1], [0], [0], [1], [0, 0, 1, 1], [], []>} : vector<8x32xbf16>, vector<32x96xbf16>, vector<8x96xf32> -> vector<8x96xf32>
    %287 = vector.broadcast %37 : vector<1x96xf32> to vector<8x96xf32>
    %288 = arith.addf %286, %287 : vector<8x96xf32>
    %289 = arith.truncf %284 : vector<8x32xf32> to vector<8x32xbf16>
    %cst_124 = arith.constant dense<0.000000e+00> : vector<8x96xf32>
    %290 = tpu.matmul %289, %36, %cst_124 {dimension_numbers = #tpu.dot_dimension_numbers<[1], [0], [0], [1], [0, 0, 1, 1], [], []>} : vector<8x32xbf16>, vector<32x96xbf16>, vector<8x96xf32> -> vector<8x96xf32>
    %291 = vector.broadcast %38 : vector<1x96xf32> to vector<8x96xf32>
    %292 = arith.addf %290, %291 : vector<8x96xf32>
    %293 = arith.index_cast %c3_i32 : i32 to index
    %c0_125 = arith.constant 0 : index
    %c0_126 = arith.constant 0 : index
    %294 = vector.load %arg18[%293, %c0_125, %c0_126] : memref<8x8x96xf32, #tpu.memory_space<vmem>>, vector<1x8x96xf32>
    %295 = vector.shape_cast %294 : vector<1x8x96xf32> to vector<8x96xf32>
    %296 = arith.index_cast %282 : i32 to index
    %c0_127 = arith.constant 0 : index
    %c0_128 = arith.constant 0 : index
    %297 = vector.load %arg19[%296, %c0_127, %c0_128] : memref<8x8x96xf32, #tpu.memory_space<vmem>>, vector<1x8x96xf32>
    %298 = vector.shape_cast %297 : vector<1x8x96xf32> to vector<8x96xf32>
    %299 = vector.extract_strided_slice %295 {offsets = [0, 0], sizes = [8, 32], strides = [1, 1]} : vector<8x96xf32> to vector<8x32xf32>
    %300 = vector.extract_strided_slice %288 {offsets = [0, 0], sizes = [8, 32], strides = [1, 1]} : vector<8x96xf32> to vector<8x32xf32>
    %301 = arith.addf %299, %300 : vector<8x32xf32>
    %302 = arith.negf %301 : vector<8x32xf32>
    %303 = math.exp %302 : vector<8x32xf32>
    %cst_129 = arith.constant 1.000000e+00 : f32
    %304 = vector.broadcast %cst_129 : f32 to vector<8x32xf32>
    %305 = arith.addf %304, %303 : vector<8x32xf32>
    %306 = arith.divf %304, %305 : vector<8x32xf32>
    %307 = vector.extract_strided_slice %295 {offsets = [0, 32], sizes = [8, 32], strides = [1, 1]} : vector<8x96xf32> to vector<8x32xf32>
    %308 = vector.extract_strided_slice %288 {offsets = [0, 32], sizes = [8, 32], strides = [1, 1]} : vector<8x96xf32> to vector<8x32xf32>
    %309 = arith.addf %307, %308 : vector<8x32xf32>
    %310 = arith.negf %309 : vector<8x32xf32>
    %311 = math.exp %310 : vector<8x32xf32>
    %cst_130 = arith.constant 1.000000e+00 : f32
    %312 = vector.broadcast %cst_130 : f32 to vector<8x32xf32>
    %313 = arith.addf %312, %311 : vector<8x32xf32>
    %314 = arith.divf %312, %313 : vector<8x32xf32>
    %315 = vector.extract_strided_slice %295 {offsets = [0, 64], sizes = [8, 32], strides = [1, 1]} : vector<8x96xf32> to vector<8x32xf32>
    %316 = vector.extract_strided_slice %288 {offsets = [0, 64], sizes = [8, 32], strides = [1, 1]} : vector<8x96xf32> to vector<8x32xf32>
    %317 = arith.mulf %306, %316 : vector<8x32xf32>
    %318 = arith.addf %315, %317 : vector<8x32xf32>
    %319 = math.tanh %318 : vector<8x32xf32>
    %cst_131 = arith.constant 1.000000e+00 : f32
    %320 = vector.broadcast %cst_131 : f32 to vector<8x32xf32>
    %321 = arith.subf %320, %314 : vector<8x32xf32>
    %322 = arith.mulf %321, %319 : vector<8x32xf32>
    %323 = arith.mulf %314, %283 : vector<8x32xf32>
    %324 = arith.addf %322, %323 : vector<8x32xf32>
    %325 = vector.extract_strided_slice %298 {offsets = [0, 0], sizes = [8, 32], strides = [1, 1]} : vector<8x96xf32> to vector<8x32xf32>
    %326 = vector.extract_strided_slice %292 {offsets = [0, 0], sizes = [8, 32], strides = [1, 1]} : vector<8x96xf32> to vector<8x32xf32>
    %327 = arith.addf %325, %326 : vector<8x32xf32>
    %328 = arith.negf %327 : vector<8x32xf32>
    %329 = math.exp %328 : vector<8x32xf32>
    %cst_132 = arith.constant 1.000000e+00 : f32
    %330 = vector.broadcast %cst_132 : f32 to vector<8x32xf32>
    %331 = arith.addf %330, %329 : vector<8x32xf32>
    %332 = arith.divf %330, %331 : vector<8x32xf32>
    %333 = vector.extract_strided_slice %298 {offsets = [0, 32], sizes = [8, 32], strides = [1, 1]} : vector<8x96xf32> to vector<8x32xf32>
    %334 = vector.extract_strided_slice %292 {offsets = [0, 32], sizes = [8, 32], strides = [1, 1]} : vector<8x96xf32> to vector<8x32xf32>
    %335 = arith.addf %333, %334 : vector<8x32xf32>
    %336 = arith.negf %335 : vector<8x32xf32>
    %337 = math.exp %336 : vector<8x32xf32>
    %cst_133 = arith.constant 1.000000e+00 : f32
    %338 = vector.broadcast %cst_133 : f32 to vector<8x32xf32>
    %339 = arith.addf %338, %337 : vector<8x32xf32>
    %340 = arith.divf %338, %339 : vector<8x32xf32>
    %341 = vector.extract_strided_slice %298 {offsets = [0, 64], sizes = [8, 32], strides = [1, 1]} : vector<8x96xf32> to vector<8x32xf32>
    %342 = vector.extract_strided_slice %292 {offsets = [0, 64], sizes = [8, 32], strides = [1, 1]} : vector<8x96xf32> to vector<8x32xf32>
    %343 = arith.mulf %332, %342 : vector<8x32xf32>
    %344 = arith.addf %341, %343 : vector<8x32xf32>
    %345 = math.tanh %344 : vector<8x32xf32>
    %cst_134 = arith.constant 1.000000e+00 : f32
    %346 = vector.broadcast %cst_134 : f32 to vector<8x32xf32>
    %347 = arith.subf %346, %340 : vector<8x32xf32>
    %348 = arith.mulf %347, %345 : vector<8x32xf32>
    %349 = arith.mulf %340, %284 : vector<8x32xf32>
    %350 = arith.addf %348, %349 : vector<8x32xf32>
    %c0_135 = arith.constant 0 : index
    %c0_136 = arith.constant 0 : index
    %351 = vector.load %arg20[%c0_135, %c0_136] : memref<8x32xf32, #tpu.memory_space<vmem>>, vector<8x32xf32>
    tpu.vector_store %arg20[%c0_135, %c0_136], %324 {strides = array<i32>} : memref<8x32xf32, #tpu.memory_space<vmem>>, vector<8x32xf32>,
    %c0_137 = arith.constant 0 : index
    %c0_138 = arith.constant 0 : index
    %352 = vector.load %arg21[%c0_137, %c0_138] : memref<8x32xf32, #tpu.memory_space<vmem>>, vector<8x32xf32>
    tpu.vector_store %arg21[%c0_137, %c0_138], %350 {strides = array<i32>} : memref<8x32xf32, #tpu.memory_space<vmem>>, vector<8x32xf32>,
    %353 = arith.truncf %324 : vector<8x32xf32> to vector<8x32xbf16>
    %354 = arith.index_cast %c3_i32 : i32 to index
    %c0_139 = arith.constant 0 : index
    %c0_140 = arith.constant 0 : index
    %355 = vector.load %arg16[%354, %c0_139, %c0_140] : memref<8x8x32xbf16, #tpu.memory_space<vmem>>, vector<1x8x32xbf16>
    %356 = vector.shape_cast %355 : vector<1x8x32xbf16> to vector<8x32xbf16>
    %357 = vector.shape_cast %353 : vector<8x32xbf16> to vector<1x8x32xbf16>
    tpu.vector_store %arg16[%354, %c0_139, %c0_140], %357 {strides = array<i32>} : memref<8x8x32xbf16, #tpu.memory_space<vmem>>, vector<1x8x32xbf16>,
    %358 = arith.truncf %350 : vector<8x32xf32> to vector<8x32xbf16>
    %359 = arith.index_cast %282 : i32 to index
    %c0_141 = arith.constant 0 : index
    %c0_142 = arith.constant 0 : index
    %360 = vector.load %arg17[%359, %c0_141, %c0_142] : memref<8x8x32xbf16, #tpu.memory_space<vmem>>, vector<1x8x32xbf16>
    %361 = vector.shape_cast %360 : vector<1x8x32xbf16> to vector<8x32xbf16>
    %362 = vector.shape_cast %358 : vector<8x32xbf16> to vector<1x8x32xbf16>
    tpu.vector_store %arg17[%359, %c0_141, %c0_142], %362 {strides = array<i32>} : memref<8x8x32xbf16, #tpu.memory_space<vmem>>, vector<1x8x32xbf16>,
    %c4_i32 = arith.constant 4 : i32
    %c7_i32_143 = arith.constant 7 : i32
    %363 = arith.subi %c7_i32_143, %c4_i32 : i32
    %c0_144 = arith.constant 0 : index
    %c0_145 = arith.constant 0 : index
    %364 = vector.load %arg20[%c0_144, %c0_145] : memref<8x32xf32, #tpu.memory_space<vmem>>, vector<8x32xf32>
    %c0_146 = arith.constant 0 : index
    %c0_147 = arith.constant 0 : index
    %365 = vector.load %arg21[%c0_146, %c0_147] : memref<8x32xf32, #tpu.memory_space<vmem>>, vector<8x32xf32>
    %366 = arith.truncf %364 : vector<8x32xf32> to vector<8x32xbf16>
    %cst_148 = arith.constant dense<0.000000e+00> : vector<8x96xf32>
    %367 = tpu.matmul %366, %35, %cst_148 {dimension_numbers = #tpu.dot_dimension_numbers<[1], [0], [0], [1], [0, 0, 1, 1], [], []>} : vector<8x32xbf16>, vector<32x96xbf16>, vector<8x96xf32> -> vector<8x96xf32>
    %368 = vector.broadcast %37 : vector<1x96xf32> to vector<8x96xf32>
    %369 = arith.addf %367, %368 : vector<8x96xf32>
    %370 = arith.truncf %365 : vector<8x32xf32> to vector<8x32xbf16>
    %cst_149 = arith.constant dense<0.000000e+00> : vector<8x96xf32>
    %371 = tpu.matmul %370, %36, %cst_149 {dimension_numbers = #tpu.dot_dimension_numbers<[1], [0], [0], [1], [0, 0, 1, 1], [], []>} : vector<8x32xbf16>, vector<32x96xbf16>, vector<8x96xf32> -> vector<8x96xf32>
    %372 = vector.broadcast %38 : vector<1x96xf32> to vector<8x96xf32>
    %373 = arith.addf %371, %372 : vector<8x96xf32>
    %374 = arith.index_cast %c4_i32 : i32 to index
    %c0_150 = arith.constant 0 : index
    %c0_151 = arith.constant 0 : index
    %375 = vector.load %arg18[%374, %c0_150, %c0_151] : memref<8x8x96xf32, #tpu.memory_space<vmem>>, vector<1x8x96xf32>
    %376 = vector.shape_cast %375 : vector<1x8x96xf32> to vector<8x96xf32>
    %377 = arith.index_cast %363 : i32 to index
    %c0_152 = arith.constant 0 : index
    %c0_153 = arith.constant 0 : index
    %378 = vector.load %arg19[%377, %c0_152, %c0_153] : memref<8x8x96xf32, #tpu.memory_space<vmem>>, vector<1x8x96xf32>
    %379 = vector.shape_cast %378 : vector<1x8x96xf32> to vector<8x96xf32>
    %380 = vector.extract_strided_slice %376 {offsets = [0, 0], sizes = [8, 32], strides = [1, 1]} : vector<8x96xf32> to vector<8x32xf32>
    %381 = vector.extract_strided_slice %369 {offsets = [0, 0], sizes = [8, 32], strides = [1, 1]} : vector<8x96xf32> to vector<8x32xf32>
    %382 = arith.addf %380, %381 : vector<8x32xf32>
    %383 = arith.negf %382 : vector<8x32xf32>
    %384 = math.exp %383 : vector<8x32xf32>
    %cst_154 = arith.constant 1.000000e+00 : f32
    %385 = vector.broadcast %cst_154 : f32 to vector<8x32xf32>
    %386 = arith.addf %385, %384 : vector<8x32xf32>
    %387 = arith.divf %385, %386 : vector<8x32xf32>
    %388 = vector.extract_strided_slice %376 {offsets = [0, 32], sizes = [8, 32], strides = [1, 1]} : vector<8x96xf32> to vector<8x32xf32>
    %389 = vector.extract_strided_slice %369 {offsets = [0, 32], sizes = [8, 32], strides = [1, 1]} : vector<8x96xf32> to vector<8x32xf32>
    %390 = arith.addf %388, %389 : vector<8x32xf32>
    %391 = arith.negf %390 : vector<8x32xf32>
    %392 = math.exp %391 : vector<8x32xf32>
    %cst_155 = arith.constant 1.000000e+00 : f32
    %393 = vector.broadcast %cst_155 : f32 to vector<8x32xf32>
    %394 = arith.addf %393, %392 : vector<8x32xf32>
    %395 = arith.divf %393, %394 : vector<8x32xf32>
    %396 = vector.extract_strided_slice %376 {offsets = [0, 64], sizes = [8, 32], strides = [1, 1]} : vector<8x96xf32> to vector<8x32xf32>
    %397 = vector.extract_strided_slice %369 {offsets = [0, 64], sizes = [8, 32], strides = [1, 1]} : vector<8x96xf32> to vector<8x32xf32>
    %398 = arith.mulf %387, %397 : vector<8x32xf32>
    %399 = arith.addf %396, %398 : vector<8x32xf32>
    %400 = math.tanh %399 : vector<8x32xf32>
    %cst_156 = arith.constant 1.000000e+00 : f32
    %401 = vector.broadcast %cst_156 : f32 to vector<8x32xf32>
    %402 = arith.subf %401, %395 : vector<8x32xf32>
    %403 = arith.mulf %402, %400 : vector<8x32xf32>
    %404 = arith.mulf %395, %364 : vector<8x32xf32>
    %405 = arith.addf %403, %404 : vector<8x32xf32>
    %406 = vector.extract_strided_slice %379 {offsets = [0, 0], sizes = [8, 32], strides = [1, 1]} : vector<8x96xf32> to vector<8x32xf32>
    %407 = vector.extract_strided_slice %373 {offsets = [0, 0], sizes = [8, 32], strides = [1, 1]} : vector<8x96xf32> to vector<8x32xf32>
    %408 = arith.addf %406, %407 : vector<8x32xf32>
    %409 = arith.negf %408 : vector<8x32xf32>
    %410 = math.exp %409 : vector<8x32xf32>
    %cst_157 = arith.constant 1.000000e+00 : f32
    %411 = vector.broadcast %cst_157 : f32 to vector<8x32xf32>
    %412 = arith.addf %411, %410 : vector<8x32xf32>
    %413 = arith.divf %411, %412 : vector<8x32xf32>
    %414 = vector.extract_strided_slice %379 {offsets = [0, 32], sizes = [8, 32], strides = [1, 1]} : vector<8x96xf32> to vector<8x32xf32>
    %415 = vector.extract_strided_slice %373 {offsets = [0, 32], sizes = [8, 32], strides = [1, 1]} : vector<8x96xf32> to vector<8x32xf32>
    %416 = arith.addf %414, %415 : vector<8x32xf32>
    %417 = arith.negf %416 : vector<8x32xf32>
    %418 = math.exp %417 : vector<8x32xf32>
    %cst_158 = arith.constant 1.000000e+00 : f32
    %419 = vector.broadcast %cst_158 : f32 to vector<8x32xf32>
    %420 = arith.addf %419, %418 : vector<8x32xf32>
    %421 = arith.divf %419, %420 : vector<8x32xf32>
    %422 = vector.extract_strided_slice %379 {offsets = [0, 64], sizes = [8, 32], strides = [1, 1]} : vector<8x96xf32> to vector<8x32xf32>
    %423 = vector.extract_strided_slice %373 {offsets = [0, 64], sizes = [8, 32], strides = [1, 1]} : vector<8x96xf32> to vector<8x32xf32>
    %424 = arith.mulf %413, %423 : vector<8x32xf32>
    %425 = arith.addf %422, %424 : vector<8x32xf32>
    %426 = math.tanh %425 : vector<8x32xf32>
    %cst_159 = arith.constant 1.000000e+00 : f32
    %427 = vector.broadcast %cst_159 : f32 to vector<8x32xf32>
    %428 = arith.subf %427, %421 : vector<8x32xf32>
    %429 = arith.mulf %428, %426 : vector<8x32xf32>
    %430 = arith.mulf %421, %365 : vector<8x32xf32>
    %431 = arith.addf %429, %430 : vector<8x32xf32>
    %c0_160 = arith.constant 0 : index
    %c0_161 = arith.constant 0 : index
    %432 = vector.load %arg20[%c0_160, %c0_161] : memref<8x32xf32, #tpu.memory_space<vmem>>, vector<8x32xf32>
    tpu.vector_store %arg20[%c0_160, %c0_161], %405 {strides = array<i32>} : memref<8x32xf32, #tpu.memory_space<vmem>>, vector<8x32xf32>,
    %c0_162 = arith.constant 0 : index
    %c0_163 = arith.constant 0 : index
    %433 = vector.load %arg21[%c0_162, %c0_163] : memref<8x32xf32, #tpu.memory_space<vmem>>, vector<8x32xf32>
    tpu.vector_store %arg21[%c0_162, %c0_163], %431 {strides = array<i32>} : memref<8x32xf32, #tpu.memory_space<vmem>>, vector<8x32xf32>,
    %434 = arith.truncf %405 : vector<8x32xf32> to vector<8x32xbf16>
    %435 = arith.index_cast %c4_i32 : i32 to index
    %c0_164 = arith.constant 0 : index
    %c0_165 = arith.constant 0 : index
    %436 = vector.load %arg16[%435, %c0_164, %c0_165] : memref<8x8x32xbf16, #tpu.memory_space<vmem>>, vector<1x8x32xbf16>
    %437 = vector.shape_cast %436 : vector<1x8x32xbf16> to vector<8x32xbf16>
    %438 = vector.shape_cast %434 : vector<8x32xbf16> to vector<1x8x32xbf16>
    tpu.vector_store %arg16[%435, %c0_164, %c0_165], %438 {strides = array<i32>} : memref<8x8x32xbf16, #tpu.memory_space<vmem>>, vector<1x8x32xbf16>,
    %439 = arith.truncf %431 : vector<8x32xf32> to vector<8x32xbf16>
    %440 = arith.index_cast %363 : i32 to index
    %c0_166 = arith.constant 0 : index
    %c0_167 = arith.constant 0 : index
    %441 = vector.load %arg17[%440, %c0_166, %c0_167] : memref<8x8x32xbf16, #tpu.memory_space<vmem>>, vector<1x8x32xbf16>
    %442 = vector.shape_cast %441 : vector<1x8x32xbf16> to vector<8x32xbf16>
    %443 = vector.shape_cast %439 : vector<8x32xbf16> to vector<1x8x32xbf16>
    tpu.vector_store %arg17[%440, %c0_166, %c0_167], %443 {strides = array<i32>} : memref<8x8x32xbf16, #tpu.memory_space<vmem>>, vector<1x8x32xbf16>,
    %c5_i32 = arith.constant 5 : i32
    %c7_i32_168 = arith.constant 7 : i32
    %444 = arith.subi %c7_i32_168, %c5_i32 : i32
    %c0_169 = arith.constant 0 : index
    %c0_170 = arith.constant 0 : index
    %445 = vector.load %arg20[%c0_169, %c0_170] : memref<8x32xf32, #tpu.memory_space<vmem>>, vector<8x32xf32>
    %c0_171 = arith.constant 0 : index
    %c0_172 = arith.constant 0 : index
    %446 = vector.load %arg21[%c0_171, %c0_172] : memref<8x32xf32, #tpu.memory_space<vmem>>, vector<8x32xf32>
    %447 = arith.truncf %445 : vector<8x32xf32> to vector<8x32xbf16>
    %cst_173 = arith.constant dense<0.000000e+00> : vector<8x96xf32>
    %448 = tpu.matmul %447, %35, %cst_173 {dimension_numbers = #tpu.dot_dimension_numbers<[1], [0], [0], [1], [0, 0, 1, 1], [], []>} : vector<8x32xbf16>, vector<32x96xbf16>, vector<8x96xf32> -> vector<8x96xf32>
    %449 = vector.broadcast %37 : vector<1x96xf32> to vector<8x96xf32>
    %450 = arith.addf %448, %449 : vector<8x96xf32>
    %451 = arith.truncf %446 : vector<8x32xf32> to vector<8x32xbf16>
    %cst_174 = arith.constant dense<0.000000e+00> : vector<8x96xf32>
    %452 = tpu.matmul %451, %36, %cst_174 {dimension_numbers = #tpu.dot_dimension_numbers<[1], [0], [0], [1], [0, 0, 1, 1], [], []>} : vector<8x32xbf16>, vector<32x96xbf16>, vector<8x96xf32> -> vector<8x96xf32>
    %453 = vector.broadcast %38 : vector<1x96xf32> to vector<8x96xf32>
    %454 = arith.addf %452, %453 : vector<8x96xf32>
    %455 = arith.index_cast %c5_i32 : i32 to index
    %c0_175 = arith.constant 0 : index
    %c0_176 = arith.constant 0 : index
    %456 = vector.load %arg18[%455, %c0_175, %c0_176] : memref<8x8x96xf32, #tpu.memory_space<vmem>>, vector<1x8x96xf32>
    %457 = vector.shape_cast %456 : vector<1x8x96xf32> to vector<8x96xf32>
    %458 = arith.index_cast %444 : i32 to index
    %c0_177 = arith.constant 0 : index
    %c0_178 = arith.constant 0 : index
    %459 = vector.load %arg19[%458, %c0_177, %c0_178] : memref<8x8x96xf32, #tpu.memory_space<vmem>>, vector<1x8x96xf32>
    %460 = vector.shape_cast %459 : vector<1x8x96xf32> to vector<8x96xf32>
    %461 = vector.extract_strided_slice %457 {offsets = [0, 0], sizes = [8, 32], strides = [1, 1]} : vector<8x96xf32> to vector<8x32xf32>
    %462 = vector.extract_strided_slice %450 {offsets = [0, 0], sizes = [8, 32], strides = [1, 1]} : vector<8x96xf32> to vector<8x32xf32>
    %463 = arith.addf %461, %462 : vector<8x32xf32>
    %464 = arith.negf %463 : vector<8x32xf32>
    %465 = math.exp %464 : vector<8x32xf32>
    %cst_179 = arith.constant 1.000000e+00 : f32
    %466 = vector.broadcast %cst_179 : f32 to vector<8x32xf32>
    %467 = arith.addf %466, %465 : vector<8x32xf32>
    %468 = arith.divf %466, %467 : vector<8x32xf32>
    %469 = vector.extract_strided_slice %457 {offsets = [0, 32], sizes = [8, 32], strides = [1, 1]} : vector<8x96xf32> to vector<8x32xf32>
    %470 = vector.extract_strided_slice %450 {offsets = [0, 32], sizes = [8, 32], strides = [1, 1]} : vector<8x96xf32> to vector<8x32xf32>
    %471 = arith.addf %469, %470 : vector<8x32xf32>
    %472 = arith.negf %471 : vector<8x32xf32>
    %473 = math.exp %472 : vector<8x32xf32>
    %cst_180 = arith.constant 1.000000e+00 : f32
    %474 = vector.broadcast %cst_180 : f32 to vector<8x32xf32>
    %475 = arith.addf %474, %473 : vector<8x32xf32>
    %476 = arith.divf %474, %475 : vector<8x32xf32>
    %477 = vector.extract_strided_slice %457 {offsets = [0, 64], sizes = [8, 32], strides = [1, 1]} : vector<8x96xf32> to vector<8x32xf32>
    %478 = vector.extract_strided_slice %450 {offsets = [0, 64], sizes = [8, 32], strides = [1, 1]} : vector<8x96xf32> to vector<8x32xf32>
    %479 = arith.mulf %468, %478 : vector<8x32xf32>
    %480 = arith.addf %477, %479 : vector<8x32xf32>
    %481 = math.tanh %480 : vector<8x32xf32>
    %cst_181 = arith.constant 1.000000e+00 : f32
    %482 = vector.broadcast %cst_181 : f32 to vector<8x32xf32>
    %483 = arith.subf %482, %476 : vector<8x32xf32>
    %484 = arith.mulf %483, %481 : vector<8x32xf32>
    %485 = arith.mulf %476, %445 : vector<8x32xf32>
    %486 = arith.addf %484, %485 : vector<8x32xf32>
    %487 = vector.extract_strided_slice %460 {offsets = [0, 0], sizes = [8, 32], strides = [1, 1]} : vector<8x96xf32> to vector<8x32xf32>
    %488 = vector.extract_strided_slice %454 {offsets = [0, 0], sizes = [8, 32], strides = [1, 1]} : vector<8x96xf32> to vector<8x32xf32>
    %489 = arith.addf %487, %488 : vector<8x32xf32>
    %490 = arith.negf %489 : vector<8x32xf32>
    %491 = math.exp %490 : vector<8x32xf32>
    %cst_182 = arith.constant 1.000000e+00 : f32
    %492 = vector.broadcast %cst_182 : f32 to vector<8x32xf32>
    %493 = arith.addf %492, %491 : vector<8x32xf32>
    %494 = arith.divf %492, %493 : vector<8x32xf32>
    %495 = vector.extract_strided_slice %460 {offsets = [0, 32], sizes = [8, 32], strides = [1, 1]} : vector<8x96xf32> to vector<8x32xf32>
    %496 = vector.extract_strided_slice %454 {offsets = [0, 32], sizes = [8, 32], strides = [1, 1]} : vector<8x96xf32> to vector<8x32xf32>
    %497 = arith.addf %495, %496 : vector<8x32xf32>
    %498 = arith.negf %497 : vector<8x32xf32>
    %499 = math.exp %498 : vector<8x32xf32>
    %cst_183 = arith.constant 1.000000e+00 : f32
    %500 = vector.broadcast %cst_183 : f32 to vector<8x32xf32>
    %501 = arith.addf %500, %499 : vector<8x32xf32>
    %502 = arith.divf %500, %501 : vector<8x32xf32>
    %503 = vector.extract_strided_slice %460 {offsets = [0, 64], sizes = [8, 32], strides = [1, 1]} : vector<8x96xf32> to vector<8x32xf32>
    %504 = vector.extract_strided_slice %454 {offsets = [0, 64], sizes = [8, 32], strides = [1, 1]} : vector<8x96xf32> to vector<8x32xf32>
    %505 = arith.mulf %494, %504 : vector<8x32xf32>
    %506 = arith.addf %503, %505 : vector<8x32xf32>
    %507 = math.tanh %506 : vector<8x32xf32>
    %cst_184 = arith.constant 1.000000e+00 : f32
    %508 = vector.broadcast %cst_184 : f32 to vector<8x32xf32>
    %509 = arith.subf %508, %502 : vector<8x32xf32>
    %510 = arith.mulf %509, %507 : vector<8x32xf32>
    %511 = arith.mulf %502, %446 : vector<8x32xf32>
    %512 = arith.addf %510, %511 : vector<8x32xf32>
    %c0_185 = arith.constant 0 : index
    %c0_186 = arith.constant 0 : index
    %513 = vector.load %arg20[%c0_185, %c0_186] : memref<8x32xf32, #tpu.memory_space<vmem>>, vector<8x32xf32>
    tpu.vector_store %arg20[%c0_185, %c0_186], %486 {strides = array<i32>} : memref<8x32xf32, #tpu.memory_space<vmem>>, vector<8x32xf32>,
    %c0_187 = arith.constant 0 : index
    %c0_188 = arith.constant 0 : index
    %514 = vector.load %arg21[%c0_187, %c0_188] : memref<8x32xf32, #tpu.memory_space<vmem>>, vector<8x32xf32>
    tpu.vector_store %arg21[%c0_187, %c0_188], %512 {strides = array<i32>} : memref<8x32xf32, #tpu.memory_space<vmem>>, vector<8x32xf32>,
    %515 = arith.truncf %486 : vector<8x32xf32> to vector<8x32xbf16>
    %516 = arith.index_cast %c5_i32 : i32 to index
    %c0_189 = arith.constant 0 : index
    %c0_190 = arith.constant 0 : index
    %517 = vector.load %arg16[%516, %c0_189, %c0_190] : memref<8x8x32xbf16, #tpu.memory_space<vmem>>, vector<1x8x32xbf16>
    %518 = vector.shape_cast %517 : vector<1x8x32xbf16> to vector<8x32xbf16>
    %519 = vector.shape_cast %515 : vector<8x32xbf16> to vector<1x8x32xbf16>
    tpu.vector_store %arg16[%516, %c0_189, %c0_190], %519 {strides = array<i32>} : memref<8x8x32xbf16, #tpu.memory_space<vmem>>, vector<1x8x32xbf16>,
    %520 = arith.truncf %512 : vector<8x32xf32> to vector<8x32xbf16>
    %521 = arith.index_cast %444 : i32 to index
    %c0_191 = arith.constant 0 : index
    %c0_192 = arith.constant 0 : index
    %522 = vector.load %arg17[%521, %c0_191, %c0_192] : memref<8x8x32xbf16, #tpu.memory_space<vmem>>, vector<1x8x32xbf16>
    %523 = vector.shape_cast %522 : vector<1x8x32xbf16> to vector<8x32xbf16>
    %524 = vector.shape_cast %520 : vector<8x32xbf16> to vector<1x8x32xbf16>
    tpu.vector_store %arg17[%521, %c0_191, %c0_192], %524 {strides = array<i32>} : memref<8x8x32xbf16, #tpu.memory_space<vmem>>, vector<1x8x32xbf16>,
    %c6_i32 = arith.constant 6 : i32
    %c7_i32_193 = arith.constant 7 : i32
    %525 = arith.subi %c7_i32_193, %c6_i32 : i32
    %c0_194 = arith.constant 0 : index
    %c0_195 = arith.constant 0 : index
    %526 = vector.load %arg20[%c0_194, %c0_195] : memref<8x32xf32, #tpu.memory_space<vmem>>, vector<8x32xf32>
    %c0_196 = arith.constant 0 : index
    %c0_197 = arith.constant 0 : index
    %527 = vector.load %arg21[%c0_196, %c0_197] : memref<8x32xf32, #tpu.memory_space<vmem>>, vector<8x32xf32>
    %528 = arith.truncf %526 : vector<8x32xf32> to vector<8x32xbf16>
    %cst_198 = arith.constant dense<0.000000e+00> : vector<8x96xf32>
    %529 = tpu.matmul %528, %35, %cst_198 {dimension_numbers = #tpu.dot_dimension_numbers<[1], [0], [0], [1], [0, 0, 1, 1], [], []>} : vector<8x32xbf16>, vector<32x96xbf16>, vector<8x96xf32> -> vector<8x96xf32>
    %530 = vector.broadcast %37 : vector<1x96xf32> to vector<8x96xf32>
    %531 = arith.addf %529, %530 : vector<8x96xf32>
    %532 = arith.truncf %527 : vector<8x32xf32> to vector<8x32xbf16>
    %cst_199 = arith.constant dense<0.000000e+00> : vector<8x96xf32>
    %533 = tpu.matmul %532, %36, %cst_199 {dimension_numbers = #tpu.dot_dimension_numbers<[1], [0], [0], [1], [0, 0, 1, 1], [], []>} : vector<8x32xbf16>, vector<32x96xbf16>, vector<8x96xf32> -> vector<8x96xf32>
    %534 = vector.broadcast %38 : vector<1x96xf32> to vector<8x96xf32>
    %535 = arith.addf %533, %534 : vector<8x96xf32>
    %536 = arith.index_cast %c6_i32 : i32 to index
    %c0_200 = arith.constant 0 : index
    %c0_201 = arith.constant 0 : index
    %537 = vector.load %arg18[%536, %c0_200, %c0_201] : memref<8x8x96xf32, #tpu.memory_space<vmem>>, vector<1x8x96xf32>
    %538 = vector.shape_cast %537 : vector<1x8x96xf32> to vector<8x96xf32>
    %539 = arith.index_cast %525 : i32 to index
    %c0_202 = arith.constant 0 : index
    %c0_203 = arith.constant 0 : index
    %540 = vector.load %arg19[%539, %c0_202, %c0_203] : memref<8x8x96xf32, #tpu.memory_space<vmem>>, vector<1x8x96xf32>
    %541 = vector.shape_cast %540 : vector<1x8x96xf32> to vector<8x96xf32>
    %542 = vector.extract_strided_slice %538 {offsets = [0, 0], sizes = [8, 32], strides = [1, 1]} : vector<8x96xf32> to vector<8x32xf32>
    %543 = vector.extract_strided_slice %531 {offsets = [0, 0], sizes = [8, 32], strides = [1, 1]} : vector<8x96xf32> to vector<8x32xf32>
    %544 = arith.addf %542, %543 : vector<8x32xf32>
    %545 = arith.negf %544 : vector<8x32xf32>
    %546 = math.exp %545 : vector<8x32xf32>
    %cst_204 = arith.constant 1.000000e+00 : f32
    %547 = vector.broadcast %cst_204 : f32 to vector<8x32xf32>
    %548 = arith.addf %547, %546 : vector<8x32xf32>
    %549 = arith.divf %547, %548 : vector<8x32xf32>
    %550 = vector.extract_strided_slice %538 {offsets = [0, 32], sizes = [8, 32], strides = [1, 1]} : vector<8x96xf32> to vector<8x32xf32>
    %551 = vector.extract_strided_slice %531 {offsets = [0, 32], sizes = [8, 32], strides = [1, 1]} : vector<8x96xf32> to vector<8x32xf32>
    %552 = arith.addf %550, %551 : vector<8x32xf32>
    %553 = arith.negf %552 : vector<8x32xf32>
    %554 = math.exp %553 : vector<8x32xf32>
    %cst_205 = arith.constant 1.000000e+00 : f32
    %555 = vector.broadcast %cst_205 : f32 to vector<8x32xf32>
    %556 = arith.addf %555, %554 : vector<8x32xf32>
    %557 = arith.divf %555, %556 : vector<8x32xf32>
    %558 = vector.extract_strided_slice %538 {offsets = [0, 64], sizes = [8, 32], strides = [1, 1]} : vector<8x96xf32> to vector<8x32xf32>
    %559 = vector.extract_strided_slice %531 {offsets = [0, 64], sizes = [8, 32], strides = [1, 1]} : vector<8x96xf32> to vector<8x32xf32>
    %560 = arith.mulf %549, %559 : vector<8x32xf32>
    %561 = arith.addf %558, %560 : vector<8x32xf32>
    %562 = math.tanh %561 : vector<8x32xf32>
    %cst_206 = arith.constant 1.000000e+00 : f32
    %563 = vector.broadcast %cst_206 : f32 to vector<8x32xf32>
    %564 = arith.subf %563, %557 : vector<8x32xf32>
    %565 = arith.mulf %564, %562 : vector<8x32xf32>
    %566 = arith.mulf %557, %526 : vector<8x32xf32>
    %567 = arith.addf %565, %566 : vector<8x32xf32>
    %568 = vector.extract_strided_slice %541 {offsets = [0, 0], sizes = [8, 32], strides = [1, 1]} : vector<8x96xf32> to vector<8x32xf32>
    %569 = vector.extract_strided_slice %535 {offsets = [0, 0], sizes = [8, 32], strides = [1, 1]} : vector<8x96xf32> to vector<8x32xf32>
    %570 = arith.addf %568, %569 : vector<8x32xf32>
    %571 = arith.negf %570 : vector<8x32xf32>
    %572 = math.exp %571 : vector<8x32xf32>
    %cst_207 = arith.constant 1.000000e+00 : f32
    %573 = vector.broadcast %cst_207 : f32 to vector<8x32xf32>
    %574 = arith.addf %573, %572 : vector<8x32xf32>
    %575 = arith.divf %573, %574 : vector<8x32xf32>
    %576 = vector.extract_strided_slice %541 {offsets = [0, 32], sizes = [8, 32], strides = [1, 1]} : vector<8x96xf32> to vector<8x32xf32>
    %577 = vector.extract_strided_slice %535 {offsets = [0, 32], sizes = [8, 32], strides = [1, 1]} : vector<8x96xf32> to vector<8x32xf32>
    %578 = arith.addf %576, %577 : vector<8x32xf32>
    %579 = arith.negf %578 : vector<8x32xf32>
    %580 = math.exp %579 : vector<8x32xf32>
    %cst_208 = arith.constant 1.000000e+00 : f32
    %581 = vector.broadcast %cst_208 : f32 to vector<8x32xf32>
    %582 = arith.addf %581, %580 : vector<8x32xf32>
    %583 = arith.divf %581, %582 : vector<8x32xf32>
    %584 = vector.extract_strided_slice %541 {offsets = [0, 64], sizes = [8, 32], strides = [1, 1]} : vector<8x96xf32> to vector<8x32xf32>
    %585 = vector.extract_strided_slice %535 {offsets = [0, 64], sizes = [8, 32], strides = [1, 1]} : vector<8x96xf32> to vector<8x32xf32>
    %586 = arith.mulf %575, %585 : vector<8x32xf32>
    %587 = arith.addf %584, %586 : vector<8x32xf32>
    %588 = math.tanh %587 : vector<8x32xf32>
    %cst_209 = arith.constant 1.000000e+00 : f32
    %589 = vector.broadcast %cst_209 : f32 to vector<8x32xf32>
    %590 = arith.subf %589, %583 : vector<8x32xf32>
    %591 = arith.mulf %590, %588 : vector<8x32xf32>
    %592 = arith.mulf %583, %527 : vector<8x32xf32>
    %593 = arith.addf %591, %592 : vector<8x32xf32>
    %c0_210 = arith.constant 0 : index
    %c0_211 = arith.constant 0 : index
    %594 = vector.load %arg20[%c0_210, %c0_211] : memref<8x32xf32, #tpu.memory_space<vmem>>, vector<8x32xf32>
    tpu.vector_store %arg20[%c0_210, %c0_211], %567 {strides = array<i32>} : memref<8x32xf32, #tpu.memory_space<vmem>>, vector<8x32xf32>,
    %c0_212 = arith.constant 0 : index
    %c0_213 = arith.constant 0 : index
    %595 = vector.load %arg21[%c0_212, %c0_213] : memref<8x32xf32, #tpu.memory_space<vmem>>, vector<8x32xf32>
    tpu.vector_store %arg21[%c0_212, %c0_213], %593 {strides = array<i32>} : memref<8x32xf32, #tpu.memory_space<vmem>>, vector<8x32xf32>,
    %596 = arith.truncf %567 : vector<8x32xf32> to vector<8x32xbf16>
    %597 = arith.index_cast %c6_i32 : i32 to index
    %c0_214 = arith.constant 0 : index
    %c0_215 = arith.constant 0 : index
    %598 = vector.load %arg16[%597, %c0_214, %c0_215] : memref<8x8x32xbf16, #tpu.memory_space<vmem>>, vector<1x8x32xbf16>
    %599 = vector.shape_cast %598 : vector<1x8x32xbf16> to vector<8x32xbf16>
    %600 = vector.shape_cast %596 : vector<8x32xbf16> to vector<1x8x32xbf16>
    tpu.vector_store %arg16[%597, %c0_214, %c0_215], %600 {strides = array<i32>} : memref<8x8x32xbf16, #tpu.memory_space<vmem>>, vector<1x8x32xbf16>,
    %601 = arith.truncf %593 : vector<8x32xf32> to vector<8x32xbf16>
    %602 = arith.index_cast %525 : i32 to index
    %c0_216 = arith.constant 0 : index
    %c0_217 = arith.constant 0 : index
    %603 = vector.load %arg17[%602, %c0_216, %c0_217] : memref<8x8x32xbf16, #tpu.memory_space<vmem>>, vector<1x8x32xbf16>
    %604 = vector.shape_cast %603 : vector<1x8x32xbf16> to vector<8x32xbf16>
    %605 = vector.shape_cast %601 : vector<8x32xbf16> to vector<1x8x32xbf16>
    tpu.vector_store %arg17[%602, %c0_216, %c0_217], %605 {strides = array<i32>} : memref<8x8x32xbf16, #tpu.memory_space<vmem>>, vector<1x8x32xbf16>,
    %c7_i32_218 = arith.constant 7 : i32
    %c7_i32_219 = arith.constant 7 : i32
    %606 = arith.subi %c7_i32_219, %c7_i32_218 : i32
    %c0_220 = arith.constant 0 : index
    %c0_221 = arith.constant 0 : index
    %607 = vector.load %arg20[%c0_220, %c0_221] : memref<8x32xf32, #tpu.memory_space<vmem>>, vector<8x32xf32>
    %c0_222 = arith.constant 0 : index
    %c0_223 = arith.constant 0 : index
    %608 = vector.load %arg21[%c0_222, %c0_223] : memref<8x32xf32, #tpu.memory_space<vmem>>, vector<8x32xf32>
    %609 = arith.truncf %607 : vector<8x32xf32> to vector<8x32xbf16>
    %cst_224 = arith.constant dense<0.000000e+00> : vector<8x96xf32>
    %610 = tpu.matmul %609, %35, %cst_224 {dimension_numbers = #tpu.dot_dimension_numbers<[1], [0], [0], [1], [0, 0, 1, 1], [], []>} : vector<8x32xbf16>, vector<32x96xbf16>, vector<8x96xf32> -> vector<8x96xf32>
    %611 = vector.broadcast %37 : vector<1x96xf32> to vector<8x96xf32>
    %612 = arith.addf %610, %611 : vector<8x96xf32>
    %613 = arith.truncf %608 : vector<8x32xf32> to vector<8x32xbf16>
    %cst_225 = arith.constant dense<0.000000e+00> : vector<8x96xf32>
    %614 = tpu.matmul %613, %36, %cst_225 {dimension_numbers = #tpu.dot_dimension_numbers<[1], [0], [0], [1], [0, 0, 1, 1], [], []>} : vector<8x32xbf16>, vector<32x96xbf16>, vector<8x96xf32> -> vector<8x96xf32>
    %615 = vector.broadcast %38 : vector<1x96xf32> to vector<8x96xf32>
    %616 = arith.addf %614, %615 : vector<8x96xf32>
    %617 = arith.index_cast %c7_i32_218 : i32 to index
    %c0_226 = arith.constant 0 : index
    %c0_227 = arith.constant 0 : index
    %618 = vector.load %arg18[%617, %c0_226, %c0_227] : memref<8x8x96xf32, #tpu.memory_space<vmem>>, vector<1x8x96xf32>
    %619 = vector.shape_cast %618 : vector<1x8x96xf32> to vector<8x96xf32>
    %620 = arith.index_cast %606 : i32 to index
    %c0_228 = arith.constant 0 : index
    %c0_229 = arith.constant 0 : index
    %621 = vector.load %arg19[%620, %c0_228, %c0_229] : memref<8x8x96xf32, #tpu.memory_space<vmem>>, vector<1x8x96xf32>
    %622 = vector.shape_cast %621 : vector<1x8x96xf32> to vector<8x96xf32>
    %623 = vector.extract_strided_slice %619 {offsets = [0, 0], sizes = [8, 32], strides = [1, 1]} : vector<8x96xf32> to vector<8x32xf32>
    %624 = vector.extract_strided_slice %612 {offsets = [0, 0], sizes = [8, 32], strides = [1, 1]} : vector<8x96xf32> to vector<8x32xf32>
    %625 = arith.addf %623, %624 : vector<8x32xf32>
    %626 = arith.negf %625 : vector<8x32xf32>
    %627 = math.exp %626 : vector<8x32xf32>
    %cst_230 = arith.constant 1.000000e+00 : f32
    %628 = vector.broadcast %cst_230 : f32 to vector<8x32xf32>
    %629 = arith.addf %628, %627 : vector<8x32xf32>
    %630 = arith.divf %628, %629 : vector<8x32xf32>
    %631 = vector.extract_strided_slice %619 {offsets = [0, 32], sizes = [8, 32], strides = [1, 1]} : vector<8x96xf32> to vector<8x32xf32>
    %632 = vector.extract_strided_slice %612 {offsets = [0, 32], sizes = [8, 32], strides = [1, 1]} : vector<8x96xf32> to vector<8x32xf32>
    %633 = arith.addf %631, %632 : vector<8x32xf32>
    %634 = arith.negf %633 : vector<8x32xf32>
    %635 = math.exp %634 : vector<8x32xf32>
    %cst_231 = arith.constant 1.000000e+00 : f32
    %636 = vector.broadcast %cst_231 : f32 to vector<8x32xf32>
    %637 = arith.addf %636, %635 : vector<8x32xf32>
    %638 = arith.divf %636, %637 : vector<8x32xf32>
    %639 = vector.extract_strided_slice %619 {offsets = [0, 64], sizes = [8, 32], strides = [1, 1]} : vector<8x96xf32> to vector<8x32xf32>
    %640 = vector.extract_strided_slice %612 {offsets = [0, 64], sizes = [8, 32], strides = [1, 1]} : vector<8x96xf32> to vector<8x32xf32>
    %641 = arith.mulf %630, %640 : vector<8x32xf32>
    %642 = arith.addf %639, %641 : vector<8x32xf32>
    %643 = math.tanh %642 : vector<8x32xf32>
    %cst_232 = arith.constant 1.000000e+00 : f32
    %644 = vector.broadcast %cst_232 : f32 to vector<8x32xf32>
    %645 = arith.subf %644, %638 : vector<8x32xf32>
    %646 = arith.mulf %645, %643 : vector<8x32xf32>
    %647 = arith.mulf %638, %607 : vector<8x32xf32>
    %648 = arith.addf %646, %647 : vector<8x32xf32>
    %649 = vector.extract_strided_slice %622 {offsets = [0, 0], sizes = [8, 32], strides = [1, 1]} : vector<8x96xf32> to vector<8x32xf32>
    %650 = vector.extract_strided_slice %616 {offsets = [0, 0], sizes = [8, 32], strides = [1, 1]} : vector<8x96xf32> to vector<8x32xf32>
    %651 = arith.addf %649, %650 : vector<8x32xf32>
    %652 = arith.negf %651 : vector<8x32xf32>
    %653 = math.exp %652 : vector<8x32xf32>
    %cst_233 = arith.constant 1.000000e+00 : f32
    %654 = vector.broadcast %cst_233 : f32 to vector<8x32xf32>
    %655 = arith.addf %654, %653 : vector<8x32xf32>
    %656 = arith.divf %654, %655 : vector<8x32xf32>
    %657 = vector.extract_strided_slice %622 {offsets = [0, 32], sizes = [8, 32], strides = [1, 1]} : vector<8x96xf32> to vector<8x32xf32>
    %658 = vector.extract_strided_slice %616 {offsets = [0, 32], sizes = [8, 32], strides = [1, 1]} : vector<8x96xf32> to vector<8x32xf32>
    %659 = arith.addf %657, %658 : vector<8x32xf32>
    %660 = arith.negf %659 : vector<8x32xf32>
    %661 = math.exp %660 : vector<8x32xf32>
    %cst_234 = arith.constant 1.000000e+00 : f32
    %662 = vector.broadcast %cst_234 : f32 to vector<8x32xf32>
    %663 = arith.addf %662, %661 : vector<8x32xf32>
    %664 = arith.divf %662, %663 : vector<8x32xf32>
    %665 = vector.extract_strided_slice %622 {offsets = [0, 64], sizes = [8, 32], strides = [1, 1]} : vector<8x96xf32> to vector<8x32xf32>
    %666 = vector.extract_strided_slice %616 {offsets = [0, 64], sizes = [8, 32], strides = [1, 1]} : vector<8x96xf32> to vector<8x32xf32>
    %667 = arith.mulf %656, %666 : vector<8x32xf32>
    %668 = arith.addf %665, %667 : vector<8x32xf32>
    %669 = math.tanh %668 : vector<8x32xf32>
    %cst_235 = arith.constant 1.000000e+00 : f32
    %670 = vector.broadcast %cst_235 : f32 to vector<8x32xf32>
    %671 = arith.subf %670, %664 : vector<8x32xf32>
    %672 = arith.mulf %671, %669 : vector<8x32xf32>
    %673 = arith.mulf %664, %608 : vector<8x32xf32>
    %674 = arith.addf %672, %673 : vector<8x32xf32>
    %c0_236 = arith.constant 0 : index
    %c0_237 = arith.constant 0 : index
    %675 = vector.load %arg20[%c0_236, %c0_237] : memref<8x32xf32, #tpu.memory_space<vmem>>, vector<8x32xf32>
    tpu.vector_store %arg20[%c0_236, %c0_237], %648 {strides = array<i32>} : memref<8x32xf32, #tpu.memory_space<vmem>>, vector<8x32xf32>,
    %c0_238 = arith.constant 0 : index
    %c0_239 = arith.constant 0 : index
    %676 = vector.load %arg21[%c0_238, %c0_239] : memref<8x32xf32, #tpu.memory_space<vmem>>, vector<8x32xf32>
    tpu.vector_store %arg21[%c0_238, %c0_239], %674 {strides = array<i32>} : memref<8x32xf32, #tpu.memory_space<vmem>>, vector<8x32xf32>,
    %677 = arith.truncf %648 : vector<8x32xf32> to vector<8x32xbf16>
    %678 = arith.index_cast %c7_i32_218 : i32 to index
    %c0_240 = arith.constant 0 : index
    %c0_241 = arith.constant 0 : index
    %679 = vector.load %arg16[%678, %c0_240, %c0_241] : memref<8x8x32xbf16, #tpu.memory_space<vmem>>, vector<1x8x32xbf16>
    %680 = vector.shape_cast %679 : vector<1x8x32xbf16> to vector<8x32xbf16>
    %681 = vector.shape_cast %677 : vector<8x32xbf16> to vector<1x8x32xbf16>
    tpu.vector_store %arg16[%678, %c0_240, %c0_241], %681 {strides = array<i32>} : memref<8x8x32xbf16, #tpu.memory_space<vmem>>, vector<1x8x32xbf16>,
    %682 = arith.truncf %674 : vector<8x32xf32> to vector<8x32xbf16>
    %683 = arith.index_cast %606 : i32 to index
    %c0_242 = arith.constant 0 : index
    %c0_243 = arith.constant 0 : index
    %684 = vector.load %arg17[%683, %c0_242, %c0_243] : memref<8x8x32xbf16, #tpu.memory_space<vmem>>, vector<1x8x32xbf16>
    %685 = vector.shape_cast %684 : vector<1x8x32xbf16> to vector<8x32xbf16>
    %686 = vector.shape_cast %682 : vector<8x32xbf16> to vector<1x8x32xbf16>
    tpu.vector_store %arg17[%683, %c0_242, %c0_243], %686 {strides = array<i32>} : memref<8x8x32xbf16, #tpu.memory_space<vmem>>, vector<1x8x32xbf16>,
    %c8_i32 = arith.constant 8 : i32
    return
  }
  func.func @transform_0(%arg0: i32, %arg1: i32) -> (i32, i32, i32) {
    %c0_i32 = arith.constant 0 : i32
    %c0_i32_0 = arith.constant 0 : i32
    return %arg1, %arg0, %c0_i32 : i32, i32, i32
  }
  func.func @transform_1(%arg0: i32, %arg1: i32) -> (i32, i32, i32) {
    %c0_i32 = arith.constant 0 : i32
    %c0_i32_0 = arith.constant 0 : i32
    return %arg1, %arg0, %c0_i32 : i32, i32, i32
  }
  func.func @transform_2(%arg0: i32, %arg1: i32) -> (i32, i32, i32) {
    %c0_i32 = arith.constant 0 : i32
    %0 = arith.subi %c0_i32, %arg1 : i32
    %c0_i32_0 = arith.constant 0 : i32
    %c0_i32_1 = arith.constant 0 : i32
    return %0, %arg0, %c0_i32_0 : i32, i32, i32
  }
  func.func @transform_3(%arg0: i32, %arg1: i32) -> (i32, i32, i32) {
    %c0_i32 = arith.constant 0 : i32
    %0 = arith.subi %c0_i32, %arg1 : i32
    %c0_i32_0 = arith.constant 0 : i32
    %c0_i32_1 = arith.constant 0 : i32
    return %0, %arg0, %c0_i32_0 : i32, i32, i32
  }
  func.func @transform_4(%arg0: i32, %arg1: i32) -> (i32, i32) {
    %c0_i32 = arith.constant 0 : i32
    %c0_i32_0 = arith.constant 0 : i32
    %c0_i32_1 = arith.constant 0 : i32
    return %c0_i32, %c0_i32_0 : i32, i32
  }
  func.func @transform_5(%arg0: i32, %arg1: i32) -> (i32, i32) {
    %c0_i32 = arith.constant 0 : i32
    %c0_i32_0 = arith.constant 0 : i32
    %c0_i32_1 = arith.constant 0 : i32
    return %c0_i32, %c0_i32_0 : i32, i32
  }
  func.func @transform_6(%arg0: i32, %arg1: i32) -> (i32, i32) {
    %c0_i32 = arith.constant 0 : i32
    %c0_i32_0 = arith.constant 0 : i32
    %c0_i32_1 = arith.constant 0 : i32
    return %c0_i32, %c0_i32_0 : i32, i32
  }
  func.func @transform_7(%arg0: i32, %arg1: i32) -> (i32, i32) {
    %c0_i32 = arith.constant 0 : i32
    %c0_i32_0 = arith.constant 0 : i32
    %c0_i32_1 = arith.constant 0 : i32
    return %c0_i32, %c0_i32_0 : i32, i32
  }
  func.func @transform_8(%arg0: i32, %arg1: i32) -> (i32, i32) {
    %c0_i32 = arith.constant 0 : i32
    %c0_i32_0 = arith.constant 0 : i32
    %c0_i32_1 = arith.constant 0 : i32
    return %c0_i32, %c0_i32_0 : i32, i32
  }
  func.func @transform_9(%arg0: i32, %arg1: i32) -> (i32, i32) {
    %c0_i32 = arith.constant 0 : i32
    %c0_i32_0 = arith.constant 0 : i32
    %c0_i32_1 = arith.constant 0 : i32
    return %c0_i32, %c0_i32_0 : i32, i32
  }
  func.func @transform_10(%arg0: i32, %arg1: i32) -> (i32, i32) {
    %c0_i32 = arith.constant 0 : i32
    %c0_i32_0 = arith.constant 0 : i32
    %c0_i32_1 = arith.constant 0 : i32
    return %c0_i32, %c0_i32_0 : i32, i32
  }
  func.func @transform_11(%arg0: i32, %arg1: i32) -> (i32, i32) {
    %c0_i32 = arith.constant 0 : i32
    %c0_i32_0 = arith.constant 0 : i32
    %c0_i32_1 = arith.constant 0 : i32
    return %c0_i32, %c0_i32_0 : i32, i32
  }
  func.func @transform_12(%arg0: i32, %arg1: i32) -> (i32, i32) {
    %c0_i32 = arith.constant 0 : i32
    %c0_i32_0 = arith.constant 0 : i32
    %c0_i32_1 = arith.constant 0 : i32
    return %c0_i32, %c0_i32_0 : i32, i32
  }
  func.func @transform_13(%arg0: i32, %arg1: i32) -> (i32, i32) {
    %c0_i32 = arith.constant 0 : i32
    %c0_i32_0 = arith.constant 0 : i32
    %c0_i32_1 = arith.constant 0 : i32
    return %c0_i32, %c0_i32_0 : i32, i32
  }
  func.func @transform_14(%arg0: i32, %arg1: i32) -> (i32, i32, i32) {
    %c0_i32 = arith.constant 0 : i32
    %c0_i32_0 = arith.constant 0 : i32
    return %arg1, %arg0, %c0_i32 : i32, i32, i32
  }
  func.func @transform_15(%arg0: i32, %arg1: i32) -> (i32, i32, i32) {
    %c0_i32 = arith.constant 0 : i32
    %0 = arith.subi %c0_i32, %arg1 : i32
    %c0_i32_0 = arith.constant 0 : i32
    %c0_i32_1 = arith.constant 0 : i32
    return %0, %arg0, %c0_i32_0 : i32, i32, i32
  }
}

module attributes {stable_mosaic.version = 11 : i64} {
  func.func @kernel(%arg0: i32, %arg1: i32, %arg2: memref<8x8x32xbf16, #tpu.memory_space<vmem>>, %arg3: memref<8x8x32xbf16, #tpu.memory_space<vmem>>, %arg4: memref<32x96xbf16, #tpu.memory_space<vmem>>, %arg5: memref<32x96xbf16, #tpu.memory_space<vmem>>, %arg6: memref<1x96xf32, #tpu.memory_space<vmem>>, %arg7: memref<1x96xf32, #tpu.memory_space<vmem>>, %arg8: memref<32x96xbf16, #tpu.memory_space<vmem>>, %arg9: memref<32x96xbf16, #tpu.memory_space<vmem>>, %arg10: memref<1x96xf32, #tpu.memory_space<vmem>>, %arg11: memref<1x96xf32, #tpu.memory_space<vmem>>, %arg12: memref<8x8x32xbf16, #tpu.memory_space<vmem>>, %arg13: memref<8x8x32xbf16, #tpu.memory_space<vmem>>, %arg14: memref<8x8x96xf32, #tpu.memory_space<vmem>>, %arg15: memref<8x8x96xf32, #tpu.memory_space<vmem>>, %arg16: memref<8x32xf32, #tpu.memory_space<vmem>>, %arg17: memref<8x32xf32, #tpu.memory_space<vmem>>) attributes {dimension_semantics = [#tpu.dimension_semantics<parallel>, #tpu.dimension_semantics<arbitrary>], iteration_bounds = array<i64: 1, 1>, scalar_prefetch = 0 : i64, scratch_operands = 4 : i64, tpu.core_type = #tpu.core_type<tc>, window_params = [{transform_indices = @transform_0, window_bounds = array<i64: 8, 8, 32>}, {transform_indices = @transform_1, window_bounds = array<i64: 8, 8, 32>}, {pipeline_mode = #tpu.pipeline_mode<synchronous>, transform_indices = @transform_2, window_bounds = array<i64: 32, 96>}, {pipeline_mode = #tpu.pipeline_mode<synchronous>, transform_indices = @transform_3, window_bounds = array<i64: 32, 96>}, {pipeline_mode = #tpu.pipeline_mode<synchronous>, transform_indices = @transform_4, window_bounds = array<i64: 1, 96>}, {pipeline_mode = #tpu.pipeline_mode<synchronous>, transform_indices = @transform_5, window_bounds = array<i64: 1, 96>}, {pipeline_mode = #tpu.pipeline_mode<synchronous>, transform_indices = @transform_6, window_bounds = array<i64: 32, 96>}, {pipeline_mode = #tpu.pipeline_mode<synchronous>, transform_indices = @transform_7, window_bounds = array<i64: 32, 96>}, {pipeline_mode = #tpu.pipeline_mode<synchronous>, transform_indices = @transform_8, window_bounds = array<i64: 1, 96>}, {pipeline_mode = #tpu.pipeline_mode<synchronous>, transform_indices = @transform_9, window_bounds = array<i64: 1, 96>}, {transform_indices = @transform_10, window_bounds = array<i64: 8, 8, 32>}, {transform_indices = @transform_11, window_bounds = array<i64: 8, 8, 32>}]} {
    %c0_i32 = arith.constant 0 : i32
    %0 = arith.cmpi eq, %arg1, %c0_i32 : i32
    %1 = arith.extui %0 : i1 to i32
    %c0_i32_0 = arith.constant 0 : i32
    %2 = arith.cmpi ne, %1, %c0_i32_0 : i32
    scf.if %2 {
      %cst_232 = arith.constant 0.000000e+00 : f32
      %677 = vector.broadcast %cst_232 : f32 to vector<8x32xf32>
      %c0_233 = arith.constant 0 : index
      %c0_234 = arith.constant 0 : index
      %678 = vector.load %arg16[%c0_233, %c0_234] : memref<8x32xf32, #tpu.memory_space<vmem>>, vector<8x32xf32>
      tpu.vector_store %arg16[%c0_233, %c0_234], %677 {strides = array<i32>} : memref<8x32xf32, #tpu.memory_space<vmem>>, vector<8x32xf32>,
      %cst_235 = arith.constant 0.000000e+00 : f32
      %679 = vector.broadcast %cst_235 : f32 to vector<8x32xf32>
      %c0_236 = arith.constant 0 : index
      %c0_237 = arith.constant 0 : index
      %680 = vector.load %arg17[%c0_236, %c0_237] : memref<8x32xf32, #tpu.memory_space<vmem>>, vector<8x32xf32>
      tpu.vector_store %arg17[%c0_236, %c0_237], %679 {strides = array<i32>} : memref<8x32xf32, #tpu.memory_space<vmem>>, vector<8x32xf32>,
    } else {
    }
    %cst = arith.constant 0.000000e+00 : f32
    %3 = vector.broadcast %cst : f32 to vector<64x96xf32>
    %c0 = arith.constant 0 : index
    %c0_1 = arith.constant 0 : index
    %c0_2 = arith.constant 0 : index
    %4 = vector.load %arg2[%c0, %c0_1, %c0_2] : memref<8x8x32xbf16, #tpu.memory_space<vmem>>, vector<8x8x32xbf16>
    %5 = vector.shape_cast %4 : vector<8x8x32xbf16> to vector<64x32xbf16>
    %c0_3 = arith.constant 0 : index
    %c0_4 = arith.constant 0 : index
    %6 = vector.load %arg4[%c0_3, %c0_4] : memref<32x96xbf16, #tpu.memory_space<vmem>>, vector<32x96xbf16>
    %cst_5 = arith.constant dense<0.000000e+00> : vector<64x96xf32>
    %7 = tpu.matmul %5, %6, %cst_5 {dimension_numbers = #tpu.dot_dimension_numbers<[1], [0], [0], [1], [0, 0, 1, 1], [], []>} : vector<64x32xbf16>, vector<32x96xbf16>, vector<64x96xf32> -> vector<64x96xf32>
    %8 = arith.addf %3, %7 : vector<64x96xf32>
    %c0_6 = arith.constant 0 : index
    %c0_7 = arith.constant 0 : index
    %9 = vector.load %arg6[%c0_6, %c0_7] : memref<1x96xf32, #tpu.memory_space<vmem>>, vector<1x96xf32>
    %10 = vector.broadcast %9 : vector<1x96xf32> to vector<64x96xf32>
    %11 = arith.addf %8, %10 : vector<64x96xf32>
    %12 = vector.shape_cast %11 : vector<64x96xf32> to vector<8x8x96xf32>
    %c0_8 = arith.constant 0 : index
    %c0_9 = arith.constant 0 : index
    %c0_10 = arith.constant 0 : index
    %13 = vector.load %arg14[%c0_8, %c0_9, %c0_10] : memref<8x8x96xf32, #tpu.memory_space<vmem>>, vector<8x8x96xf32>
    tpu.vector_store %arg14[%c0_8, %c0_9, %c0_10], %12 {strides = array<i32>} : memref<8x8x96xf32, #tpu.memory_space<vmem>>, vector<8x8x96xf32>,
    %cst_11 = arith.constant 0.000000e+00 : f32
    %14 = vector.broadcast %cst_11 : f32 to vector<64x96xf32>
    %c0_12 = arith.constant 0 : index
    %c0_13 = arith.constant 0 : index
    %c0_14 = arith.constant 0 : index
    %15 = vector.load %arg3[%c0_12, %c0_13, %c0_14] : memref<8x8x32xbf16, #tpu.memory_space<vmem>>, vector<8x8x32xbf16>
    %16 = vector.shape_cast %15 : vector<8x8x32xbf16> to vector<64x32xbf16>
    %c0_15 = arith.constant 0 : index
    %c0_16 = arith.constant 0 : index
    %17 = vector.load %arg5[%c0_15, %c0_16] : memref<32x96xbf16, #tpu.memory_space<vmem>>, vector<32x96xbf16>
    %cst_17 = arith.constant dense<0.000000e+00> : vector<64x96xf32>
    %18 = tpu.matmul %16, %17, %cst_17 {dimension_numbers = #tpu.dot_dimension_numbers<[1], [0], [0], [1], [0, 0, 1, 1], [], []>} : vector<64x32xbf16>, vector<32x96xbf16>, vector<64x96xf32> -> vector<64x96xf32>
    %19 = arith.addf %14, %18 : vector<64x96xf32>
    %c0_18 = arith.constant 0 : index
    %c0_19 = arith.constant 0 : index
    %20 = vector.load %arg7[%c0_18, %c0_19] : memref<1x96xf32, #tpu.memory_space<vmem>>, vector<1x96xf32>
    %21 = vector.broadcast %20 : vector<1x96xf32> to vector<64x96xf32>
    %22 = arith.addf %19, %21 : vector<64x96xf32>
    %23 = vector.shape_cast %22 : vector<64x96xf32> to vector<8x8x96xf32>
    %c0_20 = arith.constant 0 : index
    %c0_21 = arith.constant 0 : index
    %c0_22 = arith.constant 0 : index
    %24 = vector.load %arg15[%c0_20, %c0_21, %c0_22] : memref<8x8x96xf32, #tpu.memory_space<vmem>>, vector<8x8x96xf32>
    tpu.vector_store %arg15[%c0_20, %c0_21, %c0_22], %23 {strides = array<i32>} : memref<8x8x96xf32, #tpu.memory_space<vmem>>, vector<8x8x96xf32>,
    %c0_23 = arith.constant 0 : index
    %c0_24 = arith.constant 0 : index
    %25 = vector.load %arg8[%c0_23, %c0_24] : memref<32x96xbf16, #tpu.memory_space<vmem>>, vector<32x96xbf16>
    %c0_25 = arith.constant 0 : index
    %c0_26 = arith.constant 0 : index
    %26 = vector.load %arg9[%c0_25, %c0_26] : memref<32x96xbf16, #tpu.memory_space<vmem>>, vector<32x96xbf16>
    %c0_27 = arith.constant 0 : index
    %c0_28 = arith.constant 0 : index
    %27 = vector.load %arg10[%c0_27, %c0_28] : memref<1x96xf32, #tpu.memory_space<vmem>>, vector<1x96xf32>
    %c0_29 = arith.constant 0 : index
    %c0_30 = arith.constant 0 : index
    %28 = vector.load %arg11[%c0_29, %c0_30] : memref<1x96xf32, #tpu.memory_space<vmem>>, vector<1x96xf32>
    %c0_i32_31 = arith.constant 0 : i32
    %c7_i32 = arith.constant 7 : i32
    %29 = arith.subi %c7_i32, %c0_i32_31 : i32
    %c0_32 = arith.constant 0 : index
    %c0_33 = arith.constant 0 : index
    %30 = vector.load %arg16[%c0_32, %c0_33] : memref<8x32xf32, #tpu.memory_space<vmem>>, vector<8x32xf32>
    %c0_34 = arith.constant 0 : index
    %c0_35 = arith.constant 0 : index
    %31 = vector.load %arg17[%c0_34, %c0_35] : memref<8x32xf32, #tpu.memory_space<vmem>>, vector<8x32xf32>
    %32 = arith.truncf %30 : vector<8x32xf32> to vector<8x32xbf16>
    %cst_36 = arith.constant dense<0.000000e+00> : vector<8x96xf32>
    %33 = tpu.matmul %32, %25, %cst_36 {dimension_numbers = #tpu.dot_dimension_numbers<[1], [0], [0], [1], [0, 0, 1, 1], [], []>} : vector<8x32xbf16>, vector<32x96xbf16>, vector<8x96xf32> -> vector<8x96xf32>
    %34 = vector.broadcast %27 : vector<1x96xf32> to vector<8x96xf32>
    %35 = arith.addf %33, %34 : vector<8x96xf32>
    %36 = arith.truncf %31 : vector<8x32xf32> to vector<8x32xbf16>
    %cst_37 = arith.constant dense<0.000000e+00> : vector<8x96xf32>
    %37 = tpu.matmul %36, %26, %cst_37 {dimension_numbers = #tpu.dot_dimension_numbers<[1], [0], [0], [1], [0, 0, 1, 1], [], []>} : vector<8x32xbf16>, vector<32x96xbf16>, vector<8x96xf32> -> vector<8x96xf32>
    %38 = vector.broadcast %28 : vector<1x96xf32> to vector<8x96xf32>
    %39 = arith.addf %37, %38 : vector<8x96xf32>
    %40 = arith.index_cast %c0_i32_31 : i32 to index
    %c0_38 = arith.constant 0 : index
    %c0_39 = arith.constant 0 : index
    %41 = vector.load %arg14[%40, %c0_38, %c0_39] : memref<8x8x96xf32, #tpu.memory_space<vmem>>, vector<1x8x96xf32>
    %42 = vector.shape_cast %41 : vector<1x8x96xf32> to vector<8x96xf32>
    %43 = arith.index_cast %29 : i32 to index
    %c0_40 = arith.constant 0 : index
    %c0_41 = arith.constant 0 : index
    %44 = vector.load %arg15[%43, %c0_40, %c0_41] : memref<8x8x96xf32, #tpu.memory_space<vmem>>, vector<1x8x96xf32>
    %45 = vector.shape_cast %44 : vector<1x8x96xf32> to vector<8x96xf32>
    %46 = vector.extract_strided_slice %42 {offsets = [0, 0], sizes = [8, 32], strides = [1, 1]} : vector<8x96xf32> to vector<8x32xf32>
    %47 = vector.extract_strided_slice %35 {offsets = [0, 0], sizes = [8, 32], strides = [1, 1]} : vector<8x96xf32> to vector<8x32xf32>
    %48 = arith.addf %46, %47 : vector<8x32xf32>
    %49 = arith.negf %48 : vector<8x32xf32>
    %50 = math.exp %49 : vector<8x32xf32>
    %cst_42 = arith.constant 1.000000e+00 : f32
    %51 = vector.broadcast %cst_42 : f32 to vector<8x32xf32>
    %52 = arith.addf %51, %50 : vector<8x32xf32>
    %53 = arith.divf %51, %52 : vector<8x32xf32>
    %54 = vector.extract_strided_slice %42 {offsets = [0, 32], sizes = [8, 32], strides = [1, 1]} : vector<8x96xf32> to vector<8x32xf32>
    %55 = vector.extract_strided_slice %35 {offsets = [0, 32], sizes = [8, 32], strides = [1, 1]} : vector<8x96xf32> to vector<8x32xf32>
    %56 = arith.addf %54, %55 : vector<8x32xf32>
    %57 = arith.negf %56 : vector<8x32xf32>
    %58 = math.exp %57 : vector<8x32xf32>
    %cst_43 = arith.constant 1.000000e+00 : f32
    %59 = vector.broadcast %cst_43 : f32 to vector<8x32xf32>
    %60 = arith.addf %59, %58 : vector<8x32xf32>
    %61 = arith.divf %59, %60 : vector<8x32xf32>
    %62 = vector.extract_strided_slice %42 {offsets = [0, 64], sizes = [8, 32], strides = [1, 1]} : vector<8x96xf32> to vector<8x32xf32>
    %63 = vector.extract_strided_slice %35 {offsets = [0, 64], sizes = [8, 32], strides = [1, 1]} : vector<8x96xf32> to vector<8x32xf32>
    %64 = arith.mulf %53, %63 : vector<8x32xf32>
    %65 = arith.addf %62, %64 : vector<8x32xf32>
    %66 = math.tanh %65 : vector<8x32xf32>
    %cst_44 = arith.constant 1.000000e+00 : f32
    %67 = vector.broadcast %cst_44 : f32 to vector<8x32xf32>
    %68 = arith.subf %67, %61 : vector<8x32xf32>
    %69 = arith.mulf %68, %66 : vector<8x32xf32>
    %70 = arith.mulf %61, %30 : vector<8x32xf32>
    %71 = arith.addf %69, %70 : vector<8x32xf32>
    %72 = vector.extract_strided_slice %45 {offsets = [0, 0], sizes = [8, 32], strides = [1, 1]} : vector<8x96xf32> to vector<8x32xf32>
    %73 = vector.extract_strided_slice %39 {offsets = [0, 0], sizes = [8, 32], strides = [1, 1]} : vector<8x96xf32> to vector<8x32xf32>
    %74 = arith.addf %72, %73 : vector<8x32xf32>
    %75 = arith.negf %74 : vector<8x32xf32>
    %76 = math.exp %75 : vector<8x32xf32>
    %cst_45 = arith.constant 1.000000e+00 : f32
    %77 = vector.broadcast %cst_45 : f32 to vector<8x32xf32>
    %78 = arith.addf %77, %76 : vector<8x32xf32>
    %79 = arith.divf %77, %78 : vector<8x32xf32>
    %80 = vector.extract_strided_slice %45 {offsets = [0, 32], sizes = [8, 32], strides = [1, 1]} : vector<8x96xf32> to vector<8x32xf32>
    %81 = vector.extract_strided_slice %39 {offsets = [0, 32], sizes = [8, 32], strides = [1, 1]} : vector<8x96xf32> to vector<8x32xf32>
    %82 = arith.addf %80, %81 : vector<8x32xf32>
    %83 = arith.negf %82 : vector<8x32xf32>
    %84 = math.exp %83 : vector<8x32xf32>
    %cst_46 = arith.constant 1.000000e+00 : f32
    %85 = vector.broadcast %cst_46 : f32 to vector<8x32xf32>
    %86 = arith.addf %85, %84 : vector<8x32xf32>
    %87 = arith.divf %85, %86 : vector<8x32xf32>
    %88 = vector.extract_strided_slice %45 {offsets = [0, 64], sizes = [8, 32], strides = [1, 1]} : vector<8x96xf32> to vector<8x32xf32>
    %89 = vector.extract_strided_slice %39 {offsets = [0, 64], sizes = [8, 32], strides = [1, 1]} : vector<8x96xf32> to vector<8x32xf32>
    %90 = arith.mulf %79, %89 : vector<8x32xf32>
    %91 = arith.addf %88, %90 : vector<8x32xf32>
    %92 = math.tanh %91 : vector<8x32xf32>
    %cst_47 = arith.constant 1.000000e+00 : f32
    %93 = vector.broadcast %cst_47 : f32 to vector<8x32xf32>
    %94 = arith.subf %93, %87 : vector<8x32xf32>
    %95 = arith.mulf %94, %92 : vector<8x32xf32>
    %96 = arith.mulf %87, %31 : vector<8x32xf32>
    %97 = arith.addf %95, %96 : vector<8x32xf32>
    %c0_48 = arith.constant 0 : index
    %c0_49 = arith.constant 0 : index
    %98 = vector.load %arg16[%c0_48, %c0_49] : memref<8x32xf32, #tpu.memory_space<vmem>>, vector<8x32xf32>
    tpu.vector_store %arg16[%c0_48, %c0_49], %71 {strides = array<i32>} : memref<8x32xf32, #tpu.memory_space<vmem>>, vector<8x32xf32>,
    %c0_50 = arith.constant 0 : index
    %c0_51 = arith.constant 0 : index
    %99 = vector.load %arg17[%c0_50, %c0_51] : memref<8x32xf32, #tpu.memory_space<vmem>>, vector<8x32xf32>
    tpu.vector_store %arg17[%c0_50, %c0_51], %97 {strides = array<i32>} : memref<8x32xf32, #tpu.memory_space<vmem>>, vector<8x32xf32>,
    %100 = arith.truncf %71 : vector<8x32xf32> to vector<8x32xbf16>
    %101 = arith.index_cast %c0_i32_31 : i32 to index
    %c0_52 = arith.constant 0 : index
    %c0_53 = arith.constant 0 : index
    %102 = vector.load %arg12[%101, %c0_52, %c0_53] : memref<8x8x32xbf16, #tpu.memory_space<vmem>>, vector<1x8x32xbf16>
    %103 = vector.shape_cast %102 : vector<1x8x32xbf16> to vector<8x32xbf16>
    %104 = vector.shape_cast %100 : vector<8x32xbf16> to vector<1x8x32xbf16>
    tpu.vector_store %arg12[%101, %c0_52, %c0_53], %104 {strides = array<i32>} : memref<8x8x32xbf16, #tpu.memory_space<vmem>>, vector<1x8x32xbf16>,
    %105 = arith.truncf %97 : vector<8x32xf32> to vector<8x32xbf16>
    %106 = arith.index_cast %29 : i32 to index
    %c0_54 = arith.constant 0 : index
    %c0_55 = arith.constant 0 : index
    %107 = vector.load %arg13[%106, %c0_54, %c0_55] : memref<8x8x32xbf16, #tpu.memory_space<vmem>>, vector<1x8x32xbf16>
    %108 = vector.shape_cast %107 : vector<1x8x32xbf16> to vector<8x32xbf16>
    %109 = vector.shape_cast %105 : vector<8x32xbf16> to vector<1x8x32xbf16>
    tpu.vector_store %arg13[%106, %c0_54, %c0_55], %109 {strides = array<i32>} : memref<8x8x32xbf16, #tpu.memory_space<vmem>>, vector<1x8x32xbf16>,
    %c1_i32 = arith.constant 1 : i32
    %c7_i32_56 = arith.constant 7 : i32
    %110 = arith.subi %c7_i32_56, %c1_i32 : i32
    %c0_57 = arith.constant 0 : index
    %c0_58 = arith.constant 0 : index
    %111 = vector.load %arg16[%c0_57, %c0_58] : memref<8x32xf32, #tpu.memory_space<vmem>>, vector<8x32xf32>
    %c0_59 = arith.constant 0 : index
    %c0_60 = arith.constant 0 : index
    %112 = vector.load %arg17[%c0_59, %c0_60] : memref<8x32xf32, #tpu.memory_space<vmem>>, vector<8x32xf32>
    %113 = arith.truncf %111 : vector<8x32xf32> to vector<8x32xbf16>
    %cst_61 = arith.constant dense<0.000000e+00> : vector<8x96xf32>
    %114 = tpu.matmul %113, %25, %cst_61 {dimension_numbers = #tpu.dot_dimension_numbers<[1], [0], [0], [1], [0, 0, 1, 1], [], []>} : vector<8x32xbf16>, vector<32x96xbf16>, vector<8x96xf32> -> vector<8x96xf32>
    %115 = vector.broadcast %27 : vector<1x96xf32> to vector<8x96xf32>
    %116 = arith.addf %114, %115 : vector<8x96xf32>
    %117 = arith.truncf %112 : vector<8x32xf32> to vector<8x32xbf16>
    %cst_62 = arith.constant dense<0.000000e+00> : vector<8x96xf32>
    %118 = tpu.matmul %117, %26, %cst_62 {dimension_numbers = #tpu.dot_dimension_numbers<[1], [0], [0], [1], [0, 0, 1, 1], [], []>} : vector<8x32xbf16>, vector<32x96xbf16>, vector<8x96xf32> -> vector<8x96xf32>
    %119 = vector.broadcast %28 : vector<1x96xf32> to vector<8x96xf32>
    %120 = arith.addf %118, %119 : vector<8x96xf32>
    %121 = arith.index_cast %c1_i32 : i32 to index
    %c0_63 = arith.constant 0 : index
    %c0_64 = arith.constant 0 : index
    %122 = vector.load %arg14[%121, %c0_63, %c0_64] : memref<8x8x96xf32, #tpu.memory_space<vmem>>, vector<1x8x96xf32>
    %123 = vector.shape_cast %122 : vector<1x8x96xf32> to vector<8x96xf32>
    %124 = arith.index_cast %110 : i32 to index
    %c0_65 = arith.constant 0 : index
    %c0_66 = arith.constant 0 : index
    %125 = vector.load %arg15[%124, %c0_65, %c0_66] : memref<8x8x96xf32, #tpu.memory_space<vmem>>, vector<1x8x96xf32>
    %126 = vector.shape_cast %125 : vector<1x8x96xf32> to vector<8x96xf32>
    %127 = vector.extract_strided_slice %123 {offsets = [0, 0], sizes = [8, 32], strides = [1, 1]} : vector<8x96xf32> to vector<8x32xf32>
    %128 = vector.extract_strided_slice %116 {offsets = [0, 0], sizes = [8, 32], strides = [1, 1]} : vector<8x96xf32> to vector<8x32xf32>
    %129 = arith.addf %127, %128 : vector<8x32xf32>
    %130 = arith.negf %129 : vector<8x32xf32>
    %131 = math.exp %130 : vector<8x32xf32>
    %cst_67 = arith.constant 1.000000e+00 : f32
    %132 = vector.broadcast %cst_67 : f32 to vector<8x32xf32>
    %133 = arith.addf %132, %131 : vector<8x32xf32>
    %134 = arith.divf %132, %133 : vector<8x32xf32>
    %135 = vector.extract_strided_slice %123 {offsets = [0, 32], sizes = [8, 32], strides = [1, 1]} : vector<8x96xf32> to vector<8x32xf32>
    %136 = vector.extract_strided_slice %116 {offsets = [0, 32], sizes = [8, 32], strides = [1, 1]} : vector<8x96xf32> to vector<8x32xf32>
    %137 = arith.addf %135, %136 : vector<8x32xf32>
    %138 = arith.negf %137 : vector<8x32xf32>
    %139 = math.exp %138 : vector<8x32xf32>
    %cst_68 = arith.constant 1.000000e+00 : f32
    %140 = vector.broadcast %cst_68 : f32 to vector<8x32xf32>
    %141 = arith.addf %140, %139 : vector<8x32xf32>
    %142 = arith.divf %140, %141 : vector<8x32xf32>
    %143 = vector.extract_strided_slice %123 {offsets = [0, 64], sizes = [8, 32], strides = [1, 1]} : vector<8x96xf32> to vector<8x32xf32>
    %144 = vector.extract_strided_slice %116 {offsets = [0, 64], sizes = [8, 32], strides = [1, 1]} : vector<8x96xf32> to vector<8x32xf32>
    %145 = arith.mulf %134, %144 : vector<8x32xf32>
    %146 = arith.addf %143, %145 : vector<8x32xf32>
    %147 = math.tanh %146 : vector<8x32xf32>
    %cst_69 = arith.constant 1.000000e+00 : f32
    %148 = vector.broadcast %cst_69 : f32 to vector<8x32xf32>
    %149 = arith.subf %148, %142 : vector<8x32xf32>
    %150 = arith.mulf %149, %147 : vector<8x32xf32>
    %151 = arith.mulf %142, %111 : vector<8x32xf32>
    %152 = arith.addf %150, %151 : vector<8x32xf32>
    %153 = vector.extract_strided_slice %126 {offsets = [0, 0], sizes = [8, 32], strides = [1, 1]} : vector<8x96xf32> to vector<8x32xf32>
    %154 = vector.extract_strided_slice %120 {offsets = [0, 0], sizes = [8, 32], strides = [1, 1]} : vector<8x96xf32> to vector<8x32xf32>
    %155 = arith.addf %153, %154 : vector<8x32xf32>
    %156 = arith.negf %155 : vector<8x32xf32>
    %157 = math.exp %156 : vector<8x32xf32>
    %cst_70 = arith.constant 1.000000e+00 : f32
    %158 = vector.broadcast %cst_70 : f32 to vector<8x32xf32>
    %159 = arith.addf %158, %157 : vector<8x32xf32>
    %160 = arith.divf %158, %159 : vector<8x32xf32>
    %161 = vector.extract_strided_slice %126 {offsets = [0, 32], sizes = [8, 32], strides = [1, 1]} : vector<8x96xf32> to vector<8x32xf32>
    %162 = vector.extract_strided_slice %120 {offsets = [0, 32], sizes = [8, 32], strides = [1, 1]} : vector<8x96xf32> to vector<8x32xf32>
    %163 = arith.addf %161, %162 : vector<8x32xf32>
    %164 = arith.negf %163 : vector<8x32xf32>
    %165 = math.exp %164 : vector<8x32xf32>
    %cst_71 = arith.constant 1.000000e+00 : f32
    %166 = vector.broadcast %cst_71 : f32 to vector<8x32xf32>
    %167 = arith.addf %166, %165 : vector<8x32xf32>
    %168 = arith.divf %166, %167 : vector<8x32xf32>
    %169 = vector.extract_strided_slice %126 {offsets = [0, 64], sizes = [8, 32], strides = [1, 1]} : vector<8x96xf32> to vector<8x32xf32>
    %170 = vector.extract_strided_slice %120 {offsets = [0, 64], sizes = [8, 32], strides = [1, 1]} : vector<8x96xf32> to vector<8x32xf32>
    %171 = arith.mulf %160, %170 : vector<8x32xf32>
    %172 = arith.addf %169, %171 : vector<8x32xf32>
    %173 = math.tanh %172 : vector<8x32xf32>
    %cst_72 = arith.constant 1.000000e+00 : f32
    %174 = vector.broadcast %cst_72 : f32 to vector<8x32xf32>
    %175 = arith.subf %174, %168 : vector<8x32xf32>
    %176 = arith.mulf %175, %173 : vector<8x32xf32>
    %177 = arith.mulf %168, %112 : vector<8x32xf32>
    %178 = arith.addf %176, %177 : vector<8x32xf32>
    %c0_73 = arith.constant 0 : index
    %c0_74 = arith.constant 0 : index
    %179 = vector.load %arg16[%c0_73, %c0_74] : memref<8x32xf32, #tpu.memory_space<vmem>>, vector<8x32xf32>
    tpu.vector_store %arg16[%c0_73, %c0_74], %152 {strides = array<i32>} : memref<8x32xf32, #tpu.memory_space<vmem>>, vector<8x32xf32>,
    %c0_75 = arith.constant 0 : index
    %c0_76 = arith.constant 0 : index
    %180 = vector.load %arg17[%c0_75, %c0_76] : memref<8x32xf32, #tpu.memory_space<vmem>>, vector<8x32xf32>
    tpu.vector_store %arg17[%c0_75, %c0_76], %178 {strides = array<i32>} : memref<8x32xf32, #tpu.memory_space<vmem>>, vector<8x32xf32>,
    %181 = arith.truncf %152 : vector<8x32xf32> to vector<8x32xbf16>
    %182 = arith.index_cast %c1_i32 : i32 to index
    %c0_77 = arith.constant 0 : index
    %c0_78 = arith.constant 0 : index
    %183 = vector.load %arg12[%182, %c0_77, %c0_78] : memref<8x8x32xbf16, #tpu.memory_space<vmem>>, vector<1x8x32xbf16>
    %184 = vector.shape_cast %183 : vector<1x8x32xbf16> to vector<8x32xbf16>
    %185 = vector.shape_cast %181 : vector<8x32xbf16> to vector<1x8x32xbf16>
    tpu.vector_store %arg12[%182, %c0_77, %c0_78], %185 {strides = array<i32>} : memref<8x8x32xbf16, #tpu.memory_space<vmem>>, vector<1x8x32xbf16>,
    %186 = arith.truncf %178 : vector<8x32xf32> to vector<8x32xbf16>
    %187 = arith.index_cast %110 : i32 to index
    %c0_79 = arith.constant 0 : index
    %c0_80 = arith.constant 0 : index
    %188 = vector.load %arg13[%187, %c0_79, %c0_80] : memref<8x8x32xbf16, #tpu.memory_space<vmem>>, vector<1x8x32xbf16>
    %189 = vector.shape_cast %188 : vector<1x8x32xbf16> to vector<8x32xbf16>
    %190 = vector.shape_cast %186 : vector<8x32xbf16> to vector<1x8x32xbf16>
    tpu.vector_store %arg13[%187, %c0_79, %c0_80], %190 {strides = array<i32>} : memref<8x8x32xbf16, #tpu.memory_space<vmem>>, vector<1x8x32xbf16>,
    %c2_i32 = arith.constant 2 : i32
    %c7_i32_81 = arith.constant 7 : i32
    %191 = arith.subi %c7_i32_81, %c2_i32 : i32
    %c0_82 = arith.constant 0 : index
    %c0_83 = arith.constant 0 : index
    %192 = vector.load %arg16[%c0_82, %c0_83] : memref<8x32xf32, #tpu.memory_space<vmem>>, vector<8x32xf32>
    %c0_84 = arith.constant 0 : index
    %c0_85 = arith.constant 0 : index
    %193 = vector.load %arg17[%c0_84, %c0_85] : memref<8x32xf32, #tpu.memory_space<vmem>>, vector<8x32xf32>
    %194 = arith.truncf %192 : vector<8x32xf32> to vector<8x32xbf16>
    %cst_86 = arith.constant dense<0.000000e+00> : vector<8x96xf32>
    %195 = tpu.matmul %194, %25, %cst_86 {dimension_numbers = #tpu.dot_dimension_numbers<[1], [0], [0], [1], [0, 0, 1, 1], [], []>} : vector<8x32xbf16>, vector<32x96xbf16>, vector<8x96xf32> -> vector<8x96xf32>
    %196 = vector.broadcast %27 : vector<1x96xf32> to vector<8x96xf32>
    %197 = arith.addf %195, %196 : vector<8x96xf32>
    %198 = arith.truncf %193 : vector<8x32xf32> to vector<8x32xbf16>
    %cst_87 = arith.constant dense<0.000000e+00> : vector<8x96xf32>
    %199 = tpu.matmul %198, %26, %cst_87 {dimension_numbers = #tpu.dot_dimension_numbers<[1], [0], [0], [1], [0, 0, 1, 1], [], []>} : vector<8x32xbf16>, vector<32x96xbf16>, vector<8x96xf32> -> vector<8x96xf32>
    %200 = vector.broadcast %28 : vector<1x96xf32> to vector<8x96xf32>
    %201 = arith.addf %199, %200 : vector<8x96xf32>
    %202 = arith.index_cast %c2_i32 : i32 to index
    %c0_88 = arith.constant 0 : index
    %c0_89 = arith.constant 0 : index
    %203 = vector.load %arg14[%202, %c0_88, %c0_89] : memref<8x8x96xf32, #tpu.memory_space<vmem>>, vector<1x8x96xf32>
    %204 = vector.shape_cast %203 : vector<1x8x96xf32> to vector<8x96xf32>
    %205 = arith.index_cast %191 : i32 to index
    %c0_90 = arith.constant 0 : index
    %c0_91 = arith.constant 0 : index
    %206 = vector.load %arg15[%205, %c0_90, %c0_91] : memref<8x8x96xf32, #tpu.memory_space<vmem>>, vector<1x8x96xf32>
    %207 = vector.shape_cast %206 : vector<1x8x96xf32> to vector<8x96xf32>
    %208 = vector.extract_strided_slice %204 {offsets = [0, 0], sizes = [8, 32], strides = [1, 1]} : vector<8x96xf32> to vector<8x32xf32>
    %209 = vector.extract_strided_slice %197 {offsets = [0, 0], sizes = [8, 32], strides = [1, 1]} : vector<8x96xf32> to vector<8x32xf32>
    %210 = arith.addf %208, %209 : vector<8x32xf32>
    %211 = arith.negf %210 : vector<8x32xf32>
    %212 = math.exp %211 : vector<8x32xf32>
    %cst_92 = arith.constant 1.000000e+00 : f32
    %213 = vector.broadcast %cst_92 : f32 to vector<8x32xf32>
    %214 = arith.addf %213, %212 : vector<8x32xf32>
    %215 = arith.divf %213, %214 : vector<8x32xf32>
    %216 = vector.extract_strided_slice %204 {offsets = [0, 32], sizes = [8, 32], strides = [1, 1]} : vector<8x96xf32> to vector<8x32xf32>
    %217 = vector.extract_strided_slice %197 {offsets = [0, 32], sizes = [8, 32], strides = [1, 1]} : vector<8x96xf32> to vector<8x32xf32>
    %218 = arith.addf %216, %217 : vector<8x32xf32>
    %219 = arith.negf %218 : vector<8x32xf32>
    %220 = math.exp %219 : vector<8x32xf32>
    %cst_93 = arith.constant 1.000000e+00 : f32
    %221 = vector.broadcast %cst_93 : f32 to vector<8x32xf32>
    %222 = arith.addf %221, %220 : vector<8x32xf32>
    %223 = arith.divf %221, %222 : vector<8x32xf32>
    %224 = vector.extract_strided_slice %204 {offsets = [0, 64], sizes = [8, 32], strides = [1, 1]} : vector<8x96xf32> to vector<8x32xf32>
    %225 = vector.extract_strided_slice %197 {offsets = [0, 64], sizes = [8, 32], strides = [1, 1]} : vector<8x96xf32> to vector<8x32xf32>
    %226 = arith.mulf %215, %225 : vector<8x32xf32>
    %227 = arith.addf %224, %226 : vector<8x32xf32>
    %228 = math.tanh %227 : vector<8x32xf32>
    %cst_94 = arith.constant 1.000000e+00 : f32
    %229 = vector.broadcast %cst_94 : f32 to vector<8x32xf32>
    %230 = arith.subf %229, %223 : vector<8x32xf32>
    %231 = arith.mulf %230, %228 : vector<8x32xf32>
    %232 = arith.mulf %223, %192 : vector<8x32xf32>
    %233 = arith.addf %231, %232 : vector<8x32xf32>
    %234 = vector.extract_strided_slice %207 {offsets = [0, 0], sizes = [8, 32], strides = [1, 1]} : vector<8x96xf32> to vector<8x32xf32>
    %235 = vector.extract_strided_slice %201 {offsets = [0, 0], sizes = [8, 32], strides = [1, 1]} : vector<8x96xf32> to vector<8x32xf32>
    %236 = arith.addf %234, %235 : vector<8x32xf32>
    %237 = arith.negf %236 : vector<8x32xf32>
    %238 = math.exp %237 : vector<8x32xf32>
    %cst_95 = arith.constant 1.000000e+00 : f32
    %239 = vector.broadcast %cst_95 : f32 to vector<8x32xf32>
    %240 = arith.addf %239, %238 : vector<8x32xf32>
    %241 = arith.divf %239, %240 : vector<8x32xf32>
    %242 = vector.extract_strided_slice %207 {offsets = [0, 32], sizes = [8, 32], strides = [1, 1]} : vector<8x96xf32> to vector<8x32xf32>
    %243 = vector.extract_strided_slice %201 {offsets = [0, 32], sizes = [8, 32], strides = [1, 1]} : vector<8x96xf32> to vector<8x32xf32>
    %244 = arith.addf %242, %243 : vector<8x32xf32>
    %245 = arith.negf %244 : vector<8x32xf32>
    %246 = math.exp %245 : vector<8x32xf32>
    %cst_96 = arith.constant 1.000000e+00 : f32
    %247 = vector.broadcast %cst_96 : f32 to vector<8x32xf32>
    %248 = arith.addf %247, %246 : vector<8x32xf32>
    %249 = arith.divf %247, %248 : vector<8x32xf32>
    %250 = vector.extract_strided_slice %207 {offsets = [0, 64], sizes = [8, 32], strides = [1, 1]} : vector<8x96xf32> to vector<8x32xf32>
    %251 = vector.extract_strided_slice %201 {offsets = [0, 64], sizes = [8, 32], strides = [1, 1]} : vector<8x96xf32> to vector<8x32xf32>
    %252 = arith.mulf %241, %251 : vector<8x32xf32>
    %253 = arith.addf %250, %252 : vector<8x32xf32>
    %254 = math.tanh %253 : vector<8x32xf32>
    %cst_97 = arith.constant 1.000000e+00 : f32
    %255 = vector.broadcast %cst_97 : f32 to vector<8x32xf32>
    %256 = arith.subf %255, %249 : vector<8x32xf32>
    %257 = arith.mulf %256, %254 : vector<8x32xf32>
    %258 = arith.mulf %249, %193 : vector<8x32xf32>
    %259 = arith.addf %257, %258 : vector<8x32xf32>
    %c0_98 = arith.constant 0 : index
    %c0_99 = arith.constant 0 : index
    %260 = vector.load %arg16[%c0_98, %c0_99] : memref<8x32xf32, #tpu.memory_space<vmem>>, vector<8x32xf32>
    tpu.vector_store %arg16[%c0_98, %c0_99], %233 {strides = array<i32>} : memref<8x32xf32, #tpu.memory_space<vmem>>, vector<8x32xf32>,
    %c0_100 = arith.constant 0 : index
    %c0_101 = arith.constant 0 : index
    %261 = vector.load %arg17[%c0_100, %c0_101] : memref<8x32xf32, #tpu.memory_space<vmem>>, vector<8x32xf32>
    tpu.vector_store %arg17[%c0_100, %c0_101], %259 {strides = array<i32>} : memref<8x32xf32, #tpu.memory_space<vmem>>, vector<8x32xf32>,
    %262 = arith.truncf %233 : vector<8x32xf32> to vector<8x32xbf16>
    %263 = arith.index_cast %c2_i32 : i32 to index
    %c0_102 = arith.constant 0 : index
    %c0_103 = arith.constant 0 : index
    %264 = vector.load %arg12[%263, %c0_102, %c0_103] : memref<8x8x32xbf16, #tpu.memory_space<vmem>>, vector<1x8x32xbf16>
    %265 = vector.shape_cast %264 : vector<1x8x32xbf16> to vector<8x32xbf16>
    %266 = vector.shape_cast %262 : vector<8x32xbf16> to vector<1x8x32xbf16>
    tpu.vector_store %arg12[%263, %c0_102, %c0_103], %266 {strides = array<i32>} : memref<8x8x32xbf16, #tpu.memory_space<vmem>>, vector<1x8x32xbf16>,
    %267 = arith.truncf %259 : vector<8x32xf32> to vector<8x32xbf16>
    %268 = arith.index_cast %191 : i32 to index
    %c0_104 = arith.constant 0 : index
    %c0_105 = arith.constant 0 : index
    %269 = vector.load %arg13[%268, %c0_104, %c0_105] : memref<8x8x32xbf16, #tpu.memory_space<vmem>>, vector<1x8x32xbf16>
    %270 = vector.shape_cast %269 : vector<1x8x32xbf16> to vector<8x32xbf16>
    %271 = vector.shape_cast %267 : vector<8x32xbf16> to vector<1x8x32xbf16>
    tpu.vector_store %arg13[%268, %c0_104, %c0_105], %271 {strides = array<i32>} : memref<8x8x32xbf16, #tpu.memory_space<vmem>>, vector<1x8x32xbf16>,
    %c3_i32 = arith.constant 3 : i32
    %c7_i32_106 = arith.constant 7 : i32
    %272 = arith.subi %c7_i32_106, %c3_i32 : i32
    %c0_107 = arith.constant 0 : index
    %c0_108 = arith.constant 0 : index
    %273 = vector.load %arg16[%c0_107, %c0_108] : memref<8x32xf32, #tpu.memory_space<vmem>>, vector<8x32xf32>
    %c0_109 = arith.constant 0 : index
    %c0_110 = arith.constant 0 : index
    %274 = vector.load %arg17[%c0_109, %c0_110] : memref<8x32xf32, #tpu.memory_space<vmem>>, vector<8x32xf32>
    %275 = arith.truncf %273 : vector<8x32xf32> to vector<8x32xbf16>
    %cst_111 = arith.constant dense<0.000000e+00> : vector<8x96xf32>
    %276 = tpu.matmul %275, %25, %cst_111 {dimension_numbers = #tpu.dot_dimension_numbers<[1], [0], [0], [1], [0, 0, 1, 1], [], []>} : vector<8x32xbf16>, vector<32x96xbf16>, vector<8x96xf32> -> vector<8x96xf32>
    %277 = vector.broadcast %27 : vector<1x96xf32> to vector<8x96xf32>
    %278 = arith.addf %276, %277 : vector<8x96xf32>
    %279 = arith.truncf %274 : vector<8x32xf32> to vector<8x32xbf16>
    %cst_112 = arith.constant dense<0.000000e+00> : vector<8x96xf32>
    %280 = tpu.matmul %279, %26, %cst_112 {dimension_numbers = #tpu.dot_dimension_numbers<[1], [0], [0], [1], [0, 0, 1, 1], [], []>} : vector<8x32xbf16>, vector<32x96xbf16>, vector<8x96xf32> -> vector<8x96xf32>
    %281 = vector.broadcast %28 : vector<1x96xf32> to vector<8x96xf32>
    %282 = arith.addf %280, %281 : vector<8x96xf32>
    %283 = arith.index_cast %c3_i32 : i32 to index
    %c0_113 = arith.constant 0 : index
    %c0_114 = arith.constant 0 : index
    %284 = vector.load %arg14[%283, %c0_113, %c0_114] : memref<8x8x96xf32, #tpu.memory_space<vmem>>, vector<1x8x96xf32>
    %285 = vector.shape_cast %284 : vector<1x8x96xf32> to vector<8x96xf32>
    %286 = arith.index_cast %272 : i32 to index
    %c0_115 = arith.constant 0 : index
    %c0_116 = arith.constant 0 : index
    %287 = vector.load %arg15[%286, %c0_115, %c0_116] : memref<8x8x96xf32, #tpu.memory_space<vmem>>, vector<1x8x96xf32>
    %288 = vector.shape_cast %287 : vector<1x8x96xf32> to vector<8x96xf32>
    %289 = vector.extract_strided_slice %285 {offsets = [0, 0], sizes = [8, 32], strides = [1, 1]} : vector<8x96xf32> to vector<8x32xf32>
    %290 = vector.extract_strided_slice %278 {offsets = [0, 0], sizes = [8, 32], strides = [1, 1]} : vector<8x96xf32> to vector<8x32xf32>
    %291 = arith.addf %289, %290 : vector<8x32xf32>
    %292 = arith.negf %291 : vector<8x32xf32>
    %293 = math.exp %292 : vector<8x32xf32>
    %cst_117 = arith.constant 1.000000e+00 : f32
    %294 = vector.broadcast %cst_117 : f32 to vector<8x32xf32>
    %295 = arith.addf %294, %293 : vector<8x32xf32>
    %296 = arith.divf %294, %295 : vector<8x32xf32>
    %297 = vector.extract_strided_slice %285 {offsets = [0, 32], sizes = [8, 32], strides = [1, 1]} : vector<8x96xf32> to vector<8x32xf32>
    %298 = vector.extract_strided_slice %278 {offsets = [0, 32], sizes = [8, 32], strides = [1, 1]} : vector<8x96xf32> to vector<8x32xf32>
    %299 = arith.addf %297, %298 : vector<8x32xf32>
    %300 = arith.negf %299 : vector<8x32xf32>
    %301 = math.exp %300 : vector<8x32xf32>
    %cst_118 = arith.constant 1.000000e+00 : f32
    %302 = vector.broadcast %cst_118 : f32 to vector<8x32xf32>
    %303 = arith.addf %302, %301 : vector<8x32xf32>
    %304 = arith.divf %302, %303 : vector<8x32xf32>
    %305 = vector.extract_strided_slice %285 {offsets = [0, 64], sizes = [8, 32], strides = [1, 1]} : vector<8x96xf32> to vector<8x32xf32>
    %306 = vector.extract_strided_slice %278 {offsets = [0, 64], sizes = [8, 32], strides = [1, 1]} : vector<8x96xf32> to vector<8x32xf32>
    %307 = arith.mulf %296, %306 : vector<8x32xf32>
    %308 = arith.addf %305, %307 : vector<8x32xf32>
    %309 = math.tanh %308 : vector<8x32xf32>
    %cst_119 = arith.constant 1.000000e+00 : f32
    %310 = vector.broadcast %cst_119 : f32 to vector<8x32xf32>
    %311 = arith.subf %310, %304 : vector<8x32xf32>
    %312 = arith.mulf %311, %309 : vector<8x32xf32>
    %313 = arith.mulf %304, %273 : vector<8x32xf32>
    %314 = arith.addf %312, %313 : vector<8x32xf32>
    %315 = vector.extract_strided_slice %288 {offsets = [0, 0], sizes = [8, 32], strides = [1, 1]} : vector<8x96xf32> to vector<8x32xf32>
    %316 = vector.extract_strided_slice %282 {offsets = [0, 0], sizes = [8, 32], strides = [1, 1]} : vector<8x96xf32> to vector<8x32xf32>
    %317 = arith.addf %315, %316 : vector<8x32xf32>
    %318 = arith.negf %317 : vector<8x32xf32>
    %319 = math.exp %318 : vector<8x32xf32>
    %cst_120 = arith.constant 1.000000e+00 : f32
    %320 = vector.broadcast %cst_120 : f32 to vector<8x32xf32>
    %321 = arith.addf %320, %319 : vector<8x32xf32>
    %322 = arith.divf %320, %321 : vector<8x32xf32>
    %323 = vector.extract_strided_slice %288 {offsets = [0, 32], sizes = [8, 32], strides = [1, 1]} : vector<8x96xf32> to vector<8x32xf32>
    %324 = vector.extract_strided_slice %282 {offsets = [0, 32], sizes = [8, 32], strides = [1, 1]} : vector<8x96xf32> to vector<8x32xf32>
    %325 = arith.addf %323, %324 : vector<8x32xf32>
    %326 = arith.negf %325 : vector<8x32xf32>
    %327 = math.exp %326 : vector<8x32xf32>
    %cst_121 = arith.constant 1.000000e+00 : f32
    %328 = vector.broadcast %cst_121 : f32 to vector<8x32xf32>
    %329 = arith.addf %328, %327 : vector<8x32xf32>
    %330 = arith.divf %328, %329 : vector<8x32xf32>
    %331 = vector.extract_strided_slice %288 {offsets = [0, 64], sizes = [8, 32], strides = [1, 1]} : vector<8x96xf32> to vector<8x32xf32>
    %332 = vector.extract_strided_slice %282 {offsets = [0, 64], sizes = [8, 32], strides = [1, 1]} : vector<8x96xf32> to vector<8x32xf32>
    %333 = arith.mulf %322, %332 : vector<8x32xf32>
    %334 = arith.addf %331, %333 : vector<8x32xf32>
    %335 = math.tanh %334 : vector<8x32xf32>
    %cst_122 = arith.constant 1.000000e+00 : f32
    %336 = vector.broadcast %cst_122 : f32 to vector<8x32xf32>
    %337 = arith.subf %336, %330 : vector<8x32xf32>
    %338 = arith.mulf %337, %335 : vector<8x32xf32>
    %339 = arith.mulf %330, %274 : vector<8x32xf32>
    %340 = arith.addf %338, %339 : vector<8x32xf32>
    %c0_123 = arith.constant 0 : index
    %c0_124 = arith.constant 0 : index
    %341 = vector.load %arg16[%c0_123, %c0_124] : memref<8x32xf32, #tpu.memory_space<vmem>>, vector<8x32xf32>
    tpu.vector_store %arg16[%c0_123, %c0_124], %314 {strides = array<i32>} : memref<8x32xf32, #tpu.memory_space<vmem>>, vector<8x32xf32>,
    %c0_125 = arith.constant 0 : index
    %c0_126 = arith.constant 0 : index
    %342 = vector.load %arg17[%c0_125, %c0_126] : memref<8x32xf32, #tpu.memory_space<vmem>>, vector<8x32xf32>
    tpu.vector_store %arg17[%c0_125, %c0_126], %340 {strides = array<i32>} : memref<8x32xf32, #tpu.memory_space<vmem>>, vector<8x32xf32>,
    %343 = arith.truncf %314 : vector<8x32xf32> to vector<8x32xbf16>
    %344 = arith.index_cast %c3_i32 : i32 to index
    %c0_127 = arith.constant 0 : index
    %c0_128 = arith.constant 0 : index
    %345 = vector.load %arg12[%344, %c0_127, %c0_128] : memref<8x8x32xbf16, #tpu.memory_space<vmem>>, vector<1x8x32xbf16>
    %346 = vector.shape_cast %345 : vector<1x8x32xbf16> to vector<8x32xbf16>
    %347 = vector.shape_cast %343 : vector<8x32xbf16> to vector<1x8x32xbf16>
    tpu.vector_store %arg12[%344, %c0_127, %c0_128], %347 {strides = array<i32>} : memref<8x8x32xbf16, #tpu.memory_space<vmem>>, vector<1x8x32xbf16>,
    %348 = arith.truncf %340 : vector<8x32xf32> to vector<8x32xbf16>
    %349 = arith.index_cast %272 : i32 to index
    %c0_129 = arith.constant 0 : index
    %c0_130 = arith.constant 0 : index
    %350 = vector.load %arg13[%349, %c0_129, %c0_130] : memref<8x8x32xbf16, #tpu.memory_space<vmem>>, vector<1x8x32xbf16>
    %351 = vector.shape_cast %350 : vector<1x8x32xbf16> to vector<8x32xbf16>
    %352 = vector.shape_cast %348 : vector<8x32xbf16> to vector<1x8x32xbf16>
    tpu.vector_store %arg13[%349, %c0_129, %c0_130], %352 {strides = array<i32>} : memref<8x8x32xbf16, #tpu.memory_space<vmem>>, vector<1x8x32xbf16>,
    %c4_i32 = arith.constant 4 : i32
    %c7_i32_131 = arith.constant 7 : i32
    %353 = arith.subi %c7_i32_131, %c4_i32 : i32
    %c0_132 = arith.constant 0 : index
    %c0_133 = arith.constant 0 : index
    %354 = vector.load %arg16[%c0_132, %c0_133] : memref<8x32xf32, #tpu.memory_space<vmem>>, vector<8x32xf32>
    %c0_134 = arith.constant 0 : index
    %c0_135 = arith.constant 0 : index
    %355 = vector.load %arg17[%c0_134, %c0_135] : memref<8x32xf32, #tpu.memory_space<vmem>>, vector<8x32xf32>
    %356 = arith.truncf %354 : vector<8x32xf32> to vector<8x32xbf16>
    %cst_136 = arith.constant dense<0.000000e+00> : vector<8x96xf32>
    %357 = tpu.matmul %356, %25, %cst_136 {dimension_numbers = #tpu.dot_dimension_numbers<[1], [0], [0], [1], [0, 0, 1, 1], [], []>} : vector<8x32xbf16>, vector<32x96xbf16>, vector<8x96xf32> -> vector<8x96xf32>
    %358 = vector.broadcast %27 : vector<1x96xf32> to vector<8x96xf32>
    %359 = arith.addf %357, %358 : vector<8x96xf32>
    %360 = arith.truncf %355 : vector<8x32xf32> to vector<8x32xbf16>
    %cst_137 = arith.constant dense<0.000000e+00> : vector<8x96xf32>
    %361 = tpu.matmul %360, %26, %cst_137 {dimension_numbers = #tpu.dot_dimension_numbers<[1], [0], [0], [1], [0, 0, 1, 1], [], []>} : vector<8x32xbf16>, vector<32x96xbf16>, vector<8x96xf32> -> vector<8x96xf32>
    %362 = vector.broadcast %28 : vector<1x96xf32> to vector<8x96xf32>
    %363 = arith.addf %361, %362 : vector<8x96xf32>
    %364 = arith.index_cast %c4_i32 : i32 to index
    %c0_138 = arith.constant 0 : index
    %c0_139 = arith.constant 0 : index
    %365 = vector.load %arg14[%364, %c0_138, %c0_139] : memref<8x8x96xf32, #tpu.memory_space<vmem>>, vector<1x8x96xf32>
    %366 = vector.shape_cast %365 : vector<1x8x96xf32> to vector<8x96xf32>
    %367 = arith.index_cast %353 : i32 to index
    %c0_140 = arith.constant 0 : index
    %c0_141 = arith.constant 0 : index
    %368 = vector.load %arg15[%367, %c0_140, %c0_141] : memref<8x8x96xf32, #tpu.memory_space<vmem>>, vector<1x8x96xf32>
    %369 = vector.shape_cast %368 : vector<1x8x96xf32> to vector<8x96xf32>
    %370 = vector.extract_strided_slice %366 {offsets = [0, 0], sizes = [8, 32], strides = [1, 1]} : vector<8x96xf32> to vector<8x32xf32>
    %371 = vector.extract_strided_slice %359 {offsets = [0, 0], sizes = [8, 32], strides = [1, 1]} : vector<8x96xf32> to vector<8x32xf32>
    %372 = arith.addf %370, %371 : vector<8x32xf32>
    %373 = arith.negf %372 : vector<8x32xf32>
    %374 = math.exp %373 : vector<8x32xf32>
    %cst_142 = arith.constant 1.000000e+00 : f32
    %375 = vector.broadcast %cst_142 : f32 to vector<8x32xf32>
    %376 = arith.addf %375, %374 : vector<8x32xf32>
    %377 = arith.divf %375, %376 : vector<8x32xf32>
    %378 = vector.extract_strided_slice %366 {offsets = [0, 32], sizes = [8, 32], strides = [1, 1]} : vector<8x96xf32> to vector<8x32xf32>
    %379 = vector.extract_strided_slice %359 {offsets = [0, 32], sizes = [8, 32], strides = [1, 1]} : vector<8x96xf32> to vector<8x32xf32>
    %380 = arith.addf %378, %379 : vector<8x32xf32>
    %381 = arith.negf %380 : vector<8x32xf32>
    %382 = math.exp %381 : vector<8x32xf32>
    %cst_143 = arith.constant 1.000000e+00 : f32
    %383 = vector.broadcast %cst_143 : f32 to vector<8x32xf32>
    %384 = arith.addf %383, %382 : vector<8x32xf32>
    %385 = arith.divf %383, %384 : vector<8x32xf32>
    %386 = vector.extract_strided_slice %366 {offsets = [0, 64], sizes = [8, 32], strides = [1, 1]} : vector<8x96xf32> to vector<8x32xf32>
    %387 = vector.extract_strided_slice %359 {offsets = [0, 64], sizes = [8, 32], strides = [1, 1]} : vector<8x96xf32> to vector<8x32xf32>
    %388 = arith.mulf %377, %387 : vector<8x32xf32>
    %389 = arith.addf %386, %388 : vector<8x32xf32>
    %390 = math.tanh %389 : vector<8x32xf32>
    %cst_144 = arith.constant 1.000000e+00 : f32
    %391 = vector.broadcast %cst_144 : f32 to vector<8x32xf32>
    %392 = arith.subf %391, %385 : vector<8x32xf32>
    %393 = arith.mulf %392, %390 : vector<8x32xf32>
    %394 = arith.mulf %385, %354 : vector<8x32xf32>
    %395 = arith.addf %393, %394 : vector<8x32xf32>
    %396 = vector.extract_strided_slice %369 {offsets = [0, 0], sizes = [8, 32], strides = [1, 1]} : vector<8x96xf32> to vector<8x32xf32>
    %397 = vector.extract_strided_slice %363 {offsets = [0, 0], sizes = [8, 32], strides = [1, 1]} : vector<8x96xf32> to vector<8x32xf32>
    %398 = arith.addf %396, %397 : vector<8x32xf32>
    %399 = arith.negf %398 : vector<8x32xf32>
    %400 = math.exp %399 : vector<8x32xf32>
    %cst_145 = arith.constant 1.000000e+00 : f32
    %401 = vector.broadcast %cst_145 : f32 to vector<8x32xf32>
    %402 = arith.addf %401, %400 : vector<8x32xf32>
    %403 = arith.divf %401, %402 : vector<8x32xf32>
    %404 = vector.extract_strided_slice %369 {offsets = [0, 32], sizes = [8, 32], strides = [1, 1]} : vector<8x96xf32> to vector<8x32xf32>
    %405 = vector.extract_strided_slice %363 {offsets = [0, 32], sizes = [8, 32], strides = [1, 1]} : vector<8x96xf32> to vector<8x32xf32>
    %406 = arith.addf %404, %405 : vector<8x32xf32>
    %407 = arith.negf %406 : vector<8x32xf32>
    %408 = math.exp %407 : vector<8x32xf32>
    %cst_146 = arith.constant 1.000000e+00 : f32
    %409 = vector.broadcast %cst_146 : f32 to vector<8x32xf32>
    %410 = arith.addf %409, %408 : vector<8x32xf32>
    %411 = arith.divf %409, %410 : vector<8x32xf32>
    %412 = vector.extract_strided_slice %369 {offsets = [0, 64], sizes = [8, 32], strides = [1, 1]} : vector<8x96xf32> to vector<8x32xf32>
    %413 = vector.extract_strided_slice %363 {offsets = [0, 64], sizes = [8, 32], strides = [1, 1]} : vector<8x96xf32> to vector<8x32xf32>
    %414 = arith.mulf %403, %413 : vector<8x32xf32>
    %415 = arith.addf %412, %414 : vector<8x32xf32>
    %416 = math.tanh %415 : vector<8x32xf32>
    %cst_147 = arith.constant 1.000000e+00 : f32
    %417 = vector.broadcast %cst_147 : f32 to vector<8x32xf32>
    %418 = arith.subf %417, %411 : vector<8x32xf32>
    %419 = arith.mulf %418, %416 : vector<8x32xf32>
    %420 = arith.mulf %411, %355 : vector<8x32xf32>
    %421 = arith.addf %419, %420 : vector<8x32xf32>
    %c0_148 = arith.constant 0 : index
    %c0_149 = arith.constant 0 : index
    %422 = vector.load %arg16[%c0_148, %c0_149] : memref<8x32xf32, #tpu.memory_space<vmem>>, vector<8x32xf32>
    tpu.vector_store %arg16[%c0_148, %c0_149], %395 {strides = array<i32>} : memref<8x32xf32, #tpu.memory_space<vmem>>, vector<8x32xf32>,
    %c0_150 = arith.constant 0 : index
    %c0_151 = arith.constant 0 : index
    %423 = vector.load %arg17[%c0_150, %c0_151] : memref<8x32xf32, #tpu.memory_space<vmem>>, vector<8x32xf32>
    tpu.vector_store %arg17[%c0_150, %c0_151], %421 {strides = array<i32>} : memref<8x32xf32, #tpu.memory_space<vmem>>, vector<8x32xf32>,
    %424 = arith.truncf %395 : vector<8x32xf32> to vector<8x32xbf16>
    %425 = arith.index_cast %c4_i32 : i32 to index
    %c0_152 = arith.constant 0 : index
    %c0_153 = arith.constant 0 : index
    %426 = vector.load %arg12[%425, %c0_152, %c0_153] : memref<8x8x32xbf16, #tpu.memory_space<vmem>>, vector<1x8x32xbf16>
    %427 = vector.shape_cast %426 : vector<1x8x32xbf16> to vector<8x32xbf16>
    %428 = vector.shape_cast %424 : vector<8x32xbf16> to vector<1x8x32xbf16>
    tpu.vector_store %arg12[%425, %c0_152, %c0_153], %428 {strides = array<i32>} : memref<8x8x32xbf16, #tpu.memory_space<vmem>>, vector<1x8x32xbf16>,
    %429 = arith.truncf %421 : vector<8x32xf32> to vector<8x32xbf16>
    %430 = arith.index_cast %353 : i32 to index
    %c0_154 = arith.constant 0 : index
    %c0_155 = arith.constant 0 : index
    %431 = vector.load %arg13[%430, %c0_154, %c0_155] : memref<8x8x32xbf16, #tpu.memory_space<vmem>>, vector<1x8x32xbf16>
    %432 = vector.shape_cast %431 : vector<1x8x32xbf16> to vector<8x32xbf16>
    %433 = vector.shape_cast %429 : vector<8x32xbf16> to vector<1x8x32xbf16>
    tpu.vector_store %arg13[%430, %c0_154, %c0_155], %433 {strides = array<i32>} : memref<8x8x32xbf16, #tpu.memory_space<vmem>>, vector<1x8x32xbf16>,
    %c5_i32 = arith.constant 5 : i32
    %c7_i32_156 = arith.constant 7 : i32
    %434 = arith.subi %c7_i32_156, %c5_i32 : i32
    %c0_157 = arith.constant 0 : index
    %c0_158 = arith.constant 0 : index
    %435 = vector.load %arg16[%c0_157, %c0_158] : memref<8x32xf32, #tpu.memory_space<vmem>>, vector<8x32xf32>
    %c0_159 = arith.constant 0 : index
    %c0_160 = arith.constant 0 : index
    %436 = vector.load %arg17[%c0_159, %c0_160] : memref<8x32xf32, #tpu.memory_space<vmem>>, vector<8x32xf32>
    %437 = arith.truncf %435 : vector<8x32xf32> to vector<8x32xbf16>
    %cst_161 = arith.constant dense<0.000000e+00> : vector<8x96xf32>
    %438 = tpu.matmul %437, %25, %cst_161 {dimension_numbers = #tpu.dot_dimension_numbers<[1], [0], [0], [1], [0, 0, 1, 1], [], []>} : vector<8x32xbf16>, vector<32x96xbf16>, vector<8x96xf32> -> vector<8x96xf32>
    %439 = vector.broadcast %27 : vector<1x96xf32> to vector<8x96xf32>
    %440 = arith.addf %438, %439 : vector<8x96xf32>
    %441 = arith.truncf %436 : vector<8x32xf32> to vector<8x32xbf16>
    %cst_162 = arith.constant dense<0.000000e+00> : vector<8x96xf32>
    %442 = tpu.matmul %441, %26, %cst_162 {dimension_numbers = #tpu.dot_dimension_numbers<[1], [0], [0], [1], [0, 0, 1, 1], [], []>} : vector<8x32xbf16>, vector<32x96xbf16>, vector<8x96xf32> -> vector<8x96xf32>
    %443 = vector.broadcast %28 : vector<1x96xf32> to vector<8x96xf32>
    %444 = arith.addf %442, %443 : vector<8x96xf32>
    %445 = arith.index_cast %c5_i32 : i32 to index
    %c0_163 = arith.constant 0 : index
    %c0_164 = arith.constant 0 : index
    %446 = vector.load %arg14[%445, %c0_163, %c0_164] : memref<8x8x96xf32, #tpu.memory_space<vmem>>, vector<1x8x96xf32>
    %447 = vector.shape_cast %446 : vector<1x8x96xf32> to vector<8x96xf32>
    %448 = arith.index_cast %434 : i32 to index
    %c0_165 = arith.constant 0 : index
    %c0_166 = arith.constant 0 : index
    %449 = vector.load %arg15[%448, %c0_165, %c0_166] : memref<8x8x96xf32, #tpu.memory_space<vmem>>, vector<1x8x96xf32>
    %450 = vector.shape_cast %449 : vector<1x8x96xf32> to vector<8x96xf32>
    %451 = vector.extract_strided_slice %447 {offsets = [0, 0], sizes = [8, 32], strides = [1, 1]} : vector<8x96xf32> to vector<8x32xf32>
    %452 = vector.extract_strided_slice %440 {offsets = [0, 0], sizes = [8, 32], strides = [1, 1]} : vector<8x96xf32> to vector<8x32xf32>
    %453 = arith.addf %451, %452 : vector<8x32xf32>
    %454 = arith.negf %453 : vector<8x32xf32>
    %455 = math.exp %454 : vector<8x32xf32>
    %cst_167 = arith.constant 1.000000e+00 : f32
    %456 = vector.broadcast %cst_167 : f32 to vector<8x32xf32>
    %457 = arith.addf %456, %455 : vector<8x32xf32>
    %458 = arith.divf %456, %457 : vector<8x32xf32>
    %459 = vector.extract_strided_slice %447 {offsets = [0, 32], sizes = [8, 32], strides = [1, 1]} : vector<8x96xf32> to vector<8x32xf32>
    %460 = vector.extract_strided_slice %440 {offsets = [0, 32], sizes = [8, 32], strides = [1, 1]} : vector<8x96xf32> to vector<8x32xf32>
    %461 = arith.addf %459, %460 : vector<8x32xf32>
    %462 = arith.negf %461 : vector<8x32xf32>
    %463 = math.exp %462 : vector<8x32xf32>
    %cst_168 = arith.constant 1.000000e+00 : f32
    %464 = vector.broadcast %cst_168 : f32 to vector<8x32xf32>
    %465 = arith.addf %464, %463 : vector<8x32xf32>
    %466 = arith.divf %464, %465 : vector<8x32xf32>
    %467 = vector.extract_strided_slice %447 {offsets = [0, 64], sizes = [8, 32], strides = [1, 1]} : vector<8x96xf32> to vector<8x32xf32>
    %468 = vector.extract_strided_slice %440 {offsets = [0, 64], sizes = [8, 32], strides = [1, 1]} : vector<8x96xf32> to vector<8x32xf32>
    %469 = arith.mulf %458, %468 : vector<8x32xf32>
    %470 = arith.addf %467, %469 : vector<8x32xf32>
    %471 = math.tanh %470 : vector<8x32xf32>
    %cst_169 = arith.constant 1.000000e+00 : f32
    %472 = vector.broadcast %cst_169 : f32 to vector<8x32xf32>
    %473 = arith.subf %472, %466 : vector<8x32xf32>
    %474 = arith.mulf %473, %471 : vector<8x32xf32>
    %475 = arith.mulf %466, %435 : vector<8x32xf32>
    %476 = arith.addf %474, %475 : vector<8x32xf32>
    %477 = vector.extract_strided_slice %450 {offsets = [0, 0], sizes = [8, 32], strides = [1, 1]} : vector<8x96xf32> to vector<8x32xf32>
    %478 = vector.extract_strided_slice %444 {offsets = [0, 0], sizes = [8, 32], strides = [1, 1]} : vector<8x96xf32> to vector<8x32xf32>
    %479 = arith.addf %477, %478 : vector<8x32xf32>
    %480 = arith.negf %479 : vector<8x32xf32>
    %481 = math.exp %480 : vector<8x32xf32>
    %cst_170 = arith.constant 1.000000e+00 : f32
    %482 = vector.broadcast %cst_170 : f32 to vector<8x32xf32>
    %483 = arith.addf %482, %481 : vector<8x32xf32>
    %484 = arith.divf %482, %483 : vector<8x32xf32>
    %485 = vector.extract_strided_slice %450 {offsets = [0, 32], sizes = [8, 32], strides = [1, 1]} : vector<8x96xf32> to vector<8x32xf32>
    %486 = vector.extract_strided_slice %444 {offsets = [0, 32], sizes = [8, 32], strides = [1, 1]} : vector<8x96xf32> to vector<8x32xf32>
    %487 = arith.addf %485, %486 : vector<8x32xf32>
    %488 = arith.negf %487 : vector<8x32xf32>
    %489 = math.exp %488 : vector<8x32xf32>
    %cst_171 = arith.constant 1.000000e+00 : f32
    %490 = vector.broadcast %cst_171 : f32 to vector<8x32xf32>
    %491 = arith.addf %490, %489 : vector<8x32xf32>
    %492 = arith.divf %490, %491 : vector<8x32xf32>
    %493 = vector.extract_strided_slice %450 {offsets = [0, 64], sizes = [8, 32], strides = [1, 1]} : vector<8x96xf32> to vector<8x32xf32>
    %494 = vector.extract_strided_slice %444 {offsets = [0, 64], sizes = [8, 32], strides = [1, 1]} : vector<8x96xf32> to vector<8x32xf32>
    %495 = arith.mulf %484, %494 : vector<8x32xf32>
    %496 = arith.addf %493, %495 : vector<8x32xf32>
    %497 = math.tanh %496 : vector<8x32xf32>
    %cst_172 = arith.constant 1.000000e+00 : f32
    %498 = vector.broadcast %cst_172 : f32 to vector<8x32xf32>
    %499 = arith.subf %498, %492 : vector<8x32xf32>
    %500 = arith.mulf %499, %497 : vector<8x32xf32>
    %501 = arith.mulf %492, %436 : vector<8x32xf32>
    %502 = arith.addf %500, %501 : vector<8x32xf32>
    %c0_173 = arith.constant 0 : index
    %c0_174 = arith.constant 0 : index
    %503 = vector.load %arg16[%c0_173, %c0_174] : memref<8x32xf32, #tpu.memory_space<vmem>>, vector<8x32xf32>
    tpu.vector_store %arg16[%c0_173, %c0_174], %476 {strides = array<i32>} : memref<8x32xf32, #tpu.memory_space<vmem>>, vector<8x32xf32>,
    %c0_175 = arith.constant 0 : index
    %c0_176 = arith.constant 0 : index
    %504 = vector.load %arg17[%c0_175, %c0_176] : memref<8x32xf32, #tpu.memory_space<vmem>>, vector<8x32xf32>
    tpu.vector_store %arg17[%c0_175, %c0_176], %502 {strides = array<i32>} : memref<8x32xf32, #tpu.memory_space<vmem>>, vector<8x32xf32>,
    %505 = arith.truncf %476 : vector<8x32xf32> to vector<8x32xbf16>
    %506 = arith.index_cast %c5_i32 : i32 to index
    %c0_177 = arith.constant 0 : index
    %c0_178 = arith.constant 0 : index
    %507 = vector.load %arg12[%506, %c0_177, %c0_178] : memref<8x8x32xbf16, #tpu.memory_space<vmem>>, vector<1x8x32xbf16>
    %508 = vector.shape_cast %507 : vector<1x8x32xbf16> to vector<8x32xbf16>
    %509 = vector.shape_cast %505 : vector<8x32xbf16> to vector<1x8x32xbf16>
    tpu.vector_store %arg12[%506, %c0_177, %c0_178], %509 {strides = array<i32>} : memref<8x8x32xbf16, #tpu.memory_space<vmem>>, vector<1x8x32xbf16>,
    %510 = arith.truncf %502 : vector<8x32xf32> to vector<8x32xbf16>
    %511 = arith.index_cast %434 : i32 to index
    %c0_179 = arith.constant 0 : index
    %c0_180 = arith.constant 0 : index
    %512 = vector.load %arg13[%511, %c0_179, %c0_180] : memref<8x8x32xbf16, #tpu.memory_space<vmem>>, vector<1x8x32xbf16>
    %513 = vector.shape_cast %512 : vector<1x8x32xbf16> to vector<8x32xbf16>
    %514 = vector.shape_cast %510 : vector<8x32xbf16> to vector<1x8x32xbf16>
    tpu.vector_store %arg13[%511, %c0_179, %c0_180], %514 {strides = array<i32>} : memref<8x8x32xbf16, #tpu.memory_space<vmem>>, vector<1x8x32xbf16>,
    %c6_i32 = arith.constant 6 : i32
    %c7_i32_181 = arith.constant 7 : i32
    %515 = arith.subi %c7_i32_181, %c6_i32 : i32
    %c0_182 = arith.constant 0 : index
    %c0_183 = arith.constant 0 : index
    %516 = vector.load %arg16[%c0_182, %c0_183] : memref<8x32xf32, #tpu.memory_space<vmem>>, vector<8x32xf32>
    %c0_184 = arith.constant 0 : index
    %c0_185 = arith.constant 0 : index
    %517 = vector.load %arg17[%c0_184, %c0_185] : memref<8x32xf32, #tpu.memory_space<vmem>>, vector<8x32xf32>
    %518 = arith.truncf %516 : vector<8x32xf32> to vector<8x32xbf16>
    %cst_186 = arith.constant dense<0.000000e+00> : vector<8x96xf32>
    %519 = tpu.matmul %518, %25, %cst_186 {dimension_numbers = #tpu.dot_dimension_numbers<[1], [0], [0], [1], [0, 0, 1, 1], [], []>} : vector<8x32xbf16>, vector<32x96xbf16>, vector<8x96xf32> -> vector<8x96xf32>
    %520 = vector.broadcast %27 : vector<1x96xf32> to vector<8x96xf32>
    %521 = arith.addf %519, %520 : vector<8x96xf32>
    %522 = arith.truncf %517 : vector<8x32xf32> to vector<8x32xbf16>
    %cst_187 = arith.constant dense<0.000000e+00> : vector<8x96xf32>
    %523 = tpu.matmul %522, %26, %cst_187 {dimension_numbers = #tpu.dot_dimension_numbers<[1], [0], [0], [1], [0, 0, 1, 1], [], []>} : vector<8x32xbf16>, vector<32x96xbf16>, vector<8x96xf32> -> vector<8x96xf32>
    %524 = vector.broadcast %28 : vector<1x96xf32> to vector<8x96xf32>
    %525 = arith.addf %523, %524 : vector<8x96xf32>
    %526 = arith.index_cast %c6_i32 : i32 to index
    %c0_188 = arith.constant 0 : index
    %c0_189 = arith.constant 0 : index
    %527 = vector.load %arg14[%526, %c0_188, %c0_189] : memref<8x8x96xf32, #tpu.memory_space<vmem>>, vector<1x8x96xf32>
    %528 = vector.shape_cast %527 : vector<1x8x96xf32> to vector<8x96xf32>
    %529 = arith.index_cast %515 : i32 to index
    %c0_190 = arith.constant 0 : index
    %c0_191 = arith.constant 0 : index
    %530 = vector.load %arg15[%529, %c0_190, %c0_191] : memref<8x8x96xf32, #tpu.memory_space<vmem>>, vector<1x8x96xf32>
    %531 = vector.shape_cast %530 : vector<1x8x96xf32> to vector<8x96xf32>
    %532 = vector.extract_strided_slice %528 {offsets = [0, 0], sizes = [8, 32], strides = [1, 1]} : vector<8x96xf32> to vector<8x32xf32>
    %533 = vector.extract_strided_slice %521 {offsets = [0, 0], sizes = [8, 32], strides = [1, 1]} : vector<8x96xf32> to vector<8x32xf32>
    %534 = arith.addf %532, %533 : vector<8x32xf32>
    %535 = arith.negf %534 : vector<8x32xf32>
    %536 = math.exp %535 : vector<8x32xf32>
    %cst_192 = arith.constant 1.000000e+00 : f32
    %537 = vector.broadcast %cst_192 : f32 to vector<8x32xf32>
    %538 = arith.addf %537, %536 : vector<8x32xf32>
    %539 = arith.divf %537, %538 : vector<8x32xf32>
    %540 = vector.extract_strided_slice %528 {offsets = [0, 32], sizes = [8, 32], strides = [1, 1]} : vector<8x96xf32> to vector<8x32xf32>
    %541 = vector.extract_strided_slice %521 {offsets = [0, 32], sizes = [8, 32], strides = [1, 1]} : vector<8x96xf32> to vector<8x32xf32>
    %542 = arith.addf %540, %541 : vector<8x32xf32>
    %543 = arith.negf %542 : vector<8x32xf32>
    %544 = math.exp %543 : vector<8x32xf32>
    %cst_193 = arith.constant 1.000000e+00 : f32
    %545 = vector.broadcast %cst_193 : f32 to vector<8x32xf32>
    %546 = arith.addf %545, %544 : vector<8x32xf32>
    %547 = arith.divf %545, %546 : vector<8x32xf32>
    %548 = vector.extract_strided_slice %528 {offsets = [0, 64], sizes = [8, 32], strides = [1, 1]} : vector<8x96xf32> to vector<8x32xf32>
    %549 = vector.extract_strided_slice %521 {offsets = [0, 64], sizes = [8, 32], strides = [1, 1]} : vector<8x96xf32> to vector<8x32xf32>
    %550 = arith.mulf %539, %549 : vector<8x32xf32>
    %551 = arith.addf %548, %550 : vector<8x32xf32>
    %552 = math.tanh %551 : vector<8x32xf32>
    %cst_194 = arith.constant 1.000000e+00 : f32
    %553 = vector.broadcast %cst_194 : f32 to vector<8x32xf32>
    %554 = arith.subf %553, %547 : vector<8x32xf32>
    %555 = arith.mulf %554, %552 : vector<8x32xf32>
    %556 = arith.mulf %547, %516 : vector<8x32xf32>
    %557 = arith.addf %555, %556 : vector<8x32xf32>
    %558 = vector.extract_strided_slice %531 {offsets = [0, 0], sizes = [8, 32], strides = [1, 1]} : vector<8x96xf32> to vector<8x32xf32>
    %559 = vector.extract_strided_slice %525 {offsets = [0, 0], sizes = [8, 32], strides = [1, 1]} : vector<8x96xf32> to vector<8x32xf32>
    %560 = arith.addf %558, %559 : vector<8x32xf32>
    %561 = arith.negf %560 : vector<8x32xf32>
    %562 = math.exp %561 : vector<8x32xf32>
    %cst_195 = arith.constant 1.000000e+00 : f32
    %563 = vector.broadcast %cst_195 : f32 to vector<8x32xf32>
    %564 = arith.addf %563, %562 : vector<8x32xf32>
    %565 = arith.divf %563, %564 : vector<8x32xf32>
    %566 = vector.extract_strided_slice %531 {offsets = [0, 32], sizes = [8, 32], strides = [1, 1]} : vector<8x96xf32> to vector<8x32xf32>
    %567 = vector.extract_strided_slice %525 {offsets = [0, 32], sizes = [8, 32], strides = [1, 1]} : vector<8x96xf32> to vector<8x32xf32>
    %568 = arith.addf %566, %567 : vector<8x32xf32>
    %569 = arith.negf %568 : vector<8x32xf32>
    %570 = math.exp %569 : vector<8x32xf32>
    %cst_196 = arith.constant 1.000000e+00 : f32
    %571 = vector.broadcast %cst_196 : f32 to vector<8x32xf32>
    %572 = arith.addf %571, %570 : vector<8x32xf32>
    %573 = arith.divf %571, %572 : vector<8x32xf32>
    %574 = vector.extract_strided_slice %531 {offsets = [0, 64], sizes = [8, 32], strides = [1, 1]} : vector<8x96xf32> to vector<8x32xf32>
    %575 = vector.extract_strided_slice %525 {offsets = [0, 64], sizes = [8, 32], strides = [1, 1]} : vector<8x96xf32> to vector<8x32xf32>
    %576 = arith.mulf %565, %575 : vector<8x32xf32>
    %577 = arith.addf %574, %576 : vector<8x32xf32>
    %578 = math.tanh %577 : vector<8x32xf32>
    %cst_197 = arith.constant 1.000000e+00 : f32
    %579 = vector.broadcast %cst_197 : f32 to vector<8x32xf32>
    %580 = arith.subf %579, %573 : vector<8x32xf32>
    %581 = arith.mulf %580, %578 : vector<8x32xf32>
    %582 = arith.mulf %573, %517 : vector<8x32xf32>
    %583 = arith.addf %581, %582 : vector<8x32xf32>
    %c0_198 = arith.constant 0 : index
    %c0_199 = arith.constant 0 : index
    %584 = vector.load %arg16[%c0_198, %c0_199] : memref<8x32xf32, #tpu.memory_space<vmem>>, vector<8x32xf32>
    tpu.vector_store %arg16[%c0_198, %c0_199], %557 {strides = array<i32>} : memref<8x32xf32, #tpu.memory_space<vmem>>, vector<8x32xf32>,
    %c0_200 = arith.constant 0 : index
    %c0_201 = arith.constant 0 : index
    %585 = vector.load %arg17[%c0_200, %c0_201] : memref<8x32xf32, #tpu.memory_space<vmem>>, vector<8x32xf32>
    tpu.vector_store %arg17[%c0_200, %c0_201], %583 {strides = array<i32>} : memref<8x32xf32, #tpu.memory_space<vmem>>, vector<8x32xf32>,
    %586 = arith.truncf %557 : vector<8x32xf32> to vector<8x32xbf16>
    %587 = arith.index_cast %c6_i32 : i32 to index
    %c0_202 = arith.constant 0 : index
    %c0_203 = arith.constant 0 : index
    %588 = vector.load %arg12[%587, %c0_202, %c0_203] : memref<8x8x32xbf16, #tpu.memory_space<vmem>>, vector<1x8x32xbf16>
    %589 = vector.shape_cast %588 : vector<1x8x32xbf16> to vector<8x32xbf16>
    %590 = vector.shape_cast %586 : vector<8x32xbf16> to vector<1x8x32xbf16>
    tpu.vector_store %arg12[%587, %c0_202, %c0_203], %590 {strides = array<i32>} : memref<8x8x32xbf16, #tpu.memory_space<vmem>>, vector<1x8x32xbf16>,
    %591 = arith.truncf %583 : vector<8x32xf32> to vector<8x32xbf16>
    %592 = arith.index_cast %515 : i32 to index
    %c0_204 = arith.constant 0 : index
    %c0_205 = arith.constant 0 : index
    %593 = vector.load %arg13[%592, %c0_204, %c0_205] : memref<8x8x32xbf16, #tpu.memory_space<vmem>>, vector<1x8x32xbf16>
    %594 = vector.shape_cast %593 : vector<1x8x32xbf16> to vector<8x32xbf16>
    %595 = vector.shape_cast %591 : vector<8x32xbf16> to vector<1x8x32xbf16>
    tpu.vector_store %arg13[%592, %c0_204, %c0_205], %595 {strides = array<i32>} : memref<8x8x32xbf16, #tpu.memory_space<vmem>>, vector<1x8x32xbf16>,
    %c7_i32_206 = arith.constant 7 : i32
    %c7_i32_207 = arith.constant 7 : i32
    %596 = arith.subi %c7_i32_207, %c7_i32_206 : i32
    %c0_208 = arith.constant 0 : index
    %c0_209 = arith.constant 0 : index
    %597 = vector.load %arg16[%c0_208, %c0_209] : memref<8x32xf32, #tpu.memory_space<vmem>>, vector<8x32xf32>
    %c0_210 = arith.constant 0 : index
    %c0_211 = arith.constant 0 : index
    %598 = vector.load %arg17[%c0_210, %c0_211] : memref<8x32xf32, #tpu.memory_space<vmem>>, vector<8x32xf32>
    %599 = arith.truncf %597 : vector<8x32xf32> to vector<8x32xbf16>
    %cst_212 = arith.constant dense<0.000000e+00> : vector<8x96xf32>
    %600 = tpu.matmul %599, %25, %cst_212 {dimension_numbers = #tpu.dot_dimension_numbers<[1], [0], [0], [1], [0, 0, 1, 1], [], []>} : vector<8x32xbf16>, vector<32x96xbf16>, vector<8x96xf32> -> vector<8x96xf32>
    %601 = vector.broadcast %27 : vector<1x96xf32> to vector<8x96xf32>
    %602 = arith.addf %600, %601 : vector<8x96xf32>
    %603 = arith.truncf %598 : vector<8x32xf32> to vector<8x32xbf16>
    %cst_213 = arith.constant dense<0.000000e+00> : vector<8x96xf32>
    %604 = tpu.matmul %603, %26, %cst_213 {dimension_numbers = #tpu.dot_dimension_numbers<[1], [0], [0], [1], [0, 0, 1, 1], [], []>} : vector<8x32xbf16>, vector<32x96xbf16>, vector<8x96xf32> -> vector<8x96xf32>
    %605 = vector.broadcast %28 : vector<1x96xf32> to vector<8x96xf32>
    %606 = arith.addf %604, %605 : vector<8x96xf32>
    %607 = arith.index_cast %c7_i32_206 : i32 to index
    %c0_214 = arith.constant 0 : index
    %c0_215 = arith.constant 0 : index
    %608 = vector.load %arg14[%607, %c0_214, %c0_215] : memref<8x8x96xf32, #tpu.memory_space<vmem>>, vector<1x8x96xf32>
    %609 = vector.shape_cast %608 : vector<1x8x96xf32> to vector<8x96xf32>
    %610 = arith.index_cast %596 : i32 to index
    %c0_216 = arith.constant 0 : index
    %c0_217 = arith.constant 0 : index
    %611 = vector.load %arg15[%610, %c0_216, %c0_217] : memref<8x8x96xf32, #tpu.memory_space<vmem>>, vector<1x8x96xf32>
    %612 = vector.shape_cast %611 : vector<1x8x96xf32> to vector<8x96xf32>
    %613 = vector.extract_strided_slice %609 {offsets = [0, 0], sizes = [8, 32], strides = [1, 1]} : vector<8x96xf32> to vector<8x32xf32>
    %614 = vector.extract_strided_slice %602 {offsets = [0, 0], sizes = [8, 32], strides = [1, 1]} : vector<8x96xf32> to vector<8x32xf32>
    %615 = arith.addf %613, %614 : vector<8x32xf32>
    %616 = arith.negf %615 : vector<8x32xf32>
    %617 = math.exp %616 : vector<8x32xf32>
    %cst_218 = arith.constant 1.000000e+00 : f32
    %618 = vector.broadcast %cst_218 : f32 to vector<8x32xf32>
    %619 = arith.addf %618, %617 : vector<8x32xf32>
    %620 = arith.divf %618, %619 : vector<8x32xf32>
    %621 = vector.extract_strided_slice %609 {offsets = [0, 32], sizes = [8, 32], strides = [1, 1]} : vector<8x96xf32> to vector<8x32xf32>
    %622 = vector.extract_strided_slice %602 {offsets = [0, 32], sizes = [8, 32], strides = [1, 1]} : vector<8x96xf32> to vector<8x32xf32>
    %623 = arith.addf %621, %622 : vector<8x32xf32>
    %624 = arith.negf %623 : vector<8x32xf32>
    %625 = math.exp %624 : vector<8x32xf32>
    %cst_219 = arith.constant 1.000000e+00 : f32
    %626 = vector.broadcast %cst_219 : f32 to vector<8x32xf32>
    %627 = arith.addf %626, %625 : vector<8x32xf32>
    %628 = arith.divf %626, %627 : vector<8x32xf32>
    %629 = vector.extract_strided_slice %609 {offsets = [0, 64], sizes = [8, 32], strides = [1, 1]} : vector<8x96xf32> to vector<8x32xf32>
    %630 = vector.extract_strided_slice %602 {offsets = [0, 64], sizes = [8, 32], strides = [1, 1]} : vector<8x96xf32> to vector<8x32xf32>
    %631 = arith.mulf %620, %630 : vector<8x32xf32>
    %632 = arith.addf %629, %631 : vector<8x32xf32>
    %633 = math.tanh %632 : vector<8x32xf32>
    %cst_220 = arith.constant 1.000000e+00 : f32
    %634 = vector.broadcast %cst_220 : f32 to vector<8x32xf32>
    %635 = arith.subf %634, %628 : vector<8x32xf32>
    %636 = arith.mulf %635, %633 : vector<8x32xf32>
    %637 = arith.mulf %628, %597 : vector<8x32xf32>
    %638 = arith.addf %636, %637 : vector<8x32xf32>
    %639 = vector.extract_strided_slice %612 {offsets = [0, 0], sizes = [8, 32], strides = [1, 1]} : vector<8x96xf32> to vector<8x32xf32>
    %640 = vector.extract_strided_slice %606 {offsets = [0, 0], sizes = [8, 32], strides = [1, 1]} : vector<8x96xf32> to vector<8x32xf32>
    %641 = arith.addf %639, %640 : vector<8x32xf32>
    %642 = arith.negf %641 : vector<8x32xf32>
    %643 = math.exp %642 : vector<8x32xf32>
    %cst_221 = arith.constant 1.000000e+00 : f32
    %644 = vector.broadcast %cst_221 : f32 to vector<8x32xf32>
    %645 = arith.addf %644, %643 : vector<8x32xf32>
    %646 = arith.divf %644, %645 : vector<8x32xf32>
    %647 = vector.extract_strided_slice %612 {offsets = [0, 32], sizes = [8, 32], strides = [1, 1]} : vector<8x96xf32> to vector<8x32xf32>
    %648 = vector.extract_strided_slice %606 {offsets = [0, 32], sizes = [8, 32], strides = [1, 1]} : vector<8x96xf32> to vector<8x32xf32>
    %649 = arith.addf %647, %648 : vector<8x32xf32>
    %650 = arith.negf %649 : vector<8x32xf32>
    %651 = math.exp %650 : vector<8x32xf32>
    %cst_222 = arith.constant 1.000000e+00 : f32
    %652 = vector.broadcast %cst_222 : f32 to vector<8x32xf32>
    %653 = arith.addf %652, %651 : vector<8x32xf32>
    %654 = arith.divf %652, %653 : vector<8x32xf32>
    %655 = vector.extract_strided_slice %612 {offsets = [0, 64], sizes = [8, 32], strides = [1, 1]} : vector<8x96xf32> to vector<8x32xf32>
    %656 = vector.extract_strided_slice %606 {offsets = [0, 64], sizes = [8, 32], strides = [1, 1]} : vector<8x96xf32> to vector<8x32xf32>
    %657 = arith.mulf %646, %656 : vector<8x32xf32>
    %658 = arith.addf %655, %657 : vector<8x32xf32>
    %659 = math.tanh %658 : vector<8x32xf32>
    %cst_223 = arith.constant 1.000000e+00 : f32
    %660 = vector.broadcast %cst_223 : f32 to vector<8x32xf32>
    %661 = arith.subf %660, %654 : vector<8x32xf32>
    %662 = arith.mulf %661, %659 : vector<8x32xf32>
    %663 = arith.mulf %654, %598 : vector<8x32xf32>
    %664 = arith.addf %662, %663 : vector<8x32xf32>
    %c0_224 = arith.constant 0 : index
    %c0_225 = arith.constant 0 : index
    %665 = vector.load %arg16[%c0_224, %c0_225] : memref<8x32xf32, #tpu.memory_space<vmem>>, vector<8x32xf32>
    tpu.vector_store %arg16[%c0_224, %c0_225], %638 {strides = array<i32>} : memref<8x32xf32, #tpu.memory_space<vmem>>, vector<8x32xf32>,
    %c0_226 = arith.constant 0 : index
    %c0_227 = arith.constant 0 : index
    %666 = vector.load %arg17[%c0_226, %c0_227] : memref<8x32xf32, #tpu.memory_space<vmem>>, vector<8x32xf32>
    tpu.vector_store %arg17[%c0_226, %c0_227], %664 {strides = array<i32>} : memref<8x32xf32, #tpu.memory_space<vmem>>, vector<8x32xf32>,
    %667 = arith.truncf %638 : vector<8x32xf32> to vector<8x32xbf16>
    %668 = arith.index_cast %c7_i32_206 : i32 to index
    %c0_228 = arith.constant 0 : index
    %c0_229 = arith.constant 0 : index
    %669 = vector.load %arg12[%668, %c0_228, %c0_229] : memref<8x8x32xbf16, #tpu.memory_space<vmem>>, vector<1x8x32xbf16>
    %670 = vector.shape_cast %669 : vector<1x8x32xbf16> to vector<8x32xbf16>
    %671 = vector.shape_cast %667 : vector<8x32xbf16> to vector<1x8x32xbf16>
    tpu.vector_store %arg12[%668, %c0_228, %c0_229], %671 {strides = array<i32>} : memref<8x8x32xbf16, #tpu.memory_space<vmem>>, vector<1x8x32xbf16>,
    %672 = arith.truncf %664 : vector<8x32xf32> to vector<8x32xbf16>
    %673 = arith.index_cast %596 : i32 to index
    %c0_230 = arith.constant 0 : index
    %c0_231 = arith.constant 0 : index
    %674 = vector.load %arg13[%673, %c0_230, %c0_231] : memref<8x8x32xbf16, #tpu.memory_space<vmem>>, vector<1x8x32xbf16>
    %675 = vector.shape_cast %674 : vector<1x8x32xbf16> to vector<8x32xbf16>
    %676 = vector.shape_cast %672 : vector<8x32xbf16> to vector<1x8x32xbf16>
    tpu.vector_store %arg13[%673, %c0_230, %c0_231], %676 {strides = array<i32>} : memref<8x8x32xbf16, #tpu.memory_space<vmem>>, vector<1x8x32xbf16>,
    %c8_i32 = arith.constant 8 : i32
    return
  }
  func.func @transform_0(%arg0: i32, %arg1: i32) -> (i32, i32, i32) {
    %c0_i32 = arith.constant 0 : i32
    %c0_i32_0 = arith.constant 0 : i32
    return %arg1, %arg0, %c0_i32 : i32, i32, i32
  }
  func.func @transform_1(%arg0: i32, %arg1: i32) -> (i32, i32, i32) {
    %c0_i32 = arith.constant 0 : i32
    %0 = arith.subi %c0_i32, %arg1 : i32
    %c0_i32_0 = arith.constant 0 : i32
    %c0_i32_1 = arith.constant 0 : i32
    return %0, %arg0, %c0_i32_0 : i32, i32, i32
  }
  func.func @transform_2(%arg0: i32, %arg1: i32) -> (i32, i32) {
    %c0_i32 = arith.constant 0 : i32
    %c0_i32_0 = arith.constant 0 : i32
    %c0_i32_1 = arith.constant 0 : i32
    return %c0_i32, %c0_i32_0 : i32, i32
  }
  func.func @transform_3(%arg0: i32, %arg1: i32) -> (i32, i32) {
    %c0_i32 = arith.constant 0 : i32
    %c0_i32_0 = arith.constant 0 : i32
    %c0_i32_1 = arith.constant 0 : i32
    return %c0_i32, %c0_i32_0 : i32, i32
  }
  func.func @transform_4(%arg0: i32, %arg1: i32) -> (i32, i32) {
    %c0_i32 = arith.constant 0 : i32
    %c0_i32_0 = arith.constant 0 : i32
    %c0_i32_1 = arith.constant 0 : i32
    return %c0_i32, %c0_i32_0 : i32, i32
  }
  func.func @transform_5(%arg0: i32, %arg1: i32) -> (i32, i32) {
    %c0_i32 = arith.constant 0 : i32
    %c0_i32_0 = arith.constant 0 : i32
    %c0_i32_1 = arith.constant 0 : i32
    return %c0_i32, %c0_i32_0 : i32, i32
  }
  func.func @transform_6(%arg0: i32, %arg1: i32) -> (i32, i32) {
    %c0_i32 = arith.constant 0 : i32
    %c0_i32_0 = arith.constant 0 : i32
    %c0_i32_1 = arith.constant 0 : i32
    return %c0_i32, %c0_i32_0 : i32, i32
  }
  func.func @transform_7(%arg0: i32, %arg1: i32) -> (i32, i32) {
    %c0_i32 = arith.constant 0 : i32
    %c0_i32_0 = arith.constant 0 : i32
    %c0_i32_1 = arith.constant 0 : i32
    return %c0_i32, %c0_i32_0 : i32, i32
  }
  func.func @transform_8(%arg0: i32, %arg1: i32) -> (i32, i32) {
    %c0_i32 = arith.constant 0 : i32
    %c0_i32_0 = arith.constant 0 : i32
    %c0_i32_1 = arith.constant 0 : i32
    return %c0_i32, %c0_i32_0 : i32, i32
  }
  func.func @transform_9(%arg0: i32, %arg1: i32) -> (i32, i32) {
    %c0_i32 = arith.constant 0 : i32
    %c0_i32_0 = arith.constant 0 : i32
    %c0_i32_1 = arith.constant 0 : i32
    return %c0_i32, %c0_i32_0 : i32, i32
  }
  func.func @transform_10(%arg0: i32, %arg1: i32) -> (i32, i32, i32) {
    %c0_i32 = arith.constant 0 : i32
    %c0_i32_0 = arith.constant 0 : i32
    return %arg1, %arg0, %c0_i32 : i32, i32, i32
  }
  func.func @transform_11(%arg0: i32, %arg1: i32) -> (i32, i32, i32) {
    %c0_i32 = arith.constant 0 : i32
    %0 = arith.subi %c0_i32, %arg1 : i32
    %c0_i32_0 = arith.constant 0 : i32
    %c0_i32_1 = arith.constant 0 : i32
    return %0, %arg0, %c0_i32_0 : i32, i32, i32
  }
}

module attributes {stable_mosaic.version = 11 : i64} {
  func.func @kernel(%arg0: i32, %arg1: i32, %arg2: memref<8x8x32xbf16, #tpu.memory_space<vmem>>, %arg3: memref<8x8x32xbf16, #tpu.memory_space<vmem>>, %arg4: memref<8x8x32xbf16, #tpu.memory_space<vmem>>, %arg5: memref<8x8x32xbf16, #tpu.memory_space<vmem>>, %arg6: memref<32x48xbf16, #tpu.memory_space<vmem>>, %arg7: memref<32x48xbf16, #tpu.memory_space<vmem>>, %arg8: memref<32x48xbf16, #tpu.memory_space<vmem>>, %arg9: memref<32x48xbf16, #tpu.memory_space<vmem>>, %arg10: memref<1x48xf32, #tpu.memory_space<vmem>>, %arg11: memref<1x48xf32, #tpu.memory_space<vmem>>, %arg12: memref<16x48xbf16, #tpu.memory_space<vmem>>, %arg13: memref<16x48xbf16, #tpu.memory_space<vmem>>, %arg14: memref<1x48xf32, #tpu.memory_space<vmem>>, %arg15: memref<1x48xf32, #tpu.memory_space<vmem>>, %arg16: memref<16x128xbf16, #tpu.memory_space<vmem>>, %arg17: memref<16x128xbf16, #tpu.memory_space<vmem>>, %arg18: memref<1x128xf32, #tpu.memory_space<vmem>>, %arg19: memref<8x8x128xf32, #tpu.memory_space<vmem>>, %arg20: memref<8x8x128xf32, #tpu.memory_space<vmem>>, %arg21: memref<8x8x48xf32, #tpu.memory_space<vmem>>, %arg22: memref<8x8x48xf32, #tpu.memory_space<vmem>>, %arg23: memref<8x16xf32, #tpu.memory_space<vmem>>, %arg24: memref<8x16xf32, #tpu.memory_space<vmem>>, %arg25: memref<8x8x16xbf16, #tpu.memory_space<vmem>>, %arg26: memref<8x8x16xbf16, #tpu.memory_space<vmem>>) attributes {dimension_semantics = [#tpu.dimension_semantics<parallel>, #tpu.dimension_semantics<arbitrary>], iteration_bounds = array<i64: 1, 1>, scalar_prefetch = 0 : i64, scratch_operands = 6 : i64, tpu.core_type = #tpu.core_type<tc>, window_params = [{transform_indices = @transform_0, window_bounds = array<i64: 8, 8, 32>}, {transform_indices = @transform_1, window_bounds = array<i64: 8, 8, 32>}, {transform_indices = @transform_2, window_bounds = array<i64: 8, 8, 32>}, {transform_indices = @transform_3, window_bounds = array<i64: 8, 8, 32>}, {pipeline_mode = #tpu.pipeline_mode<synchronous>, transform_indices = @transform_4, window_bounds = array<i64: 32, 48>}, {pipeline_mode = #tpu.pipeline_mode<synchronous>, transform_indices = @transform_5, window_bounds = array<i64: 32, 48>}, {pipeline_mode = #tpu.pipeline_mode<synchronous>, transform_indices = @transform_6, window_bounds = array<i64: 32, 48>}, {pipeline_mode = #tpu.pipeline_mode<synchronous>, transform_indices = @transform_7, window_bounds = array<i64: 32, 48>}, {pipeline_mode = #tpu.pipeline_mode<synchronous>, transform_indices = @transform_8, window_bounds = array<i64: 1, 48>}, {pipeline_mode = #tpu.pipeline_mode<synchronous>, transform_indices = @transform_9, window_bounds = array<i64: 1, 48>}, {pipeline_mode = #tpu.pipeline_mode<synchronous>, transform_indices = @transform_10, window_bounds = array<i64: 16, 48>}, {pipeline_mode = #tpu.pipeline_mode<synchronous>, transform_indices = @transform_11, window_bounds = array<i64: 16, 48>}, {pipeline_mode = #tpu.pipeline_mode<synchronous>, transform_indices = @transform_12, window_bounds = array<i64: 1, 48>}, {pipeline_mode = #tpu.pipeline_mode<synchronous>, transform_indices = @transform_13, window_bounds = array<i64: 1, 48>}, {pipeline_mode = #tpu.pipeline_mode<synchronous>, transform_indices = @transform_14, window_bounds = array<i64: 16, 128>}, {pipeline_mode = #tpu.pipeline_mode<synchronous>, transform_indices = @transform_15, window_bounds = array<i64: 16, 128>}, {pipeline_mode = #tpu.pipeline_mode<synchronous>, transform_indices = @transform_16, window_bounds = array<i64: 1, 128>}, {transform_indices = @transform_17, window_bounds = array<i64: 8, 8, 128>}, {transform_indices = @transform_18, window_bounds = array<i64: 8, 8, 128>}]} {
    %c0_i32 = arith.constant 0 : i32
    %0 = arith.cmpi eq, %arg1, %c0_i32 : i32
    %1 = arith.extui %0 : i1 to i32
    %c0_i32_0 = arith.constant 0 : i32
    %2 = arith.cmpi ne, %1, %c0_i32_0 : i32
    scf.if %2 {
      %cst_264 = arith.constant 0.000000e+00 : f32
      %702 = vector.broadcast %cst_264 : f32 to vector<8x16xf32>
      %c0_265 = arith.constant 0 : index
      %c0_266 = arith.constant 0 : index
      %703 = vector.load %arg23[%c0_265, %c0_266] : memref<8x16xf32, #tpu.memory_space<vmem>>, vector<8x16xf32>
      tpu.vector_store %arg23[%c0_265, %c0_266], %702 {strides = array<i32>} : memref<8x16xf32, #tpu.memory_space<vmem>>, vector<8x16xf32>,
      %cst_267 = arith.constant 0.000000e+00 : f32
      %704 = vector.broadcast %cst_267 : f32 to vector<8x16xf32>
      %c0_268 = arith.constant 0 : index
      %c0_269 = arith.constant 0 : index
      %705 = vector.load %arg24[%c0_268, %c0_269] : memref<8x16xf32, #tpu.memory_space<vmem>>, vector<8x16xf32>
      tpu.vector_store %arg24[%c0_268, %c0_269], %704 {strides = array<i32>} : memref<8x16xf32, #tpu.memory_space<vmem>>, vector<8x16xf32>,
    } else {
    }
    %cst = arith.constant 0.000000e+00 : f32
    %3 = vector.broadcast %cst : f32 to vector<64x48xf32>
    %c0 = arith.constant 0 : index
    %c0_1 = arith.constant 0 : index
    %c0_2 = arith.constant 0 : index
    %4 = vector.load %arg2[%c0, %c0_1, %c0_2] : memref<8x8x32xbf16, #tpu.memory_space<vmem>>, vector<8x8x32xbf16>
    %5 = vector.shape_cast %4 : vector<8x8x32xbf16> to vector<64x32xbf16>
    %c0_3 = arith.constant 0 : index
    %c0_4 = arith.constant 0 : index
    %6 = vector.load %arg6[%c0_3, %c0_4] : memref<32x48xbf16, #tpu.memory_space<vmem>>, vector<32x48xbf16>
    %cst_5 = arith.constant dense<0.000000e+00> : vector<64x48xf32>
    %7 = tpu.matmul %5, %6, %cst_5 {dimension_numbers = #tpu.dot_dimension_numbers<[1], [0], [0], [1], [0, 0, 1, 1], [], []>} : vector<64x32xbf16>, vector<32x48xbf16>, vector<64x48xf32> -> vector<64x48xf32>
    %8 = arith.addf %3, %7 : vector<64x48xf32>
    %c0_6 = arith.constant 0 : index
    %c0_7 = arith.constant 0 : index
    %c0_8 = arith.constant 0 : index
    %9 = vector.load %arg3[%c0_6, %c0_7, %c0_8] : memref<8x8x32xbf16, #tpu.memory_space<vmem>>, vector<8x8x32xbf16>
    %10 = vector.shape_cast %9 : vector<8x8x32xbf16> to vector<64x32xbf16>
    %c0_9 = arith.constant 0 : index
    %c0_10 = arith.constant 0 : index
    %11 = vector.load %arg7[%c0_9, %c0_10] : memref<32x48xbf16, #tpu.memory_space<vmem>>, vector<32x48xbf16>
    %cst_11 = arith.constant dense<0.000000e+00> : vector<64x48xf32>
    %12 = tpu.matmul %10, %11, %cst_11 {dimension_numbers = #tpu.dot_dimension_numbers<[1], [0], [0], [1], [0, 0, 1, 1], [], []>} : vector<64x32xbf16>, vector<32x48xbf16>, vector<64x48xf32> -> vector<64x48xf32>
    %13 = arith.addf %8, %12 : vector<64x48xf32>
    %c0_12 = arith.constant 0 : index
    %c0_13 = arith.constant 0 : index
    %14 = vector.load %arg10[%c0_12, %c0_13] : memref<1x48xf32, #tpu.memory_space<vmem>>, vector<1x48xf32>
    %15 = vector.broadcast %14 : vector<1x48xf32> to vector<64x48xf32>
    %16 = arith.addf %13, %15 : vector<64x48xf32>
    %17 = vector.shape_cast %16 : vector<64x48xf32> to vector<8x8x48xf32>
    %c0_14 = arith.constant 0 : index
    %c0_15 = arith.constant 0 : index
    %c0_16 = arith.constant 0 : index
    %18 = vector.load %arg21[%c0_14, %c0_15, %c0_16] : memref<8x8x48xf32, #tpu.memory_space<vmem>>, vector<8x8x48xf32>
    tpu.vector_store %arg21[%c0_14, %c0_15, %c0_16], %17 {strides = array<i32>} : memref<8x8x48xf32, #tpu.memory_space<vmem>>, vector<8x8x48xf32>,
    %cst_17 = arith.constant 0.000000e+00 : f32
    %19 = vector.broadcast %cst_17 : f32 to vector<64x48xf32>
    %c0_18 = arith.constant 0 : index
    %c0_19 = arith.constant 0 : index
    %c0_20 = arith.constant 0 : index
    %20 = vector.load %arg4[%c0_18, %c0_19, %c0_20] : memref<8x8x32xbf16, #tpu.memory_space<vmem>>, vector<8x8x32xbf16>
    %21 = vector.shape_cast %20 : vector<8x8x32xbf16> to vector<64x32xbf16>
    %c0_21 = arith.constant 0 : index
    %c0_22 = arith.constant 0 : index
    %22 = vector.load %arg8[%c0_21, %c0_22] : memref<32x48xbf16, #tpu.memory_space<vmem>>, vector<32x48xbf16>
    %cst_23 = arith.constant dense<0.000000e+00> : vector<64x48xf32>
    %23 = tpu.matmul %21, %22, %cst_23 {dimension_numbers = #tpu.dot_dimension_numbers<[1], [0], [0], [1], [0, 0, 1, 1], [], []>} : vector<64x32xbf16>, vector<32x48xbf16>, vector<64x48xf32> -> vector<64x48xf32>
    %24 = arith.addf %19, %23 : vector<64x48xf32>
    %c0_24 = arith.constant 0 : index
    %c0_25 = arith.constant 0 : index
    %c0_26 = arith.constant 0 : index
    %25 = vector.load %arg5[%c0_24, %c0_25, %c0_26] : memref<8x8x32xbf16, #tpu.memory_space<vmem>>, vector<8x8x32xbf16>
    %26 = vector.shape_cast %25 : vector<8x8x32xbf16> to vector<64x32xbf16>
    %c0_27 = arith.constant 0 : index
    %c0_28 = arith.constant 0 : index
    %27 = vector.load %arg9[%c0_27, %c0_28] : memref<32x48xbf16, #tpu.memory_space<vmem>>, vector<32x48xbf16>
    %cst_29 = arith.constant dense<0.000000e+00> : vector<64x48xf32>
    %28 = tpu.matmul %26, %27, %cst_29 {dimension_numbers = #tpu.dot_dimension_numbers<[1], [0], [0], [1], [0, 0, 1, 1], [], []>} : vector<64x32xbf16>, vector<32x48xbf16>, vector<64x48xf32> -> vector<64x48xf32>
    %29 = arith.addf %24, %28 : vector<64x48xf32>
    %c0_30 = arith.constant 0 : index
    %c0_31 = arith.constant 0 : index
    %30 = vector.load %arg11[%c0_30, %c0_31] : memref<1x48xf32, #tpu.memory_space<vmem>>, vector<1x48xf32>
    %31 = vector.broadcast %30 : vector<1x48xf32> to vector<64x48xf32>
    %32 = arith.addf %29, %31 : vector<64x48xf32>
    %33 = vector.shape_cast %32 : vector<64x48xf32> to vector<8x8x48xf32>
    %c0_32 = arith.constant 0 : index
    %c0_33 = arith.constant 0 : index
    %c0_34 = arith.constant 0 : index
    %34 = vector.load %arg22[%c0_32, %c0_33, %c0_34] : memref<8x8x48xf32, #tpu.memory_space<vmem>>, vector<8x8x48xf32>
    tpu.vector_store %arg22[%c0_32, %c0_33, %c0_34], %33 {strides = array<i32>} : memref<8x8x48xf32, #tpu.memory_space<vmem>>, vector<8x8x48xf32>,
    %c0_35 = arith.constant 0 : index
    %c0_36 = arith.constant 0 : index
    %35 = vector.load %arg12[%c0_35, %c0_36] : memref<16x48xbf16, #tpu.memory_space<vmem>>, vector<16x48xbf16>
    %c0_37 = arith.constant 0 : index
    %c0_38 = arith.constant 0 : index
    %36 = vector.load %arg13[%c0_37, %c0_38] : memref<16x48xbf16, #tpu.memory_space<vmem>>, vector<16x48xbf16>
    %c0_39 = arith.constant 0 : index
    %c0_40 = arith.constant 0 : index
    %37 = vector.load %arg14[%c0_39, %c0_40] : memref<1x48xf32, #tpu.memory_space<vmem>>, vector<1x48xf32>
    %c0_41 = arith.constant 0 : index
    %c0_42 = arith.constant 0 : index
    %38 = vector.load %arg15[%c0_41, %c0_42] : memref<1x48xf32, #tpu.memory_space<vmem>>, vector<1x48xf32>
    %c0_i32_43 = arith.constant 0 : i32
    %c7_i32 = arith.constant 7 : i32
    %39 = arith.subi %c7_i32, %c0_i32_43 : i32
    %c0_44 = arith.constant 0 : index
    %c0_45 = arith.constant 0 : index
    %40 = vector.load %arg23[%c0_44, %c0_45] : memref<8x16xf32, #tpu.memory_space<vmem>>, vector<8x16xf32>
    %c0_46 = arith.constant 0 : index
    %c0_47 = arith.constant 0 : index
    %41 = vector.load %arg24[%c0_46, %c0_47] : memref<8x16xf32, #tpu.memory_space<vmem>>, vector<8x16xf32>
    %42 = arith.truncf %40 : vector<8x16xf32> to vector<8x16xbf16>
    %cst_48 = arith.constant dense<0.000000e+00> : vector<8x48xf32>
    %43 = tpu.matmul %42, %35, %cst_48 {dimension_numbers = #tpu.dot_dimension_numbers<[1], [0], [0], [1], [0, 0, 1, 1], [], []>} : vector<8x16xbf16>, vector<16x48xbf16>, vector<8x48xf32> -> vector<8x48xf32>
    %44 = vector.broadcast %37 : vector<1x48xf32> to vector<8x48xf32>
    %45 = arith.addf %43, %44 : vector<8x48xf32>
    %46 = arith.truncf %41 : vector<8x16xf32> to vector<8x16xbf16>
    %cst_49 = arith.constant dense<0.000000e+00> : vector<8x48xf32>
    %47 = tpu.matmul %46, %36, %cst_49 {dimension_numbers = #tpu.dot_dimension_numbers<[1], [0], [0], [1], [0, 0, 1, 1], [], []>} : vector<8x16xbf16>, vector<16x48xbf16>, vector<8x48xf32> -> vector<8x48xf32>
    %48 = vector.broadcast %38 : vector<1x48xf32> to vector<8x48xf32>
    %49 = arith.addf %47, %48 : vector<8x48xf32>
    %50 = arith.index_cast %c0_i32_43 : i32 to index
    %c0_50 = arith.constant 0 : index
    %c0_51 = arith.constant 0 : index
    %51 = vector.load %arg21[%50, %c0_50, %c0_51] : memref<8x8x48xf32, #tpu.memory_space<vmem>>, vector<1x8x48xf32>
    %52 = vector.shape_cast %51 : vector<1x8x48xf32> to vector<8x48xf32>
    %53 = arith.index_cast %39 : i32 to index
    %c0_52 = arith.constant 0 : index
    %c0_53 = arith.constant 0 : index
    %54 = vector.load %arg22[%53, %c0_52, %c0_53] : memref<8x8x48xf32, #tpu.memory_space<vmem>>, vector<1x8x48xf32>
    %55 = vector.shape_cast %54 : vector<1x8x48xf32> to vector<8x48xf32>
    %56 = vector.extract_strided_slice %52 {offsets = [0, 0], sizes = [8, 16], strides = [1, 1]} : vector<8x48xf32> to vector<8x16xf32>
    %57 = vector.extract_strided_slice %45 {offsets = [0, 0], sizes = [8, 16], strides = [1, 1]} : vector<8x48xf32> to vector<8x16xf32>
    %58 = arith.addf %56, %57 : vector<8x16xf32>
    %59 = arith.negf %58 : vector<8x16xf32>
    %60 = math.exp %59 : vector<8x16xf32>
    %cst_54 = arith.constant 1.000000e+00 : f32
    %61 = vector.broadcast %cst_54 : f32 to vector<8x16xf32>
    %62 = arith.addf %61, %60 : vector<8x16xf32>
    %63 = arith.divf %61, %62 : vector<8x16xf32>
    %64 = vector.extract_strided_slice %52 {offsets = [0, 16], sizes = [8, 16], strides = [1, 1]} : vector<8x48xf32> to vector<8x16xf32>
    %65 = vector.extract_strided_slice %45 {offsets = [0, 16], sizes = [8, 16], strides = [1, 1]} : vector<8x48xf32> to vector<8x16xf32>
    %66 = arith.addf %64, %65 : vector<8x16xf32>
    %67 = arith.negf %66 : vector<8x16xf32>
    %68 = math.exp %67 : vector<8x16xf32>
    %cst_55 = arith.constant 1.000000e+00 : f32
    %69 = vector.broadcast %cst_55 : f32 to vector<8x16xf32>
    %70 = arith.addf %69, %68 : vector<8x16xf32>
    %71 = arith.divf %69, %70 : vector<8x16xf32>
    %72 = vector.extract_strided_slice %52 {offsets = [0, 32], sizes = [8, 16], strides = [1, 1]} : vector<8x48xf32> to vector<8x16xf32>
    %73 = vector.extract_strided_slice %45 {offsets = [0, 32], sizes = [8, 16], strides = [1, 1]} : vector<8x48xf32> to vector<8x16xf32>
    %74 = arith.mulf %63, %73 : vector<8x16xf32>
    %75 = arith.addf %72, %74 : vector<8x16xf32>
    %76 = math.tanh %75 : vector<8x16xf32>
    %cst_56 = arith.constant 1.000000e+00 : f32
    %77 = vector.broadcast %cst_56 : f32 to vector<8x16xf32>
    %78 = arith.subf %77, %71 : vector<8x16xf32>
    %79 = arith.mulf %78, %76 : vector<8x16xf32>
    %80 = arith.mulf %71, %40 : vector<8x16xf32>
    %81 = arith.addf %79, %80 : vector<8x16xf32>
    %82 = vector.extract_strided_slice %55 {offsets = [0, 0], sizes = [8, 16], strides = [1, 1]} : vector<8x48xf32> to vector<8x16xf32>
    %83 = vector.extract_strided_slice %49 {offsets = [0, 0], sizes = [8, 16], strides = [1, 1]} : vector<8x48xf32> to vector<8x16xf32>
    %84 = arith.addf %82, %83 : vector<8x16xf32>
    %85 = arith.negf %84 : vector<8x16xf32>
    %86 = math.exp %85 : vector<8x16xf32>
    %cst_57 = arith.constant 1.000000e+00 : f32
    %87 = vector.broadcast %cst_57 : f32 to vector<8x16xf32>
    %88 = arith.addf %87, %86 : vector<8x16xf32>
    %89 = arith.divf %87, %88 : vector<8x16xf32>
    %90 = vector.extract_strided_slice %55 {offsets = [0, 16], sizes = [8, 16], strides = [1, 1]} : vector<8x48xf32> to vector<8x16xf32>
    %91 = vector.extract_strided_slice %49 {offsets = [0, 16], sizes = [8, 16], strides = [1, 1]} : vector<8x48xf32> to vector<8x16xf32>
    %92 = arith.addf %90, %91 : vector<8x16xf32>
    %93 = arith.negf %92 : vector<8x16xf32>
    %94 = math.exp %93 : vector<8x16xf32>
    %cst_58 = arith.constant 1.000000e+00 : f32
    %95 = vector.broadcast %cst_58 : f32 to vector<8x16xf32>
    %96 = arith.addf %95, %94 : vector<8x16xf32>
    %97 = arith.divf %95, %96 : vector<8x16xf32>
    %98 = vector.extract_strided_slice %55 {offsets = [0, 32], sizes = [8, 16], strides = [1, 1]} : vector<8x48xf32> to vector<8x16xf32>
    %99 = vector.extract_strided_slice %49 {offsets = [0, 32], sizes = [8, 16], strides = [1, 1]} : vector<8x48xf32> to vector<8x16xf32>
    %100 = arith.mulf %89, %99 : vector<8x16xf32>
    %101 = arith.addf %98, %100 : vector<8x16xf32>
    %102 = math.tanh %101 : vector<8x16xf32>
    %cst_59 = arith.constant 1.000000e+00 : f32
    %103 = vector.broadcast %cst_59 : f32 to vector<8x16xf32>
    %104 = arith.subf %103, %97 : vector<8x16xf32>
    %105 = arith.mulf %104, %102 : vector<8x16xf32>
    %106 = arith.mulf %97, %41 : vector<8x16xf32>
    %107 = arith.addf %105, %106 : vector<8x16xf32>
    %c0_60 = arith.constant 0 : index
    %c0_61 = arith.constant 0 : index
    %108 = vector.load %arg23[%c0_60, %c0_61] : memref<8x16xf32, #tpu.memory_space<vmem>>, vector<8x16xf32>
    tpu.vector_store %arg23[%c0_60, %c0_61], %81 {strides = array<i32>} : memref<8x16xf32, #tpu.memory_space<vmem>>, vector<8x16xf32>,
    %c0_62 = arith.constant 0 : index
    %c0_63 = arith.constant 0 : index
    %109 = vector.load %arg24[%c0_62, %c0_63] : memref<8x16xf32, #tpu.memory_space<vmem>>, vector<8x16xf32>
    tpu.vector_store %arg24[%c0_62, %c0_63], %107 {strides = array<i32>} : memref<8x16xf32, #tpu.memory_space<vmem>>, vector<8x16xf32>,
    %110 = arith.truncf %81 : vector<8x16xf32> to vector<8x16xbf16>
    %111 = arith.index_cast %c0_i32_43 : i32 to index
    %c0_64 = arith.constant 0 : index
    %c0_65 = arith.constant 0 : index
    %112 = vector.load %arg25[%111, %c0_64, %c0_65] : memref<8x8x16xbf16, #tpu.memory_space<vmem>>, vector<1x8x16xbf16>
    %113 = vector.shape_cast %112 : vector<1x8x16xbf16> to vector<8x16xbf16>
    %114 = vector.shape_cast %110 : vector<8x16xbf16> to vector<1x8x16xbf16>
    tpu.vector_store %arg25[%111, %c0_64, %c0_65], %114 {strides = array<i32>} : memref<8x8x16xbf16, #tpu.memory_space<vmem>>, vector<1x8x16xbf16>,
    %115 = arith.truncf %107 : vector<8x16xf32> to vector<8x16xbf16>
    %116 = arith.index_cast %39 : i32 to index
    %c0_66 = arith.constant 0 : index
    %c0_67 = arith.constant 0 : index
    %117 = vector.load %arg26[%116, %c0_66, %c0_67] : memref<8x8x16xbf16, #tpu.memory_space<vmem>>, vector<1x8x16xbf16>
    %118 = vector.shape_cast %117 : vector<1x8x16xbf16> to vector<8x16xbf16>
    %119 = vector.shape_cast %115 : vector<8x16xbf16> to vector<1x8x16xbf16>
    tpu.vector_store %arg26[%116, %c0_66, %c0_67], %119 {strides = array<i32>} : memref<8x8x16xbf16, #tpu.memory_space<vmem>>, vector<1x8x16xbf16>,
    %c1_i32 = arith.constant 1 : i32
    %c7_i32_68 = arith.constant 7 : i32
    %120 = arith.subi %c7_i32_68, %c1_i32 : i32
    %c0_69 = arith.constant 0 : index
    %c0_70 = arith.constant 0 : index
    %121 = vector.load %arg23[%c0_69, %c0_70] : memref<8x16xf32, #tpu.memory_space<vmem>>, vector<8x16xf32>
    %c0_71 = arith.constant 0 : index
    %c0_72 = arith.constant 0 : index
    %122 = vector.load %arg24[%c0_71, %c0_72] : memref<8x16xf32, #tpu.memory_space<vmem>>, vector<8x16xf32>
    %123 = arith.truncf %121 : vector<8x16xf32> to vector<8x16xbf16>
    %cst_73 = arith.constant dense<0.000000e+00> : vector<8x48xf32>
    %124 = tpu.matmul %123, %35, %cst_73 {dimension_numbers = #tpu.dot_dimension_numbers<[1], [0], [0], [1], [0, 0, 1, 1], [], []>} : vector<8x16xbf16>, vector<16x48xbf16>, vector<8x48xf32> -> vector<8x48xf32>
    %125 = vector.broadcast %37 : vector<1x48xf32> to vector<8x48xf32>
    %126 = arith.addf %124, %125 : vector<8x48xf32>
    %127 = arith.truncf %122 : vector<8x16xf32> to vector<8x16xbf16>
    %cst_74 = arith.constant dense<0.000000e+00> : vector<8x48xf32>
    %128 = tpu.matmul %127, %36, %cst_74 {dimension_numbers = #tpu.dot_dimension_numbers<[1], [0], [0], [1], [0, 0, 1, 1], [], []>} : vector<8x16xbf16>, vector<16x48xbf16>, vector<8x48xf32> -> vector<8x48xf32>
    %129 = vector.broadcast %38 : vector<1x48xf32> to vector<8x48xf32>
    %130 = arith.addf %128, %129 : vector<8x48xf32>
    %131 = arith.index_cast %c1_i32 : i32 to index
    %c0_75 = arith.constant 0 : index
    %c0_76 = arith.constant 0 : index
    %132 = vector.load %arg21[%131, %c0_75, %c0_76] : memref<8x8x48xf32, #tpu.memory_space<vmem>>, vector<1x8x48xf32>
    %133 = vector.shape_cast %132 : vector<1x8x48xf32> to vector<8x48xf32>
    %134 = arith.index_cast %120 : i32 to index
    %c0_77 = arith.constant 0 : index
    %c0_78 = arith.constant 0 : index
    %135 = vector.load %arg22[%134, %c0_77, %c0_78] : memref<8x8x48xf32, #tpu.memory_space<vmem>>, vector<1x8x48xf32>
    %136 = vector.shape_cast %135 : vector<1x8x48xf32> to vector<8x48xf32>
    %137 = vector.extract_strided_slice %133 {offsets = [0, 0], sizes = [8, 16], strides = [1, 1]} : vector<8x48xf32> to vector<8x16xf32>
    %138 = vector.extract_strided_slice %126 {offsets = [0, 0], sizes = [8, 16], strides = [1, 1]} : vector<8x48xf32> to vector<8x16xf32>
    %139 = arith.addf %137, %138 : vector<8x16xf32>
    %140 = arith.negf %139 : vector<8x16xf32>
    %141 = math.exp %140 : vector<8x16xf32>
    %cst_79 = arith.constant 1.000000e+00 : f32
    %142 = vector.broadcast %cst_79 : f32 to vector<8x16xf32>
    %143 = arith.addf %142, %141 : vector<8x16xf32>
    %144 = arith.divf %142, %143 : vector<8x16xf32>
    %145 = vector.extract_strided_slice %133 {offsets = [0, 16], sizes = [8, 16], strides = [1, 1]} : vector<8x48xf32> to vector<8x16xf32>
    %146 = vector.extract_strided_slice %126 {offsets = [0, 16], sizes = [8, 16], strides = [1, 1]} : vector<8x48xf32> to vector<8x16xf32>
    %147 = arith.addf %145, %146 : vector<8x16xf32>
    %148 = arith.negf %147 : vector<8x16xf32>
    %149 = math.exp %148 : vector<8x16xf32>
    %cst_80 = arith.constant 1.000000e+00 : f32
    %150 = vector.broadcast %cst_80 : f32 to vector<8x16xf32>
    %151 = arith.addf %150, %149 : vector<8x16xf32>
    %152 = arith.divf %150, %151 : vector<8x16xf32>
    %153 = vector.extract_strided_slice %133 {offsets = [0, 32], sizes = [8, 16], strides = [1, 1]} : vector<8x48xf32> to vector<8x16xf32>
    %154 = vector.extract_strided_slice %126 {offsets = [0, 32], sizes = [8, 16], strides = [1, 1]} : vector<8x48xf32> to vector<8x16xf32>
    %155 = arith.mulf %144, %154 : vector<8x16xf32>
    %156 = arith.addf %153, %155 : vector<8x16xf32>
    %157 = math.tanh %156 : vector<8x16xf32>
    %cst_81 = arith.constant 1.000000e+00 : f32
    %158 = vector.broadcast %cst_81 : f32 to vector<8x16xf32>
    %159 = arith.subf %158, %152 : vector<8x16xf32>
    %160 = arith.mulf %159, %157 : vector<8x16xf32>
    %161 = arith.mulf %152, %121 : vector<8x16xf32>
    %162 = arith.addf %160, %161 : vector<8x16xf32>
    %163 = vector.extract_strided_slice %136 {offsets = [0, 0], sizes = [8, 16], strides = [1, 1]} : vector<8x48xf32> to vector<8x16xf32>
    %164 = vector.extract_strided_slice %130 {offsets = [0, 0], sizes = [8, 16], strides = [1, 1]} : vector<8x48xf32> to vector<8x16xf32>
    %165 = arith.addf %163, %164 : vector<8x16xf32>
    %166 = arith.negf %165 : vector<8x16xf32>
    %167 = math.exp %166 : vector<8x16xf32>
    %cst_82 = arith.constant 1.000000e+00 : f32
    %168 = vector.broadcast %cst_82 : f32 to vector<8x16xf32>
    %169 = arith.addf %168, %167 : vector<8x16xf32>
    %170 = arith.divf %168, %169 : vector<8x16xf32>
    %171 = vector.extract_strided_slice %136 {offsets = [0, 16], sizes = [8, 16], strides = [1, 1]} : vector<8x48xf32> to vector<8x16xf32>
    %172 = vector.extract_strided_slice %130 {offsets = [0, 16], sizes = [8, 16], strides = [1, 1]} : vector<8x48xf32> to vector<8x16xf32>
    %173 = arith.addf %171, %172 : vector<8x16xf32>
    %174 = arith.negf %173 : vector<8x16xf32>
    %175 = math.exp %174 : vector<8x16xf32>
    %cst_83 = arith.constant 1.000000e+00 : f32
    %176 = vector.broadcast %cst_83 : f32 to vector<8x16xf32>
    %177 = arith.addf %176, %175 : vector<8x16xf32>
    %178 = arith.divf %176, %177 : vector<8x16xf32>
    %179 = vector.extract_strided_slice %136 {offsets = [0, 32], sizes = [8, 16], strides = [1, 1]} : vector<8x48xf32> to vector<8x16xf32>
    %180 = vector.extract_strided_slice %130 {offsets = [0, 32], sizes = [8, 16], strides = [1, 1]} : vector<8x48xf32> to vector<8x16xf32>
    %181 = arith.mulf %170, %180 : vector<8x16xf32>
    %182 = arith.addf %179, %181 : vector<8x16xf32>
    %183 = math.tanh %182 : vector<8x16xf32>
    %cst_84 = arith.constant 1.000000e+00 : f32
    %184 = vector.broadcast %cst_84 : f32 to vector<8x16xf32>
    %185 = arith.subf %184, %178 : vector<8x16xf32>
    %186 = arith.mulf %185, %183 : vector<8x16xf32>
    %187 = arith.mulf %178, %122 : vector<8x16xf32>
    %188 = arith.addf %186, %187 : vector<8x16xf32>
    %c0_85 = arith.constant 0 : index
    %c0_86 = arith.constant 0 : index
    %189 = vector.load %arg23[%c0_85, %c0_86] : memref<8x16xf32, #tpu.memory_space<vmem>>, vector<8x16xf32>
    tpu.vector_store %arg23[%c0_85, %c0_86], %162 {strides = array<i32>} : memref<8x16xf32, #tpu.memory_space<vmem>>, vector<8x16xf32>,
    %c0_87 = arith.constant 0 : index
    %c0_88 = arith.constant 0 : index
    %190 = vector.load %arg24[%c0_87, %c0_88] : memref<8x16xf32, #tpu.memory_space<vmem>>, vector<8x16xf32>
    tpu.vector_store %arg24[%c0_87, %c0_88], %188 {strides = array<i32>} : memref<8x16xf32, #tpu.memory_space<vmem>>, vector<8x16xf32>,
    %191 = arith.truncf %162 : vector<8x16xf32> to vector<8x16xbf16>
    %192 = arith.index_cast %c1_i32 : i32 to index
    %c0_89 = arith.constant 0 : index
    %c0_90 = arith.constant 0 : index
    %193 = vector.load %arg25[%192, %c0_89, %c0_90] : memref<8x8x16xbf16, #tpu.memory_space<vmem>>, vector<1x8x16xbf16>
    %194 = vector.shape_cast %193 : vector<1x8x16xbf16> to vector<8x16xbf16>
    %195 = vector.shape_cast %191 : vector<8x16xbf16> to vector<1x8x16xbf16>
    tpu.vector_store %arg25[%192, %c0_89, %c0_90], %195 {strides = array<i32>} : memref<8x8x16xbf16, #tpu.memory_space<vmem>>, vector<1x8x16xbf16>,
    %196 = arith.truncf %188 : vector<8x16xf32> to vector<8x16xbf16>
    %197 = arith.index_cast %120 : i32 to index
    %c0_91 = arith.constant 0 : index
    %c0_92 = arith.constant 0 : index
    %198 = vector.load %arg26[%197, %c0_91, %c0_92] : memref<8x8x16xbf16, #tpu.memory_space<vmem>>, vector<1x8x16xbf16>
    %199 = vector.shape_cast %198 : vector<1x8x16xbf16> to vector<8x16xbf16>
    %200 = vector.shape_cast %196 : vector<8x16xbf16> to vector<1x8x16xbf16>
    tpu.vector_store %arg26[%197, %c0_91, %c0_92], %200 {strides = array<i32>} : memref<8x8x16xbf16, #tpu.memory_space<vmem>>, vector<1x8x16xbf16>,
    %c2_i32 = arith.constant 2 : i32
    %c7_i32_93 = arith.constant 7 : i32
    %201 = arith.subi %c7_i32_93, %c2_i32 : i32
    %c0_94 = arith.constant 0 : index
    %c0_95 = arith.constant 0 : index
    %202 = vector.load %arg23[%c0_94, %c0_95] : memref<8x16xf32, #tpu.memory_space<vmem>>, vector<8x16xf32>
    %c0_96 = arith.constant 0 : index
    %c0_97 = arith.constant 0 : index
    %203 = vector.load %arg24[%c0_96, %c0_97] : memref<8x16xf32, #tpu.memory_space<vmem>>, vector<8x16xf32>
    %204 = arith.truncf %202 : vector<8x16xf32> to vector<8x16xbf16>
    %cst_98 = arith.constant dense<0.000000e+00> : vector<8x48xf32>
    %205 = tpu.matmul %204, %35, %cst_98 {dimension_numbers = #tpu.dot_dimension_numbers<[1], [0], [0], [1], [0, 0, 1, 1], [], []>} : vector<8x16xbf16>, vector<16x48xbf16>, vector<8x48xf32> -> vector<8x48xf32>
    %206 = vector.broadcast %37 : vector<1x48xf32> to vector<8x48xf32>
    %207 = arith.addf %205, %206 : vector<8x48xf32>
    %208 = arith.truncf %203 : vector<8x16xf32> to vector<8x16xbf16>
    %cst_99 = arith.constant dense<0.000000e+00> : vector<8x48xf32>
    %209 = tpu.matmul %208, %36, %cst_99 {dimension_numbers = #tpu.dot_dimension_numbers<[1], [0], [0], [1], [0, 0, 1, 1], [], []>} : vector<8x16xbf16>, vector<16x48xbf16>, vector<8x48xf32> -> vector<8x48xf32>
    %210 = vector.broadcast %38 : vector<1x48xf32> to vector<8x48xf32>
    %211 = arith.addf %209, %210 : vector<8x48xf32>
    %212 = arith.index_cast %c2_i32 : i32 to index
    %c0_100 = arith.constant 0 : index
    %c0_101 = arith.constant 0 : index
    %213 = vector.load %arg21[%212, %c0_100, %c0_101] : memref<8x8x48xf32, #tpu.memory_space<vmem>>, vector<1x8x48xf32>
    %214 = vector.shape_cast %213 : vector<1x8x48xf32> to vector<8x48xf32>
    %215 = arith.index_cast %201 : i32 to index
    %c0_102 = arith.constant 0 : index
    %c0_103 = arith.constant 0 : index
    %216 = vector.load %arg22[%215, %c0_102, %c0_103] : memref<8x8x48xf32, #tpu.memory_space<vmem>>, vector<1x8x48xf32>
    %217 = vector.shape_cast %216 : vector<1x8x48xf32> to vector<8x48xf32>
    %218 = vector.extract_strided_slice %214 {offsets = [0, 0], sizes = [8, 16], strides = [1, 1]} : vector<8x48xf32> to vector<8x16xf32>
    %219 = vector.extract_strided_slice %207 {offsets = [0, 0], sizes = [8, 16], strides = [1, 1]} : vector<8x48xf32> to vector<8x16xf32>
    %220 = arith.addf %218, %219 : vector<8x16xf32>
    %221 = arith.negf %220 : vector<8x16xf32>
    %222 = math.exp %221 : vector<8x16xf32>
    %cst_104 = arith.constant 1.000000e+00 : f32
    %223 = vector.broadcast %cst_104 : f32 to vector<8x16xf32>
    %224 = arith.addf %223, %222 : vector<8x16xf32>
    %225 = arith.divf %223, %224 : vector<8x16xf32>
    %226 = vector.extract_strided_slice %214 {offsets = [0, 16], sizes = [8, 16], strides = [1, 1]} : vector<8x48xf32> to vector<8x16xf32>
    %227 = vector.extract_strided_slice %207 {offsets = [0, 16], sizes = [8, 16], strides = [1, 1]} : vector<8x48xf32> to vector<8x16xf32>
    %228 = arith.addf %226, %227 : vector<8x16xf32>
    %229 = arith.negf %228 : vector<8x16xf32>
    %230 = math.exp %229 : vector<8x16xf32>
    %cst_105 = arith.constant 1.000000e+00 : f32
    %231 = vector.broadcast %cst_105 : f32 to vector<8x16xf32>
    %232 = arith.addf %231, %230 : vector<8x16xf32>
    %233 = arith.divf %231, %232 : vector<8x16xf32>
    %234 = vector.extract_strided_slice %214 {offsets = [0, 32], sizes = [8, 16], strides = [1, 1]} : vector<8x48xf32> to vector<8x16xf32>
    %235 = vector.extract_strided_slice %207 {offsets = [0, 32], sizes = [8, 16], strides = [1, 1]} : vector<8x48xf32> to vector<8x16xf32>
    %236 = arith.mulf %225, %235 : vector<8x16xf32>
    %237 = arith.addf %234, %236 : vector<8x16xf32>
    %238 = math.tanh %237 : vector<8x16xf32>
    %cst_106 = arith.constant 1.000000e+00 : f32
    %239 = vector.broadcast %cst_106 : f32 to vector<8x16xf32>
    %240 = arith.subf %239, %233 : vector<8x16xf32>
    %241 = arith.mulf %240, %238 : vector<8x16xf32>
    %242 = arith.mulf %233, %202 : vector<8x16xf32>
    %243 = arith.addf %241, %242 : vector<8x16xf32>
    %244 = vector.extract_strided_slice %217 {offsets = [0, 0], sizes = [8, 16], strides = [1, 1]} : vector<8x48xf32> to vector<8x16xf32>
    %245 = vector.extract_strided_slice %211 {offsets = [0, 0], sizes = [8, 16], strides = [1, 1]} : vector<8x48xf32> to vector<8x16xf32>
    %246 = arith.addf %244, %245 : vector<8x16xf32>
    %247 = arith.negf %246 : vector<8x16xf32>
    %248 = math.exp %247 : vector<8x16xf32>
    %cst_107 = arith.constant 1.000000e+00 : f32
    %249 = vector.broadcast %cst_107 : f32 to vector<8x16xf32>
    %250 = arith.addf %249, %248 : vector<8x16xf32>
    %251 = arith.divf %249, %250 : vector<8x16xf32>
    %252 = vector.extract_strided_slice %217 {offsets = [0, 16], sizes = [8, 16], strides = [1, 1]} : vector<8x48xf32> to vector<8x16xf32>
    %253 = vector.extract_strided_slice %211 {offsets = [0, 16], sizes = [8, 16], strides = [1, 1]} : vector<8x48xf32> to vector<8x16xf32>
    %254 = arith.addf %252, %253 : vector<8x16xf32>
    %255 = arith.negf %254 : vector<8x16xf32>
    %256 = math.exp %255 : vector<8x16xf32>
    %cst_108 = arith.constant 1.000000e+00 : f32
    %257 = vector.broadcast %cst_108 : f32 to vector<8x16xf32>
    %258 = arith.addf %257, %256 : vector<8x16xf32>
    %259 = arith.divf %257, %258 : vector<8x16xf32>
    %260 = vector.extract_strided_slice %217 {offsets = [0, 32], sizes = [8, 16], strides = [1, 1]} : vector<8x48xf32> to vector<8x16xf32>
    %261 = vector.extract_strided_slice %211 {offsets = [0, 32], sizes = [8, 16], strides = [1, 1]} : vector<8x48xf32> to vector<8x16xf32>
    %262 = arith.mulf %251, %261 : vector<8x16xf32>
    %263 = arith.addf %260, %262 : vector<8x16xf32>
    %264 = math.tanh %263 : vector<8x16xf32>
    %cst_109 = arith.constant 1.000000e+00 : f32
    %265 = vector.broadcast %cst_109 : f32 to vector<8x16xf32>
    %266 = arith.subf %265, %259 : vector<8x16xf32>
    %267 = arith.mulf %266, %264 : vector<8x16xf32>
    %268 = arith.mulf %259, %203 : vector<8x16xf32>
    %269 = arith.addf %267, %268 : vector<8x16xf32>
    %c0_110 = arith.constant 0 : index
    %c0_111 = arith.constant 0 : index
    %270 = vector.load %arg23[%c0_110, %c0_111] : memref<8x16xf32, #tpu.memory_space<vmem>>, vector<8x16xf32>
    tpu.vector_store %arg23[%c0_110, %c0_111], %243 {strides = array<i32>} : memref<8x16xf32, #tpu.memory_space<vmem>>, vector<8x16xf32>,
    %c0_112 = arith.constant 0 : index
    %c0_113 = arith.constant 0 : index
    %271 = vector.load %arg24[%c0_112, %c0_113] : memref<8x16xf32, #tpu.memory_space<vmem>>, vector<8x16xf32>
    tpu.vector_store %arg24[%c0_112, %c0_113], %269 {strides = array<i32>} : memref<8x16xf32, #tpu.memory_space<vmem>>, vector<8x16xf32>,
    %272 = arith.truncf %243 : vector<8x16xf32> to vector<8x16xbf16>
    %273 = arith.index_cast %c2_i32 : i32 to index
    %c0_114 = arith.constant 0 : index
    %c0_115 = arith.constant 0 : index
    %274 = vector.load %arg25[%273, %c0_114, %c0_115] : memref<8x8x16xbf16, #tpu.memory_space<vmem>>, vector<1x8x16xbf16>
    %275 = vector.shape_cast %274 : vector<1x8x16xbf16> to vector<8x16xbf16>
    %276 = vector.shape_cast %272 : vector<8x16xbf16> to vector<1x8x16xbf16>
    tpu.vector_store %arg25[%273, %c0_114, %c0_115], %276 {strides = array<i32>} : memref<8x8x16xbf16, #tpu.memory_space<vmem>>, vector<1x8x16xbf16>,
    %277 = arith.truncf %269 : vector<8x16xf32> to vector<8x16xbf16>
    %278 = arith.index_cast %201 : i32 to index
    %c0_116 = arith.constant 0 : index
    %c0_117 = arith.constant 0 : index
    %279 = vector.load %arg26[%278, %c0_116, %c0_117] : memref<8x8x16xbf16, #tpu.memory_space<vmem>>, vector<1x8x16xbf16>
    %280 = vector.shape_cast %279 : vector<1x8x16xbf16> to vector<8x16xbf16>
    %281 = vector.shape_cast %277 : vector<8x16xbf16> to vector<1x8x16xbf16>
    tpu.vector_store %arg26[%278, %c0_116, %c0_117], %281 {strides = array<i32>} : memref<8x8x16xbf16, #tpu.memory_space<vmem>>, vector<1x8x16xbf16>,
    %c3_i32 = arith.constant 3 : i32
    %c7_i32_118 = arith.constant 7 : i32
    %282 = arith.subi %c7_i32_118, %c3_i32 : i32
    %c0_119 = arith.constant 0 : index
    %c0_120 = arith.constant 0 : index
    %283 = vector.load %arg23[%c0_119, %c0_120] : memref<8x16xf32, #tpu.memory_space<vmem>>, vector<8x16xf32>
    %c0_121 = arith.constant 0 : index
    %c0_122 = arith.constant 0 : index
    %284 = vector.load %arg24[%c0_121, %c0_122] : memref<8x16xf32, #tpu.memory_space<vmem>>, vector<8x16xf32>
    %285 = arith.truncf %283 : vector<8x16xf32> to vector<8x16xbf16>
    %cst_123 = arith.constant dense<0.000000e+00> : vector<8x48xf32>
    %286 = tpu.matmul %285, %35, %cst_123 {dimension_numbers = #tpu.dot_dimension_numbers<[1], [0], [0], [1], [0, 0, 1, 1], [], []>} : vector<8x16xbf16>, vector<16x48xbf16>, vector<8x48xf32> -> vector<8x48xf32>
    %287 = vector.broadcast %37 : vector<1x48xf32> to vector<8x48xf32>
    %288 = arith.addf %286, %287 : vector<8x48xf32>
    %289 = arith.truncf %284 : vector<8x16xf32> to vector<8x16xbf16>
    %cst_124 = arith.constant dense<0.000000e+00> : vector<8x48xf32>
    %290 = tpu.matmul %289, %36, %cst_124 {dimension_numbers = #tpu.dot_dimension_numbers<[1], [0], [0], [1], [0, 0, 1, 1], [], []>} : vector<8x16xbf16>, vector<16x48xbf16>, vector<8x48xf32> -> vector<8x48xf32>
    %291 = vector.broadcast %38 : vector<1x48xf32> to vector<8x48xf32>
    %292 = arith.addf %290, %291 : vector<8x48xf32>
    %293 = arith.index_cast %c3_i32 : i32 to index
    %c0_125 = arith.constant 0 : index
    %c0_126 = arith.constant 0 : index
    %294 = vector.load %arg21[%293, %c0_125, %c0_126] : memref<8x8x48xf32, #tpu.memory_space<vmem>>, vector<1x8x48xf32>
    %295 = vector.shape_cast %294 : vector<1x8x48xf32> to vector<8x48xf32>
    %296 = arith.index_cast %282 : i32 to index
    %c0_127 = arith.constant 0 : index
    %c0_128 = arith.constant 0 : index
    %297 = vector.load %arg22[%296, %c0_127, %c0_128] : memref<8x8x48xf32, #tpu.memory_space<vmem>>, vector<1x8x48xf32>
    %298 = vector.shape_cast %297 : vector<1x8x48xf32> to vector<8x48xf32>
    %299 = vector.extract_strided_slice %295 {offsets = [0, 0], sizes = [8, 16], strides = [1, 1]} : vector<8x48xf32> to vector<8x16xf32>
    %300 = vector.extract_strided_slice %288 {offsets = [0, 0], sizes = [8, 16], strides = [1, 1]} : vector<8x48xf32> to vector<8x16xf32>
    %301 = arith.addf %299, %300 : vector<8x16xf32>
    %302 = arith.negf %301 : vector<8x16xf32>
    %303 = math.exp %302 : vector<8x16xf32>
    %cst_129 = arith.constant 1.000000e+00 : f32
    %304 = vector.broadcast %cst_129 : f32 to vector<8x16xf32>
    %305 = arith.addf %304, %303 : vector<8x16xf32>
    %306 = arith.divf %304, %305 : vector<8x16xf32>
    %307 = vector.extract_strided_slice %295 {offsets = [0, 16], sizes = [8, 16], strides = [1, 1]} : vector<8x48xf32> to vector<8x16xf32>
    %308 = vector.extract_strided_slice %288 {offsets = [0, 16], sizes = [8, 16], strides = [1, 1]} : vector<8x48xf32> to vector<8x16xf32>
    %309 = arith.addf %307, %308 : vector<8x16xf32>
    %310 = arith.negf %309 : vector<8x16xf32>
    %311 = math.exp %310 : vector<8x16xf32>
    %cst_130 = arith.constant 1.000000e+00 : f32
    %312 = vector.broadcast %cst_130 : f32 to vector<8x16xf32>
    %313 = arith.addf %312, %311 : vector<8x16xf32>
    %314 = arith.divf %312, %313 : vector<8x16xf32>
    %315 = vector.extract_strided_slice %295 {offsets = [0, 32], sizes = [8, 16], strides = [1, 1]} : vector<8x48xf32> to vector<8x16xf32>
    %316 = vector.extract_strided_slice %288 {offsets = [0, 32], sizes = [8, 16], strides = [1, 1]} : vector<8x48xf32> to vector<8x16xf32>
    %317 = arith.mulf %306, %316 : vector<8x16xf32>
    %318 = arith.addf %315, %317 : vector<8x16xf32>
    %319 = math.tanh %318 : vector<8x16xf32>
    %cst_131 = arith.constant 1.000000e+00 : f32
    %320 = vector.broadcast %cst_131 : f32 to vector<8x16xf32>
    %321 = arith.subf %320, %314 : vector<8x16xf32>
    %322 = arith.mulf %321, %319 : vector<8x16xf32>
    %323 = arith.mulf %314, %283 : vector<8x16xf32>
    %324 = arith.addf %322, %323 : vector<8x16xf32>
    %325 = vector.extract_strided_slice %298 {offsets = [0, 0], sizes = [8, 16], strides = [1, 1]} : vector<8x48xf32> to vector<8x16xf32>
    %326 = vector.extract_strided_slice %292 {offsets = [0, 0], sizes = [8, 16], strides = [1, 1]} : vector<8x48xf32> to vector<8x16xf32>
    %327 = arith.addf %325, %326 : vector<8x16xf32>
    %328 = arith.negf %327 : vector<8x16xf32>
    %329 = math.exp %328 : vector<8x16xf32>
    %cst_132 = arith.constant 1.000000e+00 : f32
    %330 = vector.broadcast %cst_132 : f32 to vector<8x16xf32>
    %331 = arith.addf %330, %329 : vector<8x16xf32>
    %332 = arith.divf %330, %331 : vector<8x16xf32>
    %333 = vector.extract_strided_slice %298 {offsets = [0, 16], sizes = [8, 16], strides = [1, 1]} : vector<8x48xf32> to vector<8x16xf32>
    %334 = vector.extract_strided_slice %292 {offsets = [0, 16], sizes = [8, 16], strides = [1, 1]} : vector<8x48xf32> to vector<8x16xf32>
    %335 = arith.addf %333, %334 : vector<8x16xf32>
    %336 = arith.negf %335 : vector<8x16xf32>
    %337 = math.exp %336 : vector<8x16xf32>
    %cst_133 = arith.constant 1.000000e+00 : f32
    %338 = vector.broadcast %cst_133 : f32 to vector<8x16xf32>
    %339 = arith.addf %338, %337 : vector<8x16xf32>
    %340 = arith.divf %338, %339 : vector<8x16xf32>
    %341 = vector.extract_strided_slice %298 {offsets = [0, 32], sizes = [8, 16], strides = [1, 1]} : vector<8x48xf32> to vector<8x16xf32>
    %342 = vector.extract_strided_slice %292 {offsets = [0, 32], sizes = [8, 16], strides = [1, 1]} : vector<8x48xf32> to vector<8x16xf32>
    %343 = arith.mulf %332, %342 : vector<8x16xf32>
    %344 = arith.addf %341, %343 : vector<8x16xf32>
    %345 = math.tanh %344 : vector<8x16xf32>
    %cst_134 = arith.constant 1.000000e+00 : f32
    %346 = vector.broadcast %cst_134 : f32 to vector<8x16xf32>
    %347 = arith.subf %346, %340 : vector<8x16xf32>
    %348 = arith.mulf %347, %345 : vector<8x16xf32>
    %349 = arith.mulf %340, %284 : vector<8x16xf32>
    %350 = arith.addf %348, %349 : vector<8x16xf32>
    %c0_135 = arith.constant 0 : index
    %c0_136 = arith.constant 0 : index
    %351 = vector.load %arg23[%c0_135, %c0_136] : memref<8x16xf32, #tpu.memory_space<vmem>>, vector<8x16xf32>
    tpu.vector_store %arg23[%c0_135, %c0_136], %324 {strides = array<i32>} : memref<8x16xf32, #tpu.memory_space<vmem>>, vector<8x16xf32>,
    %c0_137 = arith.constant 0 : index
    %c0_138 = arith.constant 0 : index
    %352 = vector.load %arg24[%c0_137, %c0_138] : memref<8x16xf32, #tpu.memory_space<vmem>>, vector<8x16xf32>
    tpu.vector_store %arg24[%c0_137, %c0_138], %350 {strides = array<i32>} : memref<8x16xf32, #tpu.memory_space<vmem>>, vector<8x16xf32>,
    %353 = arith.truncf %324 : vector<8x16xf32> to vector<8x16xbf16>
    %354 = arith.index_cast %c3_i32 : i32 to index
    %c0_139 = arith.constant 0 : index
    %c0_140 = arith.constant 0 : index
    %355 = vector.load %arg25[%354, %c0_139, %c0_140] : memref<8x8x16xbf16, #tpu.memory_space<vmem>>, vector<1x8x16xbf16>
    %356 = vector.shape_cast %355 : vector<1x8x16xbf16> to vector<8x16xbf16>
    %357 = vector.shape_cast %353 : vector<8x16xbf16> to vector<1x8x16xbf16>
    tpu.vector_store %arg25[%354, %c0_139, %c0_140], %357 {strides = array<i32>} : memref<8x8x16xbf16, #tpu.memory_space<vmem>>, vector<1x8x16xbf16>,
    %358 = arith.truncf %350 : vector<8x16xf32> to vector<8x16xbf16>
    %359 = arith.index_cast %282 : i32 to index
    %c0_141 = arith.constant 0 : index
    %c0_142 = arith.constant 0 : index
    %360 = vector.load %arg26[%359, %c0_141, %c0_142] : memref<8x8x16xbf16, #tpu.memory_space<vmem>>, vector<1x8x16xbf16>
    %361 = vector.shape_cast %360 : vector<1x8x16xbf16> to vector<8x16xbf16>
    %362 = vector.shape_cast %358 : vector<8x16xbf16> to vector<1x8x16xbf16>
    tpu.vector_store %arg26[%359, %c0_141, %c0_142], %362 {strides = array<i32>} : memref<8x8x16xbf16, #tpu.memory_space<vmem>>, vector<1x8x16xbf16>,
    %c4_i32 = arith.constant 4 : i32
    %c7_i32_143 = arith.constant 7 : i32
    %363 = arith.subi %c7_i32_143, %c4_i32 : i32
    %c0_144 = arith.constant 0 : index
    %c0_145 = arith.constant 0 : index
    %364 = vector.load %arg23[%c0_144, %c0_145] : memref<8x16xf32, #tpu.memory_space<vmem>>, vector<8x16xf32>
    %c0_146 = arith.constant 0 : index
    %c0_147 = arith.constant 0 : index
    %365 = vector.load %arg24[%c0_146, %c0_147] : memref<8x16xf32, #tpu.memory_space<vmem>>, vector<8x16xf32>
    %366 = arith.truncf %364 : vector<8x16xf32> to vector<8x16xbf16>
    %cst_148 = arith.constant dense<0.000000e+00> : vector<8x48xf32>
    %367 = tpu.matmul %366, %35, %cst_148 {dimension_numbers = #tpu.dot_dimension_numbers<[1], [0], [0], [1], [0, 0, 1, 1], [], []>} : vector<8x16xbf16>, vector<16x48xbf16>, vector<8x48xf32> -> vector<8x48xf32>
    %368 = vector.broadcast %37 : vector<1x48xf32> to vector<8x48xf32>
    %369 = arith.addf %367, %368 : vector<8x48xf32>
    %370 = arith.truncf %365 : vector<8x16xf32> to vector<8x16xbf16>
    %cst_149 = arith.constant dense<0.000000e+00> : vector<8x48xf32>
    %371 = tpu.matmul %370, %36, %cst_149 {dimension_numbers = #tpu.dot_dimension_numbers<[1], [0], [0], [1], [0, 0, 1, 1], [], []>} : vector<8x16xbf16>, vector<16x48xbf16>, vector<8x48xf32> -> vector<8x48xf32>
    %372 = vector.broadcast %38 : vector<1x48xf32> to vector<8x48xf32>
    %373 = arith.addf %371, %372 : vector<8x48xf32>
    %374 = arith.index_cast %c4_i32 : i32 to index
    %c0_150 = arith.constant 0 : index
    %c0_151 = arith.constant 0 : index
    %375 = vector.load %arg21[%374, %c0_150, %c0_151] : memref<8x8x48xf32, #tpu.memory_space<vmem>>, vector<1x8x48xf32>
    %376 = vector.shape_cast %375 : vector<1x8x48xf32> to vector<8x48xf32>
    %377 = arith.index_cast %363 : i32 to index
    %c0_152 = arith.constant 0 : index
    %c0_153 = arith.constant 0 : index
    %378 = vector.load %arg22[%377, %c0_152, %c0_153] : memref<8x8x48xf32, #tpu.memory_space<vmem>>, vector<1x8x48xf32>
    %379 = vector.shape_cast %378 : vector<1x8x48xf32> to vector<8x48xf32>
    %380 = vector.extract_strided_slice %376 {offsets = [0, 0], sizes = [8, 16], strides = [1, 1]} : vector<8x48xf32> to vector<8x16xf32>
    %381 = vector.extract_strided_slice %369 {offsets = [0, 0], sizes = [8, 16], strides = [1, 1]} : vector<8x48xf32> to vector<8x16xf32>
    %382 = arith.addf %380, %381 : vector<8x16xf32>
    %383 = arith.negf %382 : vector<8x16xf32>
    %384 = math.exp %383 : vector<8x16xf32>
    %cst_154 = arith.constant 1.000000e+00 : f32
    %385 = vector.broadcast %cst_154 : f32 to vector<8x16xf32>
    %386 = arith.addf %385, %384 : vector<8x16xf32>
    %387 = arith.divf %385, %386 : vector<8x16xf32>
    %388 = vector.extract_strided_slice %376 {offsets = [0, 16], sizes = [8, 16], strides = [1, 1]} : vector<8x48xf32> to vector<8x16xf32>
    %389 = vector.extract_strided_slice %369 {offsets = [0, 16], sizes = [8, 16], strides = [1, 1]} : vector<8x48xf32> to vector<8x16xf32>
    %390 = arith.addf %388, %389 : vector<8x16xf32>
    %391 = arith.negf %390 : vector<8x16xf32>
    %392 = math.exp %391 : vector<8x16xf32>
    %cst_155 = arith.constant 1.000000e+00 : f32
    %393 = vector.broadcast %cst_155 : f32 to vector<8x16xf32>
    %394 = arith.addf %393, %392 : vector<8x16xf32>
    %395 = arith.divf %393, %394 : vector<8x16xf32>
    %396 = vector.extract_strided_slice %376 {offsets = [0, 32], sizes = [8, 16], strides = [1, 1]} : vector<8x48xf32> to vector<8x16xf32>
    %397 = vector.extract_strided_slice %369 {offsets = [0, 32], sizes = [8, 16], strides = [1, 1]} : vector<8x48xf32> to vector<8x16xf32>
    %398 = arith.mulf %387, %397 : vector<8x16xf32>
    %399 = arith.addf %396, %398 : vector<8x16xf32>
    %400 = math.tanh %399 : vector<8x16xf32>
    %cst_156 = arith.constant 1.000000e+00 : f32
    %401 = vector.broadcast %cst_156 : f32 to vector<8x16xf32>
    %402 = arith.subf %401, %395 : vector<8x16xf32>
    %403 = arith.mulf %402, %400 : vector<8x16xf32>
    %404 = arith.mulf %395, %364 : vector<8x16xf32>
    %405 = arith.addf %403, %404 : vector<8x16xf32>
    %406 = vector.extract_strided_slice %379 {offsets = [0, 0], sizes = [8, 16], strides = [1, 1]} : vector<8x48xf32> to vector<8x16xf32>
    %407 = vector.extract_strided_slice %373 {offsets = [0, 0], sizes = [8, 16], strides = [1, 1]} : vector<8x48xf32> to vector<8x16xf32>
    %408 = arith.addf %406, %407 : vector<8x16xf32>
    %409 = arith.negf %408 : vector<8x16xf32>
    %410 = math.exp %409 : vector<8x16xf32>
    %cst_157 = arith.constant 1.000000e+00 : f32
    %411 = vector.broadcast %cst_157 : f32 to vector<8x16xf32>
    %412 = arith.addf %411, %410 : vector<8x16xf32>
    %413 = arith.divf %411, %412 : vector<8x16xf32>
    %414 = vector.extract_strided_slice %379 {offsets = [0, 16], sizes = [8, 16], strides = [1, 1]} : vector<8x48xf32> to vector<8x16xf32>
    %415 = vector.extract_strided_slice %373 {offsets = [0, 16], sizes = [8, 16], strides = [1, 1]} : vector<8x48xf32> to vector<8x16xf32>
    %416 = arith.addf %414, %415 : vector<8x16xf32>
    %417 = arith.negf %416 : vector<8x16xf32>
    %418 = math.exp %417 : vector<8x16xf32>
    %cst_158 = arith.constant 1.000000e+00 : f32
    %419 = vector.broadcast %cst_158 : f32 to vector<8x16xf32>
    %420 = arith.addf %419, %418 : vector<8x16xf32>
    %421 = arith.divf %419, %420 : vector<8x16xf32>
    %422 = vector.extract_strided_slice %379 {offsets = [0, 32], sizes = [8, 16], strides = [1, 1]} : vector<8x48xf32> to vector<8x16xf32>
    %423 = vector.extract_strided_slice %373 {offsets = [0, 32], sizes = [8, 16], strides = [1, 1]} : vector<8x48xf32> to vector<8x16xf32>
    %424 = arith.mulf %413, %423 : vector<8x16xf32>
    %425 = arith.addf %422, %424 : vector<8x16xf32>
    %426 = math.tanh %425 : vector<8x16xf32>
    %cst_159 = arith.constant 1.000000e+00 : f32
    %427 = vector.broadcast %cst_159 : f32 to vector<8x16xf32>
    %428 = arith.subf %427, %421 : vector<8x16xf32>
    %429 = arith.mulf %428, %426 : vector<8x16xf32>
    %430 = arith.mulf %421, %365 : vector<8x16xf32>
    %431 = arith.addf %429, %430 : vector<8x16xf32>
    %c0_160 = arith.constant 0 : index
    %c0_161 = arith.constant 0 : index
    %432 = vector.load %arg23[%c0_160, %c0_161] : memref<8x16xf32, #tpu.memory_space<vmem>>, vector<8x16xf32>
    tpu.vector_store %arg23[%c0_160, %c0_161], %405 {strides = array<i32>} : memref<8x16xf32, #tpu.memory_space<vmem>>, vector<8x16xf32>,
    %c0_162 = arith.constant 0 : index
    %c0_163 = arith.constant 0 : index
    %433 = vector.load %arg24[%c0_162, %c0_163] : memref<8x16xf32, #tpu.memory_space<vmem>>, vector<8x16xf32>
    tpu.vector_store %arg24[%c0_162, %c0_163], %431 {strides = array<i32>} : memref<8x16xf32, #tpu.memory_space<vmem>>, vector<8x16xf32>,
    %434 = arith.truncf %405 : vector<8x16xf32> to vector<8x16xbf16>
    %435 = arith.index_cast %c4_i32 : i32 to index
    %c0_164 = arith.constant 0 : index
    %c0_165 = arith.constant 0 : index
    %436 = vector.load %arg25[%435, %c0_164, %c0_165] : memref<8x8x16xbf16, #tpu.memory_space<vmem>>, vector<1x8x16xbf16>
    %437 = vector.shape_cast %436 : vector<1x8x16xbf16> to vector<8x16xbf16>
    %438 = vector.shape_cast %434 : vector<8x16xbf16> to vector<1x8x16xbf16>
    tpu.vector_store %arg25[%435, %c0_164, %c0_165], %438 {strides = array<i32>} : memref<8x8x16xbf16, #tpu.memory_space<vmem>>, vector<1x8x16xbf16>,
    %439 = arith.truncf %431 : vector<8x16xf32> to vector<8x16xbf16>
    %440 = arith.index_cast %363 : i32 to index
    %c0_166 = arith.constant 0 : index
    %c0_167 = arith.constant 0 : index
    %441 = vector.load %arg26[%440, %c0_166, %c0_167] : memref<8x8x16xbf16, #tpu.memory_space<vmem>>, vector<1x8x16xbf16>
    %442 = vector.shape_cast %441 : vector<1x8x16xbf16> to vector<8x16xbf16>
    %443 = vector.shape_cast %439 : vector<8x16xbf16> to vector<1x8x16xbf16>
    tpu.vector_store %arg26[%440, %c0_166, %c0_167], %443 {strides = array<i32>} : memref<8x8x16xbf16, #tpu.memory_space<vmem>>, vector<1x8x16xbf16>,
    %c5_i32 = arith.constant 5 : i32
    %c7_i32_168 = arith.constant 7 : i32
    %444 = arith.subi %c7_i32_168, %c5_i32 : i32
    %c0_169 = arith.constant 0 : index
    %c0_170 = arith.constant 0 : index
    %445 = vector.load %arg23[%c0_169, %c0_170] : memref<8x16xf32, #tpu.memory_space<vmem>>, vector<8x16xf32>
    %c0_171 = arith.constant 0 : index
    %c0_172 = arith.constant 0 : index
    %446 = vector.load %arg24[%c0_171, %c0_172] : memref<8x16xf32, #tpu.memory_space<vmem>>, vector<8x16xf32>
    %447 = arith.truncf %445 : vector<8x16xf32> to vector<8x16xbf16>
    %cst_173 = arith.constant dense<0.000000e+00> : vector<8x48xf32>
    %448 = tpu.matmul %447, %35, %cst_173 {dimension_numbers = #tpu.dot_dimension_numbers<[1], [0], [0], [1], [0, 0, 1, 1], [], []>} : vector<8x16xbf16>, vector<16x48xbf16>, vector<8x48xf32> -> vector<8x48xf32>
    %449 = vector.broadcast %37 : vector<1x48xf32> to vector<8x48xf32>
    %450 = arith.addf %448, %449 : vector<8x48xf32>
    %451 = arith.truncf %446 : vector<8x16xf32> to vector<8x16xbf16>
    %cst_174 = arith.constant dense<0.000000e+00> : vector<8x48xf32>
    %452 = tpu.matmul %451, %36, %cst_174 {dimension_numbers = #tpu.dot_dimension_numbers<[1], [0], [0], [1], [0, 0, 1, 1], [], []>} : vector<8x16xbf16>, vector<16x48xbf16>, vector<8x48xf32> -> vector<8x48xf32>
    %453 = vector.broadcast %38 : vector<1x48xf32> to vector<8x48xf32>
    %454 = arith.addf %452, %453 : vector<8x48xf32>
    %455 = arith.index_cast %c5_i32 : i32 to index
    %c0_175 = arith.constant 0 : index
    %c0_176 = arith.constant 0 : index
    %456 = vector.load %arg21[%455, %c0_175, %c0_176] : memref<8x8x48xf32, #tpu.memory_space<vmem>>, vector<1x8x48xf32>
    %457 = vector.shape_cast %456 : vector<1x8x48xf32> to vector<8x48xf32>
    %458 = arith.index_cast %444 : i32 to index
    %c0_177 = arith.constant 0 : index
    %c0_178 = arith.constant 0 : index
    %459 = vector.load %arg22[%458, %c0_177, %c0_178] : memref<8x8x48xf32, #tpu.memory_space<vmem>>, vector<1x8x48xf32>
    %460 = vector.shape_cast %459 : vector<1x8x48xf32> to vector<8x48xf32>
    %461 = vector.extract_strided_slice %457 {offsets = [0, 0], sizes = [8, 16], strides = [1, 1]} : vector<8x48xf32> to vector<8x16xf32>
    %462 = vector.extract_strided_slice %450 {offsets = [0, 0], sizes = [8, 16], strides = [1, 1]} : vector<8x48xf32> to vector<8x16xf32>
    %463 = arith.addf %461, %462 : vector<8x16xf32>
    %464 = arith.negf %463 : vector<8x16xf32>
    %465 = math.exp %464 : vector<8x16xf32>
    %cst_179 = arith.constant 1.000000e+00 : f32
    %466 = vector.broadcast %cst_179 : f32 to vector<8x16xf32>
    %467 = arith.addf %466, %465 : vector<8x16xf32>
    %468 = arith.divf %466, %467 : vector<8x16xf32>
    %469 = vector.extract_strided_slice %457 {offsets = [0, 16], sizes = [8, 16], strides = [1, 1]} : vector<8x48xf32> to vector<8x16xf32>
    %470 = vector.extract_strided_slice %450 {offsets = [0, 16], sizes = [8, 16], strides = [1, 1]} : vector<8x48xf32> to vector<8x16xf32>
    %471 = arith.addf %469, %470 : vector<8x16xf32>
    %472 = arith.negf %471 : vector<8x16xf32>
    %473 = math.exp %472 : vector<8x16xf32>
    %cst_180 = arith.constant 1.000000e+00 : f32
    %474 = vector.broadcast %cst_180 : f32 to vector<8x16xf32>
    %475 = arith.addf %474, %473 : vector<8x16xf32>
    %476 = arith.divf %474, %475 : vector<8x16xf32>
    %477 = vector.extract_strided_slice %457 {offsets = [0, 32], sizes = [8, 16], strides = [1, 1]} : vector<8x48xf32> to vector<8x16xf32>
    %478 = vector.extract_strided_slice %450 {offsets = [0, 32], sizes = [8, 16], strides = [1, 1]} : vector<8x48xf32> to vector<8x16xf32>
    %479 = arith.mulf %468, %478 : vector<8x16xf32>
    %480 = arith.addf %477, %479 : vector<8x16xf32>
    %481 = math.tanh %480 : vector<8x16xf32>
    %cst_181 = arith.constant 1.000000e+00 : f32
    %482 = vector.broadcast %cst_181 : f32 to vector<8x16xf32>
    %483 = arith.subf %482, %476 : vector<8x16xf32>
    %484 = arith.mulf %483, %481 : vector<8x16xf32>
    %485 = arith.mulf %476, %445 : vector<8x16xf32>
    %486 = arith.addf %484, %485 : vector<8x16xf32>
    %487 = vector.extract_strided_slice %460 {offsets = [0, 0], sizes = [8, 16], strides = [1, 1]} : vector<8x48xf32> to vector<8x16xf32>
    %488 = vector.extract_strided_slice %454 {offsets = [0, 0], sizes = [8, 16], strides = [1, 1]} : vector<8x48xf32> to vector<8x16xf32>
    %489 = arith.addf %487, %488 : vector<8x16xf32>
    %490 = arith.negf %489 : vector<8x16xf32>
    %491 = math.exp %490 : vector<8x16xf32>
    %cst_182 = arith.constant 1.000000e+00 : f32
    %492 = vector.broadcast %cst_182 : f32 to vector<8x16xf32>
    %493 = arith.addf %492, %491 : vector<8x16xf32>
    %494 = arith.divf %492, %493 : vector<8x16xf32>
    %495 = vector.extract_strided_slice %460 {offsets = [0, 16], sizes = [8, 16], strides = [1, 1]} : vector<8x48xf32> to vector<8x16xf32>
    %496 = vector.extract_strided_slice %454 {offsets = [0, 16], sizes = [8, 16], strides = [1, 1]} : vector<8x48xf32> to vector<8x16xf32>
    %497 = arith.addf %495, %496 : vector<8x16xf32>
    %498 = arith.negf %497 : vector<8x16xf32>
    %499 = math.exp %498 : vector<8x16xf32>
    %cst_183 = arith.constant 1.000000e+00 : f32
    %500 = vector.broadcast %cst_183 : f32 to vector<8x16xf32>
    %501 = arith.addf %500, %499 : vector<8x16xf32>
    %502 = arith.divf %500, %501 : vector<8x16xf32>
    %503 = vector.extract_strided_slice %460 {offsets = [0, 32], sizes = [8, 16], strides = [1, 1]} : vector<8x48xf32> to vector<8x16xf32>
    %504 = vector.extract_strided_slice %454 {offsets = [0, 32], sizes = [8, 16], strides = [1, 1]} : vector<8x48xf32> to vector<8x16xf32>
    %505 = arith.mulf %494, %504 : vector<8x16xf32>
    %506 = arith.addf %503, %505 : vector<8x16xf32>
    %507 = math.tanh %506 : vector<8x16xf32>
    %cst_184 = arith.constant 1.000000e+00 : f32
    %508 = vector.broadcast %cst_184 : f32 to vector<8x16xf32>
    %509 = arith.subf %508, %502 : vector<8x16xf32>
    %510 = arith.mulf %509, %507 : vector<8x16xf32>
    %511 = arith.mulf %502, %446 : vector<8x16xf32>
    %512 = arith.addf %510, %511 : vector<8x16xf32>
    %c0_185 = arith.constant 0 : index
    %c0_186 = arith.constant 0 : index
    %513 = vector.load %arg23[%c0_185, %c0_186] : memref<8x16xf32, #tpu.memory_space<vmem>>, vector<8x16xf32>
    tpu.vector_store %arg23[%c0_185, %c0_186], %486 {strides = array<i32>} : memref<8x16xf32, #tpu.memory_space<vmem>>, vector<8x16xf32>,
    %c0_187 = arith.constant 0 : index
    %c0_188 = arith.constant 0 : index
    %514 = vector.load %arg24[%c0_187, %c0_188] : memref<8x16xf32, #tpu.memory_space<vmem>>, vector<8x16xf32>
    tpu.vector_store %arg24[%c0_187, %c0_188], %512 {strides = array<i32>} : memref<8x16xf32, #tpu.memory_space<vmem>>, vector<8x16xf32>,
    %515 = arith.truncf %486 : vector<8x16xf32> to vector<8x16xbf16>
    %516 = arith.index_cast %c5_i32 : i32 to index
    %c0_189 = arith.constant 0 : index
    %c0_190 = arith.constant 0 : index
    %517 = vector.load %arg25[%516, %c0_189, %c0_190] : memref<8x8x16xbf16, #tpu.memory_space<vmem>>, vector<1x8x16xbf16>
    %518 = vector.shape_cast %517 : vector<1x8x16xbf16> to vector<8x16xbf16>
    %519 = vector.shape_cast %515 : vector<8x16xbf16> to vector<1x8x16xbf16>
    tpu.vector_store %arg25[%516, %c0_189, %c0_190], %519 {strides = array<i32>} : memref<8x8x16xbf16, #tpu.memory_space<vmem>>, vector<1x8x16xbf16>,
    %520 = arith.truncf %512 : vector<8x16xf32> to vector<8x16xbf16>
    %521 = arith.index_cast %444 : i32 to index
    %c0_191 = arith.constant 0 : index
    %c0_192 = arith.constant 0 : index
    %522 = vector.load %arg26[%521, %c0_191, %c0_192] : memref<8x8x16xbf16, #tpu.memory_space<vmem>>, vector<1x8x16xbf16>
    %523 = vector.shape_cast %522 : vector<1x8x16xbf16> to vector<8x16xbf16>
    %524 = vector.shape_cast %520 : vector<8x16xbf16> to vector<1x8x16xbf16>
    tpu.vector_store %arg26[%521, %c0_191, %c0_192], %524 {strides = array<i32>} : memref<8x8x16xbf16, #tpu.memory_space<vmem>>, vector<1x8x16xbf16>,
    %c6_i32 = arith.constant 6 : i32
    %c7_i32_193 = arith.constant 7 : i32
    %525 = arith.subi %c7_i32_193, %c6_i32 : i32
    %c0_194 = arith.constant 0 : index
    %c0_195 = arith.constant 0 : index
    %526 = vector.load %arg23[%c0_194, %c0_195] : memref<8x16xf32, #tpu.memory_space<vmem>>, vector<8x16xf32>
    %c0_196 = arith.constant 0 : index
    %c0_197 = arith.constant 0 : index
    %527 = vector.load %arg24[%c0_196, %c0_197] : memref<8x16xf32, #tpu.memory_space<vmem>>, vector<8x16xf32>
    %528 = arith.truncf %526 : vector<8x16xf32> to vector<8x16xbf16>
    %cst_198 = arith.constant dense<0.000000e+00> : vector<8x48xf32>
    %529 = tpu.matmul %528, %35, %cst_198 {dimension_numbers = #tpu.dot_dimension_numbers<[1], [0], [0], [1], [0, 0, 1, 1], [], []>} : vector<8x16xbf16>, vector<16x48xbf16>, vector<8x48xf32> -> vector<8x48xf32>
    %530 = vector.broadcast %37 : vector<1x48xf32> to vector<8x48xf32>
    %531 = arith.addf %529, %530 : vector<8x48xf32>
    %532 = arith.truncf %527 : vector<8x16xf32> to vector<8x16xbf16>
    %cst_199 = arith.constant dense<0.000000e+00> : vector<8x48xf32>
    %533 = tpu.matmul %532, %36, %cst_199 {dimension_numbers = #tpu.dot_dimension_numbers<[1], [0], [0], [1], [0, 0, 1, 1], [], []>} : vector<8x16xbf16>, vector<16x48xbf16>, vector<8x48xf32> -> vector<8x48xf32>
    %534 = vector.broadcast %38 : vector<1x48xf32> to vector<8x48xf32>
    %535 = arith.addf %533, %534 : vector<8x48xf32>
    %536 = arith.index_cast %c6_i32 : i32 to index
    %c0_200 = arith.constant 0 : index
    %c0_201 = arith.constant 0 : index
    %537 = vector.load %arg21[%536, %c0_200, %c0_201] : memref<8x8x48xf32, #tpu.memory_space<vmem>>, vector<1x8x48xf32>
    %538 = vector.shape_cast %537 : vector<1x8x48xf32> to vector<8x48xf32>
    %539 = arith.index_cast %525 : i32 to index
    %c0_202 = arith.constant 0 : index
    %c0_203 = arith.constant 0 : index
    %540 = vector.load %arg22[%539, %c0_202, %c0_203] : memref<8x8x48xf32, #tpu.memory_space<vmem>>, vector<1x8x48xf32>
    %541 = vector.shape_cast %540 : vector<1x8x48xf32> to vector<8x48xf32>
    %542 = vector.extract_strided_slice %538 {offsets = [0, 0], sizes = [8, 16], strides = [1, 1]} : vector<8x48xf32> to vector<8x16xf32>
    %543 = vector.extract_strided_slice %531 {offsets = [0, 0], sizes = [8, 16], strides = [1, 1]} : vector<8x48xf32> to vector<8x16xf32>
    %544 = arith.addf %542, %543 : vector<8x16xf32>
    %545 = arith.negf %544 : vector<8x16xf32>
    %546 = math.exp %545 : vector<8x16xf32>
    %cst_204 = arith.constant 1.000000e+00 : f32
    %547 = vector.broadcast %cst_204 : f32 to vector<8x16xf32>
    %548 = arith.addf %547, %546 : vector<8x16xf32>
    %549 = arith.divf %547, %548 : vector<8x16xf32>
    %550 = vector.extract_strided_slice %538 {offsets = [0, 16], sizes = [8, 16], strides = [1, 1]} : vector<8x48xf32> to vector<8x16xf32>
    %551 = vector.extract_strided_slice %531 {offsets = [0, 16], sizes = [8, 16], strides = [1, 1]} : vector<8x48xf32> to vector<8x16xf32>
    %552 = arith.addf %550, %551 : vector<8x16xf32>
    %553 = arith.negf %552 : vector<8x16xf32>
    %554 = math.exp %553 : vector<8x16xf32>
    %cst_205 = arith.constant 1.000000e+00 : f32
    %555 = vector.broadcast %cst_205 : f32 to vector<8x16xf32>
    %556 = arith.addf %555, %554 : vector<8x16xf32>
    %557 = arith.divf %555, %556 : vector<8x16xf32>
    %558 = vector.extract_strided_slice %538 {offsets = [0, 32], sizes = [8, 16], strides = [1, 1]} : vector<8x48xf32> to vector<8x16xf32>
    %559 = vector.extract_strided_slice %531 {offsets = [0, 32], sizes = [8, 16], strides = [1, 1]} : vector<8x48xf32> to vector<8x16xf32>
    %560 = arith.mulf %549, %559 : vector<8x16xf32>
    %561 = arith.addf %558, %560 : vector<8x16xf32>
    %562 = math.tanh %561 : vector<8x16xf32>
    %cst_206 = arith.constant 1.000000e+00 : f32
    %563 = vector.broadcast %cst_206 : f32 to vector<8x16xf32>
    %564 = arith.subf %563, %557 : vector<8x16xf32>
    %565 = arith.mulf %564, %562 : vector<8x16xf32>
    %566 = arith.mulf %557, %526 : vector<8x16xf32>
    %567 = arith.addf %565, %566 : vector<8x16xf32>
    %568 = vector.extract_strided_slice %541 {offsets = [0, 0], sizes = [8, 16], strides = [1, 1]} : vector<8x48xf32> to vector<8x16xf32>
    %569 = vector.extract_strided_slice %535 {offsets = [0, 0], sizes = [8, 16], strides = [1, 1]} : vector<8x48xf32> to vector<8x16xf32>
    %570 = arith.addf %568, %569 : vector<8x16xf32>
    %571 = arith.negf %570 : vector<8x16xf32>
    %572 = math.exp %571 : vector<8x16xf32>
    %cst_207 = arith.constant 1.000000e+00 : f32
    %573 = vector.broadcast %cst_207 : f32 to vector<8x16xf32>
    %574 = arith.addf %573, %572 : vector<8x16xf32>
    %575 = arith.divf %573, %574 : vector<8x16xf32>
    %576 = vector.extract_strided_slice %541 {offsets = [0, 16], sizes = [8, 16], strides = [1, 1]} : vector<8x48xf32> to vector<8x16xf32>
    %577 = vector.extract_strided_slice %535 {offsets = [0, 16], sizes = [8, 16], strides = [1, 1]} : vector<8x48xf32> to vector<8x16xf32>
    %578 = arith.addf %576, %577 : vector<8x16xf32>
    %579 = arith.negf %578 : vector<8x16xf32>
    %580 = math.exp %579 : vector<8x16xf32>
    %cst_208 = arith.constant 1.000000e+00 : f32
    %581 = vector.broadcast %cst_208 : f32 to vector<8x16xf32>
    %582 = arith.addf %581, %580 : vector<8x16xf32>
    %583 = arith.divf %581, %582 : vector<8x16xf32>
    %584 = vector.extract_strided_slice %541 {offsets = [0, 32], sizes = [8, 16], strides = [1, 1]} : vector<8x48xf32> to vector<8x16xf32>
    %585 = vector.extract_strided_slice %535 {offsets = [0, 32], sizes = [8, 16], strides = [1, 1]} : vector<8x48xf32> to vector<8x16xf32>
    %586 = arith.mulf %575, %585 : vector<8x16xf32>
    %587 = arith.addf %584, %586 : vector<8x16xf32>
    %588 = math.tanh %587 : vector<8x16xf32>
    %cst_209 = arith.constant 1.000000e+00 : f32
    %589 = vector.broadcast %cst_209 : f32 to vector<8x16xf32>
    %590 = arith.subf %589, %583 : vector<8x16xf32>
    %591 = arith.mulf %590, %588 : vector<8x16xf32>
    %592 = arith.mulf %583, %527 : vector<8x16xf32>
    %593 = arith.addf %591, %592 : vector<8x16xf32>
    %c0_210 = arith.constant 0 : index
    %c0_211 = arith.constant 0 : index
    %594 = vector.load %arg23[%c0_210, %c0_211] : memref<8x16xf32, #tpu.memory_space<vmem>>, vector<8x16xf32>
    tpu.vector_store %arg23[%c0_210, %c0_211], %567 {strides = array<i32>} : memref<8x16xf32, #tpu.memory_space<vmem>>, vector<8x16xf32>,
    %c0_212 = arith.constant 0 : index
    %c0_213 = arith.constant 0 : index
    %595 = vector.load %arg24[%c0_212, %c0_213] : memref<8x16xf32, #tpu.memory_space<vmem>>, vector<8x16xf32>
    tpu.vector_store %arg24[%c0_212, %c0_213], %593 {strides = array<i32>} : memref<8x16xf32, #tpu.memory_space<vmem>>, vector<8x16xf32>,
    %596 = arith.truncf %567 : vector<8x16xf32> to vector<8x16xbf16>
    %597 = arith.index_cast %c6_i32 : i32 to index
    %c0_214 = arith.constant 0 : index
    %c0_215 = arith.constant 0 : index
    %598 = vector.load %arg25[%597, %c0_214, %c0_215] : memref<8x8x16xbf16, #tpu.memory_space<vmem>>, vector<1x8x16xbf16>
    %599 = vector.shape_cast %598 : vector<1x8x16xbf16> to vector<8x16xbf16>
    %600 = vector.shape_cast %596 : vector<8x16xbf16> to vector<1x8x16xbf16>
    tpu.vector_store %arg25[%597, %c0_214, %c0_215], %600 {strides = array<i32>} : memref<8x8x16xbf16, #tpu.memory_space<vmem>>, vector<1x8x16xbf16>,
    %601 = arith.truncf %593 : vector<8x16xf32> to vector<8x16xbf16>
    %602 = arith.index_cast %525 : i32 to index
    %c0_216 = arith.constant 0 : index
    %c0_217 = arith.constant 0 : index
    %603 = vector.load %arg26[%602, %c0_216, %c0_217] : memref<8x8x16xbf16, #tpu.memory_space<vmem>>, vector<1x8x16xbf16>
    %604 = vector.shape_cast %603 : vector<1x8x16xbf16> to vector<8x16xbf16>
    %605 = vector.shape_cast %601 : vector<8x16xbf16> to vector<1x8x16xbf16>
    tpu.vector_store %arg26[%602, %c0_216, %c0_217], %605 {strides = array<i32>} : memref<8x8x16xbf16, #tpu.memory_space<vmem>>, vector<1x8x16xbf16>,
    %c7_i32_218 = arith.constant 7 : i32
    %c7_i32_219 = arith.constant 7 : i32
    %606 = arith.subi %c7_i32_219, %c7_i32_218 : i32
    %c0_220 = arith.constant 0 : index
    %c0_221 = arith.constant 0 : index
    %607 = vector.load %arg23[%c0_220, %c0_221] : memref<8x16xf32, #tpu.memory_space<vmem>>, vector<8x16xf32>
    %c0_222 = arith.constant 0 : index
    %c0_223 = arith.constant 0 : index
    %608 = vector.load %arg24[%c0_222, %c0_223] : memref<8x16xf32, #tpu.memory_space<vmem>>, vector<8x16xf32>
    %609 = arith.truncf %607 : vector<8x16xf32> to vector<8x16xbf16>
    %cst_224 = arith.constant dense<0.000000e+00> : vector<8x48xf32>
    %610 = tpu.matmul %609, %35, %cst_224 {dimension_numbers = #tpu.dot_dimension_numbers<[1], [0], [0], [1], [0, 0, 1, 1], [], []>} : vector<8x16xbf16>, vector<16x48xbf16>, vector<8x48xf32> -> vector<8x48xf32>
    %611 = vector.broadcast %37 : vector<1x48xf32> to vector<8x48xf32>
    %612 = arith.addf %610, %611 : vector<8x48xf32>
    %613 = arith.truncf %608 : vector<8x16xf32> to vector<8x16xbf16>
    %cst_225 = arith.constant dense<0.000000e+00> : vector<8x48xf32>
    %614 = tpu.matmul %613, %36, %cst_225 {dimension_numbers = #tpu.dot_dimension_numbers<[1], [0], [0], [1], [0, 0, 1, 1], [], []>} : vector<8x16xbf16>, vector<16x48xbf16>, vector<8x48xf32> -> vector<8x48xf32>
    %615 = vector.broadcast %38 : vector<1x48xf32> to vector<8x48xf32>
    %616 = arith.addf %614, %615 : vector<8x48xf32>
    %617 = arith.index_cast %c7_i32_218 : i32 to index
    %c0_226 = arith.constant 0 : index
    %c0_227 = arith.constant 0 : index
    %618 = vector.load %arg21[%617, %c0_226, %c0_227] : memref<8x8x48xf32, #tpu.memory_space<vmem>>, vector<1x8x48xf32>
    %619 = vector.shape_cast %618 : vector<1x8x48xf32> to vector<8x48xf32>
    %620 = arith.index_cast %606 : i32 to index
    %c0_228 = arith.constant 0 : index
    %c0_229 = arith.constant 0 : index
    %621 = vector.load %arg22[%620, %c0_228, %c0_229] : memref<8x8x48xf32, #tpu.memory_space<vmem>>, vector<1x8x48xf32>
    %622 = vector.shape_cast %621 : vector<1x8x48xf32> to vector<8x48xf32>
    %623 = vector.extract_strided_slice %619 {offsets = [0, 0], sizes = [8, 16], strides = [1, 1]} : vector<8x48xf32> to vector<8x16xf32>
    %624 = vector.extract_strided_slice %612 {offsets = [0, 0], sizes = [8, 16], strides = [1, 1]} : vector<8x48xf32> to vector<8x16xf32>
    %625 = arith.addf %623, %624 : vector<8x16xf32>
    %626 = arith.negf %625 : vector<8x16xf32>
    %627 = math.exp %626 : vector<8x16xf32>
    %cst_230 = arith.constant 1.000000e+00 : f32
    %628 = vector.broadcast %cst_230 : f32 to vector<8x16xf32>
    %629 = arith.addf %628, %627 : vector<8x16xf32>
    %630 = arith.divf %628, %629 : vector<8x16xf32>
    %631 = vector.extract_strided_slice %619 {offsets = [0, 16], sizes = [8, 16], strides = [1, 1]} : vector<8x48xf32> to vector<8x16xf32>
    %632 = vector.extract_strided_slice %612 {offsets = [0, 16], sizes = [8, 16], strides = [1, 1]} : vector<8x48xf32> to vector<8x16xf32>
    %633 = arith.addf %631, %632 : vector<8x16xf32>
    %634 = arith.negf %633 : vector<8x16xf32>
    %635 = math.exp %634 : vector<8x16xf32>
    %cst_231 = arith.constant 1.000000e+00 : f32
    %636 = vector.broadcast %cst_231 : f32 to vector<8x16xf32>
    %637 = arith.addf %636, %635 : vector<8x16xf32>
    %638 = arith.divf %636, %637 : vector<8x16xf32>
    %639 = vector.extract_strided_slice %619 {offsets = [0, 32], sizes = [8, 16], strides = [1, 1]} : vector<8x48xf32> to vector<8x16xf32>
    %640 = vector.extract_strided_slice %612 {offsets = [0, 32], sizes = [8, 16], strides = [1, 1]} : vector<8x48xf32> to vector<8x16xf32>
    %641 = arith.mulf %630, %640 : vector<8x16xf32>
    %642 = arith.addf %639, %641 : vector<8x16xf32>
    %643 = math.tanh %642 : vector<8x16xf32>
    %cst_232 = arith.constant 1.000000e+00 : f32
    %644 = vector.broadcast %cst_232 : f32 to vector<8x16xf32>
    %645 = arith.subf %644, %638 : vector<8x16xf32>
    %646 = arith.mulf %645, %643 : vector<8x16xf32>
    %647 = arith.mulf %638, %607 : vector<8x16xf32>
    %648 = arith.addf %646, %647 : vector<8x16xf32>
    %649 = vector.extract_strided_slice %622 {offsets = [0, 0], sizes = [8, 16], strides = [1, 1]} : vector<8x48xf32> to vector<8x16xf32>
    %650 = vector.extract_strided_slice %616 {offsets = [0, 0], sizes = [8, 16], strides = [1, 1]} : vector<8x48xf32> to vector<8x16xf32>
    %651 = arith.addf %649, %650 : vector<8x16xf32>
    %652 = arith.negf %651 : vector<8x16xf32>
    %653 = math.exp %652 : vector<8x16xf32>
    %cst_233 = arith.constant 1.000000e+00 : f32
    %654 = vector.broadcast %cst_233 : f32 to vector<8x16xf32>
    %655 = arith.addf %654, %653 : vector<8x16xf32>
    %656 = arith.divf %654, %655 : vector<8x16xf32>
    %657 = vector.extract_strided_slice %622 {offsets = [0, 16], sizes = [8, 16], strides = [1, 1]} : vector<8x48xf32> to vector<8x16xf32>
    %658 = vector.extract_strided_slice %616 {offsets = [0, 16], sizes = [8, 16], strides = [1, 1]} : vector<8x48xf32> to vector<8x16xf32>
    %659 = arith.addf %657, %658 : vector<8x16xf32>
    %660 = arith.negf %659 : vector<8x16xf32>
    %661 = math.exp %660 : vector<8x16xf32>
    %cst_234 = arith.constant 1.000000e+00 : f32
    %662 = vector.broadcast %cst_234 : f32 to vector<8x16xf32>
    %663 = arith.addf %662, %661 : vector<8x16xf32>
    %664 = arith.divf %662, %663 : vector<8x16xf32>
    %665 = vector.extract_strided_slice %622 {offsets = [0, 32], sizes = [8, 16], strides = [1, 1]} : vector<8x48xf32> to vector<8x16xf32>
    %666 = vector.extract_strided_slice %616 {offsets = [0, 32], sizes = [8, 16], strides = [1, 1]} : vector<8x48xf32> to vector<8x16xf32>
    %667 = arith.mulf %656, %666 : vector<8x16xf32>
    %668 = arith.addf %665, %667 : vector<8x16xf32>
    %669 = math.tanh %668 : vector<8x16xf32>
    %cst_235 = arith.constant 1.000000e+00 : f32
    %670 = vector.broadcast %cst_235 : f32 to vector<8x16xf32>
    %671 = arith.subf %670, %664 : vector<8x16xf32>
    %672 = arith.mulf %671, %669 : vector<8x16xf32>
    %673 = arith.mulf %664, %608 : vector<8x16xf32>
    %674 = arith.addf %672, %673 : vector<8x16xf32>
    %c0_236 = arith.constant 0 : index
    %c0_237 = arith.constant 0 : index
    %675 = vector.load %arg23[%c0_236, %c0_237] : memref<8x16xf32, #tpu.memory_space<vmem>>, vector<8x16xf32>
    tpu.vector_store %arg23[%c0_236, %c0_237], %648 {strides = array<i32>} : memref<8x16xf32, #tpu.memory_space<vmem>>, vector<8x16xf32>,
    %c0_238 = arith.constant 0 : index
    %c0_239 = arith.constant 0 : index
    %676 = vector.load %arg24[%c0_238, %c0_239] : memref<8x16xf32, #tpu.memory_space<vmem>>, vector<8x16xf32>
    tpu.vector_store %arg24[%c0_238, %c0_239], %674 {strides = array<i32>} : memref<8x16xf32, #tpu.memory_space<vmem>>, vector<8x16xf32>,
    %677 = arith.truncf %648 : vector<8x16xf32> to vector<8x16xbf16>
    %678 = arith.index_cast %c7_i32_218 : i32 to index
    %c0_240 = arith.constant 0 : index
    %c0_241 = arith.constant 0 : index
    %679 = vector.load %arg25[%678, %c0_240, %c0_241] : memref<8x8x16xbf16, #tpu.memory_space<vmem>>, vector<1x8x16xbf16>
    %680 = vector.shape_cast %679 : vector<1x8x16xbf16> to vector<8x16xbf16>
    %681 = vector.shape_cast %677 : vector<8x16xbf16> to vector<1x8x16xbf16>
    tpu.vector_store %arg25[%678, %c0_240, %c0_241], %681 {strides = array<i32>} : memref<8x8x16xbf16, #tpu.memory_space<vmem>>, vector<1x8x16xbf16>,
    %682 = arith.truncf %674 : vector<8x16xf32> to vector<8x16xbf16>
    %683 = arith.index_cast %606 : i32 to index
    %c0_242 = arith.constant 0 : index
    %c0_243 = arith.constant 0 : index
    %684 = vector.load %arg26[%683, %c0_242, %c0_243] : memref<8x8x16xbf16, #tpu.memory_space<vmem>>, vector<1x8x16xbf16>
    %685 = vector.shape_cast %684 : vector<1x8x16xbf16> to vector<8x16xbf16>
    %686 = vector.shape_cast %682 : vector<8x16xbf16> to vector<1x8x16xbf16>
    tpu.vector_store %arg26[%683, %c0_242, %c0_243], %686 {strides = array<i32>} : memref<8x8x16xbf16, #tpu.memory_space<vmem>>, vector<1x8x16xbf16>,
    %c8_i32 = arith.constant 8 : i32
    %c0_244 = arith.constant 0 : index
    %c0_245 = arith.constant 0 : index
    %c0_246 = arith.constant 0 : index
    %687 = vector.load %arg25[%c0_244, %c0_245, %c0_246] : memref<8x8x16xbf16, #tpu.memory_space<vmem>>, vector<8x8x16xbf16>
    %688 = vector.shape_cast %687 : vector<8x8x16xbf16> to vector<64x16xbf16>
    %c0_247 = arith.constant 0 : index
    %c0_248 = arith.constant 0 : index
    %c0_249 = arith.constant 0 : index
    %689 = vector.load %arg26[%c0_247, %c0_248, %c0_249] : memref<8x8x16xbf16, #tpu.memory_space<vmem>>, vector<8x8x16xbf16>
    %690 = vector.shape_cast %689 : vector<8x8x16xbf16> to vector<64x16xbf16>
    %c0_250 = arith.constant 0 : index
    %c0_251 = arith.constant 0 : index
    %691 = vector.load %arg16[%c0_250, %c0_251] : memref<16x128xbf16, #tpu.memory_space<vmem>>, vector<16x128xbf16>
    %cst_252 = arith.constant dense<0.000000e+00> : vector<64x128xf32>
    %692 = tpu.matmul %688, %691, %cst_252 {dimension_numbers = #tpu.dot_dimension_numbers<[1], [0], [0], [1], [0, 0, 1, 1], [], []>} : vector<64x16xbf16>, vector<16x128xbf16>, vector<64x128xf32> -> vector<64x128xf32>
    %693 = vector.shape_cast %692 : vector<64x128xf32> to vector<8x8x128xf32>
    %c0_253 = arith.constant 0 : index
    %c0_254 = arith.constant 0 : index
    %c0_255 = arith.constant 0 : index
    %694 = vector.load %arg19[%c0_253, %c0_254, %c0_255] : memref<8x8x128xf32, #tpu.memory_space<vmem>>, vector<8x8x128xf32>
    tpu.vector_store %arg19[%c0_253, %c0_254, %c0_255], %693 {strides = array<i32>} : memref<8x8x128xf32, #tpu.memory_space<vmem>>, vector<8x8x128xf32>,
    %c0_256 = arith.constant 0 : index
    %c0_257 = arith.constant 0 : index
    %695 = vector.load %arg17[%c0_256, %c0_257] : memref<16x128xbf16, #tpu.memory_space<vmem>>, vector<16x128xbf16>
    %cst_258 = arith.constant dense<0.000000e+00> : vector<64x128xf32>
    %696 = tpu.matmul %690, %695, %cst_258 {dimension_numbers = #tpu.dot_dimension_numbers<[1], [0], [0], [1], [0, 0, 1, 1], [], []>} : vector<64x16xbf16>, vector<16x128xbf16>, vector<64x128xf32> -> vector<64x128xf32>
    %c0_259 = arith.constant 0 : index
    %c0_260 = arith.constant 0 : index
    %697 = vector.load %arg18[%c0_259, %c0_260] : memref<1x128xf32, #tpu.memory_space<vmem>>, vector<1x128xf32>
    %698 = vector.broadcast %697 : vector<1x128xf32> to vector<64x128xf32>
    %699 = arith.addf %696, %698 : vector<64x128xf32>
    %700 = vector.shape_cast %699 : vector<64x128xf32> to vector<8x8x128xf32>
    %c0_261 = arith.constant 0 : index
    %c0_262 = arith.constant 0 : index
    %c0_263 = arith.constant 0 : index
    %701 = vector.load %arg20[%c0_261, %c0_262, %c0_263] : memref<8x8x128xf32, #tpu.memory_space<vmem>>, vector<8x8x128xf32>
    tpu.vector_store %arg20[%c0_261, %c0_262, %c0_263], %700 {strides = array<i32>} : memref<8x8x128xf32, #tpu.memory_space<vmem>>, vector<8x8x128xf32>,
    return
  }
  func.func @transform_0(%arg0: i32, %arg1: i32) -> (i32, i32, i32) {
    %c0_i32 = arith.constant 0 : i32
    %c0_i32_0 = arith.constant 0 : i32
    return %arg1, %arg0, %c0_i32 : i32, i32, i32
  }
  func.func @transform_1(%arg0: i32, %arg1: i32) -> (i32, i32, i32) {
    %c0_i32 = arith.constant 0 : i32
    %c0_i32_0 = arith.constant 0 : i32
    return %arg1, %arg0, %c0_i32 : i32, i32, i32
  }
  func.func @transform_2(%arg0: i32, %arg1: i32) -> (i32, i32, i32) {
    %c0_i32 = arith.constant 0 : i32
    %0 = arith.subi %c0_i32, %arg1 : i32
    %c0_i32_0 = arith.constant 0 : i32
    %c0_i32_1 = arith.constant 0 : i32
    return %0, %arg0, %c0_i32_0 : i32, i32, i32
  }
  func.func @transform_3(%arg0: i32, %arg1: i32) -> (i32, i32, i32) {
    %c0_i32 = arith.constant 0 : i32
    %0 = arith.subi %c0_i32, %arg1 : i32
    %c0_i32_0 = arith.constant 0 : i32
    %c0_i32_1 = arith.constant 0 : i32
    return %0, %arg0, %c0_i32_0 : i32, i32, i32
  }
  func.func @transform_4(%arg0: i32, %arg1: i32) -> (i32, i32) {
    %c0_i32 = arith.constant 0 : i32
    %c0_i32_0 = arith.constant 0 : i32
    %c0_i32_1 = arith.constant 0 : i32
    return %c0_i32, %c0_i32_0 : i32, i32
  }
  func.func @transform_5(%arg0: i32, %arg1: i32) -> (i32, i32) {
    %c0_i32 = arith.constant 0 : i32
    %c0_i32_0 = arith.constant 0 : i32
    %c0_i32_1 = arith.constant 0 : i32
    return %c0_i32, %c0_i32_0 : i32, i32
  }
  func.func @transform_6(%arg0: i32, %arg1: i32) -> (i32, i32) {
    %c0_i32 = arith.constant 0 : i32
    %c0_i32_0 = arith.constant 0 : i32
    %c0_i32_1 = arith.constant 0 : i32
    return %c0_i32, %c0_i32_0 : i32, i32
  }
  func.func @transform_7(%arg0: i32, %arg1: i32) -> (i32, i32) {
    %c0_i32 = arith.constant 0 : i32
    %c0_i32_0 = arith.constant 0 : i32
    %c0_i32_1 = arith.constant 0 : i32
    return %c0_i32, %c0_i32_0 : i32, i32
  }
  func.func @transform_8(%arg0: i32, %arg1: i32) -> (i32, i32) {
    %c0_i32 = arith.constant 0 : i32
    %c0_i32_0 = arith.constant 0 : i32
    %c0_i32_1 = arith.constant 0 : i32
    return %c0_i32, %c0_i32_0 : i32, i32
  }
  func.func @transform_9(%arg0: i32, %arg1: i32) -> (i32, i32) {
    %c0_i32 = arith.constant 0 : i32
    %c0_i32_0 = arith.constant 0 : i32
    %c0_i32_1 = arith.constant 0 : i32
    return %c0_i32, %c0_i32_0 : i32, i32
  }
  func.func @transform_10(%arg0: i32, %arg1: i32) -> (i32, i32) {
    %c0_i32 = arith.constant 0 : i32
    %c0_i32_0 = arith.constant 0 : i32
    %c0_i32_1 = arith.constant 0 : i32
    return %c0_i32, %c0_i32_0 : i32, i32
  }
  func.func @transform_11(%arg0: i32, %arg1: i32) -> (i32, i32) {
    %c0_i32 = arith.constant 0 : i32
    %c0_i32_0 = arith.constant 0 : i32
    %c0_i32_1 = arith.constant 0 : i32
    return %c0_i32, %c0_i32_0 : i32, i32
  }
  func.func @transform_12(%arg0: i32, %arg1: i32) -> (i32, i32) {
    %c0_i32 = arith.constant 0 : i32
    %c0_i32_0 = arith.constant 0 : i32
    %c0_i32_1 = arith.constant 0 : i32
    return %c0_i32, %c0_i32_0 : i32, i32
  }
  func.func @transform_13(%arg0: i32, %arg1: i32) -> (i32, i32) {
    %c0_i32 = arith.constant 0 : i32
    %c0_i32_0 = arith.constant 0 : i32
    %c0_i32_1 = arith.constant 0 : i32
    return %c0_i32, %c0_i32_0 : i32, i32
  }
  func.func @transform_14(%arg0: i32, %arg1: i32) -> (i32, i32) {
    %c0_i32 = arith.constant 0 : i32
    %c0_i32_0 = arith.constant 0 : i32
    %c0_i32_1 = arith.constant 0 : i32
    return %c0_i32, %c0_i32_0 : i32, i32
  }
  func.func @transform_15(%arg0: i32, %arg1: i32) -> (i32, i32) {
    %c0_i32 = arith.constant 0 : i32
    %c0_i32_0 = arith.constant 0 : i32
    %c0_i32_1 = arith.constant 0 : i32
    return %c0_i32, %c0_i32_0 : i32, i32
  }
  func.func @transform_16(%arg0: i32, %arg1: i32) -> (i32, i32) {
    %c0_i32 = arith.constant 0 : i32
    %c0_i32_0 = arith.constant 0 : i32
    %c0_i32_1 = arith.constant 0 : i32
    return %c0_i32, %c0_i32_0 : i32, i32
  }
  func.func @transform_17(%arg0: i32, %arg1: i32) -> (i32, i32, i32) {
    %c0_i32 = arith.constant 0 : i32
    %c0_i32_0 = arith.constant 0 : i32
    return %arg1, %arg0, %c0_i32 : i32, i32, i32
  }
  func.func @transform_18(%arg0: i32, %arg1: i32) -> (i32, i32, i32) {
    %c0_i32 = arith.constant 0 : i32
    %0 = arith.subi %c0_i32, %arg1 : i32
    %c0_i32_0 = arith.constant 0 : i32
    %c0_i32_1 = arith.constant 0 : i32
    return %0, %arg0, %c0_i32_0 : i32, i32, i32
  }
}

</mosaic_0001>

<bundles_post_ra>
// kernel: forward.3
= control target key start
LH: loop header
LB: loop body
LE: loop exit
PB: predicated region body
PF: predicated region fallthrough
CT: control target
= control target key end

     0   :  { %vm78_vm0 = vcmask 261120   ;;  %v1790_v3 = vmov 0.0   ;;  %vm171_vm1 = vcmask 785408   ;;  %s1791_s25 = smov 64   ;;  %s1792_s26 = smov 32   ;;  %s2341_s2 = inlined_call_operand.vmem [shape: bf16[32,96], index: 2, kind: input, shape index: {}]   ;;  %s2342_s3 = inlined_call_operand.vmem [shape: bf16[32,96], index: 3, kind: input, shape index: {}]   ;;  %s2343_s6 = inlined_call_operand.vmem [shape: bf16[32,96], index: 6, kind: input, shape index: {}]   ;;  %s2344_s7 = inlined_call_operand.vmem [shape: bf16[32,96], index: 7, kind: input, shape index: {}]   ;;  %s2345_s0 = inlined_call_operand.vmem [shape: bf16[8,8,32], index: 0, kind: input, shape index: {}, may-alias: {0,1}]   ;;  %s2346_s1 = inlined_call_operand.vmem [shape: bf16[8,8,32], index: 1, kind: input, shape index: {}, may-alias: {0,1}]   ;;  %s2347_s4 = inlined_call_operand.vmem [shape: f32[1,96], index: 4, kind: input, shape index: {}]   ;;  %s2348_s5 = inlined_call_operand.vmem [shape: f32[1,96], index: 5, kind: input, shape index: {}]   ;;  %s2349_s8 = inlined_call_operand.vmem [shape: f32[1,96], index: 8, kind: input, shape index: {}]   ;;  %s2350_s9 = inlined_call_operand.vmem [shape: f32[1,96], index: 9, kind: input, shape index: {}]   ;;  %s2351_s10 = inlined_call_operand.vmem [shape: bf16[8,8,32], index: 10, kind: output, shape index: {0}]   ;;  %s2352_s11 = inlined_call_operand.vmem [shape: bf16[8,8,32], index: 11, kind: output, shape index: {1}]  }
   0x1   :  { %v1673_v0 = vld [vmem:[%s2341_s2 + $0x8] sm:$0xff]  ;;  %79 = vst.msk [vmem:[#allocation4] sm:$0xff] %vm78_vm0, %v1790_v3  ;;  %v1672_v5 = vld [vmem:[%s2341_s2] sm:$0xff]  ;;  %v1676_v16 = vld [vmem:[%s2346_s1 + $0x10] sm:$0xff]  ;;  %s1793_s27 = smov 96  }
   0x2   :  { %v1679_v1 = vld [vmem:[%s2342_s3 + $0x8] sm:$0xff]  ;;  %80 = vst.msk [vmem:[#allocation5] sm:$0xff] %vm78_vm0, %v1790_v3  ;;  %148 = vmatpush.bf16.msra.mxu0 %v1673_v0  ;;  %v1678_v6 = vld [vmem:[%s2342_s3] sm:$0xff]  ;;  %v1677_v17 = vld [vmem:[%s2346_s1 + $0x18] sm:$0xff] }
   0x3   :  { %v1863_v2 = vld [vmem:[%s2343_s6 + $0x8] sm:$0xff]  ;;  %246 = vmatpush.bf16.msra.mxu1 %v1679_v1  ;;  %v1883_v7 = vld [vmem:[%s2343_s6] sm:$0xff] }
   0x4   :  { %v1869_v4 = vld [vmem:[%s2344_s7 + $0x8] sm:$0xff]  ;;  %314 = vmatpush.bf16.msra.mxu2 %v1863_v2  ;;  %v1888_v8 = vld [vmem:[%s2344_s7] sm:$0xff] }
   0x5   :  { %346 = vmatpush.bf16.msra.mxu3 %v1869_v4  ;;  %v1668_v9 = vld [vmem:[%s2345_s0] sm:$0xff]  ;;  %v1675_v15 = vld [vmem:[%s2346_s1 + $0x8] sm:$0xff] }
   0x6   :  { %v1674_v10 = vld [vmem:[%s2346_s1] sm:$0xff]  ;;  %149 = vmatpush.bf16.msra.mxu0 %v1672_v5 }
   0x7   :  { %247 = vmatpush.bf16.msra.mxu1 %v1678_v6  ;;  %v1941_v18 = vld [vmem:[%s2347_s4] ss:$0 sm:$0xff] }
   0x8   :  { %315 = vmatpush.bf16.msra.mxu2 %v1883_v7  ;;  %v1898_v11 = vld [vmem:[#allocation4] sm:$0xff] }
   0x9   :  { %347 = vmatpush.bf16.msra.mxu3 %v1888_v8  ;;  %v289_v12 = vpack.c.bf16 %v1898_v11, %v1898_v11  ;;  %v1902_v13 = vld [vmem:[#allocation5] sm:$0xff]  ;;  %1574 = vmatmul.msk.bf16.vlgmr.msra.gmra.mxu0 %vm78_vm0, %v1668_v9  ;;  %v1689_v19 = vld [vmem:[%s2348_s5] ss:$0 sm:$0xff] }
   0xa   :  { %1602 = vmatmul.msk.bf16.vlgmr.msra.gmra.mxu1 %vm78_vm0, %v1674_v10  ;;  %v321_v14 = vpack.c.bf16 %v1902_v13, %v1902_v13  ;;  %928 = vmatpush.bf16.msrb.mxu0 %v1863_v2  ;;  %v1952_v24 = vld [vmem:[%s2349_s8] ss:$0 sm:$0xff] }
   0xb   :  { %1614 = vmatmul.msk.bf16.vlgmr.msra.gmra.mxu2 %vm78_vm0, %v289_v12  ;;  %945 = vmatpush.bf16.msrb.mxu1 %v1869_v4  ;;  %v1958_v30 = vld [vmem:[%s2350_s9] ss:$0 sm:$0xff] }
   0xc   :  { %478 = vmatpush.bf16.msrb.mxu2 %v1863_v2  ;;  %1623 = vmatmul.msk.bf16.vlgmr.msra.gmra.mxu3 %vm78_vm0, %v321_v14 }
   0xd   :  { %495 = vmatpush.bf16.msrb.mxu3 %v1869_v4 }
   0xe   :  { %929 = vmatpush.bf16.msrb.mxu0 %v1883_v7 }
   0xf   :  { %946 = vmatpush.bf16.msrb.mxu1 %v1888_v8 }
  0x10   :  { %479 = vmatpush.bf16.msrb.mxu2 %v1883_v7 }
  0x11   :  { %496 = vmatpush.bf16.msrb.mxu3 %v1888_v8 }
  0x12   :  { %1228 = vmatpush.bf16.msra.mxu0 %v1863_v2 }
  0x13   :  { %1245 = vmatpush.bf16.msra.mxu1 %v1869_v4 }
  0x14   :  { %628 = vmatpush.bf16.msra.mxu2 %v1863_v2 }
  0x15   :  { %645 = vmatpush.bf16.msra.mxu3 %v1869_v4 }
  0x16   :  { %1229 = vmatpush.bf16.msra.mxu0 %v1883_v7 }
  0x17   :  { %1246 = vmatpush.bf16.msra.mxu1 %v1888_v8 }
  0x18   :  { %629 = vmatpush.bf16.msra.mxu2 %v1883_v7 }
  0x19   :  { %646 = vmatpush.bf16.msra.mxu3 %v1888_v8 }
  0x1a   :  { %1603 = vmatmul.msk.bf16.gmra.mxu1 %vm78_vm0, %v1675_v15 }
  0x2a   :  { %1604 = vmatmul.msk.bf16.gmra.mxu1 %vm78_vm0, %v1676_v16 }
  0x3a   :  { %1605 = vmatmul.msk.bf16.gmra.mxu1 %vm78_vm0, %v1677_v17 }
  0x86   :  { %v151_v20 = vpop.f32.mrf.mxu0 }
  0x87   :  { %v249_v21 = vpop.f32.mrf.mxu1  ;;  %v152_v22 = vadd.f32 %v1941_v18, %v151_v20 }
  0x88   :  { %v250_v23 = vadd.f32 %v1689_v19, %v249_v21 }
  0x89   :  { %172 = vst.msk [vmem:[#allocation2] sm:$0xff] %vm171_vm1, %v152_v22 }
  0x8a   :  { %269 = vst.msk [vmem:[#allocation3] sm:$0xff] %vm171_vm1, %v250_v23 }
  0x8e   :  { %v317_v25 = vpop.f32.mrf.mxu2  ;;  %v153_v38 = vpop.f32.mrf.mxu0 }
  0x8f   :  { %v318_v26 = vadd.f32 %v1952_v24, %v317_v25  ;;  %v349_v27 = vpop.f32.mrf.mxu3  ;;  %v251_v28 = vpop.f32.mrf.mxu1  ;;  %v154_v39 = vadd.f32 %v1941_v18, %v153_v38 }
  0x90   :  { %v252_v29 = vadd.f32 %v1689_v19, %v251_v28  ;;  %v350_v31 = vadd.f32 %v1958_v30, %v349_v27  ;;  %v353_v48 = vld [vmem:[#allocation2] sm:$0xff] }
  0x91   :  { %377 = vrot.lane.b32.xlu0 %v318_v26, %s1791_s25  ;;  %173 = vst.msk [vmem:[#allocation2 + $0x8] sm:$0xff] %vm171_vm1, %v154_v39  ;;  %v356_v49 = vadd.f32 %v353_v48, %v318_v26 }
  0x92   :  { %270 = vst.msk [vmem:[#allocation3 + $0x8] sm:$0xff] %vm171_vm1, %v252_v29 }
  0x93   :  { %v1624_v50 = vmul.f32 -1.442695, %v356_v49 }
  0x95   :  { %1692 = vpow2.f32 %v1624_v50 }
  0x96   :  { %v319_v32 = vpop.f32.mrf.mxu2 }
  0x97   :  { %v351_v33 = vpop.f32.mrf.mxu3  ;;  %v254_v34 = vpop.f32.mrf.mxu1 }
  0x98   :  { %v255_v35 = vadd.f32 %v1689_v19, %v254_v34 }
  0x99   :  { %420 = vrot.lane.b32.xlu0 %v350_v31, %s1791_s25 }
  0x9a   :  { %271 = vst.msk [vmem:[#allocation3 + $0x10] sm:$0xff] %vm171_vm1, %v255_v35 }
  0x9b   :  { %v1693_v54 = vpop.eup %1692 }
  0x9c   :  { %v360_v55 = vadd.f32 1.0, %v1693_v54 }
  0x9e   :  { %v372_v3 = vand.u32 2147483648, %v360_v55  ;;  %vm366_vm3 = vweird.f32 %v360_v55  ;;  %v370_v5 = vand.u32 2147483647, %v360_v55 }
  0x9f   :  { %v256_v36 = vpop.f32.mrf.mxu1 }
  0xa0   :  { %v257_v37 = vadd.f32 %v1689_v19, %v256_v36  ;;  %v373_v10 = vor.u32 1.1754944e-38, %v372_v3  ;;  %vm371_vm5 = vcmp.eq.f32.partialorder %v370_v5, 8.507059e+37 }
  0xa2   :  { %272 = vst.msk [vmem:[#allocation3 + $0x18] sm:$0xff] %vm171_vm1, %v257_v37 }
  0xa7   :  { %v259_v40 = vpop.f32.mrf.mxu1 }
  0xa8   :  { %v260_v41 = vadd.f32 %v1689_v19, %v259_v40 }
  0xaa   :  { %273 = vst.msk [vmem:[#allocation3 + $0x20] sm:$0xff] %vm171_vm1, %v260_v41 }
  0xaf   :  { %v261_v42 = vpop.f32.mrf.mxu1 }
  0xb0   :  { %v262_v43 = vadd.f32 %v1689_v19, %v261_v42 }
  0xb2   :  { %274 = vst.msk [vmem:[#allocation3 + $0x28] sm:$0xff] %vm171_vm1, %v262_v43 }
  0xb7   :  { %v264_v44 = vpop.f32.mrf.mxu1 }
  0xb8   :  { %v265_v45 = vadd.f32 %v1689_v19, %v264_v44 }
  0xba   :  { %275 = vst.msk [vmem:[#allocation3 + $0x30] sm:$0xff] %vm171_vm1, %v265_v45 }
  0xbf   :  { %v266_v46 = vpop.f32.mrf.mxu1 }
  0xc0   :  { %v267_v47 = vadd.f32 %v1689_v19, %v266_v46 }
  0xc2   :  { %276 = vst.msk [vmem:[#allocation3 + $0x38] sm:$0xff] %vm171_vm1, %v267_v47 }
  0xc9   :  { %v355_v51 = vld [vmem:[#allocation3 + $0x38] sm:$0xff] }
  0xca   :  { %v399_v52 = vadd.f32 %v355_v51, %v350_v31 }
  0xcc   :  { %v1625_v53 = vmul.f32 -1.442695, %v399_v52 }
  0xce   :  { %1694 = vpow2.f32 %v1625_v53 }
  0xcf   :  { %1696 = vrcp.f32 %v360_v55 }
  0xd4   :  { %v1695_v56 = vpop.eup %1694 }
  0xd5   :  { %v403_v57 = vadd.f32 1.0, %v1695_v56  ;;  %v1697_v58 = vpop.eup %1696 }
  0xd6   :  { %v362_v59 = vmul.f32 %v1697_v58, %v360_v55  ;;  %vm367_vm2 = vweird.f32 %v1697_v58  ;;  %v503_v55 = vld [vmem:[#allocation2 + $0x8] sm:$0xff] }
  0xd7   :  { %1698 = vrcp.f32 %v403_v57  ;;  %vm368_vm4 = vmor %vm366_vm3, %vm367_vm2  ;;  %v415_v17 = vand.u32 2147483648, %v403_v57  ;;  %vm409_vm7 = vweird.f32 %v403_v57  ;;  %v413_v19 = vand.u32 2147483647, %v403_v57 }
  0xd8   :  { %v363_v60 = vsub.f32 1.0, %v362_v59 }
  0xd9   :  { %v416_v21 = vor.u32 1.1754944e-38, %v415_v17  ;;  %vm414_vm9 = vcmp.eq.f32.partialorder %v413_v19, 8.507059e+37 }
  0xda   :  { %v364_v62 = vmul.f32 %v1697_v58, %v363_v60  ;;  %v505_v60 = vld [vmem:[#allocation3 + $0x30] sm:$0xff] }
  0xdc   :  { %v365_v0 = vadd.f32 %v1697_v58, %v364_v62 }
  0xdd   :  { %v1699_v61 = vpop.eup %1698 }
  0xde   :  { %v405_v63 = vmul.f32 %v1699_v61, %v403_v57  ;;  %v369_v6 = vsel %vm368_vm4, %v1697_v58, %v365_v0  ;;  %vm410_vm6 = vweird.f32 %v1699_v61 }
  0xdf   :  { %v374_v14 = vsel %vm371_vm5, %v373_v10, %v369_v6  ;;  %vm411_vm8 = vmor %vm409_vm7, %vm410_vm6 }
  0xe0   :  { %v406_v1 = vsub.f32 1.0, %v405_v63  ;;  %v387_v34 = vsub.f32 1.0, %v374_v14 }
  0xe2   :  { %v407_v9 = vmul.f32 %v1699_v61, %v406_v1 }
  0xe4   :  { %v408_v16 = vadd.f32 %v1699_v61, %v407_v9 }
  0xe6   :  { %v412_v20 = vsel %vm411_vm8, %v1699_v61, %v408_v16 }
  0xe7   :  { %v417_v23 = vsel %vm414_vm9, %v416_v21, %v412_v20 }
  0xe8   :  { %v430_v39 = vsub.f32 1.0, %v417_v23 }
 0x103   :  { %v378_v12 = vpop.permute.xlu0 %377 }
 0x104   :  { %v380_v15 = vmul.f32 %v378_v12, %v374_v14 }
 0x106   :  { %382 = vrot.lane.b32.xlu1 %v380_v15, %s1791_s25 }
 0x10b   :  { %v421_v22 = vpop.permute.xlu0 %420 }
 0x10c   :  { %v423_v25 = vmul.f32 %v421_v22, %v417_v23 }
 0x10e   :  { %425 = vrot.lane.b32.xlu1 %v423_v25, %s1791_s25 }
 0x116   :  { %437 = vrot.lane.b32.xlu1 %v1902_v13, %s1792_s26 }
 0x178   :  { %v383_v26 = vpop.permute.xlu1 %382 }
 0x179   :  { %v385_v27 = vadd.f32 %v383_v26, %v353_v48 }
 0x17b   :  { %1700 = vtanh.f32 %v385_v27 }
 0x180   :  { %v426_v28 = vpop.permute.xlu1 %425 }
 0x181   :  { %v1701_v29 = vpop.eup %1700  ;;  %v428_v31 = vadd.f32 %v426_v28, %v355_v51 }
 0x182   :  { %389 = vrot.lane.b32.xlu2 %v1701_v29, %s1793_s27 }
 0x183   :  { %1702 = vtanh.f32 %v428_v31 }
 0x188   :  { %v438_v38 = vpop.permute.xlu1 %437 }
 0x189   :  { %v1703_v32 = vpop.eup %1702  ;;  %v440_v41 = vmul.f32 %v438_v38, %v417_v23 }
 0x18a   :  { %394 = vrot.lane.b32.xlu2 %v1898_v11, %s1792_s26  ;;  %432 = vrot.lane.b32.xlu0 %v1703_v32, %s1793_s27 }
 0x1dc   :  { %v390_v33 = vpop.permute.xlu2 %389 }
 0x1dd   :  { %v392_v13 = vmul.f32 %v390_v33, %v387_v34 }
 0x1e4   :  { %v395_v35 = vpop.permute.xlu2 %394 }
 0x1e5   :  { %v397_v36 = vmul.f32 %v395_v35, %v374_v14 }
 0x1e7   :  { %v1980_v37 = vadd.f32 %v397_v36, %v392_v13 }
 0x1e9   :  { %443 = vrot.lane.b32.xlu2 %v1980_v37, %s1793_s27 }
 0x1fc   :  { %v433_v40 = vpop.permute.xlu0 %432 }
 0x1fd   :  { %v435_v42 = vmul.f32 %v433_v40, %v430_v39 }
 0x1ff   :  { %v1984_v43 = vadd.f32 %v440_v41, %v435_v42 }
 0x201   :  { %448 = vrot.lane.b32.xlu0 %v1984_v43, %s1793_s27 }
 0x243   :  { %v444_v11 = vpop.permute.xlu2 %443 }
 0x244   :  { %446 = vst.msk [vmem:[#allocation4] sm:$0xff] %vm78_vm0, %v444_v11 }
 0x24b   :  { %v466_v44 = vld [vmem:[#allocation4] sm:$0xff] }
 0x24c   :  { %v468_v45 = vpack.c.bf16 %v466_v44, %v466_v44 }
 0x24e   :  { %1627 = vmatmul.msk.bf16.vlgmr.msrb.gmra.mxu2 %vm78_vm0, %v468_v45 }
 0x24f   :  { %778 = vmatpush.bf16.msrb.mxu2 %v1863_v2 }
 0x253   :  { %779 = vmatpush.bf16.msrb.mxu2 %v1883_v7 }
 0x273   :  { %v449_v46 = vpop.permute.xlu0 %448 }
 0x274   :  { %451 = vst.msk [vmem:[#allocation5] sm:$0xff] %vm78_vm0, %v449_v46 }
 0x27b   :  { %v1993_v47 = vld [vmem:[#allocation5] sm:$0xff] }
 0x27c   :  { %v485_v48 = vpack.c.bf16 %v1993_v47, %v1993_v47 }
 0x27e   :  { %1628 = vmatmul.msk.bf16.vlgmr.msrb.gmra.mxu3 %vm78_vm0, %v485_v48 }
 0x27f   :  { %795 = vmatpush.bf16.msrb.mxu3 %v1869_v4 }
 0x283   :  { %796 = vmatpush.bf16.msrb.mxu3 %v1888_v8 }
 0x2d1   :  { %v481_v49 = vpop.f32.mrf.mxu2 }
 0x2d2   :  { %v482_v50 = vadd.f32 %v1952_v24, %v481_v49 }
 0x2d4   :  { %527 = vrot.lane.b32.xlu1 %v482_v50, %s1791_s25  ;;  %v506_v56 = vadd.f32 %v503_v55, %v482_v50 }
 0x2d6   :  { %v1629_v57 = vmul.f32 -1.442695, %v506_v56 }
 0x2d8   :  { %1704 = vpow2.f32 %v1629_v57 }
 0x2d9   :  { %v483_v51 = vpop.f32.mrf.mxu2 }
 0x2de   :  { %v1705_v58 = vpop.eup %1704 }
 0x2df   :  { %v510_v59 = vadd.f32 1.0, %v1705_v58 }
 0x2e1   :  { %1706 = vrcp.f32 %v510_v59  ;;  %v522_v10 = vand.u32 2147483648, %v510_v59  ;;  %vm516_vm11 = vweird.f32 %v510_v59  ;;  %v520_v12 = vand.u32 2147483647, %v510_v59 }
 0x2e3   :  { %v523_v15 = vor.u32 1.1754944e-38, %v522_v10  ;;  %vm521_vm13 = vcmp.eq.f32.partialorder %v520_v12, 8.507059e+37 }
 0x2e7   :  { %v1707_v62 = vpop.eup %1706 }
 0x2e8   :  { %v512_v0 = vmul.f32 %v1707_v62, %v510_v59  ;;  %vm517_vm10 = vweird.f32 %v1707_v62 }
 0x2e9   :  { %vm518_vm12 = vmor %vm516_vm11, %vm517_vm10 }
 0x2ea   :  { %v513_v1 = vsub.f32 1.0, %v512_v0 }
 0x2ec   :  { %v514_v5 = vmul.f32 %v1707_v62, %v513_v1 }
 0x2ee   :  { %v515_v9 = vadd.f32 %v1707_v62, %v514_v5 }
 0x2f0   :  { %v519_v14 = vsel %vm518_vm12, %v1707_v62, %v515_v9 }
 0x2f1   :  { %v524_v16 = vsel %vm521_vm13, %v523_v15, %v519_v14 }
 0x2f2   :  { %v537_v41 = vsub.f32 1.0, %v524_v16 }
 0x301   :  { %v498_v52 = vpop.f32.mrf.mxu3 }
 0x302   :  { %v499_v53 = vadd.f32 %v1958_v30, %v498_v52  ;;  %v1669_v52 = vld [vmem:[%s2345_s0 + $0x8] sm:$0xff] }
 0x303   :  { %1575 = vmatmul.msk.bf16.gmra.mxu0 %vm78_vm0, %v1669_v52 }
 0x304   :  { %570 = vrot.lane.b32.xlu2 %v499_v53, %s1791_s25  ;;  %v549_v61 = vadd.f32 %v505_v60, %v499_v53 }
 0x306   :  { %v1630_v63 = vmul.f32 -1.442695, %v549_v61 }
 0x308   :  { %1708 = vpow2.f32 %v1630_v63 }
 0x309   :  { %v500_v54 = vpop.f32.mrf.mxu3 }
 0x30e   :  { %v1709_v3 = vpop.eup %1708 }
 0x30f   :  { %v553_v6 = vadd.f32 1.0, %v1709_v3 }
 0x311   :  { %1710 = vrcp.f32 %v553_v6  ;;  %v565_v26 = vand.u32 2147483648, %v553_v6  ;;  %vm559_vm15 = vweird.f32 %v553_v6  ;;  %v563_v27 = vand.u32 2147483647, %v553_v6 }
 0x313   :  { %v566_v29 = vor.u32 1.1754944e-38, %v565_v26  ;;  %vm564_vm3 = vcmp.eq.f32.partialorder %v563_v27, 8.507059e+37 }
 0x317   :  { %v1711_v20 = vpop.eup %1710 }
 0x318   :  { %v555_v21 = vmul.f32 %v1711_v20, %v553_v6  ;;  %vm560_vm14 = vweird.f32 %v1711_v20 }
 0x319   :  { %vm561_vm2 = vmor %vm559_vm15, %vm560_vm14 }
 0x31a   :  { %v556_v22 = vsub.f32 1.0, %v555_v21 }
 0x31c   :  { %v557_v23 = vmul.f32 %v1711_v20, %v556_v22 }
 0x31e   :  { %v558_v25 = vadd.f32 %v1711_v20, %v557_v23 }
 0x320   :  { %v562_v28 = vsel %vm561_vm2, %v1711_v20, %v558_v25 }
 0x321   :  { %v567_v32 = vsel %vm564_vm3, %v566_v29, %v562_v28 }
 0x322   :  { %v580_v48 = vsub.f32 1.0, %v567_v32 }
 0x346   :  { %v528_v17 = vpop.permute.xlu1 %527 }
 0x347   :  { %v530_v19 = vmul.f32 %v528_v17, %v524_v16 }
 0x349   :  { %532 = vrot.lane.b32.xlu0 %v530_v19, %s1791_s25 }
 0x351   :  { %544 = vrot.lane.b32.xlu0 %v466_v44, %s1792_s26 }
 0x35e   :  { %v571_v31 = vpop.permute.xlu2 %570 }
 0x35f   :  { %v573_v33 = vmul.f32 %v571_v31, %v567_v32  ;;  %v655_v31 = vld [vmem:[#allocation3 + $0x28] sm:$0xff] }
 0x361   :  { %575 = vrot.lane.b32.xlu1 %v573_v33, %s1791_s25 }
 0x380   :  { %v156_v59 = vpop.f32.mrf.mxu0 }
 0x388   :  { %v158_v0 = vpop.f32.mrf.mxu0 }
 0x389   :  { %v159_v1 = vadd.f32 %v1941_v18, %v158_v0 }
 0x38b   :  { %175 = vst.msk [vmem:[#allocation2 + $0x18] sm:$0xff] %vm171_vm1, %v159_v1 }
 0x3bb   :  { %v533_v34 = vpop.permute.xlu0 %532 }
 0x3bc   :  { %v535_v35 = vadd.f32 %v533_v34, %v503_v55 }
 0x3be   :  { %1712 = vtanh.f32 %v535_v35 }
 0x3c3   :  { %v545_v40 = vpop.permute.xlu0 %544 }
 0x3c4   :  { %v1713_v13 = vpop.eup %1712  ;;  %v547_v11 = vmul.f32 %v545_v40, %v524_v16 }
 0x3c5   :  { %539 = vrot.lane.b32.xlu2 %v1713_v13, %s1793_s27 }
 0x3cd   :  { %587 = vrot.lane.b32.xlu2 %v1993_v47, %s1792_s26 }
 0x3d3   :  { %v576_v36 = vpop.permute.xlu1 %575 }
 0x3d4   :  { %v578_v38 = vadd.f32 %v576_v36, %v505_v60  ;;  %v157_v60 = vadd.f32 %v1941_v18, %v156_v59 }
 0x3d6   :  { %1714 = vtanh.f32 %v578_v38  ;;  %174 = vst.msk [vmem:[#allocation2 + $0x10] sm:$0xff] %vm171_vm1, %v157_v60 }
 0x3dc   :  { %v1715_v39 = vpop.eup %1714 }
 0x3dd   :  { %582 = vrot.lane.b32.xlu1 %v1715_v39, %s1793_s27  ;;  %v653_v3 = vld [vmem:[#allocation2 + $0x10] sm:$0xff] }
 0x41f   :  { %v540_v42 = vpop.permute.xlu2 %539 }
 0x420   :  { %v542_v44 = vmul.f32 %v540_v42, %v537_v41 }
 0x422   :  { %v2011_v45 = vadd.f32 %v547_v11, %v542_v44 }
 0x424   :  { %593 = vrot.lane.b32.xlu0 %v2011_v45, %s1793_s27 }
 0x427   :  { %v588_v46 = vpop.permute.xlu2 %587 }
 0x428   :  { %v590_v47 = vmul.f32 %v588_v46, %v567_v32 }
 0x44f   :  { %v583_v49 = vpop.permute.xlu1 %582 }
 0x450   :  { %v585_v50 = vmul.f32 %v583_v49, %v580_v48 }
 0x452   :  { %v2015_v51 = vadd.f32 %v590_v47, %v585_v50 }
 0x454   :  { %598 = vrot.lane.b32.xlu1 %v2015_v51, %s1793_s27 }
 0x496   :  { %v594_v53 = vpop.permute.xlu0 %593 }
 0x497   :  { %596 = vst.msk [vmem:[#allocation4] sm:$0xff] %vm78_vm0, %v594_v53 }
 0x49e   :  { %v616_v54 = vld [vmem:[#allocation4] sm:$0xff] }
 0x49f   :  { %v618_v55 = vpack.c.bf16 %v616_v54, %v616_v54 }
 0x4a1   :  { %1633 = vmatmul.msk.bf16.vlgmr.msra.gmra.mxu2 %vm78_vm0, %v618_v55 }
 0x4a2   :  { %1078 = vmatpush.bf16.msra.mxu2 %v1863_v2 }
 0x4a6   :  { %1079 = vmatpush.bf16.msra.mxu2 %v1883_v7 }
 0x4c6   :  { %v599_v56 = vpop.permute.xlu1 %598 }
 0x4c7   :  { %601 = vst.msk [vmem:[#allocation5] sm:$0xff] %vm78_vm0, %v599_v56 }
 0x4ce   :  { %v2028_v57 = vld [vmem:[#allocation5] sm:$0xff] }
 0x4cf   :  { %v635_v58 = vpack.c.bf16 %v2028_v57, %v2028_v57 }
 0x4d1   :  { %1634 = vmatmul.msk.bf16.vlgmr.msra.gmra.mxu3 %vm78_vm0, %v635_v58 }
 0x4d2   :  { %1095 = vmatpush.bf16.msra.mxu3 %v1869_v4 }
 0x4d6   :  { %1096 = vmatpush.bf16.msra.mxu3 %v1888_v8 }
 0x524   :  { %v631_v61 = vpop.f32.mrf.mxu2 }
 0x525   :  { %v632_v62 = vadd.f32 %v1952_v24, %v631_v61 }
 0x527   :  { %677 = vrot.lane.b32.xlu2 %v632_v62, %s1791_s25  ;;  %v656_v5 = vadd.f32 %v653_v3, %v632_v62 }
 0x529   :  { %v1635_v6 = vmul.f32 -1.442695, %v656_v5 }
 0x52b   :  { %1716 = vpow2.f32 %v1635_v6 }
 0x52c   :  { %v633_v63 = vpop.f32.mrf.mxu2 }
 0x531   :  { %v1717_v14 = vpop.eup %1716 }
 0x532   :  { %v660_v15 = vadd.f32 1.0, %v1717_v14 }
 0x534   :  { %1718 = vrcp.f32 %v660_v15  ;;  %v672_v22 = vand.u32 2147483648, %v660_v15  ;;  %vm666_vm5 = vweird.f32 %v660_v15  ;;  %v670_v23 = vand.u32 2147483647, %v660_v15 }
 0x536   :  { %v673_v26 = vor.u32 1.1754944e-38, %v672_v22  ;;  %vm671_vm7 = vcmp.eq.f32.partialorder %v670_v23, 8.507059e+37  ;;  %v805_v23 = vld [vmem:[#allocation3 + $0x20] sm:$0xff] }
 0x53a   :  { %v1719_v16 = vpop.eup %1718 }
 0x53b   :  { %v662_v17 = vmul.f32 %v1719_v16, %v660_v15  ;;  %vm667_vm4 = vweird.f32 %v1719_v16 }
 0x53c   :  { %vm668_vm6 = vmor %vm666_vm5, %vm667_vm4 }
 0x53d   :  { %v663_v19 = vsub.f32 1.0, %v662_v17 }
 0x53f   :  { %v664_v20 = vmul.f32 %v1719_v16, %v663_v19 }
 0x541   :  { %v665_v21 = vadd.f32 %v1719_v16, %v664_v20 }
 0x543   :  { %v669_v25 = vsel %vm668_vm6, %v1719_v16, %v665_v21 }
 0x544   :  { %v674_v28 = vsel %vm671_vm7, %v673_v26, %v669_v25 }
 0x545   :  { %v687_v58 = vsub.f32 1.0, %v674_v28 }
 0x554   :  { %v648_v9 = vpop.f32.mrf.mxu3 }
 0x555   :  { %v649_v10 = vadd.f32 %v1958_v30, %v648_v9 }
 0x557   :  { %720 = vrot.lane.b32.xlu0 %v649_v10, %s1791_s25  ;;  %v699_v32 = vadd.f32 %v655_v31, %v649_v10 }
 0x559   :  { %v1636_v33 = vmul.f32 -1.442695, %v699_v32 }
 0x55b   :  { %1720 = vpow2.f32 %v1636_v33 }
 0x55c   :  { %v650_v12 = vpop.f32.mrf.mxu3 }
 0x561   :  { %v1721_v34 = vpop.eup %1720 }
 0x562   :  { %v703_v35 = vadd.f32 1.0, %v1721_v34 }
 0x564   :  { %1722 = vrcp.f32 %v703_v35  ;;  %v715_v41 = vand.u32 2147483648, %v703_v35  ;;  %vm709_vm9 = vweird.f32 %v703_v35  ;;  %v713_v42 = vand.u32 2147483647, %v703_v35 }
 0x566   :  { %v716_v44 = vor.u32 1.1754944e-38, %v715_v41  ;;  %vm714_vm11 = vcmp.eq.f32.partialorder %v713_v42, 8.507059e+37 }
 0x56a   :  { %v1723_v13 = vpop.eup %1722 }
 0x56b   :  { %v705_v36 = vmul.f32 %v1723_v13, %v703_v35  ;;  %vm710_vm8 = vweird.f32 %v1723_v13 }
 0x56c   :  { %vm711_vm10 = vmor %vm709_vm9, %vm710_vm8 }
 0x56d   :  { %v706_v38 = vsub.f32 1.0, %v705_v36 }
 0x56f   :  { %v707_v39 = vmul.f32 %v1723_v13, %v706_v38 }
 0x571   :  { %v708_v40 = vadd.f32 %v1723_v13, %v707_v39 }
 0x573   :  { %v712_v11 = vsel %vm711_vm10, %v1723_v13, %v708_v40 }
 0x574   :  { %v717_v48 = vsel %vm714_vm11, %v716_v44, %v712_v11 }
 0x575   :  { %v730_v0 = vsub.f32 1.0, %v717_v48 }
 0x581   :  { %v678_v27 = vpop.permute.xlu2 %677 }
 0x582   :  { %v680_v29 = vmul.f32 %v678_v27, %v674_v28 }
 0x584   :  { %682 = vrot.lane.b32.xlu1 %v680_v29, %s1791_s25 }
 0x58c   :  { %694 = vrot.lane.b32.xlu1 %v616_v54, %s1792_s26 }
 0x5c9   :  { %v721_v46 = vpop.permute.xlu0 %720 }
 0x5ca   :  { %v723_v49 = vmul.f32 %v721_v46, %v717_v48 }
 0x5cc   :  { %725 = vrot.lane.b32.xlu2 %v723_v49, %s1791_s25 }
 0x5f6   :  { %v683_v47 = vpop.permute.xlu1 %682 }
 0x5f7   :  { %v685_v50 = vadd.f32 %v683_v47, %v653_v3 }
 0x5f9   :  { %1724 = vtanh.f32 %v685_v50 }
 0x5fe   :  { %v695_v56 = vpop.permute.xlu1 %694 }
 0x5ff   :  { %v1725_v52 = vpop.eup %1724  ;;  %v697_v60 = vmul.f32 %v695_v56, %v674_v28 }
 0x600   :  { %689 = vrot.lane.b32.xlu0 %v1725_v52, %s1793_s27 }
 0x608   :  { %737 = vrot.lane.b32.xlu0 %v2028_v57, %s1792_s26 }
 0x626   :  { %v726_v53 = vpop.permute.xlu2 %725 }
 0x627   :  { %v728_v54 = vadd.f32 %v726_v53, %v655_v31 }
 0x629   :  { %1726 = vtanh.f32 %v728_v54 }
 0x62f   :  { %v1727_v55 = vpop.eup %1726 }
 0x630   :  { %732 = vrot.lane.b32.xlu2 %v1727_v55, %s1793_s27 }
 0x672   :  { %v690_v59 = vpop.permute.xlu0 %689 }
 0x673   :  { %v692_v61 = vmul.f32 %v690_v59, %v687_v58 }
 0x675   :  { %v2050_v62 = vadd.f32 %v697_v60, %v692_v61 }
 0x677   :  { %743 = vrot.lane.b32.xlu1 %v2050_v62, %s1793_s27 }
 0x67a   :  { %v738_v63 = vpop.permute.xlu0 %737 }
 0x67b   :  { %v740_v57 = vmul.f32 %v738_v63, %v717_v48 }
 0x68a   :  { %v733_v1 = vpop.permute.xlu2 %732 }
 0x68b   :  { %v735_v3 = vmul.f32 %v733_v1, %v730_v0  ;;  %v1670_v1 = vld [vmem:[%s2345_s0 + $0x10] sm:$0xff] }
 0x68c   :  { %1576 = vmatmul.msk.bf16.gmra.mxu0 %vm78_vm0, %v1670_v1 }
 0x68d   :  { %v2054_v5 = vadd.f32 %v740_v57, %v735_v3 }
 0x68f   :  { %748 = vrot.lane.b32.xlu2 %v2054_v5, %s1793_s27 }
 0x6e9   :  { %v749_v6 = vpop.permute.xlu2 %748  ;;  %v744_v9 = vpop.permute.xlu1 %743 }
 0x6ea   :  { %751 = vst.msk [vmem:[#allocation5] sm:$0xff] %vm78_vm0, %v749_v6 }
 0x6eb   :  { %746 = vst.msk [vmem:[#allocation4] sm:$0xff] %vm78_vm0, %v744_v9 }
 0x6f1   :  { %v2060_v10 = vld [vmem:[#allocation5] sm:$0xff] }
 0x6f2   :  { %v2062_v12 = vld [vmem:[#allocation4] sm:$0xff]  ;;  %v785_v14 = vpack.c.bf16 %v2060_v10, %v2060_v10 }
 0x6f3   :  { %v768_v15 = vpack.c.bf16 %v2062_v12, %v2062_v12 }
 0x6f4   :  { %1640 = vmatmul.msk.bf16.vlgmr.msrb.gmra.mxu3 %vm78_vm0, %v785_v14 }
 0x6f5   :  { %1639 = vmatmul.msk.bf16.vlgmr.msrb.gmra.mxu2 %vm78_vm0, %v768_v15  ;;  %1395 = vmatpush.bf16.msrb.mxu3 %v1869_v4  ;;  %v803_v4 = vld [vmem:[#allocation2 + $0x18] sm:$0xff] }
 0x6f6   :  { %1378 = vmatpush.bf16.msrb.mxu2 %v1863_v2 }
 0x6f9   :  { %1396 = vmatpush.bf16.msrb.mxu3 %v1888_v8 }
 0x6fa   :  { %1379 = vmatpush.bf16.msrb.mxu2 %v1883_v7 }
 0x777   :  { %v798_v16 = vpop.f32.mrf.mxu3 }
 0x778   :  { %v781_v17 = vpop.f32.mrf.mxu2  ;;  %v799_v19 = vadd.f32 %v1958_v30, %v798_v16 }
 0x779   :  { %v782_v20 = vadd.f32 %v1952_v24, %v781_v17 }
 0x77a   :  { %870 = vrot.lane.b32.xlu1 %v799_v19, %s1791_s25  ;;  %v849_v25 = vadd.f32 %v805_v23, %v799_v19 }
 0x77b   :  { %827 = vrot.lane.b32.xlu0 %v782_v20, %s1791_s25  ;;  %v806_v2 = vadd.f32 %v803_v4, %v782_v20 }
 0x77c   :  { %v1642_v26 = vmul.f32 -1.442695, %v849_v25  ;;  %v161_v25 = vpop.f32.mrf.mxu0 }
 0x77d   :  { %v1641_v8 = vmul.f32 -1.442695, %v806_v2  ;;  %v162_v2 = vadd.f32 %v1941_v18, %v161_v25 }
 0x77e   :  { %1728 = vpow2.f32 %v1642_v26 }
 0x77f   :  { %v800_v21 = vpop.f32.mrf.mxu3  ;;  %1730 = vpow2.f32 %v1641_v8  ;;  %176 = vst.msk [vmem:[#allocation2 + $0x20] sm:$0xff] %vm171_vm1, %v162_v2 }
 0x780   :  { %v783_v22 = vpop.f32.mrf.mxu2 }
 0x784   :  { %v1729_v7 = vpop.eup %1728  ;;  %v163_v26 = vpop.f32.mrf.mxu0 }
 0x785   :  { %v1731_v27 = vpop.eup %1730  ;;  %v853_v28 = vadd.f32 1.0, %v1729_v7  ;;  %v164_v8 = vadd.f32 %v1941_v18, %v163_v26 }
 0x786   :  { %v810_v29 = vadd.f32 1.0, %v1731_v27 }
 0x787   :  { %1732 = vrcp.f32 %v853_v28  ;;  %v865_v41 = vand.u32 2147483648, %v853_v28  ;;  %vm859_vm14 = vweird.f32 %v853_v28  ;;  %v863_v11 = vand.u32 2147483647, %v853_v28  ;;  %177 = vst.msk [vmem:[#allocation2 + $0x28] sm:$0xff] %vm171_vm1, %v164_v8 }
 0x788   :  { %1734 = vrcp.f32 %v810_v29  ;;  %v822_v42 = vand.u32 2147483648, %v810_v29  ;;  %vm816_vm15 = vweird.f32 %v810_v29  ;;  %v820_v44 = vand.u32 2147483647, %v810_v29 }
 0x789   :  { %v866_v49 = vor.u32 1.1754944e-38, %v865_v41  ;;  %vm864_vm4 = vcmp.eq.f32.partialorder %v863_v11, 8.507059e+37 }
 0x78a   :  { %v823_v47 = vor.u32 1.1754944e-38, %v822_v42  ;;  %vm821_vm5 = vcmp.eq.f32.partialorder %v820_v44, 8.507059e+37  ;;  %v955_v44 = vld [vmem:[#allocation3 + $0x18] sm:$0xff] }
 0x78d   :  { %v1733_v31 = vpop.eup %1732 }
 0x78e   :  { %v1735_v32 = vpop.eup %1734  ;;  %v855_v33 = vmul.f32 %v1733_v31, %v853_v28  ;;  %vm860_vm12 = vweird.f32 %v1733_v31 }
 0x78f   :  { %v812_v34 = vmul.f32 %v1735_v32, %v810_v29  ;;  %vm817_vm13 = vweird.f32 %v1735_v32  ;;  %vm861_vm2 = vmor %vm859_vm14, %vm860_vm12 }
 0x790   :  { %v856_v35 = vsub.f32 1.0, %v855_v33  ;;  %vm818_vm3 = vmor %vm816_vm15, %vm817_vm13 }
 0x791   :  { %v813_v13 = vsub.f32 1.0, %v812_v34 }
 0x792   :  { %v857_v36 = vmul.f32 %v1733_v31, %v856_v35 }
 0x793   :  { %v814_v38 = vmul.f32 %v1735_v32, %v813_v13 }
 0x794   :  { %v858_v39 = vadd.f32 %v1733_v31, %v857_v36 }
 0x795   :  { %v815_v40 = vadd.f32 %v1735_v32, %v814_v38 }
 0x796   :  { %v862_v46 = vsel %vm861_vm2, %v1733_v31, %v858_v39  ;;  %v953_v39 = vld [vmem:[#allocation2 + $0x20] sm:$0xff] }
 0x797   :  { %v819_v48 = vsel %vm818_vm3, %v1735_v32, %v815_v40  ;;  %v867_v50 = vsel %vm864_vm4, %v866_v49, %v862_v46 }
 0x798   :  { %v824_v54 = vsel %vm821_vm5, %v823_v47, %v819_v48  ;;  %v880_v16 = vsub.f32 1.0, %v867_v50 }
 0x799   :  { %v837_v3 = vsub.f32 1.0, %v824_v54 }
 0x7ec   :  { %v871_v52 = vpop.permute.xlu1 %870 }
 0x7ed   :  { %v828_v53 = vpop.permute.xlu0 %827  ;;  %v873_v55 = vmul.f32 %v871_v52, %v867_v50 }
 0x7ee   :  { %v830_v56 = vmul.f32 %v828_v53, %v824_v54 }
 0x7ef   :  { %875 = vrot.lane.b32.xlu0 %v873_v55, %s1791_s25 }
 0x7f0   :  { %832 = vrot.lane.b32.xlu2 %v830_v56, %s1791_s25 }
 0x7f8   :  { %844 = vrot.lane.b32.xlu2 %v2062_v12, %s1792_s26 }
 0x84a   :  { %v833_v58 = vpop.permute.xlu2 %832 }
 0x84b   :  { %v835_v59 = vadd.f32 %v833_v58, %v803_v4 }
 0x84d   :  { %1736 = vtanh.f32 %v835_v59 }
 0x852   :  { %v845_v57 = vpop.permute.xlu2 %844 }
 0x853   :  { %v1737_v60 = vpop.eup %1736  ;;  %v847_v9 = vmul.f32 %v845_v57, %v824_v54 }
 0x854   :  { %839 = vrot.lane.b32.xlu1 %v1737_v60, %s1793_s27 }
 0x85c   :  { %887 = vrot.lane.b32.xlu1 %v2060_v10, %s1792_s26  ;;  %v1671_v10 = vld [vmem:[%s2345_s0 + $0x18] sm:$0xff] }
 0x85d   :  { %1577 = vmatmul.msk.bf16.gmra.mxu0 %vm78_vm0, %v1671_v10 }
 0x861   :  { %v876_v61 = vpop.permute.xlu0 %875 }
 0x862   :  { %v878_v63 = vadd.f32 %v876_v61, %v805_v23 }
 0x864   :  { %1738 = vtanh.f32 %v878_v63 }
 0x86a   :  { %v1739_v0 = vpop.eup %1738 }
 0x86b   :  { %882 = vrot.lane.b32.xlu0 %v1739_v0, %s1793_s27 }
 0x8c6   :  { %v840_v6 = vpop.permute.xlu1 %839 }
 0x8c7   :  { %v842_v12 = vmul.f32 %v840_v6, %v837_v3 }
 0x8c9   :  { %v2090_v14 = vadd.f32 %v847_v9, %v842_v12 }
 0x8cb   :  { %893 = vrot.lane.b32.xlu2 %v2090_v14, %s1793_s27 }
 0x8ce   :  { %v888_v15 = vpop.permute.xlu1 %887 }
 0x8cf   :  { %v890_v19 = vmul.f32 %v888_v15, %v867_v50 }
 0x8da   :  { %v166_v7 = vpop.f32.mrf.mxu0 }
 0x8db   :  { %v167_v27 = vadd.f32 %v1941_v18, %v166_v7 }
 0x8dd   :  { %v883_v17 = vpop.permute.xlu0 %882  ;;  %178 = vst.msk [vmem:[#allocation2 + $0x30] sm:$0xff] %vm171_vm1, %v167_v27 }
 0x8de   :  { %v885_v20 = vmul.f32 %v883_v17, %v880_v16 }
 0x8e0   :  { %v2098_v21 = vadd.f32 %v890_v19, %v885_v20 }
 0x8e2   :  { %898 = vrot.lane.b32.xlu0 %v2098_v21, %s1793_s27  ;;  %v168_v29 = vpop.f32.mrf.mxu0 }
 0x8e3   :  { %v169_v31 = vadd.f32 %v1941_v18, %v168_v29 }
 0x8e5   :  { %179 = vst.msk [vmem:[#allocation2 + $0x38] sm:$0xff] %vm171_vm1, %v169_v31 }
 0x925   :  { %v894_v22 = vpop.permute.xlu2 %893 }
 0x926   :  { %896 = vst.msk [vmem:[#allocation4] sm:$0xff] %vm78_vm0, %v894_v22 }
 0x92d   :  { %v916_v23 = vld [vmem:[#allocation4] sm:$0xff] }
 0x92e   :  { %v918_v4 = vpack.c.bf16 %v916_v23, %v916_v23 }
 0x930   :  { %1645 = vmatmul.msk.bf16.vlgmr.msrb.gmra.mxu0 %vm78_vm0, %v918_v4 }
 0x954   :  { %v899_v28 = vpop.permute.xlu0 %898 }
 0x955   :  { %901 = vst.msk [vmem:[#allocation5] sm:$0xff] %vm78_vm0, %v899_v28 }
 0x95c   :  { %v2112_v32 = vld [vmem:[#allocation5] sm:$0xff] }
 0x95d   :  { %v935_v33 = vpack.c.bf16 %v2112_v32, %v2112_v32 }
 0x95f   :  { %1646 = vmatmul.msk.bf16.vlgmr.msrb.gmra.mxu1 %vm78_vm0, %v935_v33 }
 0x9ad   :  { %v931_v34 = vpop.f32.mrf.mxu0 }
 0x9ae   :  { %v932_v35 = vadd.f32 %v1952_v24, %v931_v34 }
 0x9b0   :  { %977 = vrot.lane.b32.xlu1 %v932_v35, %s1791_s25  ;;  %v956_v40 = vadd.f32 %v953_v39, %v932_v35 }
 0x9b2   :  { %v1647_v41 = vmul.f32 -1.442695, %v956_v40 }
 0x9b4   :  { %1740 = vpow2.f32 %v1647_v41 }
 0x9b5   :  { %v933_v13 = vpop.f32.mrf.mxu0 }
 0x9ba   :  { %v1741_v42 = vpop.eup %1740 }
 0x9bb   :  { %v960_v11 = vadd.f32 1.0, %v1741_v42  ;;  %v2148_v42 = vld [vmem:[%s2349_s8] ss:$0 sm:$0xff] }
 0x9bd   :  { %1742 = vrcp.f32 %v960_v11  ;;  %v972_v54 = vand.u32 2147483648, %v960_v11  ;;  %vm966_vm6 = vweird.f32 %v960_v11  ;;  %v970_v55 = vand.u32 2147483647, %v960_v11 }
 0x9bf   :  { %v973_v58 = vor.u32 1.1754944e-38, %v972_v54  ;;  %vm971_vm8 = vcmp.eq.f32.partialorder %v970_v55, 8.507059e+37 }
 0x9c3   :  { %v1743_v48 = vpop.eup %1742 }
 0x9c4   :  { %v962_v49 = vmul.f32 %v1743_v48, %v960_v11  ;;  %vm967_vm1 = vweird.f32 %v1743_v48 }
 0x9c5   :  { %vm968_vm7 = vmor %vm966_vm6, %vm967_vm1 }
 0x9c6   :  { %v963_v47 = vsub.f32 1.0, %v962_v49 }
 0x9c8   :  { %v964_v52 = vmul.f32 %v1743_v48, %v963_v47  ;;  %v2155_v47 = vld [vmem:[%s2350_s9] ss:$0 sm:$0xff] }
 0x9ca   :  { %v965_v53 = vadd.f32 %v1743_v48, %v964_v52 }
 0x9cc   :  { %v969_v56 = vsel %vm968_vm7, %v1743_v48, %v965_v53 }
 0x9cd   :  { %v974_v59 = vsel %vm971_vm8, %v973_v58, %v969_v56 }
 0x9ce   :  { %v987_v26 = vsub.f32 1.0, %v974_v59 }
 0x9dc   :  { %v948_v36 = vpop.f32.mrf.mxu1 }
 0x9dd   :  { %v949_v38 = vadd.f32 %v1958_v30, %v948_v36 }
 0x9df   :  { %1020 = vrot.lane.b32.xlu2 %v949_v38, %s1791_s25  ;;  %v999_v46 = vadd.f32 %v955_v44, %v949_v38 }
 0x9e1   :  { %v1648_v24 = vmul.f32 -1.442695, %v999_v46  ;;  %v1103_v46 = vld [vmem:[#allocation2 + $0x28] sm:$0xff] }
 0x9e3   :  { %1744 = vpow2.f32 %v1648_v24 }
 0x9e4   :  { %v950_v18 = vpop.f32.mrf.mxu1 }
 0x9e9   :  { %v1745_v50 = vpop.eup %1744 }
 0x9ea   :  { %v1003_v30 = vadd.f32 1.0, %v1745_v50 }
 0x9ec   :  { %1746 = vrcp.f32 %v1003_v30  ;;  %v1015_v6 = vand.u32 2147483648, %v1003_v30  ;;  %vm1009_vm10 = vweird.f32 %v1003_v30  ;;  %v1013_v9 = vand.u32 2147483647, %v1003_v30 }
 0x9ee   :  { %v1016_v10 = vor.u32 1.1754944e-38, %v1015_v6  ;;  %vm1014_vm12 = vcmp.eq.f32.partialorder %v1013_v9, 8.507059e+37  ;;  %v1105_v6 = vld [vmem:[#allocation3 + $0x10] sm:$0xff] }
 0x9f2   :  { %v1747_v61 = vpop.eup %1746 }
 0x9f3   :  { %v1005_v0 = vmul.f32 %v1747_v61, %v1003_v30  ;;  %vm1010_vm9 = vweird.f32 %v1747_v61 }
 0x9f4   :  { %vm1011_vm11 = vmor %vm1009_vm10, %vm1010_vm9 }
 0x9f5   :  { %v1006_v1 = vsub.f32 1.0, %v1005_v0 }
 0x9f7   :  { %v1007_v57 = vmul.f32 %v1747_v61, %v1006_v1 }
 0x9f9   :  { %v1008_v3 = vadd.f32 %v1747_v61, %v1007_v57 }
 0x9fb   :  { %v1012_v12 = vsel %vm1011_vm11, %v1747_v61, %v1008_v3 }
 0x9fc   :  { %v1017_v16 = vsel %vm1014_vm12, %v1016_v10, %v1012_v12 }
 0x9fd   :  { %v1030_v31 = vsub.f32 1.0, %v1017_v16 }
 0xa22   :  { %v978_v60 = vpop.permute.xlu1 %977 }
 0xa23   :  { %v980_v63 = vmul.f32 %v978_v60, %v974_v59 }
 0xa25   :  { %982 = vrot.lane.b32.xlu0 %v980_v63, %s1791_s25 }
 0xa2d   :  { %994 = vrot.lane.b32.xlu0 %v916_v23, %s1792_s26 }
 0xa39   :  { %v1021_v15 = vpop.permute.xlu2 %1020 }
 0xa3a   :  { %v1023_v17 = vmul.f32 %v1021_v15, %v1017_v16 }
 0xa3c   :  { %1025 = vrot.lane.b32.xlu1 %v1023_v17, %s1791_s25 }
 0xa97   :  { %v983_v19 = vpop.permute.xlu0 %982 }
 0xa98   :  { %v985_v20 = vadd.f32 %v983_v19, %v953_v39 }
 0xa9a   :  { %1748 = vtanh.f32 %v985_v20 }
 0xa9f   :  { %v995_v2 = vpop.permute.xlu0 %994 }
 0xaa0   :  { %v1749_v22 = vpop.eup %1748  ;;  %v997_v7 = vmul.f32 %v995_v2, %v974_v59 }
 0xaa1   :  { %989 = vrot.lane.b32.xlu2 %v1749_v22, %s1793_s27 }
 0xaa9   :  { %1037 = vrot.lane.b32.xlu2 %v2112_v32, %s1792_s26 }
 0xaae   :  { %v1026_v23 = vpop.permute.xlu1 %1025 }
 0xaaf   :  { %v1028_v4 = vadd.f32 %v1026_v23, %v955_v44 }
 0xab1   :  { %1750 = vtanh.f32 %v1028_v4 }
 0xab7   :  { %v1751_v25 = vpop.eup %1750 }
 0xab8   :  { %1032 = vrot.lane.b32.xlu1 %v1751_v25, %s1793_s27 }
 0xafb   :  { %v990_v8 = vpop.permute.xlu2 %989 }
 0xafc   :  { %v992_v27 = vmul.f32 %v990_v8, %v987_v26 }
 0xafe   :  { %v2129_v28 = vadd.f32 %v997_v7, %v992_v27 }
 0xb00   :  { %1043 = vrot.lane.b32.xlu0 %v2129_v28, %s1793_s27 }
 0xb03   :  { %v1038_v29 = vpop.permute.xlu2 %1037 }
 0xb04   :  { %v1040_v32 = vmul.f32 %v1038_v29, %v1017_v16 }
 0xb2a   :  { %v1033_v33 = vpop.permute.xlu1 %1032 }
 0xb2b   :  { %v1035_v34 = vmul.f32 %v1033_v33, %v1030_v31 }
 0xb2d   :  { %v2133_v35 = vadd.f32 %v1040_v32, %v1035_v34 }
 0xb2f   :  { %1048 = vrot.lane.b32.xlu1 %v2133_v35, %s1793_s27 }
 0xb72   :  { %v1044_v13 = vpop.permute.xlu0 %1043 }
 0xb73   :  { %1046 = vst.msk [vmem:[#allocation4] sm:$0xff] %vm78_vm0, %v1044_v13 }
 0xb7a   :  { %v1066_v36 = vld [vmem:[#allocation4] sm:$0xff] }
 0xb7b   :  { %v1068_v38 = vpack.c.bf16 %v1066_v36, %v1066_v36 }
 0xb7d   :  { %1651 = vmatmul.msk.bf16.vlgmr.msra.gmra.mxu2 %vm78_vm0, %v1068_v38 }
 0xba1   :  { %v1049_v18 = vpop.permute.xlu1 %1048 }
 0xba2   :  { %1051 = vst.msk [vmem:[#allocation5] sm:$0xff] %vm78_vm0, %v1049_v18 }
 0xba9   :  { %v2140_v39 = vld [vmem:[#allocation5] sm:$0xff] }
 0xbaa   :  { %v1085_v40 = vpack.c.bf16 %v2140_v39, %v2140_v39 }
 0xbac   :  { %1652 = vmatmul.msk.bf16.vlgmr.msra.gmra.mxu3 %vm78_vm0, %v1085_v40 }
 0xc00   :  { %v1081_v41 = vpop.f32.mrf.mxu2 }
 0xc01   :  { %v1082_v11 = vadd.f32 %v2148_v42, %v1081_v41 }
 0xc03   :  { %1127 = vrot.lane.b32.xlu2 %v1082_v11, %s1791_s25  ;;  %v1106_v48 = vadd.f32 %v1103_v46, %v1082_v11 }
 0xc05   :  { %v1653_v49 = vmul.f32 -1.442695, %v1106_v48 }
 0xc07   :  { %1752 = vpow2.f32 %v1653_v49 }
 0xc08   :  { %v1083_v44 = vpop.f32.mrf.mxu2 }
 0xc0d   :  { %v1753_v30 = vpop.eup %1752 }
 0xc0e   :  { %v1110_v53 = vadd.f32 1.0, %v1753_v30 }
 0xc10   :  { %1754 = vrcp.f32 %v1110_v53  ;;  %v1122_v60 = vand.u32 2147483648, %v1110_v53  ;;  %vm1116_vm14 = vweird.f32 %v1110_v53  ;;  %v1120_v61 = vand.u32 2147483647, %v1110_v53 }
 0xc12   :  { %v1123_v0 = vor.u32 1.1754944e-38, %v1122_v60  ;;  %vm1121_vm2 = vcmp.eq.f32.partialorder %v1120_v61, 8.507059e+37 }
 0xc16   :  { %v1755_v54 = vpop.eup %1754 }
 0xc17   :  { %v1112_v55 = vmul.f32 %v1755_v54, %v1110_v53  ;;  %vm1117_vm13 = vweird.f32 %v1755_v54 }
 0xc18   :  { %vm1118_vm15 = vmor %vm1116_vm14, %vm1117_vm13 }
 0xc19   :  { %v1113_v56 = vsub.f32 1.0, %v1112_v55 }
 0xc1b   :  { %v1114_v58 = vmul.f32 %v1755_v54, %v1113_v56 }
 0xc1d   :  { %v1115_v59 = vadd.f32 %v1755_v54, %v1114_v58 }
 0xc1f   :  { %v1119_v63 = vsel %vm1118_vm15, %v1755_v54, %v1115_v59 }
 0xc20   :  { %v1124_v57 = vsel %vm1121_vm2, %v1123_v0, %v1119_v63  ;;  %v1255_v63 = vld [vmem:[#allocation3 + $0x8] sm:$0xff]  ;;  %v1253_v0 = vld [vmem:[#allocation2 + $0x30] sm:$0xff] }
 0xc2f   :  { %v1098_v24 = vpop.f32.mrf.mxu3 }
 0xc30   :  { %v1099_v50 = vadd.f32 %v2155_v47, %v1098_v24 }
 0xc32   :  { %1170 = vrot.lane.b32.xlu0 %v1099_v50, %s1791_s25  ;;  %v1149_v9 = vadd.f32 %v1105_v6, %v1099_v50 }
 0xc34   :  { %v1654_v12 = vmul.f32 -1.442695, %v1149_v9 }
 0xc36   :  { %1756 = vpow2.f32 %v1654_v12 }
 0xc37   :  { %v1100_v52 = vpop.f32.mrf.mxu3 }
 0xc3c   :  { %v1757_v10 = vpop.eup %1756 }
 0xc3d   :  { %v1153_v15 = vadd.f32 1.0, %v1757_v10 }
 0xc3f   :  { %1758 = vrcp.f32 %v1153_v15  ;;  %v1165_v23 = vand.u32 2147483648, %v1153_v15  ;;  %vm1159_vm4 = vweird.f32 %v1153_v15  ;;  %v1163_v4 = vand.u32 2147483647, %v1153_v15 }
 0xc41   :  { %v1166_v2 = vor.u32 1.1754944e-38, %v1165_v23  ;;  %vm1164_vm1 = vcmp.eq.f32.partialorder %v1163_v4, 8.507059e+37 }
 0xc45   :  { %v1759_v16 = vpop.eup %1758 }
 0xc46   :  { %v1155_v17 = vmul.f32 %v1759_v16, %v1153_v15  ;;  %vm1160_vm3 = vweird.f32 %v1759_v16 }
 0xc47   :  { %vm1161_vm5 = vmor %vm1159_vm4, %vm1160_vm3 }
 0xc48   :  { %v1156_v19 = vsub.f32 1.0, %v1155_v17 }
 0xc4a   :  { %v1157_v20 = vmul.f32 %v1759_v16, %v1156_v19 }
 0xc4c   :  { %v1158_v22 = vadd.f32 %v1759_v16, %v1157_v20 }
 0xc4e   :  { %v1162_v25 = vsel %vm1161_vm5, %v1759_v16, %v1158_v22 }
 0xc4f   :  { %v1167_v8 = vsel %vm1164_vm1, %v1166_v2, %v1162_v25 }
 0xc50   :  { %v1180_v44 = vsub.f32 1.0, %v1167_v8 }
 0xc5d   :  { %v1128_v1 = vpop.permute.xlu2 %1127 }
 0xc5e   :  { %v1130_v3 = vmul.f32 %v1128_v1, %v1124_v57 }
 0xc60   :  { %1132 = vrot.lane.b32.xlu1 %v1130_v3, %s1791_s25 }
 0xc68   :  { %1144 = vrot.lane.b32.xlu1 %v1066_v36, %s1792_s26  ;;  %v1137_v36 = vsub.f32 1.0, %v1124_v57 }
 0xca4   :  { %v1171_v26 = vpop.permute.xlu0 %1170 }
 0xca5   :  { %v1173_v7 = vmul.f32 %v1171_v26, %v1167_v8 }
 0xca7   :  { %1175 = vrot.lane.b32.xlu2 %v1173_v7, %s1791_s25 }
 0xcd2   :  { %v1133_v27 = vpop.permute.xlu1 %1132 }
 0xcd3   :  { %v1135_v29 = vadd.f32 %v1133_v27, %v1103_v46 }
 0xcd5   :  { %1760 = vtanh.f32 %v1135_v29 }
 0xcda   :  { %v1145_v13 = vpop.permute.xlu1 %1144 }
 0xcdb   :  { %v1761_v31 = vpop.eup %1760  ;;  %v1147_v18 = vmul.f32 %v1145_v13, %v1124_v57 }
 0xcdc   :  { %1139 = vrot.lane.b32.xlu0 %v1761_v31, %s1793_s27 }
 0xce4   :  { %1187 = vrot.lane.b32.xlu0 %v2140_v39, %s1792_s26 }
 0xd01   :  { %v1176_v33 = vpop.permute.xlu2 %1175 }
 0xd02   :  { %v1178_v32 = vadd.f32 %v1176_v33, %v1105_v6 }
 0xd04   :  { %1762 = vtanh.f32 %v1178_v32 }
 0xd0a   :  { %v1763_v34 = vpop.eup %1762 }
 0xd0b   :  { %1182 = vrot.lane.b32.xlu2 %v1763_v34, %s1793_s27 }
 0xd4e   :  { %v1140_v38 = vpop.permute.xlu0 %1139 }
 0xd4f   :  { %v1142_v40 = vmul.f32 %v1140_v38, %v1137_v36 }
 0xd51   :  { %v2166_v41 = vadd.f32 %v1147_v18, %v1142_v40 }
 0xd53   :  { %1193 = vrot.lane.b32.xlu1 %v2166_v41, %s1793_s27 }
 0xd56   :  { %v1188_v11 = vpop.permute.xlu0 %1187 }
 0xd57   :  { %v1190_v39 = vmul.f32 %v1188_v11, %v1167_v8 }
 0xd65   :  { %v1183_v46 = vpop.permute.xlu2 %1182 }
 0xd66   :  { %v1185_v48 = vmul.f32 %v1183_v46, %v1180_v44 }
 0xd68   :  { %v2170_v24 = vadd.f32 %v1190_v39, %v1185_v48 }
 0xd6a   :  { %1198 = vrot.lane.b32.xlu2 %v2170_v24, %s1793_s27 }
 0xdc4   :  { %v1199_v49 = vpop.permute.xlu2 %1198 }
 0xdc5   :  { %1201 = vst.msk [vmem:[#allocation5] sm:$0xff] %vm78_vm0, %v1199_v49  ;;  %v1194_v50 = vpop.permute.xlu1 %1193 }
 0xdc6   :  { %1196 = vst.msk [vmem:[#allocation4] sm:$0xff] %vm78_vm0, %v1194_v50 }
 0xdcc   :  { %v2176_v52 = vld [vmem:[#allocation5] sm:$0xff] }
 0xdcd   :  { %v1216_v30 = vld [vmem:[#allocation4] sm:$0xff]  ;;  %v1235_v53 = vpack.c.bf16 %v2176_v52, %v2176_v52 }
 0xdce   :  { %v1218_v54 = vpack.c.bf16 %v1216_v30, %v1216_v30 }
 0xdcf   :  { %1658 = vmatmul.msk.bf16.vlgmr.msra.gmra.mxu1 %vm78_vm0, %v1235_v53 }
 0xdd0   :  { %1657 = vmatmul.msk.bf16.vlgmr.msra.gmra.mxu0 %vm78_vm0, %v1218_v54 }
 0xe4c   :  { %v1248_v55 = vpop.f32.mrf.mxu1 }
 0xe4d   :  { %v1231_v56 = vpop.f32.mrf.mxu0  ;;  %v1249_v58 = vadd.f32 %v2155_v47, %v1248_v55 }
 0xe4e   :  { %v1232_v59 = vadd.f32 %v2148_v42, %v1231_v56 }
 0xe4f   :  { %1320 = vrot.lane.b32.xlu1 %v1249_v58, %s1791_s25  ;;  %v1299_v1 = vadd.f32 %v1255_v63, %v1249_v58 }
 0xe50   :  { %1277 = vrot.lane.b32.xlu0 %v1232_v59, %s1791_s25  ;;  %v1256_v57 = vadd.f32 %v1253_v0, %v1232_v59 }
 0xe51   :  { %v1660_v3 = vmul.f32 -1.442695, %v1299_v1 }
 0xe52   :  { %v1659_v6 = vmul.f32 -1.442695, %v1256_v57 }
 0xe53   :  { %1764 = vpow2.f32 %v1660_v3 }
 0xe54   :  { %v1250_v60 = vpop.f32.mrf.mxu1  ;;  %1766 = vpow2.f32 %v1659_v6 }
 0xe55   :  { %v1233_v61 = vpop.f32.mrf.mxu0 }
 0xe59   :  { %v1765_v9 = vpop.eup %1764 }
 0xe5a   :  { %v1767_v12 = vpop.eup %1766  ;;  %v1303_v10 = vadd.f32 1.0, %v1765_v9 }
 0xe5b   :  { %v1260_v15 = vadd.f32 1.0, %v1767_v12 }
 0xe5c   :  { %1768 = vrcp.f32 %v1303_v10  ;;  %v1315_v8 = vand.u32 2147483648, %v1303_v10  ;;  %vm1309_vm8 = vweird.f32 %v1303_v10  ;;  %v1313_v27 = vand.u32 2147483647, %v1303_v10 }
 0xe5d   :  { %1770 = vrcp.f32 %v1260_v15  ;;  %v1272_v7 = vand.u32 2147483648, %v1260_v15  ;;  %vm1266_vm9 = vweird.f32 %v1260_v15  ;;  %v1270_v29 = vand.u32 2147483647, %v1260_v15 }
 0xe5e   :  { %v1316_v32 = vor.u32 1.1754944e-38, %v1315_v8  ;;  %vm1314_vm12 = vcmp.eq.f32.partialorder %v1313_v27, 8.507059e+37 }
 0xe5f   :  { %v1273_v34 = vor.u32 1.1754944e-38, %v1272_v7  ;;  %vm1271_vm13 = vcmp.eq.f32.partialorder %v1270_v29, 8.507059e+37 }
 0xe62   :  { %v1769_v16 = vpop.eup %1768 }
 0xe63   :  { %v1771_v17 = vpop.eup %1770  ;;  %v1305_v19 = vmul.f32 %v1769_v16, %v1303_v10  ;;  %vm1310_vm6 = vweird.f32 %v1769_v16 }
 0xe64   :  { %v1262_v20 = vmul.f32 %v1771_v17, %v1260_v15  ;;  %vm1267_vm7 = vweird.f32 %v1771_v17  ;;  %vm1311_vm10 = vmor %vm1309_vm8, %vm1310_vm6 }
 0xe65   :  { %v1306_v22 = vsub.f32 1.0, %v1305_v19  ;;  %vm1268_vm11 = vmor %vm1266_vm9, %vm1267_vm7  ;;  %vm457_vm7 = vcmask 257024  }
 0xe66   :  { %v1263_v23 = vsub.f32 1.0, %v1262_v20 }
 0xe67   :  { %v1307_v4 = vmul.f32 %v1769_v16, %v1306_v22  ;;  %v1403_v22 = vld [vmem:[#allocation2 + $0x38] sm:$0xff] }
 0xe68   :  { %v1264_v25 = vmul.f32 %v1771_v17, %v1263_v23 }
 0xe69   :  { %v1308_v2 = vadd.f32 %v1769_v16, %v1307_v4 }
 0xe6a   :  { %v1265_v26 = vadd.f32 %v1771_v17, %v1264_v25 }
 0xe6b   :  { %v1312_v31 = vsel %vm1311_vm10, %v1769_v16, %v1308_v2 }
 0xe6c   :  { %v1269_v33 = vsel %vm1268_vm11, %v1771_v17, %v1265_v26  ;;  %v1317_v13 = vsel %vm1314_vm12, %v1316_v32, %v1312_v31  ;;  %v2210_v26 = vld [vmem:[#allocation3] sm:$0xff] }
 0xe6d   :  { %v1274_v18 = vsel %vm1271_vm13, %v1273_v34, %v1269_v33  ;;  %v1330_v60 = vsub.f32 1.0, %v1317_v13 }
 0xe6e   :  { %v1287_v54 = vsub.f32 1.0, %v1274_v18 }
 0xec1   :  { %v1321_v36 = vpop.permute.xlu1 %1320 }
 0xec2   :  { %v1278_v38 = vpop.permute.xlu0 %1277  ;;  %v1323_v40 = vmul.f32 %v1321_v36, %v1317_v13 }
 0xec3   :  { %v1280_v11 = vmul.f32 %v1278_v38, %v1274_v18 }
 0xec4   :  { %1325 = vrot.lane.b32.xlu0 %v1323_v40, %s1791_s25 }
 0xec5   :  { %1282 = vrot.lane.b32.xlu2 %v1280_v11, %s1791_s25 }
 0xecd   :  { %1294 = vrot.lane.b32.xlu2 %v1216_v30, %s1792_s26 }
 0xf1f   :  { %v1283_v44 = vpop.permute.xlu2 %1282 }
 0xf20   :  { %v1285_v46 = vadd.f32 %v1283_v44, %v1253_v0 }
 0xf22   :  { %1772 = vtanh.f32 %v1285_v46 }
 0xf27   :  { %v1295_v53 = vpop.permute.xlu2 %1294 }
 0xf28   :  { %v1773_v39 = vpop.eup %1772  ;;  %v1297_v56 = vmul.f32 %v1295_v53, %v1274_v18 }
 0xf29   :  { %1289 = vrot.lane.b32.xlu1 %v1773_v39, %s1793_s27 }
 0xf31   :  { %1337 = vrot.lane.b32.xlu1 %v2176_v52, %s1792_s26 }
 0xf36   :  { %v1326_v48 = vpop.permute.xlu0 %1325 }
 0xf37   :  { %v1328_v49 = vadd.f32 %v1326_v48, %v1255_v63 }
 0xf39   :  { %1774 = vtanh.f32 %v1328_v49 }
 0xf3f   :  { %v1775_v50 = vpop.eup %1774 }
 0xf40   :  { %1332 = vrot.lane.b32.xlu0 %v1775_v50, %s1793_s27  ;;  %v452_v50 = vpack.c.bf16 %v1980_v37, %v1980_v37  ;;  %v902_v37 = vpack.c.bf16 %v2090_v14, %v2090_v14 }
 0xf9b   :  { %v1290_v55 = vpop.permute.xlu1 %1289 }
 0xf9c   :  { %v1292_v30 = vmul.f32 %v1290_v55, %v1287_v54 }
 0xf9e   :  { %v2193_v58 = vadd.f32 %v1297_v56, %v1292_v30 }
 0xfa0   :  { %1343 = vrot.lane.b32.xlu2 %v2193_v58, %s1793_s27 }
 0xfa3   :  { %v1338_v59 = vpop.permute.xlu1 %1337 }
 0xfa4   :  { %v1340_v52 = vmul.f32 %v1338_v59, %v1317_v13 }
 0xfb2   :  { %v1333_v61 = vpop.permute.xlu0 %1332 }
 0xfb3   :  { %v1335_v0 = vmul.f32 %v1333_v61, %v1330_v60  ;;  %v609_v61 = vpack.c.bf16 %v2015_v51, %v2015_v51 }
 0xfb5   :  { %v2197_v63 = vadd.f32 %v1340_v52, %v1335_v0  ;;  %v1059_v52 = vpack.c.bf16 %v2133_v35, %v2133_v35  ;;  %v1352_v0 = vpack.c.bf16 %v2193_v58, %v2193_v58 }
 0xfb7   :  { %1348 = vrot.lane.b32.xlu0 %v2197_v63, %s1793_s27 }
 0xffa   :  { %v1344_v1 = vpop.permute.xlu2 %1343 }
 0xffb   :  { %1346 = vst.msk [vmem:[#allocation4] sm:$0xff] %vm78_vm0, %v1344_v1 }
0x1002   :  { %v1366_v57 = vld [vmem:[#allocation4] sm:$0xff] }
0x1003   :  { %v1368_v3 = vpack.c.bf16 %v1366_v57, %v1366_v57 }
0x1005   :  { %1663 = vmatmul.msk.bf16.vlgmr.msrb.gmra.mxu2 %vm78_vm0, %v1368_v3 }
0x1029   :  { %v1349_v6 = vpop.permute.xlu0 %1348 }
0x102a   :  { %1351 = vst.msk [vmem:[#allocation5] sm:$0xff] %vm78_vm0, %v1349_v6  ;;  %v602_v6 = vpack.c.bf16 %v2011_v45, %v2011_v45 }
0x1031   :  { %v1367_v9 = vld [vmem:[#allocation5] sm:$0xff] }
0x1032   :  { %v1385_v12 = vpack.c.bf16 %v1367_v9, %v1367_v9 }
0x1034   :  { %1664 = vmatmul.msk.bf16.vlgmr.msrb.gmra.mxu3 %vm78_vm0, %v1385_v12  ;;  %v759_v12 = vpack.c.bf16 %v2054_v5, %v2054_v5  ;;  %v459_v5 = vpack.c.bf16 %v1984_v43, %v1984_v43  ;;  %v909_v43 = vpack.c.bf16 %v2098_v21, %v2098_v21 }
0x1088   :  { %v1381_v10 = vpop.f32.mrf.mxu2 }
0x1089   :  { %v1382_v15 = vadd.f32 %v2148_v42, %v1381_v10 }
0x108b   :  { %1426 = vrot.lane.b32.xlu1 %v1382_v15, %s1791_s25  ;;  %v1405_v23 = vadd.f32 %v1403_v22, %v1382_v15  ;;  %v1052_v15 = vpack.c.bf16 %v2129_v28, %v2129_v28  ;;  %v752_v28 = vpack.c.bf16 %v2050_v62, %v2050_v62  ;;  %v1359_v62 = vpack.c.bf16 %v2197_v63, %v2197_v63 }
0x108d   :  { %v1665_v4 = vmul.f32 -1.442695, %v1405_v23 }
0x108f   :  { %1776 = vpow2.f32 %v1665_v4 }
0x1090   :  { %v1383_v16 = vpop.f32.mrf.mxu2 }
0x1095   :  { %v1777_v25 = vpop.eup %1776 }
0x1096   :  { %v1409_v2 = vadd.f32 1.0, %v1777_v25 }
0x1098   :  { %1778 = vrcp.f32 %v1409_v2  ;;  %v1421_v34 = vand.u32 2147483648, %v1409_v2  ;;  %vm1415_vm15 = vweird.f32 %v1409_v2  ;;  %v1419_v13 = vand.u32 2147483647, %v1409_v2 }
0x109a   :  { %v1422_v38 = vor.u32 1.1754944e-38, %v1421_v34  ;;  %vm1420_vm3 = vcmp.eq.f32.partialorder %v1419_v13, 8.507059e+37 }
0x109e   :  { %v1779_v8 = vpop.eup %1778 }
0x109f   :  { %v1411_v27 = vmul.f32 %v1779_v8, %v1409_v2  ;;  %vm1416_vm14 = vweird.f32 %v1779_v8 }
0x10a0   :  { %vm1417_vm2 = vmor %vm1415_vm15, %vm1416_vm14 }
0x10b7   :  { %v1398_v17 = vpop.f32.mrf.mxu3 }
0x10b8   :  { %v1399_v19 = vadd.f32 %v2155_v47, %v1398_v17  ;;  %v1412_v47 = vsub.f32 1.0, %v1411_v27  ;;  %v1209_v17 = vpack.c.bf16 %v2170_v24, %v2170_v24  ;;  %v1202_v24 = vpack.c.bf16 %v2166_v41, %v2166_v41 }
0x10ba   :  { %1469 = vrot.lane.b32.xlu2 %v1399_v19, %s1791_s25  ;;  %v1448_v42 = vadd.f32 %v2210_v26, %v1399_v19  ;;  %v1413_v31 = vmul.f32 %v1779_v8, %v1412_v47 }
0x10bc   :  { %v1666_v7 = vmul.f32 -1.442695, %v1448_v42  ;;  %v1414_v32 = vadd.f32 %v1779_v8, %v1413_v31 }
0x10be   :  { %1780 = vpow2.f32 %v1666_v7  ;;  %v1418_v36 = vsel %vm1417_vm2, %v1779_v8, %v1414_v32 }
0x10bf   :  { %v1400_v20 = vpop.f32.mrf.mxu3  ;;  %v2213_v18 = vsel %vm1420_vm3, %v1422_v38, %v1418_v36 }
0x10c2   :  { %1486 = vrot.lane.b32.xlu2 %v1367_v9, %s1792_s26 }
0x10c4   :  { %v1781_v29 = vpop.eup %1780 }
0x10c5   :  { %v1452_v33 = vadd.f32 1.0, %v1781_v29 }
0x10c7   :  { %1782 = vrcp.f32 %v1452_v33  ;;  %v1464_v53 = vand.u32 2147483648, %v1452_v33  ;;  %vm1458_vm5 = vweird.f32 %v1452_v33  ;;  %v1462_v54 = vand.u32 2147483647, %v1452_v33 }
0x10c9   :  { %v1465_v56 = vor.u32 1.1754944e-38, %v1464_v53  ;;  %vm1463_vm6 = vcmp.eq.f32.partialorder %v1462_v54, 8.507059e+37 }
0x10cd   :  { %v1783_v11 = vpop.eup %1782 }
0x10ce   :  { %v1454_v46 = vmul.f32 %v1783_v11, %v1452_v33  ;;  %vm1459_vm4 = vweird.f32 %v1783_v11 }
0x10cf   :  { %vm1460_vm1 = vmor %vm1458_vm5, %vm1459_vm4 }
0x10d0   :  { %v1455_v39 = vsub.f32 1.0, %v1454_v46 }
0x10d2   :  { %v1456_v48 = vmul.f32 %v1783_v11, %v1455_v39 }
0x10d4   :  { %v1457_v49 = vadd.f32 %v1783_v11, %v1456_v48 }
0x10d6   :  { %v1461_v55 = vsel %vm1460_vm1, %v1783_v11, %v1457_v49 }
0x10d7   :  { %v2221_v59 = vsel %vm1463_vm6, %v1465_v56, %v1461_v55 }
0x10d8   :  { %v1479_v8 = vsub.f32 1.0, %v2221_v59 }
0x10fd   :  { %v1427_v40 = vpop.permute.xlu1 %1426 }
0x10fe   :  { %v1429_v44 = vmul.f32 %v1427_v40, %v2213_v18 }
0x1100   :  { %1431 = vrot.lane.b32.xlu0 %v1429_v44, %s1791_s25 }
0x1108   :  { %1443 = vrot.lane.b32.xlu0 %v1366_v57, %s1792_s26 }
0x1110   :  { %454 = vrot.lane.b32.xlu0 %v452_v50, %s1793_s27 }
0x1114   :  { %v1470_v30 = vpop.permute.xlu2 %1469 }
0x1115   :  { %v1472_v60 = vmul.f32 %v1470_v30, %v2221_v59 }
0x1117   :  { %1474 = vrot.lane.b32.xlu1 %v1472_v60, %s1791_s25 }
0x1118   :  { %611 = vrot.lane.b32.xlu0 %v609_v61, %s1793_s27 }
0x111c   :  { %v1487_v20 = vpop.permute.xlu2 %1486 }
0x111d   :  { %v1489_v27 = vmul.f32 %v1487_v20, %v2221_v59 }
0x1120   :  { %904 = vrot.lane.b32.xlu0 %v902_v37, %s1793_s27 }
0x1128   :  { %1061 = vrot.lane.b32.xlu0 %v1059_v52, %s1793_s27 }
0x1130   :  { %1354 = vrot.lane.b32.xlu0 %v1352_v0, %s1793_s27 }
0x1172   :  { %v1432_v51 = vpop.permute.xlu0 %1431 }
0x1173   :  { %v1434_v1 = vadd.f32 %v1432_v51, %v1403_v22  ;;  %v1436_v22 = vsub.f32 1.0, %v2213_v18 }
0x1175   :  { %1784 = vtanh.f32 %v1434_v1 }
0x117a   :  { %v1444_v57 = vpop.permute.xlu0 %1443 }
0x117b   :  { %v1785_v3 = vpop.eup %1784  ;;  %v1446_v4 = vmul.f32 %v1444_v57, %v2213_v18 }
0x117c   :  { %1438 = vrot.lane.b32.xlu2 %v1785_v3, %s1793_s27 }
0x1182   :  { %v455_v14 = vpop.permute.xlu0 %454 }
0x1183   :  { %458 = vst.msk [vmem:[%s2351_s10] sm:$0xf] %vm457_vm7, %v455_v14 }
0x1184   :  { %604 = vrot.lane.b32.xlu2 %v602_v6, %s1793_s27 }
0x1189   :  { %v1475_v35 = vpop.permute.xlu1 %1474 }
0x118a   :  { %v1477_v58 = vadd.f32 %v1475_v35, %v2210_v26  ;;  %v612_v9 = vpop.permute.xlu0 %611 }
0x118b   :  { %1632 = vst.msk [vmem:[%s2352_s11 + $0x18] sm:$0xf] %vm457_vm7, %v612_v9 }
0x118c   :  { %1786 = vtanh.f32 %v1477_v58  ;;  %761 = vrot.lane.b32.xlu2 %v759_v12, %s1793_s27 }
0x1192   :  { %v1787_v45 = vpop.eup %1786  ;;  %v905_v10 = vpop.permute.xlu0 %904 }
0x1193   :  { %1643 = vst.msk [vmem:[%s2351_s10 + $0xc] sm:$0xf] %vm457_vm7, %v905_v10  ;;  %1481 = vrot.lane.b32.xlu1 %v1787_v45, %s1793_s27 }
0x1194   :  { %1054 = vrot.lane.b32.xlu2 %v1052_v15, %s1793_s27 }
0x119a   :  { %v1062_v16 = vpop.permute.xlu0 %1061 }
0x119b   :  { %1650 = vst.msk [vmem:[%s2352_s11 + $0xc] sm:$0xf] %vm457_vm7, %v1062_v16  ;;  %461 = vrot.lane.b32.xlu1 %v459_v5, %s1793_s27 }
0x119c   :  { %1211 = vrot.lane.b32.xlu2 %v1209_v17, %s1793_s27 }
0x11a2   :  { %v1355_v19 = vpop.permute.xlu0 %1354 }
0x11a3   :  { %1661 = vst.msk [vmem:[%s2351_s10 + $0x18] sm:$0xf] %vm457_vm7, %v1355_v19  ;;  %754 = vrot.lane.b32.xlu1 %v752_v28, %s1793_s27 }
0x11ab   :  { %911 = vrot.lane.b32.xlu1 %v909_v43, %s1793_s27 }
0x11b3   :  { %1204 = vrot.lane.b32.xlu1 %v1202_v24, %s1793_s27 }
0x11bb   :  { %1361 = vrot.lane.b32.xlu1 %v1359_v62, %s1793_s27 }
0x11d6   :  { %v1439_v23 = vpop.permute.xlu2 %1438 }
0x11d7   :  { %v1441_v25 = vmul.f32 %v1439_v23, %v1436_v22 }
0x11d9   :  { %v1447_v21 = vadd.f32 %v1446_v4, %v1441_v25 }
0x11db   :  { %1492 = vrot.lane.b32.xlu2 %v1447_v21, %s1793_s27  ;;  %v1501_v2 = vpack.c.bf16 %v1447_v21, %v1447_v21 }
0x11dd   :  { %1503 = vrot.lane.b32.xlu1 %v1501_v2, %s1793_s27 }
0x11de   :  { %v605_v41 = vpop.permute.xlu2 %604 }
0x11df   :  { %1631 = vst.msk [vmem:[%s2351_s10 + $0x4] sm:$0xf] %vm457_vm7, %v605_v41 }
0x11e6   :  { %v762_v63 = vpop.permute.xlu2 %761 }
0x11e7   :  { %1638 = vst.msk [vmem:[%s2352_s11 + $0x14] sm:$0xf] %vm457_vm7, %v762_v63 }
0x11ee   :  { %v1055_v26 = vpop.permute.xlu2 %1054 }
0x11ef   :  { %1649 = vst.msk [vmem:[%s2351_s10 + $0x10] sm:$0xf] %vm457_vm7, %v1055_v26 }
0x11f6   :  { %v1212_v42 = vpop.permute.xlu2 %1211 }
0x11f7   :  { %1656 = vst.msk [vmem:[%s2352_s11 + $0x8] sm:$0xf] %vm457_vm7, %v1212_v42 }
0x1205   :  { %v1482_v7 = vpop.permute.xlu1 %1481 }
0x1206   :  { %v1484_v47 = vmul.f32 %v1482_v7, %v1479_v8 }
0x1208   :  { %v1490_v29 = vadd.f32 %v1489_v27, %v1484_v47 }
0x120a   :  { %1497 = vrot.lane.b32.xlu0 %v1490_v29, %s1793_s27  ;;  %v1508_v31 = vpack.c.bf16 %v1490_v29, %v1490_v29 }
0x120c   :  { %1510 = vrot.lane.b32.xlu2 %v1508_v31, %s1793_s27 }
0x120d   :  { %v462_v33 = vpop.permute.xlu1 %461 }
0x120e   :  { %1626 = vst.msk [vmem:[%s2352_s11 + $0x1c] sm:$0xf] %vm457_vm7, %v462_v33 }
0x1215   :  { %v755_v32 = vpop.permute.xlu1 %754 }
0x1216   :  { %1637 = vst.msk [vmem:[%s2351_s10 + $0x8] sm:$0xf] %vm457_vm7, %v755_v32 }
0x121d   :  { %v912_v34 = vpop.permute.xlu1 %911 }
0x121e   :  { %1644 = vst.msk [vmem:[%s2352_s11 + $0x10] sm:$0xf] %vm457_vm7, %v912_v34 }
0x1225   :  { %v1205_v13 = vpop.permute.xlu1 %1204 }
0x1226   :  { %1655 = vst.msk [vmem:[%s2351_s10 + $0x14] sm:$0xf] %vm457_vm7, %v1205_v13 }
0x122d   :  { %v1362_v36 = vpop.permute.xlu1 %1361 }
0x122e   :  { %1662 = vst.msk [vmem:[%s2352_s11 + $0x4] sm:$0xf] %vm457_vm7, %v1362_v36 }
0x1235   :  { %v1493_v38 = vpop.permute.xlu2 %1492 }
0x1236   :  { %1495 = vst.msk [vmem:[#allocation4] sm:$0xff] %vm78_vm0, %v1493_v38 }
0x124f   :  { %v1504_v18 = vpop.permute.xlu1 %1503 }
0x1250   :  { %1667 = vst.msk [vmem:[%s2351_s10 + $0x1c] sm:$0xf] %vm457_vm7, %v1504_v18 }
0x1266   :  { %v1511_v40 = vpop.permute.xlu2 %1510 }
0x1267   :  { %1513 = vst.msk [vmem:[%s2352_s11] sm:$0xf] %vm457_vm7, %v1511_v40 }
0x127c   :  { %v1498_v11 = vpop.permute.xlu0 %1497 }
0x127d   :  { %1500 = vst.msk [vmem:[#allocation5] sm:$0xff] %vm78_vm0, %v1498_v11 }

// kernel: forward.4
= control target key start
LH: loop header
LB: loop body
LE: loop exit
PB: predicated region body
PF: predicated region fallthrough
CT: control target
= control target key end

     0   :  { %vm112_vm0 = vcmask 261120   ;;  %v2084_v20 = vmov 0.0   ;;  %vm298_vm1 = vcmask 785408   ;;  %s2085_s19 = smov 64   ;;  %s2086_s20 = smov 32   ;;  %s2709_s5 = inlined_call_operand.vmem [shape: bf16[32,96], index: 5, kind: input, shape index: {}]   ;;  %s2710_s4 = inlined_call_operand.vmem [shape: bf16[32,96], index: 4, kind: input, shape index: {}]   ;;  %s2711_s7 = inlined_call_operand.vmem [shape: bf16[32,96], index: 7, kind: input, shape index: {}]   ;;  %s2712_s6 = inlined_call_operand.vmem [shape: bf16[32,96], index: 6, kind: input, shape index: {}]   ;;  %s2713_s10 = inlined_call_operand.vmem [shape: bf16[32,96], index: 10, kind: input, shape index: {}]   ;;  %s2714_s11 = inlined_call_operand.vmem [shape: bf16[32,96], index: 11, kind: input, shape index: {}]   ;;  %s2715_s1 = inlined_call_operand.vmem [shape: bf16[8,8,32], index: 1, kind: input, shape index: {}, may-alias: {1,3}]   ;;  %s2716_s0 = inlined_call_operand.vmem [shape: bf16[8,8,32], index: 0, kind: input, shape index: {}, may-alias: {0,2}]   ;;  %s2717_s3 = inlined_call_operand.vmem [shape: bf16[8,8,32], index: 3, kind: input, shape index: {}, may-alias: {1,3}]   ;;  %s2718_s2 = inlined_call_operand.vmem [shape: bf16[8,8,32], index: 2, kind: input, shape index: {}, may-alias: {0,2}]   ;;  %s2719_s8 = inlined_call_operand.vmem [shape: f32[1,96], index: 8, kind: input, shape index: {}]   ;;  %s2720_s9 = inlined_call_operand.vmem [shape: f32[1,96], index: 9, kind: input, shape index: {}]   ;;  %s2721_s12 = inlined_call_operand.vmem [shape: f32[1,96], index: 12, kind: input, shape index: {}]   ;;  %s2722_s13 = inlined_call_operand.vmem [shape: f32[1,96], index: 13, kind: input, shape index: {}]   ;;  %s2723_s14 = inlined_call_operand.vmem [shape: bf16[8,8,32], index: 14, kind: output, shape index: {0}]   ;;  %s2724_s15 = inlined_call_operand.vmem [shape: bf16[8,8,32], index: 15, kind: output, shape index: {1}]  }
   0x1   :  { %v1961_v0 = vld [vmem:[%s2709_s5 + $0x8] sm:$0xff]  ;;  %v1960_v4 = vld [vmem:[%s2709_s5] sm:$0xff]  ;;  %113 = vst.msk [vmem:[#allocation4] sm:$0xff] %vm112_vm0, %v2084_v20  ;;  %v1958_v21 = vld [vmem:[%s2715_s1 + $0x10] sm:$0xff]  ;;  %s2087_s5 = smov 96  }
   0x2   :  { %v1955_v1 = vld [vmem:[%s2710_s4 + $0x8] sm:$0xff]  ;;  %190 = vmatpush.bf16.msra.mxu0 %v1961_v0  ;;  %v1954_v5 = vld [vmem:[%s2710_s4] sm:$0xff]  ;;  %114 = vst.msk [vmem:[#allocation5] sm:$0xff] %vm112_vm0, %v2084_v20  ;;  %v1952_v22 = vld [vmem:[%s2716_s0 + $0x10] sm:$0xff] }
   0x3   :  { %v1973_v2 = vld [vmem:[%s2711_s7 + $0x8] sm:$0xff]  ;;  %263 = vmatpush.bf16.msra.mxu1 %v1955_v1  ;;  %v1972_v6 = vld [vmem:[%s2711_s7] sm:$0xff]  ;;  %v1970_v23 = vld [vmem:[%s2717_s3 + $0x10] sm:$0xff] }
   0x4   :  { %v1967_v3 = vld [vmem:[%s2712_s6 + $0x8] sm:$0xff]  ;;  %381 = vmatpush.bf16.msra.mxu2 %v1973_v2  ;;  %v1966_v7 = vld [vmem:[%s2712_s6] sm:$0xff]  ;;  %v1964_v24 = vld [vmem:[%s2718_s2 + $0x10] sm:$0xff] }
   0x5   :  { %454 = vmatpush.bf16.msra.mxu3 %v1967_v3  ;;  %v2195_v8 = vld [vmem:[%s2713_s10 + $0x8] sm:$0xff]  ;;  %v1956_v10 = vld [vmem:[%s2715_s1] sm:$0xff]  ;;  %v1959_v25 = vld [vmem:[%s2715_s1 + $0x18] sm:$0xff] }
   0x6   :  { %v2200_v9 = vld [vmem:[%s2714_s11 + $0x8] sm:$0xff]  ;;  %v1950_v11 = vld [vmem:[%s2716_s0] sm:$0xff]  ;;  %191 = vmatpush.bf16.msra.mxu0 %v1960_v4  ;;  %v1953_v26 = vld [vmem:[%s2716_s0 + $0x18] sm:$0xff] }
   0x7   :  { %264 = vmatpush.bf16.msra.mxu1 %v1954_v5  ;;  %v1968_v12 = vld [vmem:[%s2717_s3] sm:$0xff]  ;;  %v1957_v16 = vld [vmem:[%s2715_s1 + $0x8] sm:$0xff]  ;;  %v1971_v27 = vld [vmem:[%s2717_s3 + $0x18] sm:$0xff] }
   0x8   :  { %v1962_v13 = vld [vmem:[%s2718_s2] sm:$0xff]  ;;  %382 = vmatpush.bf16.msra.mxu2 %v1972_v6  ;;  %v1951_v17 = vld [vmem:[%s2716_s0 + $0x8] sm:$0xff]  ;;  %v1965_v28 = vld [vmem:[%s2718_s2 + $0x18] sm:$0xff] }
   0x9   :  { %455 = vmatpush.bf16.msra.mxu3 %v1966_v7  ;;  %1800 = vmatmul.msk.bf16.vlgmr.msra.gmra.mxu0 %vm112_vm0, %v1956_v10  ;;  %v2223_v14 = vld [vmem:[%s2713_s10] sm:$0xff]  ;;  %v1969_v18 = vld [vmem:[%s2717_s3 + $0x8] sm:$0xff] }
   0xa   :  { %534 = vmatpush.bf16.msrb.mxu0 %v2195_v8  ;;  %1828 = vmatmul.msk.bf16.vlgmr.msra.gmra.mxu1 %vm112_vm0, %v1950_v11  ;;  %v2228_v15 = vld [vmem:[%s2714_s11] sm:$0xff]  ;;  %v1963_v19 = vld [vmem:[%s2718_s2 + $0x8] sm:$0xff] }
   0xb   :  { %566 = vmatpush.bf16.msrb.mxu1 %v2200_v9  ;;  %1856 = vmatmul.msk.bf16.vlgmr.msra.gmra.mxu2 %vm112_vm0, %v1968_v12  ;;  %v2294_v29 = vld [vmem:[#allocation4] sm:$0xff]  ;;  %v2296_v30 = vld [vmem:[#allocation5] sm:$0xff] }
   0xc   :  { %1884 = vmatmul.msk.bf16.vlgmr.msra.gmra.mxu3 %vm112_vm0, %v1962_v13  ;;  %698 = vmatpush.bf16.msrb.mxu2 %v2195_v8  ;;  %v509_v31 = vpack.c.bf16 %v2294_v29, %v2294_v29  ;;  %v541_v32 = vpack.c.bf16 %v2296_v30, %v2296_v30  ;;  %v2311_v33 = vld [vmem:[%s2719_s8] ss:$0 sm:$0xff] }
   0xd   :  { %715 = vmatpush.bf16.msrb.mxu3 %v2200_v9  ;;  %v2318_v41 = vld [vmem:[%s2720_s9] ss:$0 sm:$0xff] }
   0xe   :  { %535 = vmatpush.bf16.msrb.mxu0 %v2223_v14 }
   0xf   :  { %567 = vmatpush.bf16.msrb.mxu1 %v2228_v15 }
  0x10   :  { %699 = vmatpush.bf16.msrb.mxu2 %v2223_v14 }
  0x11   :  { %716 = vmatpush.bf16.msrb.mxu3 %v2228_v15 }
  0x12   :  { %848 = vmatpush.bf16.msra.mxu0 %v2195_v8 }
  0x13   :  { %865 = vmatpush.bf16.msra.mxu1 %v2200_v9 }
  0x14   :  { %998 = vmatpush.bf16.msra.mxu2 %v2195_v8 }
  0x15   :  { %1015 = vmatpush.bf16.msra.mxu3 %v2200_v9 }
  0x16   :  { %849 = vmatpush.bf16.msra.mxu0 %v2223_v14 }
  0x17   :  { %866 = vmatpush.bf16.msra.mxu1 %v2228_v15 }
  0x18   :  { %999 = vmatpush.bf16.msra.mxu2 %v2223_v14 }
  0x19   :  { %1016 = vmatpush.bf16.msra.mxu3 %v2228_v15  ;;  %1801 = vmatmul.msk.bf16.gmra.mxu0 %vm112_vm0, %v1957_v16 }
  0x1a   :  { %1829 = vmatmul.msk.bf16.gmra.mxu1 %vm112_vm0, %v1951_v17 }
  0x1b   :  { %1857 = vmatmul.msk.bf16.gmra.mxu2 %vm112_vm0, %v1969_v18 }
  0x1c   :  { %1885 = vmatmul.msk.bf16.gmra.mxu3 %vm112_vm0, %v1963_v19 }
  0x29   :  { %1802 = vmatmul.msk.bf16.gmra.mxu0 %vm112_vm0, %v1958_v21 }
  0x2a   :  { %1830 = vmatmul.msk.bf16.gmra.mxu1 %vm112_vm0, %v1952_v22 }
  0x2b   :  { %1858 = vmatmul.msk.bf16.gmra.mxu2 %vm112_vm0, %v1970_v23 }
  0x2c   :  { %1886 = vmatmul.msk.bf16.gmra.mxu3 %vm112_vm0, %v1964_v24 }
  0x39   :  { %1803 = vmatmul.msk.bf16.gmra.mxu0 %vm112_vm0, %v1959_v25 }
  0x3a   :  { %1831 = vmatmul.msk.bf16.gmra.mxu1 %vm112_vm0, %v1953_v26 }
  0x3b   :  { %1859 = vmatmul.msk.bf16.gmra.mxu2 %vm112_vm0, %v1971_v27 }
  0x3c   :  { %1887 = vmatmul.msk.bf16.gmra.mxu3 %vm112_vm0, %v1965_v28 }
  0x49   :  { %1896 = vmatmul.msk.bf16.vlgmr.msrb.gmra.mxu0 %vm112_vm0, %v509_v31 }
  0x4a   :  { %1905 = vmatmul.msk.bf16.vlgmr.msrb.gmra.mxu1 %vm112_vm0, %v541_v32  ;;  %1148 = vmatpush.bf16.msrb.mxu0 %v2195_v8 }
  0x4b   :  { %1165 = vmatpush.bf16.msrb.mxu1 %v2200_v9 }
  0x4e   :  { %1149 = vmatpush.bf16.msrb.mxu0 %v2223_v14 }
  0x4f   :  { %1166 = vmatpush.bf16.msrb.mxu1 %v2228_v15 }
  0x86   :  { %v193_v34 = vpop.f32.mrf.mxu0 }
  0x87   :  { %v266_v35 = vpop.f32.mrf.mxu1 }
  0x88   :  { %v267_v36 = vadd.f32 %v266_v35, %v193_v34 }
  0x8a   :  { %v290_v37 = vadd.f32 %v2311_v33, %v267_v36 }
  0x8c   :  { %299 = vst.msk [vmem:[#allocation2] sm:$0xff] %vm298_vm1, %v290_v37 }
  0x8e   :  { %v384_v38 = vpop.f32.mrf.mxu2  ;;  %v195_v42 = vpop.f32.mrf.mxu0 }
  0x8f   :  { %v457_v39 = vpop.f32.mrf.mxu3  ;;  %v268_v43 = vpop.f32.mrf.mxu1 }
  0x90   :  { %v458_v40 = vadd.f32 %v457_v39, %v384_v38  ;;  %v269_v44 = vadd.f32 %v268_v43, %v195_v42  ;;  %v2351_v38 = vld [vmem:[%s2721_s12] ss:$0 sm:$0xff] }
  0x92   :  { %v481_v45 = vadd.f32 %v2318_v41, %v458_v40  ;;  %v291_v46 = vadd.f32 %v2311_v33, %v269_v44 }
  0x94   :  { %489 = vst.msk [vmem:[#allocation3] sm:$0xff] %vm298_vm1, %v481_v45 }
  0x95   :  { %300 = vst.msk [vmem:[#allocation2 + $0x8] sm:$0xff] %vm298_vm1, %v291_v46 }
  0x96   :  { %v386_v47 = vpop.f32.mrf.mxu2  ;;  %v198_v50 = vpop.f32.mrf.mxu0 }
  0x97   :  { %v459_v48 = vpop.f32.mrf.mxu3  ;;  %v271_v51 = vpop.f32.mrf.mxu1 }
  0x98   :  { %v460_v49 = vadd.f32 %v459_v48, %v386_v47  ;;  %v272_v52 = vadd.f32 %v271_v51, %v198_v50  ;;  %v573_v50 = vld [vmem:[#allocation2] sm:$0xff] }
  0x9a   :  { %v482_v53 = vadd.f32 %v2318_v41, %v460_v49  ;;  %v292_v54 = vadd.f32 %v2311_v33, %v272_v52 }
  0x9c   :  { %490 = vst.msk [vmem:[#allocation3 + $0x8] sm:$0xff] %vm298_vm1, %v482_v53 }
  0x9d   :  { %301 = vst.msk [vmem:[#allocation2 + $0x10] sm:$0xff] %vm298_vm1, %v292_v54 }
  0x9e   :  { %v389_v55 = vpop.f32.mrf.mxu2  ;;  %v200_v58 = vpop.f32.mrf.mxu0 }
  0x9f   :  { %v462_v56 = vpop.f32.mrf.mxu3  ;;  %v273_v59 = vpop.f32.mrf.mxu1 }
  0xa0   :  { %v463_v57 = vadd.f32 %v462_v56, %v389_v55  ;;  %v274_v60 = vadd.f32 %v273_v59, %v200_v58 }
  0xa2   :  { %v483_v61 = vadd.f32 %v2318_v41, %v463_v57  ;;  %v293_v62 = vadd.f32 %v2311_v33, %v274_v60 }
  0xa4   :  { %491 = vst.msk [vmem:[#allocation3 + $0x10] sm:$0xff] %vm298_vm1, %v483_v61 }
  0xa5   :  { %302 = vst.msk [vmem:[#allocation2 + $0x18] sm:$0xff] %vm298_vm1, %v293_v62 }
  0xa6   :  { %v391_v63 = vpop.f32.mrf.mxu2  ;;  %v203_v2 = vpop.f32.mrf.mxu0 }
  0xa7   :  { %v464_v0 = vpop.f32.mrf.mxu3  ;;  %v276_v3 = vpop.f32.mrf.mxu1 }
  0xa8   :  { %v465_v1 = vadd.f32 %v464_v0, %v391_v63  ;;  %v277_v4 = vadd.f32 %v276_v3, %v203_v2 }
  0xaa   :  { %v484_v5 = vadd.f32 %v2318_v41, %v465_v1  ;;  %v294_v6 = vadd.f32 %v2311_v33, %v277_v4 }
  0xac   :  { %492 = vst.msk [vmem:[#allocation3 + $0x18] sm:$0xff] %vm298_vm1, %v484_v5 }
  0xad   :  { %303 = vst.msk [vmem:[#allocation2 + $0x20] sm:$0xff] %vm298_vm1, %v294_v6 }
  0xae   :  { %v394_v7 = vpop.f32.mrf.mxu2  ;;  %v205_v12 = vpop.f32.mrf.mxu0 }
  0xaf   :  { %v467_v10 = vpop.f32.mrf.mxu3  ;;  %v278_v13 = vpop.f32.mrf.mxu1 }
  0xb0   :  { %v468_v11 = vadd.f32 %v467_v10, %v394_v7  ;;  %v279_v16 = vadd.f32 %v278_v13, %v205_v12 }
  0xb2   :  { %v485_v17 = vadd.f32 %v2318_v41, %v468_v11  ;;  %v295_v18 = vadd.f32 %v2311_v33, %v279_v16 }
  0xb4   :  { %493 = vst.msk [vmem:[#allocation3 + $0x20] sm:$0xff] %vm298_vm1, %v485_v17 }
  0xb5   :  { %304 = vst.msk [vmem:[#allocation2 + $0x28] sm:$0xff] %vm298_vm1, %v295_v18 }
  0xb6   :  { %v396_v19 = vpop.f32.mrf.mxu2  ;;  %v208_v22 = vpop.f32.mrf.mxu0 }
  0xb7   :  { %v469_v20 = vpop.f32.mrf.mxu3  ;;  %v281_v23 = vpop.f32.mrf.mxu1 }
  0xb8   :  { %v470_v21 = vadd.f32 %v469_v20, %v396_v19  ;;  %v282_v24 = vadd.f32 %v281_v23, %v208_v22 }
  0xba   :  { %v486_v25 = vadd.f32 %v2318_v41, %v470_v21  ;;  %v296_v26 = vadd.f32 %v2311_v33, %v282_v24 }
  0xbc   :  { %494 = vst.msk [vmem:[#allocation3 + $0x28] sm:$0xff] %vm298_vm1, %v486_v25 }
  0xbd   :  { %305 = vst.msk [vmem:[#allocation2 + $0x30] sm:$0xff] %vm298_vm1, %v296_v26 }
  0xbe   :  { %v399_v27 = vpop.f32.mrf.mxu2  ;;  %v210_v32 = vpop.f32.mrf.mxu0 }
  0xbf   :  { %v472_v28 = vpop.f32.mrf.mxu3  ;;  %v283_v34 = vpop.f32.mrf.mxu1 }
  0xc0   :  { %v473_v31 = vadd.f32 %v472_v28, %v399_v27  ;;  %v284_v35 = vadd.f32 %v283_v34, %v210_v32 }
  0xc2   :  { %v487_v36 = vadd.f32 %v2318_v41, %v473_v31  ;;  %v297_v37 = vadd.f32 %v2311_v33, %v284_v35  ;;  %v2358_v33 = vld [vmem:[%s2722_s13] ss:$0 sm:$0xff] }
  0xc4   :  { %495 = vst.msk [vmem:[#allocation3 + $0x30] sm:$0xff] %vm298_vm1, %v487_v36 }
  0xc5   :  { %306 = vst.msk [vmem:[#allocation2 + $0x38] sm:$0xff] %vm298_vm1, %v297_v37 }
  0xc6   :  { %v401_v39 = vpop.f32.mrf.mxu2  ;;  %v537_v43 = vpop.f32.mrf.mxu0 }
  0xc7   :  { %v474_v40 = vpop.f32.mrf.mxu3  ;;  %v569_v44 = vpop.f32.mrf.mxu1  ;;  %v538_v45 = vadd.f32 %v2351_v38, %v537_v43 }
  0xc8   :  { %v475_v42 = vadd.f32 %v474_v40, %v401_v39  ;;  %v570_v47 = vadd.f32 %v2358_v33, %v569_v44 }
  0xc9   :  { %597 = vrot.lane.b32.xlu0 %v538_v45, %s2085_s19  ;;  %v576_v51 = vadd.f32 %v573_v50, %v538_v45 }
  0xca   :  { %v488_v46 = vadd.f32 %v2318_v41, %v475_v42 }
  0xcb   :  { %v1906_v52 = vmul.f32 -1.442695, %v576_v51 }
  0xcc   :  { %496 = vst.msk [vmem:[#allocation3 + $0x38] sm:$0xff] %vm298_vm1, %v488_v46 }
  0xcd   :  { %1986 = vpow2.f32 %v1906_v52 }
  0xce   :  { %v539_v48 = vpop.f32.mrf.mxu0 }
  0xcf   :  { %v571_v49 = vpop.f32.mrf.mxu1 }
  0xd1   :  { %640 = vrot.lane.b32.xlu0 %v570_v47, %s2085_s19 }
  0xd3   :  { %v575_v41 = vld [vmem:[#allocation3 + $0x38] sm:$0xff]  ;;  %v1987_v55 = vpop.eup %1986 }
  0xd4   :  { %v619_v53 = vadd.f32 %v575_v41, %v570_v47  ;;  %v580_v56 = vadd.f32 1.0, %v1987_v55  ;;  %v723_v55 = vld [vmem:[#allocation2 + $0x8] sm:$0xff] }
  0xd6   :  { %v1907_v54 = vmul.f32 -1.442695, %v619_v53  ;;  %v592_v3 = vand.u32 2147483648, %v580_v56  ;;  %vm586_vm3 = vweird.f32 %v580_v56  ;;  %v590_v4 = vand.u32 2147483647, %v580_v56 }
  0xd8   :  { %1988 = vpow2.f32 %v1907_v54  ;;  %v593_v7 = vor.u32 1.1754944e-38, %v592_v3  ;;  %vm591_vm5 = vcmp.eq.f32.partialorder %v590_v4, 8.507059e+37 }
  0xd9   :  { %1990 = vrcp.f32 %v580_v56 }
  0xde   :  { %v1989_v57 = vpop.eup %1988 }
  0xdf   :  { %v623_v58 = vadd.f32 1.0, %v1989_v57  ;;  %v1991_v59 = vpop.eup %1990 }
  0xe0   :  { %v582_v60 = vmul.f32 %v1991_v59, %v580_v56  ;;  %vm587_vm2 = vweird.f32 %v1991_v59 }
  0xe1   :  { %1992 = vrcp.f32 %v623_v58  ;;  %vm588_vm4 = vmor %vm586_vm3, %vm587_vm2  ;;  %v635_v16 = vand.u32 2147483648, %v623_v58  ;;  %vm629_vm7 = vweird.f32 %v623_v58  ;;  %v633_v17 = vand.u32 2147483647, %v623_v58 }
  0xe2   :  { %v583_v61 = vsub.f32 1.0, %v582_v60  ;;  %v725_v60 = vld [vmem:[#allocation3 + $0x30] sm:$0xff] }
  0xe3   :  { %v636_v19 = vor.u32 1.1754944e-38, %v635_v16  ;;  %vm634_vm9 = vcmp.eq.f32.partialorder %v633_v17, 8.507059e+37 }
  0xe4   :  { %v584_v63 = vmul.f32 %v1991_v59, %v583_v61 }
  0xe6   :  { %v585_v1 = vadd.f32 %v1991_v59, %v584_v63 }
  0xe7   :  { %v1993_v62 = vpop.eup %1992 }
  0xe8   :  { %v625_v0 = vmul.f32 %v1993_v62, %v623_v58  ;;  %v589_v5 = vsel %vm588_vm4, %v1991_v59, %v585_v1  ;;  %vm630_vm6 = vweird.f32 %v1993_v62 }
  0xe9   :  { %v594_v11 = vsel %vm591_vm5, %v593_v7, %v589_v5  ;;  %vm631_vm8 = vmor %vm629_vm7, %vm630_vm6 }
  0xea   :  { %v626_v2 = vsub.f32 1.0, %v625_v0  ;;  %v607_v32 = vsub.f32 1.0, %v594_v11 }
  0xec   :  { %v627_v6 = vmul.f32 %v1993_v62, %v626_v2 }
  0xee   :  { %v628_v13 = vadd.f32 %v1993_v62, %v627_v6 }
  0xf0   :  { %v632_v18 = vsel %vm631_vm8, %v1993_v62, %v628_v13 }
  0xf1   :  { %v637_v21 = vsel %vm634_vm9, %v636_v19, %v632_v18 }
  0xf2   :  { %v650_v39 = vsub.f32 1.0, %v637_v21 }
 0x13b   :  { %v598_v10 = vpop.permute.xlu0 %597 }
 0x13c   :  { %v600_v12 = vmul.f32 %v598_v10, %v594_v11 }
 0x13e   :  { %602 = vrot.lane.b32.xlu1 %v600_v12, %s2085_s19 }
 0x143   :  { %v641_v20 = vpop.permute.xlu0 %640 }
 0x144   :  { %v643_v22 = vmul.f32 %v641_v20, %v637_v21 }
 0x146   :  { %645 = vrot.lane.b32.xlu1 %v643_v22, %s2085_s19 }
 0x14e   :  { %657 = vrot.lane.b32.xlu1 %v2296_v30, %s2086_s20 }
 0x1b0   :  { %v603_v23 = vpop.permute.xlu1 %602 }
 0x1b1   :  { %v605_v24 = vadd.f32 %v603_v23, %v573_v50 }
 0x1b3   :  { %1994 = vtanh.f32 %v605_v24 }
 0x1b8   :  { %v646_v25 = vpop.permute.xlu1 %645 }
 0x1b9   :  { %v1995_v26 = vpop.eup %1994  ;;  %v648_v27 = vadd.f32 %v646_v25, %v575_v41 }
 0x1ba   :  { %609 = vrot.lane.b32.xlu2 %v1995_v26, %s2087_s5 }
 0x1bb   :  { %1996 = vtanh.f32 %v648_v27 }
 0x1c0   :  { %v658_v37 = vpop.permute.xlu1 %657 }
 0x1c1   :  { %v1997_v28 = vpop.eup %1996  ;;  %v660_v42 = vmul.f32 %v658_v37, %v637_v21 }
 0x1c2   :  { %614 = vrot.lane.b32.xlu2 %v2294_v29, %s2086_s20  ;;  %652 = vrot.lane.b32.xlu0 %v1997_v28, %s2087_s5 }
 0x214   :  { %v610_v31 = vpop.permute.xlu2 %609 }
 0x215   :  { %v612_v30 = vmul.f32 %v610_v31, %v607_v32 }
 0x21c   :  { %v615_v34 = vpop.permute.xlu2 %614 }
 0x21d   :  { %v617_v35 = vmul.f32 %v615_v34, %v594_v11 }
 0x21f   :  { %v2372_v36 = vadd.f32 %v617_v35, %v612_v30 }
 0x221   :  { %663 = vrot.lane.b32.xlu2 %v2372_v36, %s2087_s5 }
 0x234   :  { %v653_v40 = vpop.permute.xlu0 %652 }
 0x235   :  { %v655_v43 = vmul.f32 %v653_v40, %v650_v39 }
 0x237   :  { %v2376_v44 = vadd.f32 %v660_v42, %v655_v43 }
 0x239   :  { %668 = vrot.lane.b32.xlu0 %v2376_v44, %s2087_s5 }
 0x27b   :  { %v664_v29 = vpop.permute.xlu2 %663 }
 0x27c   :  { %666 = vst.msk [vmem:[#allocation4] sm:$0xff] %vm112_vm0, %v664_v29 }
 0x283   :  { %v686_v45 = vld [vmem:[#allocation4] sm:$0xff] }
 0x284   :  { %v688_v46 = vpack.c.bf16 %v686_v45, %v686_v45 }
 0x286   :  { %1909 = vmatmul.msk.bf16.vlgmr.msrb.gmra.mxu2 %vm112_vm0, %v688_v46 }
 0x287   :  { %1298 = vmatpush.bf16.msrb.mxu2 %v2195_v8 }
 0x28b   :  { %1299 = vmatpush.bf16.msrb.mxu2 %v2223_v14 }
 0x2ab   :  { %v669_v47 = vpop.permute.xlu0 %668 }
 0x2ac   :  { %671 = vst.msk [vmem:[#allocation5] sm:$0xff] %vm112_vm0, %v669_v47 }
 0x2b3   :  { %v2385_v48 = vld [vmem:[#allocation5] sm:$0xff] }
 0x2b4   :  { %v705_v49 = vpack.c.bf16 %v2385_v48, %v2385_v48 }
 0x2b6   :  { %1910 = vmatmul.msk.bf16.vlgmr.msrb.gmra.mxu3 %vm112_vm0, %v705_v49 }
 0x2b7   :  { %1315 = vmatpush.bf16.msrb.mxu3 %v2200_v9 }
 0x2bb   :  { %1316 = vmatpush.bf16.msrb.mxu3 %v2228_v15 }
 0x309   :  { %v701_v50 = vpop.f32.mrf.mxu2 }
 0x30a   :  { %v702_v51 = vadd.f32 %v2351_v38, %v701_v50 }
 0x30c   :  { %747 = vrot.lane.b32.xlu1 %v702_v51, %s2085_s19  ;;  %v726_v56 = vadd.f32 %v723_v55, %v702_v51 }
 0x30e   :  { %v1911_v57 = vmul.f32 -1.442695, %v726_v56 }
 0x310   :  { %1998 = vpow2.f32 %v1911_v57 }
 0x311   :  { %v703_v52 = vpop.f32.mrf.mxu2 }
 0x316   :  { %v1999_v58 = vpop.eup %1998 }
 0x317   :  { %v730_v59 = vadd.f32 1.0, %v1999_v58 }
 0x319   :  { %2000 = vrcp.f32 %v730_v59  ;;  %v742_v6 = vand.u32 2147483648, %v730_v59  ;;  %vm736_vm11 = vweird.f32 %v730_v59  ;;  %v740_v7 = vand.u32 2147483647, %v730_v59 }
 0x31b   :  { %v743_v11 = vor.u32 1.1754944e-38, %v742_v6  ;;  %vm741_vm13 = vcmp.eq.f32.partialorder %v740_v7, 8.507059e+37 }
 0x31f   :  { %v2001_v62 = vpop.eup %2000 }
 0x320   :  { %v732_v0 = vmul.f32 %v2001_v62, %v730_v59  ;;  %vm737_vm10 = vweird.f32 %v2001_v62 }
 0x321   :  { %vm738_vm12 = vmor %vm736_vm11, %vm737_vm10 }
 0x322   :  { %v733_v1 = vsub.f32 1.0, %v732_v0 }
 0x324   :  { %v734_v3 = vmul.f32 %v2001_v62, %v733_v1 }
 0x326   :  { %v735_v5 = vadd.f32 %v2001_v62, %v734_v3 }
 0x328   :  { %v739_v10 = vsel %vm738_vm12, %v2001_v62, %v735_v5 }
 0x329   :  { %v744_v12 = vsel %vm741_vm13, %v743_v11, %v739_v10 }
 0x32a   :  { %v757_v40 = vsub.f32 1.0, %v744_v12 }
 0x339   :  { %v718_v41 = vpop.f32.mrf.mxu3 }
 0x33a   :  { %v719_v53 = vadd.f32 %v2358_v33, %v718_v41 }
 0x33c   :  { %790 = vrot.lane.b32.xlu2 %v719_v53, %s2085_s19  ;;  %v769_v61 = vadd.f32 %v725_v60, %v719_v53 }
 0x33e   :  { %v1912_v63 = vmul.f32 -1.442695, %v769_v61 }
 0x340   :  { %2002 = vpow2.f32 %v1912_v63 }
 0x341   :  { %v720_v54 = vpop.f32.mrf.mxu3 }
 0x346   :  { %v2003_v2 = vpop.eup %2002 }
 0x347   :  { %v773_v4 = vadd.f32 1.0, %v2003_v2 }
 0x349   :  { %2004 = vrcp.f32 %v773_v4  ;;  %v785_v22 = vand.u32 2147483648, %v773_v4  ;;  %vm779_vm15 = vweird.f32 %v773_v4  ;;  %v783_v23 = vand.u32 2147483647, %v773_v4 }
 0x34b   :  { %v786_v25 = vor.u32 1.1754944e-38, %v785_v22  ;;  %vm784_vm2 = vcmp.eq.f32.partialorder %v783_v23, 8.507059e+37 }
 0x34f   :  { %v2005_v17 = vpop.eup %2004 }
 0x350   :  { %v775_v18 = vmul.f32 %v2005_v17, %v773_v4  ;;  %vm780_vm14 = vweird.f32 %v2005_v17 }
 0x351   :  { %vm781_vm1 = vmor %vm779_vm15, %vm780_vm14 }
 0x352   :  { %v776_v19 = vsub.f32 1.0, %v775_v18 }
 0x354   :  { %v777_v20 = vmul.f32 %v2005_v17, %v776_v19 }
 0x356   :  { %v778_v21 = vadd.f32 %v2005_v17, %v777_v20  ;;  %v875_v20 = vld [vmem:[#allocation3 + $0x28] sm:$0xff] }
 0x358   :  { %v782_v24 = vsel %vm781_vm1, %v2005_v17, %v778_v21 }
 0x359   :  { %v787_v27 = vsel %vm784_vm2, %v786_v25, %v782_v24 }
 0x35a   :  { %v800_v47 = vsub.f32 1.0, %v787_v27 }
 0x37e   :  { %v748_v13 = vpop.permute.xlu1 %747 }
 0x37f   :  { %v750_v16 = vmul.f32 %v748_v13, %v744_v12 }
 0x381   :  { %752 = vrot.lane.b32.xlu0 %v750_v16, %s2085_s19 }
 0x389   :  { %764 = vrot.lane.b32.xlu0 %v686_v45, %s2086_s20 }
 0x396   :  { %v791_v26 = vpop.permute.xlu2 %790 }
 0x397   :  { %v793_v28 = vmul.f32 %v791_v26, %v787_v27 }
 0x399   :  { %795 = vrot.lane.b32.xlu1 %v793_v28, %s2085_s19 }
 0x3f3   :  { %v753_v31 = vpop.permute.xlu0 %752 }
 0x3f4   :  { %v755_v32 = vadd.f32 %v753_v31, %v723_v55 }
 0x3f6   :  { %2006 = vtanh.f32 %v755_v32 }
 0x3fb   :  { %v765_v39 = vpop.permute.xlu0 %764 }
 0x3fc   :  { %v2007_v34 = vpop.eup %2006  ;;  %v767_v43 = vmul.f32 %v765_v39, %v744_v12 }
 0x3fd   :  { %759 = vrot.lane.b32.xlu2 %v2007_v34, %s2087_s5 }
 0x405   :  { %807 = vrot.lane.b32.xlu2 %v2385_v48, %s2086_s20 }
 0x40b   :  { %v796_v30 = vpop.permute.xlu1 %795 }
 0x40c   :  { %v798_v35 = vadd.f32 %v796_v30, %v725_v60  ;;  %v873_v60 = vld [vmem:[#allocation2 + $0x10] sm:$0xff] }
 0x40e   :  { %2008 = vtanh.f32 %v798_v35 }
 0x414   :  { %v2009_v37 = vpop.eup %2008 }
 0x415   :  { %802 = vrot.lane.b32.xlu1 %v2009_v37, %s2087_s5 }
 0x457   :  { %v760_v42 = vpop.permute.xlu2 %759 }
 0x458   :  { %v762_v29 = vmul.f32 %v760_v42, %v757_v40 }
 0x45a   :  { %v2403_v45 = vadd.f32 %v767_v43, %v762_v29 }
 0x45c   :  { %813 = vrot.lane.b32.xlu0 %v2403_v45, %s2087_s5 }
 0x45f   :  { %v808_v46 = vpop.permute.xlu2 %807 }
 0x460   :  { %v810_v48 = vmul.f32 %v808_v46, %v787_v27 }
 0x487   :  { %v803_v49 = vpop.permute.xlu1 %802 }
 0x488   :  { %v805_v50 = vmul.f32 %v803_v49, %v800_v47 }
 0x48a   :  { %v2407_v51 = vadd.f32 %v810_v48, %v805_v50 }
 0x48c   :  { %818 = vrot.lane.b32.xlu1 %v2407_v51, %s2087_s5 }
 0x4ce   :  { %v814_v52 = vpop.permute.xlu0 %813 }
 0x4cf   :  { %816 = vst.msk [vmem:[#allocation4] sm:$0xff] %vm112_vm0, %v814_v52 }
 0x4d6   :  { %v836_v41 = vld [vmem:[#allocation4] sm:$0xff] }
 0x4d7   :  { %v838_v53 = vpack.c.bf16 %v836_v41, %v836_v41 }
 0x4d9   :  { %1915 = vmatmul.msk.bf16.vlgmr.msra.gmra.mxu0 %vm112_vm0, %v838_v53 }
 0x4da   :  { %1448 = vmatpush.bf16.msra.mxu0 %v2195_v8 }
 0x4de   :  { %1449 = vmatpush.bf16.msra.mxu0 %v2223_v14 }
 0x4fe   :  { %v819_v54 = vpop.permute.xlu1 %818 }
 0x4ff   :  { %821 = vst.msk [vmem:[#allocation5] sm:$0xff] %vm112_vm0, %v819_v54 }
 0x506   :  { %v2416_v55 = vld [vmem:[#allocation5] sm:$0xff] }
 0x507   :  { %v855_v56 = vpack.c.bf16 %v2416_v55, %v2416_v55 }
 0x509   :  { %1916 = vmatmul.msk.bf16.vlgmr.msra.gmra.mxu1 %vm112_vm0, %v855_v56 }
 0x50a   :  { %1465 = vmatpush.bf16.msra.mxu1 %v2200_v9 }
 0x50e   :  { %1466 = vmatpush.bf16.msra.mxu1 %v2228_v15 }
 0x556   :  { %v851_v57 = vpop.f32.mrf.mxu0 }
 0x557   :  { %v852_v58 = vadd.f32 %v2351_v38, %v851_v57 }
 0x559   :  { %897 = vrot.lane.b32.xlu2 %v852_v58, %s2085_s19  ;;  %v876_v61 = vadd.f32 %v873_v60, %v852_v58 }
 0x55b   :  { %v1917_v62 = vmul.f32 -1.442695, %v876_v61 }
 0x55d   :  { %2010 = vpow2.f32 %v1917_v62 }
 0x55e   :  { %v853_v59 = vpop.f32.mrf.mxu0 }
 0x563   :  { %v2011_v2 = vpop.eup %2010 }
 0x564   :  { %v880_v3 = vadd.f32 1.0, %v2011_v2 }
 0x566   :  { %2012 = vrcp.f32 %v880_v3  ;;  %v892_v11 = vand.u32 2147483648, %v880_v3  ;;  %vm886_vm4 = vweird.f32 %v880_v3  ;;  %v890_v12 = vand.u32 2147483647, %v880_v3 }
 0x568   :  { %v893_v16 = vor.u32 1.1754944e-38, %v892_v11  ;;  %vm891_vm6 = vcmp.eq.f32.partialorder %v890_v12, 8.507059e+37  ;;  %v1025_v11 = vld [vmem:[#allocation3 + $0x20] sm:$0xff] }
 0x56c   :  { %v2013_v4 = vpop.eup %2012 }
 0x56d   :  { %v882_v5 = vmul.f32 %v2013_v4, %v880_v3  ;;  %vm887_vm3 = vweird.f32 %v2013_v4 }
 0x56e   :  { %vm888_vm5 = vmor %vm886_vm4, %vm887_vm3 }
 0x56f   :  { %v883_v6 = vsub.f32 1.0, %v882_v5 }
 0x571   :  { %v884_v7 = vmul.f32 %v2013_v4, %v883_v6 }
 0x573   :  { %v885_v10 = vadd.f32 %v2013_v4, %v884_v7 }
 0x575   :  { %v889_v13 = vsel %vm888_vm5, %v2013_v4, %v885_v10 }
 0x576   :  { %v894_v18 = vsel %vm891_vm6, %v893_v16, %v889_v13 }
 0x577   :  { %v907_v50 = vsub.f32 1.0, %v894_v18 }
 0x586   :  { %v868_v63 = vpop.f32.mrf.mxu1 }
 0x587   :  { %v869_v0 = vadd.f32 %v2358_v33, %v868_v63 }
 0x589   :  { %940 = vrot.lane.b32.xlu0 %v869_v0, %s2085_s19  ;;  %v919_v21 = vadd.f32 %v875_v20, %v869_v0 }
 0x58b   :  { %v1918_v22 = vmul.f32 -1.442695, %v919_v21 }
 0x58d   :  { %2014 = vpow2.f32 %v1918_v22 }
 0x58e   :  { %v870_v1 = vpop.f32.mrf.mxu1 }
 0x593   :  { %v2015_v23 = vpop.eup %2014 }
 0x594   :  { %v923_v24 = vadd.f32 1.0, %v2015_v23 }
 0x596   :  { %2016 = vrcp.f32 %v923_v24  ;;  %v935_v32 = vand.u32 2147483648, %v923_v24  ;;  %vm929_vm8 = vweird.f32 %v923_v24  ;;  %v933_v34 = vand.u32 2147483647, %v923_v24 }
 0x598   :  { %v936_v35 = vor.u32 1.1754944e-38, %v935_v32  ;;  %vm934_vm10 = vcmp.eq.f32.partialorder %v933_v34, 8.507059e+37 }
 0x59c   :  { %v2017_v25 = vpop.eup %2016 }
 0x59d   :  { %v925_v26 = vmul.f32 %v2017_v25, %v923_v24  ;;  %vm930_vm7 = vweird.f32 %v2017_v25 }
 0x59e   :  { %vm931_vm9 = vmor %vm929_vm8, %vm930_vm7 }
 0x59f   :  { %v926_v27 = vsub.f32 1.0, %v925_v26 }
 0x5a1   :  { %v927_v28 = vmul.f32 %v2017_v25, %v926_v27 }
 0x5a3   :  { %v928_v31 = vadd.f32 %v2017_v25, %v927_v28 }
 0x5a5   :  { %v932_v30 = vsel %vm931_vm9, %v2017_v25, %v928_v31 }
 0x5a6   :  { %v937_v39 = vsel %vm934_vm10, %v936_v35, %v932_v30 }
 0x5a7   :  { %v950_v57 = vsub.f32 1.0, %v937_v39 }
 0x5b3   :  { %v898_v17 = vpop.permute.xlu2 %897 }
 0x5b4   :  { %v900_v19 = vmul.f32 %v898_v17, %v894_v18 }
 0x5b6   :  { %902 = vrot.lane.b32.xlu1 %v900_v19, %s2085_s19 }
 0x5be   :  { %914 = vrot.lane.b32.xlu1 %v836_v41, %s2086_s20 }
 0x5fb   :  { %v941_v37 = vpop.permute.xlu0 %940 }
 0x5fc   :  { %v943_v40 = vmul.f32 %v941_v37, %v937_v39 }
 0x5fe   :  { %945 = vrot.lane.b32.xlu2 %v943_v40, %s2085_s19 }
 0x628   :  { %v903_v42 = vpop.permute.xlu1 %902 }
 0x629   :  { %v905_v43 = vadd.f32 %v903_v42, %v873_v60 }
 0x62b   :  { %2018 = vtanh.f32 %v905_v43 }
 0x630   :  { %v915_v48 = vpop.permute.xlu1 %914 }
 0x631   :  { %v2019_v29 = vpop.eup %2018  ;;  %v917_v41 = vmul.f32 %v915_v48, %v894_v18 }
 0x632   :  { %909 = vrot.lane.b32.xlu0 %v2019_v29, %s2087_s5 }
 0x63a   :  { %957 = vrot.lane.b32.xlu0 %v2416_v55, %s2086_s20 }
 0x658   :  { %v946_v46 = vpop.permute.xlu2 %945 }
 0x659   :  { %v948_v47 = vadd.f32 %v946_v46, %v875_v20 }
 0x65b   :  { %2020 = vtanh.f32 %v948_v47 }
 0x661   :  { %v2021_v49 = vpop.eup %2020 }
 0x662   :  { %952 = vrot.lane.b32.xlu2 %v2021_v49, %s2087_s5 }
 0x6a4   :  { %v910_v52 = vpop.permute.xlu0 %909 }
 0x6a5   :  { %v912_v53 = vmul.f32 %v910_v52, %v907_v50 }
 0x6a7   :  { %v2434_v54 = vadd.f32 %v917_v41, %v912_v53 }
 0x6a9   :  { %963 = vrot.lane.b32.xlu1 %v2434_v54, %s2087_s5 }
 0x6ac   :  { %v958_v56 = vpop.permute.xlu0 %957 }
 0x6ad   :  { %v960_v55 = vmul.f32 %v958_v56, %v937_v39 }
 0x6bc   :  { %v953_v58 = vpop.permute.xlu2 %952 }
 0x6bd   :  { %v955_v59 = vmul.f32 %v953_v58, %v950_v57 }
 0x6bf   :  { %v2438_v60 = vadd.f32 %v960_v55, %v955_v59 }
 0x6c1   :  { %968 = vrot.lane.b32.xlu2 %v2438_v60, %s2087_s5 }
 0x71b   :  { %v969_v61 = vpop.permute.xlu2 %968  ;;  %v964_v62 = vpop.permute.xlu1 %963 }
 0x71c   :  { %971 = vst.msk [vmem:[#allocation5] sm:$0xff] %vm112_vm0, %v969_v61 }
 0x71d   :  { %966 = vst.msk [vmem:[#allocation4] sm:$0xff] %vm112_vm0, %v964_v62 }
 0x723   :  { %v2444_v63 = vld [vmem:[#allocation5] sm:$0xff] }
 0x724   :  { %v2446_v0 = vld [vmem:[#allocation4] sm:$0xff]  ;;  %v1005_v1 = vpack.c.bf16 %v2444_v63, %v2444_v63 }
 0x725   :  { %v988_v2 = vpack.c.bf16 %v2446_v0, %v2446_v0 }
 0x726   :  { %1922 = vmatmul.msk.bf16.vlgmr.msra.gmra.mxu3 %vm112_vm0, %v1005_v1 }
 0x727   :  { %1921 = vmatmul.msk.bf16.vlgmr.msra.gmra.mxu2 %vm112_vm0, %v988_v2  ;;  %1615 = vmatpush.bf16.msra.mxu3 %v2200_v9  ;;  %v1023_v9 = vld [vmem:[#allocation2 + $0x18] sm:$0xff] }
 0x728   :  { %1598 = vmatpush.bf16.msra.mxu2 %v2195_v8 }
 0x72b   :  { %1616 = vmatpush.bf16.msra.mxu3 %v2228_v15 }
 0x72c   :  { %1599 = vmatpush.bf16.msra.mxu2 %v2223_v14 }
 0x7a9   :  { %v1018_v3 = vpop.f32.mrf.mxu3 }
 0x7aa   :  { %v1001_v4 = vpop.f32.mrf.mxu2  ;;  %v1019_v5 = vadd.f32 %v2358_v33, %v1018_v3 }
 0x7ab   :  { %v1002_v6 = vadd.f32 %v2351_v38, %v1001_v4 }
 0x7ac   :  { %1090 = vrot.lane.b32.xlu1 %v1019_v5, %s2085_s19  ;;  %v1069_v12 = vadd.f32 %v1025_v11, %v1019_v5 }
 0x7ad   :  { %1047 = vrot.lane.b32.xlu0 %v1002_v6, %s2085_s19  ;;  %v1026_v8 = vadd.f32 %v1023_v9, %v1002_v6 }
 0x7ae   :  { %v1924_v13 = vmul.f32 -1.442695, %v1069_v12 }
 0x7af   :  { %v1923_v15 = vmul.f32 -1.442695, %v1026_v8 }
 0x7b0   :  { %2022 = vpow2.f32 %v1924_v13 }
 0x7b1   :  { %v1020_v7 = vpop.f32.mrf.mxu3  ;;  %2024 = vpow2.f32 %v1923_v15 }
 0x7b2   :  { %v1003_v10 = vpop.f32.mrf.mxu2 }
 0x7b6   :  { %v2023_v14 = vpop.eup %2022 }
 0x7b7   :  { %v2025_v16 = vpop.eup %2024  ;;  %v1073_v17 = vadd.f32 1.0, %v2023_v14 }
 0x7b8   :  { %v1030_v18 = vadd.f32 1.0, %v2025_v16 }
 0x7b9   :  { %2026 = vrcp.f32 %v1073_v17  ;;  %v1085_v31 = vand.u32 2147483648, %v1073_v17  ;;  %vm1079_vm13 = vweird.f32 %v1073_v17  ;;  %v1083_v34 = vand.u32 2147483647, %v1073_v17 }
 0x7ba   :  { %2028 = vrcp.f32 %v1030_v18  ;;  %v1042_v32 = vand.u32 2147483648, %v1030_v18  ;;  %vm1036_vm14 = vweird.f32 %v1030_v18  ;;  %v1040_v30 = vand.u32 2147483647, %v1030_v18 }
 0x7bb   :  { %v1086_v39 = vor.u32 1.1754944e-38, %v1085_v31  ;;  %vm1084_vm2 = vcmp.eq.f32.partialorder %v1083_v34, 8.507059e+37 }
 0x7bc   :  { %v1043_v40 = vor.u32 1.1754944e-38, %v1042_v32  ;;  %vm1041_vm3 = vcmp.eq.f32.partialorder %v1040_v30, 8.507059e+37 }
 0x7bf   :  { %v2027_v19 = vpop.eup %2026 }
 0x7c0   :  { %v2029_v20 = vpop.eup %2028  ;;  %v1075_v21 = vmul.f32 %v2027_v19, %v1073_v17  ;;  %vm1080_vm11 = vweird.f32 %v2027_v19  ;;  %v1173_v17 = vld [vmem:[#allocation2 + $0x20] sm:$0xff] }
 0x7c1   :  { %v1032_v22 = vmul.f32 %v2029_v20, %v1030_v18  ;;  %vm1037_vm12 = vweird.f32 %v2029_v20  ;;  %vm1081_vm15 = vmor %vm1079_vm13, %vm1080_vm11 }
 0x7c2   :  { %v1076_v23 = vsub.f32 1.0, %v1075_v21  ;;  %vm1038_vm1 = vmor %vm1036_vm14, %vm1037_vm12 }
 0x7c3   :  { %v1033_v24 = vsub.f32 1.0, %v1032_v22  ;;  %v1175_v22 = vld [vmem:[#allocation3 + $0x18] sm:$0xff] }
 0x7c4   :  { %v1077_v25 = vmul.f32 %v2027_v19, %v1076_v23 }
 0x7c5   :  { %v1034_v26 = vmul.f32 %v2029_v20, %v1033_v24 }
 0x7c6   :  { %v1078_v27 = vadd.f32 %v2027_v19, %v1077_v25 }
 0x7c7   :  { %v1035_v28 = vadd.f32 %v2029_v20, %v1034_v26 }
 0x7c8   :  { %v1082_v35 = vsel %vm1081_vm15, %v2027_v19, %v1078_v27 }
 0x7c9   :  { %v1039_v37 = vsel %vm1038_vm1, %v2029_v20, %v1035_v28  ;;  %v1087_v42 = vsel %vm1084_vm2, %v1086_v39, %v1082_v35 }
 0x7ca   :  { %v1044_v46 = vsel %vm1041_vm3, %v1043_v40, %v1039_v37  ;;  %v1100_v1 = vsub.f32 1.0, %v1087_v42 }
 0x7cb   :  { %v1057_v58 = vsub.f32 1.0, %v1044_v46 }
 0x81e   :  { %v1091_v43 = vpop.permute.xlu1 %1090 }
 0x81f   :  { %v1048_v29 = vpop.permute.xlu0 %1047  ;;  %v1093_v47 = vmul.f32 %v1091_v43, %v1087_v42 }
 0x820   :  { %v1050_v49 = vmul.f32 %v1048_v29, %v1044_v46 }
 0x821   :  { %1095 = vrot.lane.b32.xlu0 %v1093_v47, %s2085_s19 }
 0x822   :  { %1052 = vrot.lane.b32.xlu2 %v1050_v49, %s2085_s19 }
 0x82a   :  { %1064 = vrot.lane.b32.xlu2 %v2446_v0, %s2086_s20 }
 0x87c   :  { %v1053_v48 = vpop.permute.xlu2 %1052 }
 0x87d   :  { %v1055_v50 = vadd.f32 %v1053_v48, %v1023_v9 }
 0x87f   :  { %2030 = vtanh.f32 %v1055_v50 }
 0x884   :  { %v1065_v57 = vpop.permute.xlu2 %1064 }
 0x885   :  { %v2031_v52 = vpop.eup %2030  ;;  %v1067_v59 = vmul.f32 %v1065_v57, %v1044_v46 }
 0x886   :  { %1059 = vrot.lane.b32.xlu1 %v2031_v52, %s2087_s5 }
 0x88e   :  { %1107 = vrot.lane.b32.xlu1 %v2444_v63, %s2086_s20 }
 0x893   :  { %v1096_v41 = vpop.permute.xlu0 %1095 }
 0x894   :  { %v1098_v53 = vadd.f32 %v1096_v41, %v1025_v11 }
 0x896   :  { %2032 = vtanh.f32 %v1098_v53 }
 0x89c   :  { %v2033_v56 = vpop.eup %2032 }
 0x89d   :  { %1102 = vrot.lane.b32.xlu0 %v2033_v56, %s2087_s5 }
 0x8f8   :  { %v1060_v55 = vpop.permute.xlu1 %1059 }
 0x8f9   :  { %v1062_v61 = vmul.f32 %v1060_v55, %v1057_v58 }
 0x8fb   :  { %v2470_v62 = vadd.f32 %v1067_v59, %v1062_v61 }
 0x8fd   :  { %1113 = vrot.lane.b32.xlu2 %v2470_v62, %s2087_s5 }
 0x900   :  { %v1108_v0 = vpop.permute.xlu1 %1107 }
 0x901   :  { %v1110_v63 = vmul.f32 %v1108_v0, %v1087_v42 }
 0x90f   :  { %v1103_v2 = vpop.permute.xlu0 %1102 }
 0x910   :  { %v1105_v3 = vmul.f32 %v1103_v2, %v1100_v1 }
 0x912   :  { %v2474_v4 = vadd.f32 %v1110_v63, %v1105_v3 }
 0x914   :  { %1118 = vrot.lane.b32.xlu0 %v2474_v4, %s2087_s5 }
 0x957   :  { %v1114_v5 = vpop.permute.xlu2 %1113 }
 0x958   :  { %1116 = vst.msk [vmem:[#allocation4] sm:$0xff] %vm112_vm0, %v1114_v5 }
 0x95f   :  { %v1136_v6 = vld [vmem:[#allocation4] sm:$0xff] }
 0x960   :  { %v1138_v7 = vpack.c.bf16 %v1136_v6, %v1136_v6 }
 0x962   :  { %1927 = vmatmul.msk.bf16.vlgmr.msrb.gmra.mxu0 %vm112_vm0, %v1138_v7 }
 0x986   :  { %v1119_v10 = vpop.permute.xlu0 %1118 }
 0x987   :  { %1121 = vst.msk [vmem:[#allocation5] sm:$0xff] %vm112_vm0, %v1119_v10 }
 0x98e   :  { %v2481_v11 = vld [vmem:[#allocation5] sm:$0xff] }
 0x98f   :  { %v1155_v9 = vpack.c.bf16 %v2481_v11, %v2481_v11 }
 0x991   :  { %1928 = vmatmul.msk.bf16.vlgmr.msrb.gmra.mxu1 %vm112_vm0, %v1155_v9 }
 0x9df   :  { %v1151_v12 = vpop.f32.mrf.mxu0 }
 0x9e0   :  { %v1152_v8 = vadd.f32 %v2351_v38, %v1151_v12 }
 0x9e2   :  { %1197 = vrot.lane.b32.xlu1 %v1152_v8, %s2085_s19  ;;  %v1176_v18 = vadd.f32 %v1173_v17, %v1152_v8 }
 0x9e4   :  { %v1929_v19 = vmul.f32 -1.442695, %v1176_v18 }
 0x9e6   :  { %2034 = vpow2.f32 %v1929_v19 }
 0x9e7   :  { %v1153_v13 = vpop.f32.mrf.mxu0 }
 0x9ec   :  { %v2035_v20 = vpop.eup %2034 }
 0x9ed   :  { %v1180_v21 = vadd.f32 1.0, %v2035_v20 }
 0x9ef   :  { %2036 = vrcp.f32 %v1180_v21  ;;  %v1192_v30 = vand.u32 2147483648, %v1180_v21  ;;  %vm1186_vm5 = vweird.f32 %v1180_v21  ;;  %v1190_v35 = vand.u32 2147483647, %v1180_v21 }
 0x9f1   :  { %v1193_v39 = vor.u32 1.1754944e-38, %v1192_v30  ;;  %vm1191_vm7 = vcmp.eq.f32.partialorder %v1190_v35, 8.507059e+37 }
 0x9f5   :  { %v2037_v24 = vpop.eup %2036 }
 0x9f6   :  { %v1182_v26 = vmul.f32 %v2037_v24, %v1180_v21  ;;  %vm1187_vm4 = vweird.f32 %v2037_v24 }
 0x9f7   :  { %vm1188_vm6 = vmor %vm1186_vm5, %vm1187_vm4 }
 0x9f8   :  { %v1183_v27 = vsub.f32 1.0, %v1182_v26 }
 0x9fa   :  { %v1184_v31 = vmul.f32 %v2037_v24, %v1183_v27 }
 0x9fc   :  { %v1185_v34 = vadd.f32 %v2037_v24, %v1184_v31 }
 0x9fe   :  { %v1189_v37 = vsel %vm1188_vm6, %v2037_v24, %v1185_v34  ;;  %v1323_v24 = vld [vmem:[#allocation2 + $0x28] sm:$0xff] }
 0x9ff   :  { %v1194_v40 = vsel %vm1191_vm7, %v1193_v39, %v1189_v37 }
 0xa00   :  { %v1207_v3 = vsub.f32 1.0, %v1194_v40 }
 0xa0e   :  { %v1168_v15 = vpop.f32.mrf.mxu1 }
 0xa0f   :  { %v1169_v14 = vadd.f32 %v2358_v33, %v1168_v15 }
 0xa11   :  { %1240 = vrot.lane.b32.xlu2 %v1169_v14, %s2085_s19  ;;  %v1219_v23 = vadd.f32 %v1175_v22, %v1169_v14 }
 0xa13   :  { %v1930_v25 = vmul.f32 -1.442695, %v1219_v23 }
 0xa15   :  { %2038 = vpow2.f32 %v1930_v25 }
 0xa16   :  { %v1170_v16 = vpop.f32.mrf.mxu1 }
 0xa1b   :  { %v2039_v28 = vpop.eup %2038 }
 0xa1c   :  { %v1223_v32 = vadd.f32 1.0, %v2039_v28 }
 0xa1e   :  { %2040 = vrcp.f32 %v1223_v32  ;;  %v1235_v50 = vand.u32 2147483648, %v1223_v32  ;;  %vm1229_vm9 = vweird.f32 %v1223_v32  ;;  %v1233_v52 = vand.u32 2147483647, %v1223_v32 }
 0xa20   :  { %v1236_v53 = vor.u32 1.1754944e-38, %v1235_v50  ;;  %vm1234_vm11 = vcmp.eq.f32.partialorder %v1233_v52, 8.507059e+37 }
 0xa24   :  { %v2041_v43 = vpop.eup %2040 }
 0xa25   :  { %v1225_v46 = vmul.f32 %v2041_v43, %v1223_v32  ;;  %vm1230_vm8 = vweird.f32 %v2041_v43 }
 0xa26   :  { %vm1231_vm10 = vmor %vm1229_vm9, %vm1230_vm8 }
 0xa27   :  { %v1226_v47 = vsub.f32 1.0, %v1225_v46 }
 0xa29   :  { %v1227_v49 = vmul.f32 %v2041_v43, %v1226_v47 }
 0xa2b   :  { %v1228_v48 = vadd.f32 %v2041_v43, %v1227_v49  ;;  %v1325_v49 = vld [vmem:[#allocation3 + $0x10] sm:$0xff] }
 0xa2d   :  { %v1232_v41 = vsel %vm1231_vm10, %v2041_v43, %v1228_v48 }
 0xa2e   :  { %v1237_v57 = vsel %vm1234_vm11, %v1236_v53, %v1232_v41 }
 0xa2f   :  { %v1250_v12 = vsub.f32 1.0, %v1237_v57 }
 0xa54   :  { %v1198_v42 = vpop.permute.xlu1 %1197 }
 0xa55   :  { %v1200_v29 = vmul.f32 %v1198_v42, %v1194_v40 }
 0xa57   :  { %1202 = vrot.lane.b32.xlu0 %v1200_v29, %s2085_s19 }
 0xa5f   :  { %1214 = vrot.lane.b32.xlu0 %v1136_v6, %s2086_s20 }
 0xa6b   :  { %v1241_v56 = vpop.permute.xlu2 %1240 }
 0xa6c   :  { %v1243_v58 = vmul.f32 %v1241_v56, %v1237_v57 }
 0xa6e   :  { %1245 = vrot.lane.b32.xlu1 %v1243_v58, %s2085_s19 }
 0xac9   :  { %v1203_v55 = vpop.permute.xlu0 %1202 }
 0xaca   :  { %v1205_v59 = vadd.f32 %v1203_v55, %v1173_v17 }
 0xacc   :  { %2042 = vtanh.f32 %v1205_v59 }
 0xad1   :  { %v1215_v63 = vpop.permute.xlu0 %1214 }
 0xad2   :  { %v2043_v61 = vpop.eup %2042  ;;  %v1217_v6 = vmul.f32 %v1215_v63, %v1194_v40 }
 0xad3   :  { %1209 = vrot.lane.b32.xlu2 %v2043_v61, %s2087_s5 }
 0xadb   :  { %1257 = vrot.lane.b32.xlu2 %v2481_v11, %s2086_s20 }
 0xae0   :  { %v1246_v0 = vpop.permute.xlu1 %1245 }
 0xae1   :  { %v1248_v1 = vadd.f32 %v1246_v0, %v1175_v22 }
 0xae3   :  { %2044 = vtanh.f32 %v1248_v1 }
 0xae9   :  { %v2045_v2 = vpop.eup %2044 }
 0xaea   :  { %1252 = vrot.lane.b32.xlu1 %v2045_v2, %s2087_s5 }
 0xb2d   :  { %v1210_v5 = vpop.permute.xlu2 %1209 }
 0xb2e   :  { %v1212_v7 = vmul.f32 %v1210_v5, %v1207_v3 }
 0xb30   :  { %v2497_v10 = vadd.f32 %v1217_v6, %v1212_v7 }
 0xb32   :  { %1263 = vrot.lane.b32.xlu0 %v2497_v10, %s2087_s5 }
 0xb35   :  { %v1258_v9 = vpop.permute.xlu2 %1257 }
 0xb36   :  { %v1260_v11 = vmul.f32 %v1258_v9, %v1237_v57 }
 0xb5c   :  { %v1253_v8 = vpop.permute.xlu1 %1252 }
 0xb5d   :  { %v1255_v13 = vmul.f32 %v1253_v8, %v1250_v12 }
 0xb5f   :  { %v2501_v15 = vadd.f32 %v1260_v11, %v1255_v13 }
 0xb61   :  { %1268 = vrot.lane.b32.xlu1 %v2501_v15, %s2087_s5 }
 0xba4   :  { %v1264_v14 = vpop.permute.xlu0 %1263 }
 0xba5   :  { %1266 = vst.msk [vmem:[#allocation4] sm:$0xff] %vm112_vm0, %v1264_v14 }
 0xbac   :  { %v1286_v16 = vld [vmem:[#allocation4] sm:$0xff] }
 0xbad   :  { %v1288_v17 = vpack.c.bf16 %v1286_v16, %v1286_v16 }
 0xbaf   :  { %1933 = vmatmul.msk.bf16.vlgmr.msrb.gmra.mxu2 %vm112_vm0, %v1288_v17 }
 0xbd3   :  { %v1269_v18 = vpop.permute.xlu1 %1268 }
 0xbd4   :  { %1271 = vst.msk [vmem:[#allocation5] sm:$0xff] %vm112_vm0, %v1269_v18 }
 0xbdb   :  { %v2508_v19 = vld [vmem:[#allocation5] sm:$0xff] }
 0xbdc   :  { %v1305_v20 = vpack.c.bf16 %v2508_v19, %v2508_v19 }
 0xbde   :  { %1934 = vmatmul.msk.bf16.vlgmr.msrb.gmra.mxu3 %vm112_vm0, %v1305_v20 }
 0xc32   :  { %v1301_v21 = vpop.f32.mrf.mxu2 }
 0xc33   :  { %v1302_v22 = vadd.f32 %v2351_v38, %v1301_v21 }
 0xc35   :  { %1347 = vrot.lane.b32.xlu2 %v1302_v22, %s2085_s19  ;;  %v1326_v25 = vadd.f32 %v1323_v24, %v1302_v22 }
 0xc37   :  { %v1935_v27 = vmul.f32 -1.442695, %v1326_v25 }
 0xc39   :  { %2046 = vpow2.f32 %v1935_v27 }
 0xc3a   :  { %v1303_v23 = vpop.f32.mrf.mxu2 }
 0xc3f   :  { %v2047_v32 = vpop.eup %2046 }
 0xc40   :  { %v1330_v34 = vadd.f32 1.0, %v2047_v32 }
 0xc42   :  { %2048 = vrcp.f32 %v1330_v34  ;;  %v1342_v40 = vand.u32 2147483648, %v1330_v34  ;;  %vm1336_vm13 = vweird.f32 %v1330_v34  ;;  %v1340_v42 = vand.u32 2147483647, %v1330_v34 }
 0xc44   :  { %v1343_v29 = vor.u32 1.1754944e-38, %v1342_v40  ;;  %vm1341_vm15 = vcmp.eq.f32.partialorder %v1340_v42, 8.507059e+37 }
 0xc48   :  { %v2049_v30 = vpop.eup %2048 }
 0xc49   :  { %v1332_v35 = vmul.f32 %v2049_v30, %v1330_v34  ;;  %vm1337_vm12 = vweird.f32 %v2049_v30 }
 0xc4a   :  { %vm1338_vm14 = vmor %vm1336_vm13, %vm1337_vm12 }
 0xc4b   :  { %v1333_v37 = vsub.f32 1.0, %v1332_v35  ;;  %v2543_v35 = vld [vmem:[%s2722_s13] ss:$0 sm:$0xff] }
 0xc4d   :  { %v1334_v38 = vmul.f32 %v2049_v30, %v1333_v37 }
 0xc4f   :  { %v1335_v39 = vadd.f32 %v2049_v30, %v1334_v38  ;;  %v2549_v38 = vld [vmem:[%s2721_s12] ss:$0 sm:$0xff] }
 0xc51   :  { %v1339_v43 = vsel %vm1338_vm14, %v2049_v30, %v1335_v39 }
 0xc52   :  { %v1344_v46 = vsel %vm1341_vm15, %v1343_v29, %v1339_v43  ;;  %v1475_v43 = vld [vmem:[#allocation3 + $0x8] sm:$0xff]  ;;  %v1473_v29 = vld [vmem:[#allocation2 + $0x30] sm:$0xff] }
 0xc53   :  { %v1357_v13 = vsub.f32 1.0, %v1344_v46 }
 0xc61   :  { %v1318_v26 = vpop.f32.mrf.mxu3 }
 0xc62   :  { %v1319_v28 = vadd.f32 %v2358_v33, %v1318_v26 }
 0xc64   :  { %1390 = vrot.lane.b32.xlu0 %v1319_v28, %s2085_s19  ;;  %v1369_v48 = vadd.f32 %v1325_v49, %v1319_v28 }
 0xc66   :  { %v1936_v50 = vmul.f32 -1.442695, %v1369_v48 }
 0xc68   :  { %2050 = vpow2.f32 %v1936_v50 }
 0xc69   :  { %v1320_v31 = vpop.f32.mrf.mxu3 }
 0xc6e   :  { %v2051_v52 = vpop.eup %2050 }
 0xc6f   :  { %v1373_v41 = vadd.f32 1.0, %v2051_v52 }
 0xc71   :  { %2052 = vrcp.f32 %v1373_v41  ;;  %v1385_v59 = vand.u32 2147483648, %v1373_v41  ;;  %vm1379_vm2 = vweird.f32 %v1373_v41  ;;  %v1383_v61 = vand.u32 2147483647, %v1373_v41 }
 0xc73   :  { %v1386_v1 = vor.u32 1.1754944e-38, %v1385_v59  ;;  %vm1384_vm4 = vcmp.eq.f32.partialorder %v1383_v61, 8.507059e+37 }
 0xc77   :  { %v2053_v53 = vpop.eup %2052 }
 0xc78   :  { %v1375_v56 = vmul.f32 %v2053_v53, %v1373_v41  ;;  %vm1380_vm1 = vweird.f32 %v2053_v53 }
 0xc79   :  { %vm1381_vm3 = vmor %vm1379_vm2, %vm1380_vm1 }
 0xc7a   :  { %v1376_v57 = vsub.f32 1.0, %v1375_v56 }
 0xc7c   :  { %v1377_v58 = vmul.f32 %v2053_v53, %v1376_v57 }
 0xc7e   :  { %v1378_v55 = vadd.f32 %v2053_v53, %v1377_v58 }
 0xc80   :  { %v1382_v0 = vsel %vm1381_vm3, %v2053_v53, %v1378_v55 }
 0xc81   :  { %v1387_v63 = vsel %vm1384_vm4, %v1386_v1, %v1382_v0 }
 0xc82   :  { %v1400_v21 = vsub.f32 1.0, %v1387_v63 }
 0xc8f   :  { %v1348_v33 = vpop.permute.xlu2 %1347 }
 0xc90   :  { %v1350_v47 = vmul.f32 %v1348_v33, %v1344_v46 }
 0xc92   :  { %1352 = vrot.lane.b32.xlu1 %v1350_v47, %s2085_s19 }
 0xc9a   :  { %1364 = vrot.lane.b32.xlu1 %v1286_v16, %s2086_s20 }
 0xcd6   :  { %v1391_v2 = vpop.permute.xlu0 %1390 }
 0xcd7   :  { %v1393_v3 = vmul.f32 %v1391_v2, %v1387_v63 }
 0xcd9   :  { %1395 = vrot.lane.b32.xlu2 %v1393_v3, %s2085_s19 }
 0xd04   :  { %v1353_v5 = vpop.permute.xlu1 %1352 }
 0xd05   :  { %v1355_v6 = vadd.f32 %v1353_v5, %v1323_v24 }
 0xd07   :  { %2054 = vtanh.f32 %v1355_v6 }
 0xd0c   :  { %v1365_v11 = vpop.permute.xlu1 %1364 }
 0xd0d   :  { %v2055_v7 = vpop.eup %2054  ;;  %v1367_v16 = vmul.f32 %v1365_v11, %v1344_v46 }
 0xd0e   :  { %1359 = vrot.lane.b32.xlu0 %v2055_v7, %s2087_s5 }
 0xd16   :  { %1407 = vrot.lane.b32.xlu0 %v2508_v19, %s2086_s20 }
 0xd33   :  { %v1396_v9 = vpop.permute.xlu2 %1395 }
 0xd34   :  { %v1398_v12 = vadd.f32 %v1396_v9, %v1325_v49 }
 0xd36   :  { %2056 = vtanh.f32 %v1398_v12 }
 0xd3c   :  { %v2057_v8 = vpop.eup %2056 }
 0xd3d   :  { %1402 = vrot.lane.b32.xlu2 %v2057_v8, %s2087_s5 }
 0xd80   :  { %v1360_v14 = vpop.permute.xlu0 %1359 }
 0xd81   :  { %v1362_v17 = vmul.f32 %v1360_v14, %v1357_v13 }
 0xd83   :  { %v2524_v18 = vadd.f32 %v1367_v16, %v1362_v17 }
 0xd85   :  { %1413 = vrot.lane.b32.xlu1 %v2524_v18, %s2087_s5 }
 0xd88   :  { %v1408_v20 = vpop.permute.xlu0 %1407 }
 0xd89   :  { %v1410_v19 = vmul.f32 %v1408_v20, %v1387_v63 }
 0xd97   :  { %v1403_v22 = vpop.permute.xlu2 %1402 }
 0xd98   :  { %v1405_v23 = vmul.f32 %v1403_v22, %v1400_v21 }
 0xd9a   :  { %v2528_v24 = vadd.f32 %v1410_v19, %v1405_v23 }
 0xd9c   :  { %1418 = vrot.lane.b32.xlu2 %v2528_v24, %s2087_s5 }
 0xdf6   :  { %v1419_v25 = vpop.permute.xlu2 %1418 }
 0xdf7   :  { %1421 = vst.msk [vmem:[#allocation5] sm:$0xff] %vm112_vm0, %v1419_v25  ;;  %v1414_v26 = vpop.permute.xlu1 %1413 }
 0xdf8   :  { %1416 = vst.msk [vmem:[#allocation4] sm:$0xff] %vm112_vm0, %v1414_v26 }
 0xdfe   :  { %v2534_v27 = vld [vmem:[#allocation5] sm:$0xff] }
 0xdff   :  { %v1436_v28 = vld [vmem:[#allocation4] sm:$0xff]  ;;  %v1455_v31 = vpack.c.bf16 %v2534_v27, %v2534_v27 }
 0xe00   :  { %v1438_v32 = vpack.c.bf16 %v1436_v28, %v1436_v28 }
 0xe01   :  { %1940 = vmatmul.msk.bf16.vlgmr.msra.gmra.mxu1 %vm112_vm0, %v1455_v31 }
 0xe02   :  { %1939 = vmatmul.msk.bf16.vlgmr.msra.gmra.mxu0 %vm112_vm0, %v1438_v32 }
 0xe7e   :  { %v1468_v34 = vpop.f32.mrf.mxu1 }
 0xe7f   :  { %v1451_v30 = vpop.f32.mrf.mxu0  ;;  %v1469_v37 = vadd.f32 %v2543_v35, %v1468_v34 }
 0xe80   :  { %v1452_v39 = vadd.f32 %v2549_v38, %v1451_v30 }
 0xe81   :  { %1540 = vrot.lane.b32.xlu1 %v1469_v37, %s2085_s19  ;;  %v1519_v33 = vadd.f32 %v1475_v43, %v1469_v37 }
 0xe82   :  { %1497 = vrot.lane.b32.xlu0 %v1452_v39, %s2085_s19  ;;  %v1476_v46 = vadd.f32 %v1473_v29, %v1452_v39 }
 0xe83   :  { %v1942_v47 = vmul.f32 -1.442695, %v1519_v33 }
 0xe84   :  { %v1941_v49 = vmul.f32 -1.442695, %v1476_v46 }
 0xe85   :  { %2058 = vpow2.f32 %v1942_v47 }
 0xe86   :  { %v1470_v40 = vpop.f32.mrf.mxu1  ;;  %2060 = vpow2.f32 %v1941_v49 }
 0xe87   :  { %v1453_v42 = vpop.f32.mrf.mxu0 }
 0xe8b   :  { %v2059_v48 = vpop.eup %2058 }
 0xe8c   :  { %v2061_v50 = vpop.eup %2060  ;;  %v1523_v52 = vadd.f32 1.0, %v2059_v48 }
 0xe8d   :  { %v1480_v41 = vadd.f32 1.0, %v2061_v50 }
 0xe8e   :  { %2062 = vrcp.f32 %v1523_v52  ;;  %v1535_v63 = vand.u32 2147483648, %v1523_v52  ;;  %vm1529_vm7 = vweird.f32 %v1523_v52  ;;  %v1533_v5 = vand.u32 2147483647, %v1523_v52 }
 0xe8f   :  { %2064 = vrcp.f32 %v1480_v41  ;;  %v1492_v3 = vand.u32 2147483648, %v1480_v41  ;;  %vm1486_vm8 = vweird.f32 %v1480_v41  ;;  %v1490_v6 = vand.u32 2147483647, %v1480_v41 }
 0xe90   :  { %v1536_v12 = vor.u32 1.1754944e-38, %v1535_v63  ;;  %vm1534_vm11 = vcmp.eq.f32.partialorder %v1533_v5, 8.507059e+37 }
 0xe91   :  { %v1493_v8 = vor.u32 1.1754944e-38, %v1492_v3  ;;  %vm1491_vm12 = vcmp.eq.f32.partialorder %v1490_v6, 8.507059e+37 }
 0xe94   :  { %v2063_v53 = vpop.eup %2062 }
 0xe95   :  { %v2065_v56 = vpop.eup %2064  ;;  %v1525_v57 = vmul.f32 %v2063_v53, %v1523_v52  ;;  %vm1530_vm5 = vweird.f32 %v2063_v53 }
 0xe96   :  { %v1482_v58 = vmul.f32 %v2065_v56, %v1480_v41  ;;  %vm1487_vm6 = vweird.f32 %v2065_v56  ;;  %vm1531_vm9 = vmor %vm1529_vm7, %vm1530_vm5 }
 0xe97   :  { %v1526_v55 = vsub.f32 1.0, %v1525_v57  ;;  %vm1488_vm10 = vmor %vm1486_vm8, %vm1487_vm6  ;;  %vm677_vm6 = vcmask 257024  }
 0xe98   :  { %v1483_v59 = vsub.f32 1.0, %v1482_v58 }
 0xe99   :  { %v1527_v61 = vmul.f32 %v2063_v53, %v1526_v55  ;;  %v1623_v55 = vld [vmem:[#allocation2 + $0x38] sm:$0xff] }
 0xe9a   :  { %v1484_v0 = vmul.f32 %v2065_v56, %v1483_v59 }
 0xe9b   :  { %v1528_v1 = vadd.f32 %v2063_v53, %v1527_v61 }
 0xe9c   :  { %v1485_v2 = vadd.f32 %v2065_v56, %v1484_v0 }
 0xe9d   :  { %v1532_v7 = vsel %vm1531_vm9, %v2063_v53, %v1528_v1 }
 0xe9e   :  { %v1489_v9 = vsel %vm1488_vm10, %v2065_v56, %v1485_v2  ;;  %v1537_v11 = vsel %vm1534_vm11, %v1536_v12, %v1532_v7  ;;  %v2578_v2 = vld [vmem:[#allocation3] sm:$0xff] }
 0xe9f   :  { %v1494_v16 = vsel %vm1491_vm12, %v1493_v8, %v1489_v9  ;;  %v1550_v40 = vsub.f32 1.0, %v1537_v11 }
 0xea0   :  { %v1507_v32 = vsub.f32 1.0, %v1494_v16 }
 0xef3   :  { %v1541_v13 = vpop.permute.xlu1 %1540 }
 0xef4   :  { %v1498_v14 = vpop.permute.xlu0 %1497  ;;  %v1543_v17 = vmul.f32 %v1541_v13, %v1537_v11 }
 0xef5   :  { %v1500_v20 = vmul.f32 %v1498_v14, %v1494_v16 }
 0xef6   :  { %1545 = vrot.lane.b32.xlu0 %v1543_v17, %s2085_s19 }
 0xef7   :  { %1502 = vrot.lane.b32.xlu2 %v1500_v20, %s2085_s19 }
 0xeff   :  { %1514 = vrot.lane.b32.xlu2 %v1436_v28, %s2086_s20 }
 0xf51   :  { %v1503_v21 = vpop.permute.xlu2 %1502 }
 0xf52   :  { %v1505_v22 = vadd.f32 %v1503_v21, %v1473_v29 }
 0xf54   :  { %2066 = vtanh.f32 %v1505_v22 }
 0xf59   :  { %v1515_v31 = vpop.permute.xlu2 %1514 }
 0xf5a   :  { %v2067_v19 = vpop.eup %2066  ;;  %v1517_v30 = vmul.f32 %v1515_v31, %v1494_v16 }
 0xf5b   :  { %1509 = vrot.lane.b32.xlu1 %v2067_v19, %s2087_s5 }
 0xf63   :  { %1557 = vrot.lane.b32.xlu1 %v2534_v27, %s2086_s20 }
 0xf68   :  { %v1546_v23 = vpop.permute.xlu0 %1545 }
 0xf69   :  { %v1548_v25 = vadd.f32 %v1546_v23, %v1475_v43 }
 0xf6b   :  { %2068 = vtanh.f32 %v1548_v25 }
 0xf71   :  { %v2069_v26 = vpop.eup %2068 }
 0xf72   :  { %1552 = vrot.lane.b32.xlu0 %v2069_v26, %s2087_s5  ;;  %v672_v26 = vpack.c.bf16 %v2372_v36, %v2372_v36  ;;  %v1122_v36 = vpack.c.bf16 %v2470_v62, %v2470_v62 }
 0xfcd   :  { %v1510_v34 = vpop.permute.xlu1 %1509 }
 0xfce   :  { %v1512_v28 = vmul.f32 %v1510_v34, %v1507_v32 }
 0xfd0   :  { %v2561_v37 = vadd.f32 %v1517_v30, %v1512_v28 }
 0xfd2   :  { %1563 = vrot.lane.b32.xlu2 %v2561_v37, %s2087_s5 }
 0xfd5   :  { %v1558_v39 = vpop.permute.xlu1 %1557 }
 0xfd6   :  { %v1560_v27 = vmul.f32 %v1558_v39, %v1537_v11 }
 0xfe4   :  { %v1553_v42 = vpop.permute.xlu0 %1552 }
 0xfe5   :  { %v1555_v29 = vmul.f32 %v1553_v42, %v1550_v40  ;;  %v829_v42 = vpack.c.bf16 %v2407_v51, %v2407_v51 }
 0xfe7   :  { %v2565_v43 = vadd.f32 %v1560_v27, %v1555_v29  ;;  %v1279_v27 = vpack.c.bf16 %v2501_v15, %v2501_v15  ;;  %v1572_v29 = vpack.c.bf16 %v2561_v37, %v2561_v37 }
 0xfe9   :  { %1568 = vrot.lane.b32.xlu0 %v2565_v43, %s2087_s5 }
0x102c   :  { %v1564_v33 = vpop.permute.xlu2 %1563 }
0x102d   :  { %1566 = vst.msk [vmem:[#allocation4] sm:$0xff] %vm112_vm0, %v1564_v33 }
0x1034   :  { %v1586_v46 = vld [vmem:[#allocation4] sm:$0xff] }
0x1035   :  { %v1588_v47 = vpack.c.bf16 %v1586_v46, %v1586_v46 }
0x1037   :  { %1945 = vmatmul.msk.bf16.vlgmr.msra.gmra.mxu2 %vm112_vm0, %v1588_v47 }
0x105b   :  { %v1569_v49 = vpop.permute.xlu0 %1568 }
0x105c   :  { %1571 = vst.msk [vmem:[#allocation5] sm:$0xff] %vm112_vm0, %v1569_v49  ;;  %v822_v49 = vpack.c.bf16 %v2403_v45, %v2403_v45 }
0x1063   :  { %v1587_v48 = vld [vmem:[#allocation5] sm:$0xff] }
0x1064   :  { %v1605_v50 = vpack.c.bf16 %v1587_v48, %v1587_v48 }
0x1066   :  { %1946 = vmatmul.msk.bf16.vlgmr.msra.gmra.mxu3 %vm112_vm0, %v1605_v50  ;;  %v979_v50 = vpack.c.bf16 %v2438_v60, %v2438_v60  ;;  %v679_v60 = vpack.c.bf16 %v2376_v44, %v2376_v44  ;;  %v1129_v44 = vpack.c.bf16 %v2474_v4, %v2474_v4 }
0x10ba   :  { %v1601_v52 = vpop.f32.mrf.mxu2 }
0x10bb   :  { %v1602_v41 = vadd.f32 %v2549_v38, %v1601_v52 }
0x10bd   :  { %1646 = vrot.lane.b32.xlu1 %v1602_v41, %s2085_s19  ;;  %v1625_v59 = vadd.f32 %v1623_v55, %v1602_v41  ;;  %v1272_v41 = vpack.c.bf16 %v2497_v10, %v2497_v10  ;;  %v972_v10 = vpack.c.bf16 %v2434_v54, %v2434_v54  ;;  %v1579_v54 = vpack.c.bf16 %v2565_v43, %v2565_v43 }
0x10bf   :  { %v1947_v61 = vmul.f32 -1.442695, %v1625_v59 }
0x10c1   :  { %2070 = vpow2.f32 %v1947_v61 }
0x10c2   :  { %v1603_v53 = vpop.f32.mrf.mxu2 }
0x10c7   :  { %v2071_v0 = vpop.eup %2070 }
0x10c8   :  { %v1629_v1 = vadd.f32 1.0, %v2071_v0 }
0x10ca   :  { %2072 = vrcp.f32 %v1629_v1  ;;  %v1641_v8 = vand.u32 2147483648, %v1629_v1  ;;  %vm1635_vm14 = vweird.f32 %v1629_v1  ;;  %v1639_v11 = vand.u32 2147483647, %v1629_v1 }
0x10cc   :  { %v1642_v14 = vor.u32 1.1754944e-38, %v1641_v8  ;;  %vm1640_vm1 = vcmp.eq.f32.partialorder %v1639_v11, 8.507059e+37 }
0x10d0   :  { %v2073_v63 = vpop.eup %2072 }
0x10d1   :  { %v1631_v5 = vmul.f32 %v2073_v63, %v1629_v1  ;;  %vm1636_vm13 = vweird.f32 %v2073_v63 }
0x10d2   :  { %vm1637_vm15 = vmor %vm1635_vm14, %vm1636_vm13 }
0x10e9   :  { %v1618_v56 = vpop.f32.mrf.mxu3 }
0x10ea   :  { %v1619_v57 = vadd.f32 %v2543_v35, %v1618_v56  ;;  %v1632_v35 = vsub.f32 1.0, %v1631_v5  ;;  %v1429_v56 = vpack.c.bf16 %v2528_v24, %v2528_v24  ;;  %v1422_v24 = vpack.c.bf16 %v2524_v18, %v2524_v18 }
0x10ec   :  { %1689 = vrot.lane.b32.xlu2 %v1619_v57, %s2085_s19  ;;  %v1668_v38 = vadd.f32 %v2578_v2, %v1619_v57  ;;  %v1633_v7 = vmul.f32 %v2073_v63, %v1632_v35 }
0x10ee   :  { %v1948_v3 = vmul.f32 -1.442695, %v1668_v38  ;;  %v1634_v12 = vadd.f32 %v2073_v63, %v1633_v7 }
0x10f0   :  { %2074 = vpow2.f32 %v1948_v3  ;;  %v1638_v13 = vsel %vm1637_vm15, %v2073_v63, %v1634_v12 }
0x10f1   :  { %v1620_v58 = vpop.f32.mrf.mxu3  ;;  %v2581_v16 = vsel %vm1640_vm1, %v1642_v14, %v1638_v13 }
0x10f4   :  { %1706 = vrot.lane.b32.xlu2 %v1587_v48, %s2086_s20 }
0x10f6   :  { %v2075_v6 = vpop.eup %2074 }
0x10f7   :  { %v1672_v9 = vadd.f32 1.0, %v2075_v6 }
0x10f9   :  { %2076 = vrcp.f32 %v1672_v9  ;;  %v1684_v31 = vand.u32 2147483648, %v1672_v9  ;;  %vm1678_vm3 = vweird.f32 %v1672_v9  ;;  %v1682_v32 = vand.u32 2147483647, %v1672_v9 }
0x10fb   :  { %v1685_v30 = vor.u32 1.1754944e-38, %v1684_v31  ;;  %vm1683_vm5 = vcmp.eq.f32.partialorder %v1682_v32, 8.507059e+37 }
0x10ff   :  { %v2077_v20 = vpop.eup %2076 }
0x1100   :  { %v1674_v22 = vmul.f32 %v2077_v20, %v1672_v9  ;;  %vm1679_vm2 = vweird.f32 %v2077_v20 }
0x1101   :  { %vm1680_vm4 = vmor %vm1678_vm3, %vm1679_vm2 }
0x1102   :  { %v1675_v19 = vsub.f32 1.0, %v1674_v22 }
0x1104   :  { %v1676_v23 = vmul.f32 %v2077_v20, %v1675_v19 }
0x1106   :  { %v1677_v25 = vadd.f32 %v2077_v20, %v1676_v23 }
0x1108   :  { %v1681_v34 = vsel %vm1680_vm4, %v2077_v20, %v1677_v25 }
0x1109   :  { %v2589_v39 = vsel %vm1683_vm5, %v1685_v30, %v1681_v34 }
0x110a   :  { %v1699_v63 = vsub.f32 1.0, %v2589_v39 }
0x112f   :  { %v1647_v17 = vpop.permute.xlu1 %1646 }
0x1130   :  { %v1649_v21 = vmul.f32 %v1647_v17, %v2581_v16 }
0x1132   :  { %1651 = vrot.lane.b32.xlu0 %v1649_v21, %s2085_s19 }
0x113a   :  { %1663 = vrot.lane.b32.xlu0 %v1586_v46, %s2086_s20 }
0x1142   :  { %674 = vrot.lane.b32.xlu0 %v672_v26, %s2087_s5 }
0x1146   :  { %v1690_v28 = vpop.permute.xlu2 %1689 }
0x1147   :  { %v1692_v40 = vmul.f32 %v1690_v28, %v2589_v39 }
0x1149   :  { %1694 = vrot.lane.b32.xlu1 %v1692_v40, %s2085_s19 }
0x114a   :  { %831 = vrot.lane.b32.xlu0 %v829_v42, %s2087_s5 }
0x114e   :  { %v1707_v58 = vpop.permute.xlu2 %1706 }
0x114f   :  { %v1709_v5 = vmul.f32 %v1707_v58, %v2589_v39 }
0x1152   :  { %1124 = vrot.lane.b32.xlu0 %v1122_v36, %s2087_s5 }
0x115a   :  { %1281 = vrot.lane.b32.xlu0 %v1279_v27, %s2087_s5 }
0x1162   :  { %1574 = vrot.lane.b32.xlu0 %v1572_v29, %s2087_s5 }
0x11a4   :  { %v1652_v51 = vpop.permute.xlu0 %1651 }
0x11a5   :  { %v1654_v33 = vadd.f32 %v1652_v51, %v1623_v55  ;;  %v1656_v55 = vsub.f32 1.0, %v2581_v16 }
0x11a7   :  { %2078 = vtanh.f32 %v1654_v33 }
0x11ac   :  { %v1664_v46 = vpop.permute.xlu0 %1663 }
0x11ad   :  { %v2079_v47 = vpop.eup %2078  ;;  %v1666_v61 = vmul.f32 %v1664_v46, %v2581_v16 }
0x11ae   :  { %1658 = vrot.lane.b32.xlu2 %v2079_v47, %s2087_s5 }
0x11b4   :  { %v675_v62 = vpop.permute.xlu0 %674 }
0x11b5   :  { %678 = vst.msk [vmem:[%s2723_s14] sm:$0xf] %vm677_vm6, %v675_v62 }
0x11b6   :  { %824 = vrot.lane.b32.xlu2 %v822_v49, %s2087_s5 }
0x11bb   :  { %v1695_v15 = vpop.permute.xlu1 %1694 }
0x11bc   :  { %v1697_v37 = vadd.f32 %v1695_v15, %v2578_v2  ;;  %v832_v48 = vpop.permute.xlu0 %831 }
0x11bd   :  { %1914 = vst.msk [vmem:[%s2724_s15 + $0x18] sm:$0xf] %vm677_vm6, %v832_v48 }
0x11be   :  { %2080 = vtanh.f32 %v1697_v37  ;;  %981 = vrot.lane.b32.xlu2 %v979_v50, %s2087_s5 }
0x11c4   :  { %v2081_v45 = vpop.eup %2080  ;;  %v1125_v52 = vpop.permute.xlu0 %1124 }
0x11c5   :  { %1925 = vst.msk [vmem:[%s2723_s14 + $0xc] sm:$0xf] %vm677_vm6, %v1125_v52  ;;  %1701 = vrot.lane.b32.xlu1 %v2081_v45, %s2087_s5 }
0x11c6   :  { %1274 = vrot.lane.b32.xlu2 %v1272_v41, %s2087_s5 }
0x11cc   :  { %v1282_v53 = vpop.permute.xlu0 %1281 }
0x11cd   :  { %1932 = vst.msk [vmem:[%s2724_s15 + $0xc] sm:$0xf] %vm677_vm6, %v1282_v53  ;;  %681 = vrot.lane.b32.xlu1 %v679_v60, %s2087_s5 }
0x11ce   :  { %1431 = vrot.lane.b32.xlu2 %v1429_v56, %s2087_s5 }
0x11d4   :  { %v1575_v57 = vpop.permute.xlu0 %1574 }
0x11d5   :  { %1943 = vst.msk [vmem:[%s2723_s14 + $0x18] sm:$0xf] %vm677_vm6, %v1575_v57  ;;  %974 = vrot.lane.b32.xlu1 %v972_v10, %s2087_s5 }
0x11dd   :  { %1131 = vrot.lane.b32.xlu1 %v1129_v44, %s2087_s5 }
0x11e5   :  { %1424 = vrot.lane.b32.xlu1 %v1422_v24, %s2087_s5 }
0x11ed   :  { %1581 = vrot.lane.b32.xlu1 %v1579_v54, %s2087_s5 }
0x1208   :  { %v1659_v59 = vpop.permute.xlu2 %1658 }
0x1209   :  { %v1661_v0 = vmul.f32 %v1659_v59, %v1656_v55 }
0x120b   :  { %v1667_v4 = vadd.f32 %v1666_v61, %v1661_v0 }
0x120d   :  { %1712 = vrot.lane.b32.xlu2 %v1667_v4, %s2087_s5  ;;  %v1721_v1 = vpack.c.bf16 %v1667_v4, %v1667_v4 }
0x120f   :  { %1723 = vrot.lane.b32.xlu1 %v1721_v1, %s2087_s5 }
0x1210   :  { %v825_v18 = vpop.permute.xlu2 %824 }
0x1211   :  { %1913 = vst.msk [vmem:[%s2723_s14 + $0x4] sm:$0xf] %vm677_vm6, %v825_v18 }
0x1218   :  { %v982_v43 = vpop.permute.xlu2 %981 }
0x1219   :  { %1920 = vst.msk [vmem:[%s2724_s15 + $0x14] sm:$0xf] %vm677_vm6, %v982_v43 }
0x1220   :  { %v1275_v2 = vpop.permute.xlu2 %1274 }
0x1221   :  { %1931 = vst.msk [vmem:[%s2723_s14 + $0x10] sm:$0xf] %vm677_vm6, %v1275_v2 }
0x1228   :  { %v1432_v38 = vpop.permute.xlu2 %1431 }
0x1229   :  { %1938 = vst.msk [vmem:[%s2724_s15 + $0x8] sm:$0xf] %vm677_vm6, %v1432_v38 }
0x1237   :  { %v1702_v3 = vpop.permute.xlu1 %1701 }
0x1238   :  { %v1704_v35 = vmul.f32 %v1702_v3, %v1699_v63 }
0x123a   :  { %v1710_v6 = vadd.f32 %v1709_v5, %v1704_v35 }
0x123c   :  { %1717 = vrot.lane.b32.xlu0 %v1710_v6, %s2087_s5  ;;  %v1728_v7 = vpack.c.bf16 %v1710_v6, %v1710_v6 }
0x123e   :  { %1730 = vrot.lane.b32.xlu2 %v1728_v7, %s2087_s5 }
0x123f   :  { %v682_v9 = vpop.permute.xlu1 %681 }
0x1240   :  { %1908 = vst.msk [vmem:[%s2724_s15 + $0x1c] sm:$0xf] %vm677_vm6, %v682_v9 }
0x1247   :  { %v975_v12 = vpop.permute.xlu1 %974 }
0x1248   :  { %1919 = vst.msk [vmem:[%s2723_s14 + $0x8] sm:$0xf] %vm677_vm6, %v975_v12 }
0x124f   :  { %v1132_v8 = vpop.permute.xlu1 %1131 }
0x1250   :  { %1926 = vst.msk [vmem:[%s2724_s15 + $0x10] sm:$0xf] %vm677_vm6, %v1132_v8 }
0x1257   :  { %v1425_v11 = vpop.permute.xlu1 %1424 }
0x1258   :  { %1937 = vst.msk [vmem:[%s2723_s14 + $0x14] sm:$0xf] %vm677_vm6, %v1425_v11 }
0x125f   :  { %v1582_v13 = vpop.permute.xlu1 %1581 }
0x1260   :  { %1944 = vst.msk [vmem:[%s2724_s15 + $0x4] sm:$0xf] %vm677_vm6, %v1582_v13 }
0x1267   :  { %v1713_v14 = vpop.permute.xlu2 %1712 }
0x1268   :  { %1715 = vst.msk [vmem:[#allocation4] sm:$0xff] %vm112_vm0, %v1713_v14 }
0x1281   :  { %v1724_v16 = vpop.permute.xlu1 %1723 }
0x1282   :  { %1949 = vst.msk [vmem:[%s2723_s14 + $0x1c] sm:$0xf] %vm677_vm6, %v1724_v16 }
0x1298   :  { %v1731_v17 = vpop.permute.xlu2 %1730 }
0x1299   :  { %1733 = vst.msk [vmem:[%s2724_s15] sm:$0xf] %vm677_vm6, %v1731_v17 }
0x12ae   :  { %v1718_v20 = vpop.permute.xlu0 %1717 }
0x12af   :  { %1720 = vst.msk [vmem:[#allocation5] sm:$0xff] %vm112_vm0, %v1718_v20 }

// kernel: forward.5
= control target key start
LH: loop header
LB: loop body
LE: loop exit
PB: predicated region body
PF: predicated region fallthrough
CT: control target
= control target key end

     0   :  { %vm121_vm0 = vcmask 130048   ;;  %v2292_v2 = vmov 0.0   ;;  %vm180_vm1 = vcmask 261120   ;;  %vm307_vm2 = vcmask 392192   ;;  %s2869_s5 = inlined_call_operand.vmem [shape: bf16[32,48], index: 5, kind: input, shape index: {}]   ;;  %s2870_s4 = inlined_call_operand.vmem [shape: bf16[32,48], index: 4, kind: input, shape index: {}]   ;;  %s2871_s11 = inlined_call_operand.vmem [shape: bf16[16,48], index: 11, kind: input, shape index: {}]   ;;  %s2872_s7 = inlined_call_operand.vmem [shape: bf16[32,48], index: 7, kind: input, shape index: {}]   ;;  %s2873_s1 = inlined_call_operand.vmem [shape: bf16[8,8,32], index: 1, kind: input, shape index: {}, may-alias: {1,3}]   ;;  %s2874_s0 = inlined_call_operand.vmem [shape: bf16[8,8,32], index: 0, kind: input, shape index: {}, may-alias: {0,2}]   ;;  %s2875_s6 = inlined_call_operand.vmem [shape: bf16[32,48], index: 6, kind: input, shape index: {}]   ;;  %s2876_s10 = inlined_call_operand.vmem [shape: bf16[16,48], index: 10, kind: input, shape index: {}]   ;;  %s2877_s8 = inlined_call_operand.vmem [shape: f32[1,48], index: 8, kind: input, shape index: {}]   ;;  %s2878_s3 = inlined_call_operand.vmem [shape: bf16[8,8,32], index: 3, kind: input, shape index: {}, may-alias: {1,3}]   ;;  %s2879_s2 = inlined_call_operand.vmem [shape: bf16[8,8,32], index: 2, kind: input, shape index: {}, may-alias: {0,2}]   ;;  %s2880_s12 = inlined_call_operand.vmem [shape: f32[1,48], index: 12, kind: input, shape index: {}]   ;;  %s2881_s13 = inlined_call_operand.vmem [shape: f32[1,48], index: 13, kind: input, shape index: {}]   ;;  %s2882_s9 = inlined_call_operand.vmem [shape: f32[1,48], index: 9, kind: input, shape index: {}]   ;;  %s2883_s14 = inlined_call_operand.vmem [shape: bf16[16,128], index: 14, kind: input, shape index: {}]   ;;  %s2884_s15 = inlined_call_operand.vmem [shape: bf16[16,128], index: 15, kind: input, shape index: {}]   ;;  %s2885_s16 = inlined_call_operand.vmem [shape: f32[1,128], index: 16, kind: input, shape index: {}]   ;;  %s2886_s17 = inlined_call_operand.vmem [shape: f32[8,8,128], index: 17, kind: output, shape index: {0}]   ;;  %s2887_s18 = inlined_call_operand.vmem [shape: f32[8,8,128], index: 18, kind: output, shape index: {1}]  }
   0x1   :  { %2890 = sst [smem:[#allocation8_spill]] %s2869_s5  ;;  %122 = vst.msk [vmem:[#allocation4] sm:$0xff] %vm121_vm0, %v2292_v2  ;;  %v2167_v6 = vld [vmem:[%s2872_s7 + $0x8] sm:$0xff]  ;;  %v2150_v7 = vld [vmem:[%s2873_s1] sm:$0xff]  ;;  %v2152_v8 = vld [vmem:[%s2873_s1 + $0x10] sm:$0xff] }
   0x2   :  { %2891 = sst [smem:[#allocation9_spill]] %s2870_s4  ;;  %123 = vst.msk [vmem:[#allocation5] sm:$0xff] %vm121_vm0, %v2292_v2  ;;  %v2144_v9 = vld [vmem:[%s2874_s0] sm:$0xff]  ;;  %v2146_v10 = vld [vmem:[%s2874_s0 + $0x10] sm:$0xff]  ;;  %v2161_v11 = vld [vmem:[%s2875_s6 + $0x8] sm:$0xff] }
   0x3   :  { %2892 = sst [smem:[#allocation10_spill]] %s2871_s11  ;;  %v2432_v12 = vld [vmem:[%s2876_s10] sm:$0xff]  ;;  %v2151_v15 = vld [vmem:[%s2873_s1 + $0x8] sm:$0xff]  ;;  %v2153_v16 = vld [vmem:[%s2873_s1 + $0x18] sm:$0xff]  ;;  %s2293_s11 = smov 16  }
   0x4   :  { %s2893_s29 = sld [smem:[#allocation8_spill]]  ;;  %v2166_v13 = vld [vmem:[%s2872_s7] sm:$0xff]  ;;  %v2145_v17 = vld [vmem:[%s2874_s0 + $0x8] sm:$0xff]  ;;  %v2147_v18 = vld [vmem:[%s2874_s0 + $0x18] sm:$0xff]  ;;  %s2294_s1 = smov 96  }
   0x5   :  { %s2894_s19 = sld [smem:[#allocation9_spill]]  ;;  %v2160_v14 = vld [vmem:[%s2875_s6] sm:$0xff]  ;;  %v2163_v25 = vld [vmem:[%s2878_s3 + $0x8] sm:$0xff]  ;;  %v2164_v27 = vld [vmem:[%s2878_s3 + $0x10] sm:$0xff]  ;;  %s2296_s0 = smov 112  }
   0x6   :  { %s2895_s24 = sld [smem:[#allocation10_spill]]  ;;  %v2162_v21 = vld [vmem:[%s2878_s3] sm:$0xff]  ;;  %v2157_v26 = vld [vmem:[%s2879_s2 + $0x8] sm:$0xff]  ;;  %v2158_v28 = vld [vmem:[%s2879_s2 + $0x10] sm:$0xff] }
   0x7   :  { %v2156_v23 = vld [vmem:[%s2879_s2] sm:$0xff]  ;;  %v2165_v29 = vld [vmem:[%s2878_s3 + $0x18] sm:$0xff] }
   0x8   :  { %v2466_v19 = vld [vmem:[#allocation4] sm:$0xff]  ;;  %v2159_v30 = vld [vmem:[%s2879_s2 + $0x18] sm:$0xff] }
   0x9   :  { %v513_v20 = vld [vmem:[#allocation5] sm:$0xff]  ;;  %v514_v22 = vpack.c.bf16 %v2466_v19, %v2466_v19  ;;  %v2189_v32 = vld [vmem:[%s2877_s8] ss:$0 sm:$0xff] }
   0xa   :  { %v2155_v0 = vld [vmem:[%s2893_s29 + $0x8] sm:$0xff]  ;;  %v2154_v3 = vld [vmem:[%s2893_s29] sm:$0xff]  ;;  %v541_v24 = vpack.c.bf16 %v513_v20, %v513_v20  ;;  %651 = vrot.lane.b32.xlu2 %v513_v20, %s2293_s11 }
   0xb   :  { %v2149_v1 = vld [vmem:[%s2894_s19 + $0x8] sm:$0xff]  ;;  %199 = vmatpush.bf16.msra.mxu0 %v2155_v0  ;;  %2180 = vmatpush.bf16.msra.mxu2 %v2155_v0  ;;  %v2148_v4 = vld [vmem:[%s2894_s19] sm:$0xff] }
   0xc   :  { %272 = vmatpush.bf16.msra.mxu1 %v2149_v1  ;;  %2182 = vmatpush.bf16.msra.mxu3 %v2149_v1  ;;  %v2409_v5 = vld [vmem:[%s2895_s24] sm:$0xff] }
   0xd   :  { %v2521_v60 = vld [vmem:[%s2880_s12] ss:$0 sm:$0xff] }
   0xe   :  { %v2527_v62 = vld [vmem:[%s2881_s13] ss:$0 sm:$0xff] }
   0xf   :  { %200 = vmatpush.bf16.msra.mxu0 %v2154_v3  ;;  %2181 = vmatpush.bf16.msra.mxu2 %v2154_v3 }
  0x10   :  { %273 = vmatpush.bf16.msra.mxu1 %v2148_v4  ;;  %2183 = vmatpush.bf16.msra.mxu3 %v2148_v4 }
  0x12   :  { %1968 = vmatmul.msk.bf16.vlgmr.msra.gmra.mxu0 %vm180_vm1, %v2150_v7  ;;  %1970 = vmatmul.msk.bf16.vlgmr.msra.gmra.mxu2 %vm180_vm1, %v2152_v8  ;;  %v2192_v8 = vld [vmem:[%s2882_s9] ss:$0 sm:$0xff]  ;;  %s2295_s9 = smov 32  }
  0x13   :  { %390 = vmatpush.bf16.msrb.mxu2 %v2167_v6  ;;  %1996 = vmatmul.msk.bf16.vlgmr.msra.gmra.mxu1 %vm180_vm1, %v2144_v9 }
  0x14   :  { %561 = vmatpush.bf16.msrb.mxu1 %v2409_v5  ;;  %1998 = vmatmul.msk.bf16.vlgmr.msra.gmra.mxu3 %vm180_vm1, %v2146_v10 }
  0x15   :  { %463 = vmatpush.bf16.msrb.mxu3 %v2161_v11  ;;  %535 = vmatpush.bf16.msrb.mxu0 %v2432_v12 }
  0x17   :  { %391 = vmatpush.bf16.msrb.mxu2 %v2166_v13 }
  0x18   :  { %860 = vmatpush.bf16.msra.mxu1 %v2409_v5 }
  0x19   :  { %843 = vmatpush.bf16.msra.mxu0 %v2432_v12  ;;  %464 = vmatpush.bf16.msrb.mxu3 %v2160_v14 }
  0x1b   :  { %693 = vmatpush.bf16.msra.mxu2 %v2432_v12 }
  0x1d   :  { %710 = vmatpush.bf16.msra.mxu3 %v2409_v5 }
  0x22   :  { %1969 = vmatmul.msk.bf16.gmra.mxu0 %vm180_vm1, %v2151_v15  ;;  %1971 = vmatmul.msk.bf16.gmra.mxu2 %vm180_vm1, %v2153_v16 }
  0x23   :  { %1997 = vmatmul.msk.bf16.gmra.mxu1 %vm180_vm1, %v2145_v17 }
  0x24   :  { %1999 = vmatmul.msk.bf16.gmra.mxu3 %vm180_vm1, %v2147_v18 }
  0x32   :  { %2024 = vmatmul.msk.bf16.vlgmr.msrb.gmra.mxu2 %vm180_vm1, %v2162_v21  ;;  %2060 = vmatmul.msk.bf16.vlgmr.msrb.gmra.mxu0 %vm121_vm0, %v514_v22 }
  0x33   :  { %2065 = vmatmul.msk.bf16.vlgmr.msrb.gmra.mxu1 %vm121_vm0, %v541_v24  ;;  %993 = vmatpush.bf16.msrb.mxu2 %v2432_v12 }
  0x34   :  { %2052 = vmatmul.msk.bf16.vlgmr.msrb.gmra.mxu3 %vm180_vm1, %v2156_v23  ;;  %1160 = vmatpush.bf16.msrb.mxu1 %v2409_v5 }
  0x35   :  { %1010 = vmatpush.bf16.msrb.mxu3 %v2409_v5  ;;  %1143 = vmatpush.bf16.msrb.mxu0 %v2432_v12 }
  0x42   :  { %2025 = vmatmul.msk.bf16.gmra.mxu2 %vm180_vm1, %v2163_v25 }
  0x44   :  { %2053 = vmatmul.msk.bf16.gmra.mxu3 %vm180_vm1, %v2157_v26 }
  0x52   :  { %2026 = vmatmul.msk.bf16.gmra.mxu2 %vm180_vm1, %v2164_v27 }
  0x54   :  { %2054 = vmatmul.msk.bf16.gmra.mxu3 %vm180_vm1, %v2158_v28 }
  0x62   :  { %2027 = vmatmul.msk.bf16.gmra.mxu2 %vm180_vm1, %v2165_v29 }
  0x64   :  { %2055 = vmatmul.msk.bf16.gmra.mxu3 %vm180_vm1, %v2159_v30 }
  0x8f   :  { %v202_v31 = vpop.f32.mrf.mxu0 }
  0x90   :  { %v275_v33 = vpop.f32.mrf.mxu1 }
  0x91   :  { %v276_v34 = vadd.f32 %v275_v33, %v202_v31 }
  0x93   :  { %v299_v35 = vadd.f32 %v2189_v32, %v276_v34 }
  0x95   :  { %308 = vst.msk [vmem:[#allocation2] sm:$0xff] %vm307_vm2, %v299_v35  ;;  %v212_v36 = vpop.f32.mrf.mxu2 }
  0x97   :  { %v285_v37 = vpop.f32.mrf.mxu3  ;;  %v204_v39 = vpop.f32.mrf.mxu0 }
  0x98   :  { %v286_v38 = vadd.f32 %v285_v37, %v212_v36  ;;  %v277_v40 = vpop.f32.mrf.mxu1 }
  0x99   :  { %v278_v42 = vadd.f32 %v277_v40, %v204_v39 }
  0x9a   :  { %v303_v41 = vadd.f32 %v2189_v32, %v286_v38 }
  0x9b   :  { %v300_v43 = vadd.f32 %v2189_v32, %v278_v42 }
  0x9c   :  { %312 = vst.msk [vmem:[#allocation2 + $0x20] sm:$0xff] %vm307_vm2, %v303_v41 }
  0x9d   :  { %309 = vst.msk [vmem:[#allocation2 + $0x8] sm:$0xff] %vm307_vm2, %v300_v43  ;;  %v214_v44 = vpop.f32.mrf.mxu2 }
  0x9f   :  { %v287_v45 = vpop.f32.mrf.mxu3  ;;  %v207_v47 = vpop.f32.mrf.mxu0 }
  0xa0   :  { %v288_v46 = vadd.f32 %v287_v45, %v214_v44  ;;  %v280_v48 = vpop.f32.mrf.mxu1  ;;  %v567_v44 = vld [vmem:[#allocation2] sm:$0xff] }
  0xa1   :  { %v281_v50 = vadd.f32 %v280_v48, %v207_v47 }
  0xa2   :  { %v304_v49 = vadd.f32 %v2189_v32, %v288_v46 }
  0xa3   :  { %v301_v51 = vadd.f32 %v2189_v32, %v281_v50 }
  0xa4   :  { %313 = vst.msk [vmem:[#allocation2 + $0x28] sm:$0xff] %vm307_vm2, %v304_v49 }
  0xa5   :  { %310 = vst.msk [vmem:[#allocation2 + $0x10] sm:$0xff] %vm307_vm2, %v301_v51  ;;  %v217_v52 = vpop.f32.mrf.mxu2 }
  0xa7   :  { %v290_v53 = vpop.f32.mrf.mxu3  ;;  %v209_v55 = vpop.f32.mrf.mxu0 }
  0xa8   :  { %v291_v54 = vadd.f32 %v290_v53, %v217_v52  ;;  %v282_v56 = vpop.f32.mrf.mxu1 }
  0xa9   :  { %v283_v58 = vadd.f32 %v282_v56, %v209_v55 }
  0xaa   :  { %v305_v57 = vadd.f32 %v2189_v32, %v291_v54 }
  0xab   :  { %v302_v59 = vadd.f32 %v2189_v32, %v283_v58 }
  0xac   :  { %314 = vst.msk [vmem:[#allocation2 + $0x30] sm:$0xff] %vm307_vm2, %v305_v57 }
  0xad   :  { %311 = vst.msk [vmem:[#allocation2 + $0x18] sm:$0xff] %vm307_vm2, %v302_v59  ;;  %v219_v61 = vpop.f32.mrf.mxu2 }
  0xaf   :  { %v292_v63 = vpop.f32.mrf.mxu3  ;;  %v537_v1 = vpop.f32.mrf.mxu0 }
  0xb0   :  { %v293_v0 = vadd.f32 %v292_v63, %v219_v61  ;;  %v538_v2 = vadd.f32 %v2521_v60, %v537_v1  ;;  %v563_v3 = vpop.f32.mrf.mxu1 }
  0xb1   :  { %v564_v6 = vadd.f32 %v2527_v62, %v563_v3 }
  0xb2   :  { %v306_v4 = vadd.f32 %v2189_v32, %v293_v0  ;;  %591 = vrot.lane.b32.xlu1 %v538_v2, %s2294_s1  ;;  %v570_v45 = vadd.f32 %v567_v44, %v538_v2 }
  0xb3   :  { %634 = vrot.lane.b32.xlu0 %v564_v6, %s2294_s1 }
  0xb4   :  { %315 = vst.msk [vmem:[#allocation2 + $0x38] sm:$0xff] %vm307_vm2, %v306_v4  ;;  %v2066_v46 = vmul.f32 -1.442695, %v570_v45 }
  0xb5   :  { %v393_v7 = vpop.f32.mrf.mxu2 }
  0xb6   :  { %2194 = vpow2.f32 %v2066_v46 }
  0xb7   :  { %v466_v9 = vpop.f32.mrf.mxu3  ;;  %v539_v11 = vpop.f32.mrf.mxu0 }
  0xb8   :  { %v467_v10 = vadd.f32 %v466_v9, %v393_v7  ;;  %v565_v13 = vpop.f32.mrf.mxu1 }
  0xba   :  { %v490_v14 = vadd.f32 %v2192_v8, %v467_v10 }
  0xbc   :  { %498 = vst.msk [vmem:[#allocation3] sm:$0xff] %vm307_vm2, %v490_v14  ;;  %v2195_v50 = vpop.eup %2194 }
  0xbd   :  { %v395_v15 = vpop.f32.mrf.mxu2  ;;  %v574_v51 = vadd.f32 1.0, %v2195_v50 }
  0xbf   :  { %v468_v16 = vpop.f32.mrf.mxu3  ;;  %v586_v2 = vand.u32 2147483648, %v574_v51  ;;  %vm580_vm5 = vweird.f32 %v574_v51  ;;  %v584_v4 = vand.u32 2147483647, %v574_v51 }
  0xc0   :  { %v469_v17 = vadd.f32 %v468_v16, %v395_v15 }
  0xc1   :  { %v587_v9 = vor.u32 1.1754944e-38, %v586_v2  ;;  %vm585_vm9 = vcmp.eq.f32.partialorder %v584_v4, 8.507059e+37 }
  0xc2   :  { %v491_v18 = vadd.f32 %v2192_v8, %v469_v17 }
  0xc4   :  { %499 = vst.msk [vmem:[#allocation3 + $0x8] sm:$0xff] %vm307_vm2, %v491_v18  ;;  %v652_v18 = vpop.permute.xlu2 %651 }
  0xc5   :  { %v398_v20 = vpop.f32.mrf.mxu2 }
  0xc7   :  { %v471_v21 = vpop.f32.mrf.mxu3 }
  0xc8   :  { %v472_v22 = vadd.f32 %v471_v21, %v398_v20 }
  0xca   :  { %v492_v23 = vadd.f32 %v2192_v8, %v472_v22 }
  0xcc   :  { %500 = vst.msk [vmem:[#allocation3 + $0x10] sm:$0xff] %vm307_vm2, %v492_v23 }
  0xcd   :  { %v400_v24 = vpop.f32.mrf.mxu2 }
  0xcf   :  { %v473_v25 = vpop.f32.mrf.mxu3 }
  0xd0   :  { %v474_v26 = vadd.f32 %v473_v25, %v400_v24 }
  0xd2   :  { %v493_v27 = vadd.f32 %v2192_v8, %v474_v26 }
  0xd4   :  { %501 = vst.msk [vmem:[#allocation3 + $0x18] sm:$0xff] %vm307_vm2, %v493_v27 }
  0xd5   :  { %v403_v28 = vpop.f32.mrf.mxu2 }
  0xd7   :  { %v476_v29 = vpop.f32.mrf.mxu3 }
  0xd8   :  { %v477_v30 = vadd.f32 %v476_v29, %v403_v28 }
  0xda   :  { %v494_v31 = vadd.f32 %v2192_v8, %v477_v30 }
  0xdc   :  { %502 = vst.msk [vmem:[#allocation3 + $0x20] sm:$0xff] %vm307_vm2, %v494_v31 }
  0xdd   :  { %v405_v32 = vpop.f32.mrf.mxu2 }
  0xdf   :  { %v478_v33 = vpop.f32.mrf.mxu3 }
  0xe0   :  { %v479_v34 = vadd.f32 %v478_v33, %v405_v32 }
  0xe2   :  { %v495_v35 = vadd.f32 %v2192_v8, %v479_v34 }
  0xe4   :  { %503 = vst.msk [vmem:[#allocation3 + $0x28] sm:$0xff] %vm307_vm2, %v495_v35 }
  0xe5   :  { %v408_v36 = vpop.f32.mrf.mxu2 }
  0xe7   :  { %v481_v37 = vpop.f32.mrf.mxu3 }
  0xe8   :  { %v482_v38 = vadd.f32 %v481_v37, %v408_v36 }
  0xea   :  { %v496_v39 = vadd.f32 %v2192_v8, %v482_v38 }
  0xec   :  { %504 = vst.msk [vmem:[#allocation3 + $0x30] sm:$0xff] %vm307_vm2, %v496_v39 }
  0xed   :  { %v410_v40 = vpop.f32.mrf.mxu2 }
  0xef   :  { %v483_v41 = vpop.f32.mrf.mxu3 }
  0xf0   :  { %v484_v42 = vadd.f32 %v483_v41, %v410_v40 }
  0xf2   :  { %v497_v43 = vadd.f32 %v2192_v8, %v484_v42 }
  0xf4   :  { %505 = vst.msk [vmem:[#allocation3 + $0x38] sm:$0xff] %vm307_vm2, %v497_v43 }
  0xfb   :  { %v569_v47 = vld [vmem:[#allocation3 + $0x38] sm:$0xff] }
  0xfc   :  { %v613_v48 = vadd.f32 %v569_v47, %v564_v6 }
  0xfe   :  { %v2067_v49 = vmul.f32 -1.442695, %v613_v48  ;;  %v719_v48 = vld [vmem:[#allocation3 + $0x30] sm:$0xff] }
 0x100   :  { %2196 = vpow2.f32 %v2067_v49 }
 0x101   :  { %2198 = vrcp.f32 %v574_v51 }
 0x106   :  { %v2197_v52 = vpop.eup %2196 }
 0x107   :  { %v617_v53 = vadd.f32 1.0, %v2197_v52  ;;  %v2199_v54 = vpop.eup %2198 }
 0x108   :  { %v576_v56 = vmul.f32 %v2199_v54, %v574_v51  ;;  %vm581_vm3 = vweird.f32 %v2199_v54  ;;  %v717_v51 = vld [vmem:[#allocation2 + $0x8] sm:$0xff] }
 0x109   :  { %2200 = vrcp.f32 %v617_v53  ;;  %v629_v3 = vand.u32 2147483648, %v617_v53  ;;  %vm623_vm6 = vweird.f32 %v617_v53  ;;  %v627_v6 = vand.u32 2147483647, %v617_v53  ;;  %vm582_vm7 = vmor %vm580_vm5, %vm581_vm3 }
 0x10a   :  { %v577_v58 = vsub.f32 1.0, %v576_v56 }
 0x10b   :  { %v630_v10 = vor.u32 1.1754944e-38, %v629_v3  ;;  %vm628_vm10 = vcmp.eq.f32.partialorder %v627_v6, 8.507059e+37 }
 0x10c   :  { %v578_v61 = vmul.f32 %v2199_v54, %v577_v58 }
 0x10e   :  { %v579_v0 = vadd.f32 %v2199_v54, %v578_v61 }
 0x10f   :  { %v2201_v55 = vpop.eup %2200 }
 0x110   :  { %v619_v57 = vmul.f32 %v2201_v55, %v617_v53  ;;  %vm624_vm4 = vweird.f32 %v2201_v55  ;;  %v583_v7 = vsel %vm582_vm7, %v2199_v54, %v579_v0 }
 0x111   :  { %vm625_vm8 = vmor %vm623_vm6, %vm624_vm4  ;;  %v588_v13 = vsel %vm585_vm9, %v587_v9, %v583_v7 }
 0x112   :  { %v620_v59 = vsub.f32 1.0, %v619_v57  ;;  %v601_v31 = vsub.f32 1.0, %v588_v13 }
 0x114   :  { %v621_v63 = vmul.f32 %v2201_v55, %v620_v59 }
 0x116   :  { %v622_v1 = vadd.f32 %v2201_v55, %v621_v63 }
 0x118   :  { %v626_v8 = vsel %vm625_vm8, %v2201_v55, %v622_v1 }
 0x119   :  { %v631_v14 = vsel %vm628_vm10, %v630_v10, %v626_v8 }
 0x11a   :  { %v644_v26 = vsub.f32 1.0, %v631_v14  ;;  %v654_v28 = vmul.f32 %v652_v18, %v631_v14 }
 0x124   :  { %v592_v11 = vpop.permute.xlu1 %591 }
 0x125   :  { %v594_v15 = vmul.f32 %v592_v11, %v588_v13  ;;  %v635_v16 = vpop.permute.xlu0 %634 }
 0x126   :  { %v637_v17 = vmul.f32 %v635_v16, %v631_v14 }
 0x127   :  { %596 = vrot.lane.b32.xlu2 %v594_v15, %s2295_s9 }
 0x128   :  { %639 = vrot.lane.b32.xlu0 %v637_v17, %s2295_s9 }
 0x12f   :  { %608 = vrot.lane.b32.xlu2 %v2466_v19, %s2293_s11 }
 0x181   :  { %v597_v22 = vpop.permute.xlu2 %596 }
 0x182   :  { %v599_v23 = vadd.f32 %v597_v22, %v567_v44 }
 0x189   :  { %v609_v19 = vpop.permute.xlu2 %608 }
 0x18a   :  { %v611_v33 = vmul.f32 %v609_v19, %v588_v13 }
 0x19a   :  { %v640_v20 = vpop.permute.xlu0 %639 }
 0x19b   :  { %v642_v21 = vadd.f32 %v640_v20, %v569_v47 }
 0x19d   :  { %2202 = vtanh.f32 %v642_v21 }
 0x19e   :  { %2204 = vtanh.f32 %v599_v23 }
 0x1a3   :  { %v2203_v24 = vpop.eup %2202 }
 0x1a4   :  { %646 = vrot.lane.b32.xlu1 %v2203_v24, %s2296_s0  ;;  %v2205_v25 = vpop.eup %2204 }
 0x1ac   :  { %603 = vrot.lane.b32.xlu1 %v2205_v25, %s2296_s0 }
 0x216   :  { %v647_v27 = vpop.permute.xlu1 %646 }
 0x217   :  { %v649_v29 = vmul.f32 %v647_v27, %v644_v26 }
 0x219   :  { %v2551_v30 = vadd.f32 %v654_v28, %v649_v29 }
 0x21b   :  { %662 = vrot.lane.b32.xlu0 %v2551_v30, %s2296_s0 }
 0x21e   :  { %v604_v32 = vpop.permute.xlu1 %603 }
 0x21f   :  { %v606_v34 = vmul.f32 %v604_v32, %v601_v31 }
 0x221   :  { %v2555_v35 = vadd.f32 %v611_v33, %v606_v34 }
 0x223   :  { %657 = vrot.lane.b32.xlu0 %v2555_v35, %s2296_s0 }
 0x28d   :  { %v663_v36 = vpop.permute.xlu0 %662 }
 0x28e   :  { %665 = vst.msk [vmem:[#allocation5] sm:$0xff] %vm121_vm0, %v663_v36 }
 0x295   :  { %v658_v37 = vpop.permute.xlu0 %657  ;;  %v2560_v38 = vld [vmem:[#allocation5] sm:$0xff] }
 0x296   :  { %660 = vst.msk [vmem:[#allocation4] sm:$0xff] %vm121_vm0, %v658_v37  ;;  %v699_v39 = vpack.c.bf16 %v2560_v38, %v2560_v38 }
 0x298   :  { %2069 = vmatmul.msk.bf16.vlgmr.msra.gmra.mxu3 %vm121_vm0, %v699_v39 }
 0x299   :  { %1310 = vmatpush.bf16.msra.mxu3 %v2409_v5 }
 0x29d   :  { %v680_v40 = vld [vmem:[#allocation4] sm:$0xff] }
 0x29e   :  { %v682_v41 = vpack.c.bf16 %v680_v40, %v680_v40 }
 0x2a0   :  { %2068 = vmatmul.msk.bf16.vlgmr.msra.gmra.mxu2 %vm121_vm0, %v682_v41 }
 0x2a1   :  { %1293 = vmatpush.bf16.msra.mxu2 %v2432_v12 }
 0x31b   :  { %v712_v42 = vpop.f32.mrf.mxu3 }
 0x31c   :  { %v713_v43 = vadd.f32 %v2527_v62, %v712_v42 }
 0x31e   :  { %784 = vrot.lane.b32.xlu1 %v713_v43, %s2294_s1  ;;  %v763_v49 = vadd.f32 %v719_v48, %v713_v43 }
 0x320   :  { %v2071_v50 = vmul.f32 -1.442695, %v763_v49 }
 0x322   :  { %2206 = vpow2.f32 %v2071_v50 }
 0x323   :  { %v695_v44 = vpop.f32.mrf.mxu2  ;;  %v714_v45 = vpop.f32.mrf.mxu3 }
 0x324   :  { %v696_v46 = vadd.f32 %v2521_v60, %v695_v44 }
 0x326   :  { %741 = vrot.lane.b32.xlu0 %v696_v46, %s2294_s1  ;;  %v720_v52 = vadd.f32 %v717_v51, %v696_v46 }
 0x328   :  { %v2070_v53 = vmul.f32 -1.442695, %v720_v52  ;;  %v2207_v54 = vpop.eup %2206 }
 0x329   :  { %v767_v55 = vadd.f32 1.0, %v2207_v54  ;;  %v869_v54 = vld [vmem:[#allocation3 + $0x28] sm:$0xff] }
 0x32a   :  { %2208 = vpow2.f32 %v2070_v53 }
 0x32b   :  { %v697_v47 = vpop.f32.mrf.mxu2  ;;  %2210 = vrcp.f32 %v767_v55  ;;  %v779_v4 = vand.u32 2147483648, %v767_v55  ;;  %vm773_vm12 = vweird.f32 %v767_v55  ;;  %v777_v6 = vand.u32 2147483647, %v767_v55 }
 0x32d   :  { %v780_v9 = vor.u32 1.1754944e-38, %v779_v4  ;;  %vm778_vm14 = vcmp.eq.f32.partialorder %v777_v6, 8.507059e+37 }
 0x330   :  { %v2209_v56 = vpop.eup %2208 }
 0x331   :  { %v724_v57 = vadd.f32 1.0, %v2209_v56  ;;  %v2211_v58 = vpop.eup %2210 }
 0x332   :  { %v769_v59 = vmul.f32 %v2211_v58, %v767_v55  ;;  %vm774_vm11 = vweird.f32 %v2211_v58 }
 0x333   :  { %2212 = vrcp.f32 %v724_v57  ;;  %vm775_vm13 = vmor %vm773_vm12, %vm774_vm11  ;;  %v736_v15 = vand.u32 2147483648, %v724_v57  ;;  %vm730_vm1 = vweird.f32 %v724_v57  ;;  %v734_v16 = vand.u32 2147483647, %v724_v57 }
 0x334   :  { %v770_v61 = vsub.f32 1.0, %v769_v59 }
 0x335   :  { %v737_v18 = vor.u32 1.1754944e-38, %v736_v15  ;;  %vm735_vm3 = vcmp.eq.f32.partialorder %v734_v16, 8.507059e+37 }
 0x336   :  { %v771_v0 = vmul.f32 %v2211_v58, %v770_v61 }
 0x338   :  { %v772_v2 = vadd.f32 %v2211_v58, %v771_v0 }
 0x339   :  { %v2213_v63 = vpop.eup %2212 }
 0x33a   :  { %v726_v1 = vmul.f32 %v2213_v63, %v724_v57  ;;  %v776_v7 = vsel %vm775_vm13, %v2211_v58, %v772_v2  ;;  %vm731_vm15 = vweird.f32 %v2213_v63 }
 0x33b   :  { %v781_v10 = vsel %vm778_vm14, %v780_v9, %v776_v7  ;;  %vm732_vm2 = vmor %vm730_vm1, %vm731_vm15 }
 0x33c   :  { %v727_v3 = vsub.f32 1.0, %v726_v1  ;;  %v794_v19 = vsub.f32 1.0, %v781_v10 }
 0x33e   :  { %v728_v8 = vmul.f32 %v2213_v63, %v727_v3 }
 0x340   :  { %v729_v14 = vadd.f32 %v2213_v63, %v728_v8 }
 0x342   :  { %v733_v17 = vsel %vm732_vm2, %v2213_v63, %v729_v14  ;;  %v867_v63 = vld [vmem:[#allocation2 + $0x10] sm:$0xff] }
 0x343   :  { %v738_v21 = vsel %vm735_vm3, %v737_v18, %v733_v17 }
 0x344   :  { %v751_v37 = vsub.f32 1.0, %v738_v21 }
 0x390   :  { %v785_v11 = vpop.permute.xlu1 %784 }
 0x391   :  { %v787_v13 = vmul.f32 %v785_v11, %v781_v10 }
 0x393   :  { %789 = vrot.lane.b32.xlu2 %v787_v13, %s2295_s9 }
 0x398   :  { %v742_v20 = vpop.permute.xlu0 %741 }
 0x399   :  { %v744_v22 = vmul.f32 %v742_v20, %v738_v21 }
 0x39b   :  { %801 = vrot.lane.b32.xlu2 %v2560_v38, %s2293_s11  ;;  %746 = vrot.lane.b32.xlu0 %v744_v22, %s2295_s9 }
 0x3a3   :  { %758 = vrot.lane.b32.xlu0 %v680_v40, %s2293_s11 }
 0x3ed   :  { %v790_v23 = vpop.permute.xlu2 %789 }
 0x3ee   :  { %v792_v24 = vadd.f32 %v790_v23, %v719_v48 }
 0x3f0   :  { %2214 = vtanh.f32 %v792_v24 }
 0x3f5   :  { %v802_v29 = vpop.permute.xlu2 %801 }
 0x3f6   :  { %v2215_v25 = vpop.eup %2214  ;;  %v804_v32 = vmul.f32 %v802_v29, %v781_v10 }
 0x3f7   :  { %796 = vrot.lane.b32.xlu1 %v2215_v25, %s2296_s0 }
 0x40d   :  { %v747_v26 = vpop.permute.xlu0 %746 }
 0x40e   :  { %v749_v27 = vadd.f32 %v747_v26, %v717_v51 }
 0x410   :  { %2216 = vtanh.f32 %v749_v27 }
 0x415   :  { %v759_v36 = vpop.permute.xlu0 %758 }
 0x416   :  { %v2217_v28 = vpop.eup %2216  ;;  %v761_v39 = vmul.f32 %v759_v36, %v738_v21 }
 0x417   :  { %753 = vrot.lane.b32.xlu2 %v2217_v28, %s2296_s0 }
 0x469   :  { %v797_v31 = vpop.permute.xlu1 %796 }
 0x46a   :  { %v799_v33 = vmul.f32 %v797_v31, %v794_v19 }
 0x46c   :  { %v2580_v34 = vadd.f32 %v804_v32, %v799_v33 }
 0x46e   :  { %812 = vrot.lane.b32.xlu1 %v2580_v34, %s2296_s0 }
 0x471   :  { %v754_v38 = vpop.permute.xlu2 %753 }
 0x472   :  { %v756_v40 = vmul.f32 %v754_v38, %v751_v37 }
 0x474   :  { %v2584_v41 = vadd.f32 %v761_v39, %v756_v40 }
 0x476   :  { %807 = vrot.lane.b32.xlu1 %v2584_v41, %s2296_s0 }
 0x4e0   :  { %v813_v42 = vpop.permute.xlu1 %812 }
 0x4e1   :  { %815 = vst.msk [vmem:[#allocation5] sm:$0xff] %vm121_vm0, %v813_v42 }
 0x4e8   :  { %v808_v43 = vpop.permute.xlu1 %807  ;;  %v831_v44 = vld [vmem:[#allocation5] sm:$0xff] }
 0x4e9   :  { %810 = vst.msk [vmem:[#allocation4] sm:$0xff] %vm121_vm0, %v808_v43  ;;  %v849_v45 = vpack.c.bf16 %v831_v44, %v831_v44 }
 0x4eb   :  { %2073 = vmatmul.msk.bf16.vlgmr.msra.gmra.mxu1 %vm121_vm0, %v849_v45 }
 0x4ec   :  { %1460 = vmatpush.bf16.msra.mxu1 %v2409_v5 }
 0x4f0   :  { %v830_v46 = vld [vmem:[#allocation4] sm:$0xff] }
 0x4f1   :  { %v832_v47 = vpack.c.bf16 %v830_v46, %v830_v46 }
 0x4f3   :  { %2072 = vmatmul.msk.bf16.vlgmr.msra.gmra.mxu0 %vm121_vm0, %v832_v47 }
 0x4f4   :  { %1443 = vmatpush.bf16.msra.mxu0 %v2432_v12 }
 0x568   :  { %v862_v48 = vpop.f32.mrf.mxu1 }
 0x569   :  { %v863_v49 = vadd.f32 %v2527_v62, %v862_v48 }
 0x56b   :  { %934 = vrot.lane.b32.xlu2 %v863_v49, %s2294_s1  ;;  %v913_v55 = vadd.f32 %v869_v54, %v863_v49 }
 0x56d   :  { %v2075_v56 = vmul.f32 -1.442695, %v913_v55 }
 0x56f   :  { %2218 = vpow2.f32 %v2075_v56 }
 0x570   :  { %v845_v50 = vpop.f32.mrf.mxu0  ;;  %v864_v51 = vpop.f32.mrf.mxu1 }
 0x571   :  { %v846_v52 = vadd.f32 %v2521_v60, %v845_v50 }
 0x573   :  { %891 = vrot.lane.b32.xlu1 %v846_v52, %s2294_s1  ;;  %v870_v0 = vadd.f32 %v867_v63, %v846_v52 }
 0x575   :  { %v2219_v57 = vpop.eup %2218  ;;  %v2074_v2 = vmul.f32 -1.442695, %v870_v0 }
 0x576   :  { %v917_v58 = vadd.f32 1.0, %v2219_v57 }
 0x578   :  { %v847_v53 = vpop.f32.mrf.mxu0  ;;  %2220 = vrcp.f32 %v917_v58  ;;  %v929_v6 = vand.u32 2147483648, %v917_v58  ;;  %vm923_vm5 = vweird.f32 %v917_v58  ;;  %v927_v7 = vand.u32 2147483647, %v917_v58 }
 0x579   :  { %2222 = vpow2.f32 %v2074_v2 }
 0x57a   :  { %v930_v10 = vor.u32 1.1754944e-38, %v929_v6  ;;  %vm928_vm7 = vcmp.eq.f32.partialorder %v927_v7, 8.507059e+37  ;;  %v1017_v6 = vld [vmem:[#allocation2 + $0x18] sm:$0xff] }
 0x57e   :  { %v2221_v59 = vpop.eup %2220 }
 0x57f   :  { %v919_v61 = vmul.f32 %v2221_v59, %v917_v58  ;;  %vm924_vm4 = vweird.f32 %v2221_v59  ;;  %v2223_v8 = vpop.eup %2222 }
 0x580   :  { %vm925_vm6 = vmor %vm923_vm5, %vm924_vm4  ;;  %v874_v11 = vadd.f32 1.0, %v2223_v8 }
 0x581   :  { %v920_v1 = vsub.f32 1.0, %v919_v61 }
 0x582   :  { %2224 = vrcp.f32 %v874_v11  ;;  %v886_v22 = vand.u32 2147483648, %v874_v11  ;;  %vm880_vm9 = vweird.f32 %v874_v11  ;;  %v884_v23 = vand.u32 2147483647, %v874_v11 }
 0x583   :  { %v921_v3 = vmul.f32 %v2221_v59, %v920_v1 }
 0x584   :  { %v887_v25 = vor.u32 1.1754944e-38, %v886_v22  ;;  %vm885_vm11 = vcmp.eq.f32.partialorder %v884_v23, 8.507059e+37 }
 0x585   :  { %v922_v4 = vadd.f32 %v2221_v59, %v921_v3 }
 0x587   :  { %v926_v9 = vsel %vm925_vm6, %v2221_v59, %v922_v4 }
 0x588   :  { %v931_v13 = vsel %vm928_vm7, %v930_v10, %v926_v9  ;;  %v2225_v16 = vpop.eup %2224 }
 0x589   :  { %v876_v17 = vmul.f32 %v2225_v16, %v874_v11  ;;  %vm881_vm8 = vweird.f32 %v2225_v16  ;;  %v944_v38 = vsub.f32 1.0, %v931_v13 }
 0x58a   :  { %vm882_vm10 = vmor %vm880_vm9, %vm881_vm8 }
 0x58b   :  { %v877_v18 = vsub.f32 1.0, %v876_v17 }
 0x58d   :  { %v878_v20 = vmul.f32 %v2225_v16, %v877_v18 }
 0x58f   :  { %v879_v21 = vadd.f32 %v2225_v16, %v878_v20 }
 0x591   :  { %v883_v24 = vsel %vm882_vm10, %v2225_v16, %v879_v21 }
 0x592   :  { %v888_v27 = vsel %vm885_vm11, %v887_v25, %v883_v24 }
 0x593   :  { %v901_v45 = vsub.f32 1.0, %v888_v27 }
 0x5c5   :  { %v935_v14 = vpop.permute.xlu2 %934 }
 0x5c6   :  { %v937_v15 = vmul.f32 %v935_v14, %v931_v13 }
 0x5c8   :  { %939 = vrot.lane.b32.xlu0 %v937_v15, %s2295_s9 }
 0x5d0   :  { %951 = vrot.lane.b32.xlu0 %v831_v44, %s2293_s11 }
 0x5e5   :  { %v892_v26 = vpop.permute.xlu1 %891 }
 0x5e6   :  { %v894_v28 = vmul.f32 %v892_v26, %v888_v27 }
 0x5e8   :  { %896 = vrot.lane.b32.xlu1 %v894_v28, %s2295_s9 }
 0x5f0   :  { %908 = vrot.lane.b32.xlu1 %v830_v46, %s2293_s11 }
 0x63a   :  { %v940_v29 = vpop.permute.xlu0 %939 }
 0x63b   :  { %v942_v19 = vadd.f32 %v940_v29, %v869_v54 }
 0x63d   :  { %2226 = vtanh.f32 %v942_v19 }
 0x642   :  { %v952_v37 = vpop.permute.xlu0 %951 }
 0x643   :  { %v2227_v31 = vpop.eup %2226  ;;  %v954_v40 = vmul.f32 %v952_v37, %v931_v13 }
 0x644   :  { %946 = vrot.lane.b32.xlu2 %v2227_v31, %s2296_s0 }
 0x65a   :  { %v897_v32 = vpop.permute.xlu1 %896 }
 0x65b   :  { %v899_v33 = vadd.f32 %v897_v32, %v867_v63  ;;  %v1019_v63 = vld [vmem:[#allocation3 + $0x20] sm:$0xff] }
 0x65d   :  { %2228 = vtanh.f32 %v899_v33 }
 0x662   :  { %v909_v44 = vpop.permute.xlu1 %908 }
 0x663   :  { %v2229_v36 = vpop.eup %2228  ;;  %v911_v47 = vmul.f32 %v909_v44, %v888_v27 }
 0x664   :  { %903 = vrot.lane.b32.xlu0 %v2229_v36, %s2296_s0 }
 0x69e   :  { %v947_v39 = vpop.permute.xlu2 %946 }
 0x69f   :  { %v949_v42 = vmul.f32 %v947_v39, %v944_v38 }
 0x6a1   :  { %v2604_v43 = vadd.f32 %v954_v40, %v949_v42 }
 0x6a3   :  { %962 = vrot.lane.b32.xlu2 %v2604_v43, %s2296_s0 }
 0x6d6   :  { %v904_v46 = vpop.permute.xlu0 %903 }
 0x6d7   :  { %v906_v48 = vmul.f32 %v904_v46, %v901_v45 }
 0x6d9   :  { %v2608_v49 = vadd.f32 %v911_v47, %v906_v48 }
 0x6db   :  { %957 = vrot.lane.b32.xlu2 %v2608_v49, %s2296_s0 }
 0x6fd   :  { %v963_v50 = vpop.permute.xlu2 %962 }
 0x6fe   :  { %965 = vst.msk [vmem:[#allocation5] sm:$0xff] %vm121_vm0, %v963_v50 }
 0x705   :  { %v981_v51 = vld [vmem:[#allocation5] sm:$0xff] }
 0x706   :  { %v999_v52 = vpack.c.bf16 %v981_v51, %v981_v51 }
 0x708   :  { %2077 = vmatmul.msk.bf16.vlgmr.msrb.gmra.mxu3 %vm121_vm0, %v999_v52 }
 0x709   :  { %1610 = vmatpush.bf16.msrb.mxu3 %v2409_v5 }
 0x735   :  { %v958_v53 = vpop.permute.xlu2 %957 }
 0x736   :  { %960 = vst.msk [vmem:[#allocation4] sm:$0xff] %vm121_vm0, %v958_v53 }
 0x73d   :  { %v980_v54 = vld [vmem:[#allocation4] sm:$0xff] }
 0x73e   :  { %v982_v55 = vpack.c.bf16 %v980_v54, %v980_v54 }
 0x740   :  { %2076 = vmatmul.msk.bf16.vlgmr.msrb.gmra.mxu2 %vm121_vm0, %v982_v55 }
 0x741   :  { %1593 = vmatpush.bf16.msrb.mxu2 %v2432_v12 }
 0x78b   :  { %v1012_v56 = vpop.f32.mrf.mxu3 }
 0x78c   :  { %v1013_v57 = vadd.f32 %v2527_v62, %v1012_v56 }
 0x78e   :  { %1084 = vrot.lane.b32.xlu0 %v1013_v57, %s2294_s1  ;;  %v1063_v0 = vadd.f32 %v1019_v63, %v1013_v57 }
 0x790   :  { %v2079_v1 = vmul.f32 -1.442695, %v1063_v0 }
 0x792   :  { %2230 = vpow2.f32 %v2079_v1 }
 0x793   :  { %v1014_v58 = vpop.f32.mrf.mxu3 }
 0x798   :  { %v2231_v2 = vpop.eup %2230 }
 0x799   :  { %v1067_v3 = vadd.f32 1.0, %v2231_v2 }
 0x79b   :  { %2232 = vrcp.f32 %v1067_v3  ;;  %v1079_v13 = vand.u32 2147483648, %v1067_v3  ;;  %vm1073_vm13 = vweird.f32 %v1067_v3  ;;  %v1077_v14 = vand.u32 2147483647, %v1067_v3 }
 0x79d   :  { %v1080_v17 = vor.u32 1.1754944e-38, %v1079_v13  ;;  %vm1078_vm15 = vcmp.eq.f32.partialorder %v1077_v14, 8.507059e+37 }
 0x7a1   :  { %v2233_v12 = vpop.eup %2232 }
 0x7a2   :  { %v1069_v4 = vmul.f32 %v2233_v12, %v1067_v3  ;;  %vm1074_vm12 = vweird.f32 %v2233_v12 }
 0x7a3   :  { %vm1075_vm14 = vmor %vm1073_vm13, %vm1074_vm12 }
 0x7a4   :  { %v1070_v8 = vsub.f32 1.0, %v1069_v4 }
 0x7a6   :  { %v1071_v10 = vmul.f32 %v2233_v12, %v1070_v8 }
 0x7a8   :  { %v1072_v11 = vadd.f32 %v2233_v12, %v1071_v10  ;;  %v1167_v10 = vld [vmem:[#allocation2 + $0x20] sm:$0xff] }
 0x7aa   :  { %v1076_v16 = vsel %vm1075_vm14, %v2233_v12, %v1072_v11 }
 0x7ab   :  { %v1081_v20 = vsel %vm1078_vm15, %v1080_v17, %v1076_v16 }
 0x7ac   :  { %v1094_v46 = vsub.f32 1.0, %v1081_v20 }
 0x7c3   :  { %v995_v59 = vpop.f32.mrf.mxu2 }
 0x7c4   :  { %v996_v61 = vadd.f32 %v2521_v60, %v995_v59 }
 0x7c6   :  { %1041 = vrot.lane.b32.xlu2 %v996_v61, %s2294_s1  ;;  %v1020_v7 = vadd.f32 %v1017_v6, %v996_v61 }
 0x7c8   :  { %v2078_v9 = vmul.f32 -1.442695, %v1020_v7  ;;  %v1169_v7 = vld [vmem:[#allocation3 + $0x18] sm:$0xff] }
 0x7ca   :  { %2234 = vpow2.f32 %v2078_v9 }
 0x7cb   :  { %v997_v5 = vpop.f32.mrf.mxu2 }
 0x7d0   :  { %v2235_v15 = vpop.eup %2234 }
 0x7d1   :  { %v1024_v18 = vadd.f32 1.0, %v2235_v15 }
 0x7d3   :  { %2236 = vrcp.f32 %v1024_v18  ;;  %v1036_v28 = vand.u32 2147483648, %v1024_v18  ;;  %vm1030_vm2 = vweird.f32 %v1024_v18  ;;  %v1034_v29 = vand.u32 2147483647, %v1024_v18 }
 0x7d5   :  { %v1037_v31 = vor.u32 1.1754944e-38, %v1036_v28  ;;  %vm1035_vm4 = vcmp.eq.f32.partialorder %v1034_v29, 8.507059e+37 }
 0x7d9   :  { %v2237_v23 = vpop.eup %2236 }
 0x7da   :  { %v1026_v24 = vmul.f32 %v2237_v23, %v1024_v18  ;;  %vm1031_vm1 = vweird.f32 %v2237_v23 }
 0x7db   :  { %vm1032_vm3 = vmor %vm1030_vm2, %vm1031_vm1 }
 0x7dc   :  { %v1027_v25 = vsub.f32 1.0, %v1026_v24 }
 0x7de   :  { %v1028_v26 = vmul.f32 %v2237_v23, %v1027_v25 }
 0x7e0   :  { %v1029_v27 = vadd.f32 %v2237_v23, %v1028_v26 }
 0x7e2   :  { %v1033_v19 = vsel %vm1032_vm3, %v2237_v23, %v1029_v27 }
 0x7e3   :  { %v1038_v33 = vsel %vm1035_vm4, %v1037_v31, %v1033_v19 }
 0x7e4   :  { %v1051_v53 = vsub.f32 1.0, %v1038_v33 }
 0x800   :  { %v1085_v21 = vpop.permute.xlu0 %1084 }
 0x801   :  { %v1087_v22 = vmul.f32 %v1085_v21, %v1081_v20 }
 0x803   :  { %1089 = vrot.lane.b32.xlu1 %v1087_v22, %s2295_s9 }
 0x80b   :  { %1101 = vrot.lane.b32.xlu1 %v981_v51, %s2293_s11 }
 0x820   :  { %v1042_v32 = vpop.permute.xlu2 %1041 }
 0x821   :  { %v1044_v36 = vmul.f32 %v1042_v32, %v1038_v33 }
 0x823   :  { %1046 = vrot.lane.b32.xlu2 %v1044_v36, %s2295_s9 }
 0x82b   :  { %1058 = vrot.lane.b32.xlu2 %v980_v54, %s2293_s11 }
 0x875   :  { %v1090_v37 = vpop.permute.xlu1 %1089 }
 0x876   :  { %v1092_v38 = vadd.f32 %v1090_v37, %v1019_v63 }
 0x878   :  { %2238 = vtanh.f32 %v1092_v38 }
 0x87d   :  { %v1047_v39 = vpop.permute.xlu2 %1046  ;;  %v1102_v45 = vpop.permute.xlu1 %1101 }
 0x87e   :  { %v2239_v40 = vpop.eup %2238  ;;  %v1049_v42 = vadd.f32 %v1047_v39, %v1017_v6  ;;  %v1104_v48 = vmul.f32 %v1102_v45, %v1081_v20 }
 0x87f   :  { %1096 = vrot.lane.b32.xlu0 %v2239_v40, %s2296_s0 }
 0x880   :  { %2240 = vtanh.f32 %v1049_v42 }
 0x885   :  { %v1059_v52 = vpop.permute.xlu2 %1058 }
 0x886   :  { %v2241_v44 = vpop.eup %2240  ;;  %v1061_v55 = vmul.f32 %v1059_v52, %v1038_v33 }
 0x887   :  { %1053 = vrot.lane.b32.xlu1 %v2241_v44, %s2296_s0 }
 0x8f1   :  { %v1097_v47 = vpop.permute.xlu0 %1096 }
 0x8f2   :  { %v1099_v50 = vmul.f32 %v1097_v47, %v1094_v46 }
 0x8f4   :  { %v2628_v51 = vadd.f32 %v1104_v48, %v1099_v50 }
 0x8f6   :  { %1112 = vrot.lane.b32.xlu0 %v2628_v51, %s2296_s0 }
 0x8f9   :  { %v1054_v54 = vpop.permute.xlu1 %1053 }
 0x8fa   :  { %v1056_v56 = vmul.f32 %v1054_v54, %v1051_v53 }
 0x8fc   :  { %v2632_v57 = vadd.f32 %v1061_v55, %v1056_v56 }
 0x8fe   :  { %1107 = vrot.lane.b32.xlu0 %v2632_v57, %s2296_s0 }
 0x968   :  { %v1113_v58 = vpop.permute.xlu0 %1112 }
 0x969   :  { %1115 = vst.msk [vmem:[#allocation5] sm:$0xff] %vm121_vm0, %v1113_v58 }
 0x970   :  { %v1108_v59 = vpop.permute.xlu0 %1107  ;;  %v1131_v61 = vld [vmem:[#allocation5] sm:$0xff] }
 0x971   :  { %1110 = vst.msk [vmem:[#allocation4] sm:$0xff] %vm121_vm0, %v1108_v59  ;;  %v1149_v5 = vpack.c.bf16 %v1131_v61, %v1131_v61 }
 0x973   :  { %2081 = vmatmul.msk.bf16.vlgmr.msrb.gmra.mxu1 %vm121_vm0, %v1149_v5 }
 0x978   :  { %v1130_v63 = vld [vmem:[#allocation4] sm:$0xff] }
 0x979   :  { %v1132_v0 = vpack.c.bf16 %v1130_v63, %v1130_v63 }
 0x97b   :  { %2080 = vmatmul.msk.bf16.vlgmr.msrb.gmra.mxu0 %vm121_vm0, %v1132_v0 }
 0x9f0   :  { %v1162_v1 = vpop.f32.mrf.mxu1 }
 0x9f1   :  { %v1163_v2 = vadd.f32 %v2527_v62, %v1162_v1 }
 0x9f3   :  { %1234 = vrot.lane.b32.xlu1 %v1163_v2, %s2294_s1  ;;  %v1213_v8 = vadd.f32 %v1169_v7, %v1163_v2 }
 0x9f5   :  { %v2083_v9 = vmul.f32 -1.442695, %v1213_v8 }
 0x9f7   :  { %2242 = vpow2.f32 %v2083_v9 }
 0x9f8   :  { %v1145_v3 = vpop.f32.mrf.mxu0  ;;  %v1164_v12 = vpop.f32.mrf.mxu1 }
 0x9f9   :  { %v1146_v4 = vadd.f32 %v2521_v60, %v1145_v3 }
 0x9fb   :  { %1191 = vrot.lane.b32.xlu0 %v1146_v4, %s2294_s1  ;;  %v1170_v11 = vadd.f32 %v1167_v10, %v1146_v4 }
 0x9fd   :  { %v2082_v13 = vmul.f32 -1.442695, %v1170_v11  ;;  %v2243_v14 = vpop.eup %2242 }
 0x9fe   :  { %v1217_v15 = vadd.f32 1.0, %v2243_v14 }
 0x9ff   :  { %2244 = vpow2.f32 %v2082_v13 }
 0xa00   :  { %v1147_v6 = vpop.f32.mrf.mxu0  ;;  %2246 = vrcp.f32 %v1217_v15  ;;  %v1229_v25 = vand.u32 2147483648, %v1217_v15  ;;  %vm1223_vm6 = vweird.f32 %v1217_v15  ;;  %v1227_v26 = vand.u32 2147483647, %v1217_v15 }
 0xa02   :  { %v1230_v29 = vor.u32 1.1754944e-38, %v1229_v25  ;;  %vm1228_vm8 = vcmp.eq.f32.partialorder %v1227_v26, 8.507059e+37 }
 0xa05   :  { %v2245_v62 = vpop.eup %2244 }
 0xa06   :  { %v1174_v16 = vadd.f32 1.0, %v2245_v62  ;;  %v2247_v17 = vpop.eup %2246 }
 0xa07   :  { %v1219_v18 = vmul.f32 %v2247_v17, %v1217_v15  ;;  %vm1224_vm5 = vweird.f32 %v2247_v17  ;;  %v2672_v15 = vld [vmem:[%s2880_s12] ss:$0 sm:$0xff] }
 0xa08   :  { %2248 = vrcp.f32 %v1174_v16  ;;  %vm1225_vm7 = vmor %vm1223_vm6, %vm1224_vm5  ;;  %v1186_v36 = vand.u32 2147483648, %v1174_v16  ;;  %vm1180_vm10 = vweird.f32 %v1174_v16  ;;  %v1184_v37 = vand.u32 2147483647, %v1174_v16 }
 0xa09   :  { %v1220_v60 = vsub.f32 1.0, %v1219_v18 }
 0xa0a   :  { %v1187_v39 = vor.u32 1.1754944e-38, %v1186_v36  ;;  %vm1185_vm12 = vcmp.eq.f32.partialorder %v1184_v37, 8.507059e+37 }
 0xa0b   :  { %v1221_v21 = vmul.f32 %v2247_v17, %v1220_v60 }
 0xa0d   :  { %v1222_v23 = vadd.f32 %v2247_v17, %v1221_v21 }
 0xa0e   :  { %v2249_v20 = vpop.eup %2248 }
 0xa0f   :  { %v1176_v22 = vmul.f32 %v2249_v20, %v1174_v16  ;;  %v1226_v27 = vsel %vm1225_vm7, %v2247_v17, %v1222_v23  ;;  %vm1181_vm9 = vweird.f32 %v2249_v20  ;;  %v1319_v17 = vld [vmem:[#allocation3 + $0x10] sm:$0xff] }
 0xa10   :  { %v1231_v19 = vsel %vm1228_vm8, %v1230_v29, %v1226_v27  ;;  %vm1182_vm11 = vmor %vm1180_vm10, %vm1181_vm9 }
 0xa11   :  { %v1177_v24 = vsub.f32 1.0, %v1176_v22  ;;  %v1244_v54 = vsub.f32 1.0, %v1231_v19 }
 0xa13   :  { %v1178_v28 = vmul.f32 %v2249_v20, %v1177_v24  ;;  %v1317_v24 = vld [vmem:[#allocation2 + $0x28] sm:$0xff] }
 0xa15   :  { %v1179_v33 = vadd.f32 %v2249_v20, %v1178_v28 }
 0xa17   :  { %v1183_v38 = vsel %vm1182_vm11, %v2249_v20, %v1179_v33 }
 0xa18   :  { %v1188_v42 = vsel %vm1185_vm12, %v1187_v39, %v1183_v38 }
 0xa19   :  { %v1201_v5 = vsub.f32 1.0, %v1188_v42 }
 0xa65   :  { %v1235_v31 = vpop.permute.xlu1 %1234 }
 0xa66   :  { %v1237_v32 = vmul.f32 %v1235_v31, %v1231_v19 }
 0xa68   :  { %1239 = vrot.lane.b32.xlu2 %v1237_v32, %s2295_s9 }
 0xa6d   :  { %v1192_v40 = vpop.permute.xlu0 %1191 }
 0xa6e   :  { %v1194_v44 = vmul.f32 %v1192_v40, %v1188_v42 }
 0xa70   :  { %1196 = vrot.lane.b32.xlu0 %v1194_v44, %s2295_s9  ;;  %1251 = vrot.lane.b32.xlu2 %v1131_v61, %s2293_s11 }
 0xa78   :  { %1208 = vrot.lane.b32.xlu0 %v1130_v63, %s2293_s11 }
 0xac2   :  { %v1240_v45 = vpop.permute.xlu2 %1239 }
 0xac3   :  { %v1242_v46 = vadd.f32 %v1240_v45, %v1169_v7 }
 0xac5   :  { %2250 = vtanh.f32 %v1242_v46 }
 0xaca   :  { %v1252_v53 = vpop.permute.xlu2 %1251 }
 0xacb   :  { %v2251_v47 = vpop.eup %2250  ;;  %v1254_v56 = vmul.f32 %v1252_v53, %v1231_v19 }
 0xacc   :  { %1246 = vrot.lane.b32.xlu1 %v2251_v47, %s2296_s0 }
 0xae2   :  { %v1197_v48 = vpop.permute.xlu0 %1196 }
 0xae3   :  { %v1199_v50 = vadd.f32 %v1197_v48, %v1167_v10  ;;  %v2665_v10 = vld [vmem:[%s2881_s13] ss:$0 sm:$0xff] }
 0xae5   :  { %2252 = vtanh.f32 %v1199_v50 }
 0xaea   :  { %v1209_v61 = vpop.permute.xlu0 %1208 }
 0xaeb   :  { %v2253_v52 = vpop.eup %2252  ;;  %v1211_v0 = vmul.f32 %v1209_v61, %v1188_v42 }
 0xaec   :  { %1203 = vrot.lane.b32.xlu2 %v2253_v52, %s2296_s0 }
 0xb3e   :  { %v1247_v55 = vpop.permute.xlu1 %1246 }
 0xb3f   :  { %v1249_v58 = vmul.f32 %v1247_v55, %v1244_v54 }
 0xb41   :  { %v2650_v59 = vadd.f32 %v1254_v56, %v1249_v58 }
 0xb43   :  { %1262 = vrot.lane.b32.xlu1 %v2650_v59, %s2296_s0 }
 0xb46   :  { %v1204_v63 = vpop.permute.xlu2 %1203 }
 0xb47   :  { %v1206_v1 = vmul.f32 %v1204_v63, %v1201_v5 }
 0xb49   :  { %v2654_v2 = vadd.f32 %v1211_v0, %v1206_v1 }
 0xb4b   :  { %1257 = vrot.lane.b32.xlu1 %v2654_v2, %s2296_s0 }
 0xbb5   :  { %v1263_v3 = vpop.permute.xlu1 %1262 }
 0xbb6   :  { %1265 = vst.msk [vmem:[#allocation5] sm:$0xff] %vm121_vm0, %v1263_v3 }
 0xbbd   :  { %v1258_v12 = vpop.permute.xlu1 %1257  ;;  %v1281_v4 = vld [vmem:[#allocation5] sm:$0xff] }
 0xbbe   :  { %1260 = vst.msk [vmem:[#allocation4] sm:$0xff] %vm121_vm0, %v1258_v12  ;;  %v1299_v6 = vpack.c.bf16 %v1281_v4, %v1281_v4 }
 0xbc0   :  { %2085 = vmatmul.msk.bf16.vlgmr.msra.gmra.mxu3 %vm121_vm0, %v1299_v6 }
 0xbc5   :  { %v1280_v7 = vld [vmem:[#allocation4] sm:$0xff] }
 0xbc6   :  { %v1282_v8 = vpack.c.bf16 %v1280_v7, %v1280_v7 }
 0xbc8   :  { %2084 = vmatmul.msk.bf16.vlgmr.msra.gmra.mxu2 %vm121_vm0, %v1282_v8 }
 0xc43   :  { %v1312_v9 = vpop.f32.mrf.mxu3 }
 0xc44   :  { %v1313_v11 = vadd.f32 %v2665_v10, %v1312_v9 }
 0xc46   :  { %1384 = vrot.lane.b32.xlu2 %v1313_v11, %s2294_s1  ;;  %v1363_v18 = vadd.f32 %v1319_v17, %v1313_v11 }
 0xc48   :  { %v2087_v60 = vmul.f32 -1.442695, %v1363_v18 }
 0xc4a   :  { %2254 = vpow2.f32 %v2087_v60 }
 0xc4b   :  { %v1295_v13 = vpop.f32.mrf.mxu2  ;;  %v1314_v14 = vpop.f32.mrf.mxu3 }
 0xc4c   :  { %v1296_v62 = vadd.f32 %v2672_v15, %v1295_v13 }
 0xc4e   :  { %1341 = vrot.lane.b32.xlu1 %v1296_v62, %s2294_s1  ;;  %v1320_v25 = vadd.f32 %v1317_v24, %v1296_v62 }
 0xc50   :  { %v2255_v20 = vpop.eup %2254  ;;  %v2086_v27 = vmul.f32 -1.442695, %v1320_v25 }
 0xc51   :  { %v1367_v21 = vadd.f32 1.0, %v2255_v20 }
 0xc53   :  { %v1297_v16 = vpop.f32.mrf.mxu2  ;;  %2256 = vrcp.f32 %v1367_v21  ;;  %v1379_v19 = vand.u32 2147483648, %v1367_v21  ;;  %vm1373_vm14 = vweird.f32 %v1367_v21  ;;  %v1377_v31 = vand.u32 2147483647, %v1367_v21 }
 0xc54   :  { %2258 = vpow2.f32 %v2086_v27 }
 0xc55   :  { %v1380_v36 = vor.u32 1.1754944e-38, %v1379_v19  ;;  %vm1378_vm1 = vcmp.eq.f32.partialorder %v1377_v31, 8.507059e+37 }
 0xc59   :  { %v2257_v22 = vpop.eup %2256 }
 0xc5a   :  { %v1369_v23 = vmul.f32 %v2257_v22, %v1367_v21  ;;  %vm1374_vm13 = vweird.f32 %v2257_v22  ;;  %v2259_v32 = vpop.eup %2258 }
 0xc5b   :  { %vm1375_vm15 = vmor %vm1373_vm14, %vm1374_vm13  ;;  %v1324_v37 = vadd.f32 1.0, %v2259_v32 }
 0xc5c   :  { %v1370_v26 = vsub.f32 1.0, %v1369_v23 }
 0xc5d   :  { %2260 = vrcp.f32 %v1324_v37  ;;  %v1336_v48 = vand.u32 2147483648, %v1324_v37  ;;  %vm1330_vm3 = vweird.f32 %v1324_v37  ;;  %v1334_v50 = vand.u32 2147483647, %v1324_v37 }
 0xc5e   :  { %v1371_v28 = vmul.f32 %v2257_v22, %v1370_v26 }
 0xc5f   :  { %v1337_v53 = vor.u32 1.1754944e-38, %v1336_v48  ;;  %vm1335_vm5 = vcmp.eq.f32.partialorder %v1334_v50, 8.507059e+37 }
 0xc60   :  { %v1372_v29 = vadd.f32 %v2257_v22, %v1371_v28 }
 0xc62   :  { %v1376_v33 = vsel %vm1375_vm15, %v2257_v22, %v1372_v29  ;;  %v1469_v29 = vld [vmem:[#allocation3 + $0x8] sm:$0xff] }
 0xc63   :  { %v1381_v38 = vsel %vm1378_vm1, %v1380_v36, %v1376_v33  ;;  %v2261_v42 = vpop.eup %2260 }
 0xc64   :  { %v1326_v44 = vmul.f32 %v2261_v42, %v1324_v37  ;;  %vm1331_vm2 = vweird.f32 %v2261_v42  ;;  %v1394_v12 = vsub.f32 1.0, %v1381_v38 }
 0xc65   :  { %vm1332_vm4 = vmor %vm1330_vm3, %vm1331_vm2 }
 0xc66   :  { %v1327_v45 = vsub.f32 1.0, %v1326_v44 }
 0xc68   :  { %v1328_v46 = vmul.f32 %v2261_v42, %v1327_v45 }
 0xc6a   :  { %v1329_v47 = vadd.f32 %v2261_v42, %v1328_v46 }
 0xc6c   :  { %v1333_v52 = vsel %vm1332_vm4, %v2261_v42, %v1329_v47 }
 0xc6d   :  { %v1338_v55 = vsel %vm1335_vm5, %v1337_v53, %v1333_v52 }
 0xc6e   :  { %v1351_v11 = vsub.f32 1.0, %v1338_v55 }
 0xca0   :  { %v1385_v39 = vpop.permute.xlu2 %1384 }
 0xca1   :  { %v1387_v40 = vmul.f32 %v1385_v39, %v1381_v38 }
 0xca3   :  { %1389 = vrot.lane.b32.xlu0 %v1387_v40, %s2295_s9 }
 0xcab   :  { %1401 = vrot.lane.b32.xlu0 %v1281_v4, %s2293_s11 }
 0xcc0   :  { %v1342_v54 = vpop.permute.xlu1 %1341 }
 0xcc1   :  { %v1344_v56 = vmul.f32 %v1342_v54, %v1338_v55 }
 0xcc3   :  { %1346 = vrot.lane.b32.xlu1 %v1344_v56, %s2295_s9 }
 0xccb   :  { %1358 = vrot.lane.b32.xlu1 %v1280_v7, %s2293_s11 }
 0xd15   :  { %v1390_v58 = vpop.permute.xlu0 %1389 }
 0xd16   :  { %v1392_v61 = vadd.f32 %v1390_v58, %v1319_v17 }
 0xd18   :  { %2262 = vtanh.f32 %v1392_v61 }
 0xd1d   :  { %v1402_v3 = vpop.permute.xlu0 %1401 }
 0xd1e   :  { %v2263_v5 = vpop.eup %2262  ;;  %v1404_v6 = vmul.f32 %v1402_v3, %v1381_v38  ;;  %v1467_v38 = vld [vmem:[#allocation2 + $0x30] sm:$0xff] }
 0xd1f   :  { %1396 = vrot.lane.b32.xlu2 %v2263_v5, %s2296_s0 }
 0xd35   :  { %v1347_v63 = vpop.permute.xlu1 %1346 }
 0xd36   :  { %v1349_v0 = vadd.f32 %v1347_v63, %v1317_v24 }
 0xd38   :  { %2264 = vtanh.f32 %v1349_v0 }
 0xd3d   :  { %v1359_v7 = vpop.permute.xlu1 %1358 }
 0xd3e   :  { %v2265_v1 = vpop.eup %2264  ;;  %v1361_v14 = vmul.f32 %v1359_v7, %v1338_v55 }
 0xd3f   :  { %1353 = vrot.lane.b32.xlu0 %v2265_v1, %s2296_s0 }
 0xd79   :  { %v1397_v4 = vpop.permute.xlu2 %1396 }
 0xd7a   :  { %v1399_v8 = vmul.f32 %v1397_v4, %v1394_v12 }
 0xd7c   :  { %v2682_v9 = vadd.f32 %v1404_v6, %v1399_v8 }
 0xd7e   :  { %1412 = vrot.lane.b32.xlu2 %v2682_v9, %s2296_s0 }
 0xdb1   :  { %v1354_v13 = vpop.permute.xlu0 %1353 }
 0xdb2   :  { %v1356_v62 = vmul.f32 %v1354_v13, %v1351_v11 }
 0xdb4   :  { %v2686_v16 = vadd.f32 %v1361_v14, %v1356_v62 }
 0xdb6   :  { %1407 = vrot.lane.b32.xlu2 %v2686_v16, %s2296_s0 }
 0xdd8   :  { %v1413_v17 = vpop.permute.xlu2 %1412 }
 0xdd9   :  { %1415 = vst.msk [vmem:[#allocation5] sm:$0xff] %vm121_vm0, %v1413_v17 }
 0xde0   :  { %v1431_v18 = vld [vmem:[#allocation5] sm:$0xff] }
 0xde1   :  { %v1449_v60 = vpack.c.bf16 %v1431_v18, %v1431_v18 }
 0xde3   :  { %2089 = vmatmul.msk.bf16.vlgmr.msra.gmra.mxu1 %vm121_vm0, %v1449_v60 }
 0xe10   :  { %v1408_v20 = vpop.permute.xlu2 %1407 }
 0xe11   :  { %1410 = vst.msk [vmem:[#allocation4] sm:$0xff] %vm121_vm0, %v1408_v20 }
 0xe18   :  { %v1430_v21 = vld [vmem:[#allocation4] sm:$0xff] }
 0xe19   :  { %v1432_v22 = vpack.c.bf16 %v1430_v21, %v1430_v21 }
 0xe1b   :  { %2088 = vmatmul.msk.bf16.vlgmr.msra.gmra.mxu0 %vm121_vm0, %v1432_v22 }
 0xe60   :  { %v1462_v23 = vpop.f32.mrf.mxu1 }
 0xe61   :  { %v1463_v24 = vadd.f32 %v2665_v10, %v1462_v23 }
 0xe63   :  { %1534 = vrot.lane.b32.xlu0 %v1463_v24, %s2294_s1  ;;  %v1513_v19 = vadd.f32 %v1469_v29, %v1463_v24 }
 0xe65   :  { %v2091_v31 = vmul.f32 -1.442695, %v1513_v19 }
 0xe67   :  { %2266 = vpow2.f32 %v2091_v31 }
 0xe68   :  { %v1464_v25 = vpop.f32.mrf.mxu1 }
 0xe6d   :  { %v2267_v32 = vpop.eup %2266 }
 0xe6e   :  { %v1517_v33 = vadd.f32 1.0, %v2267_v32 }
 0xe70   :  { %2268 = vrcp.f32 %v1517_v33  ;;  %v1529_v46 = vand.u32 2147483648, %v1517_v33  ;;  %vm1523_vm7 = vweird.f32 %v1517_v33  ;;  %v1527_v47 = vand.u32 2147483647, %v1517_v33 }
 0xe72   :  { %v1530_v52 = vor.u32 1.1754944e-38, %v1529_v46  ;;  %vm1528_vm9 = vcmp.eq.f32.partialorder %v1527_v47, 8.507059e+37  ;;  %v1618_v47 = vld [vmem:[#allocation3] sm:$0xff] }
 0xe76   :  { %v2269_v36 = vpop.eup %2268 }
 0xe77   :  { %v1519_v37 = vmul.f32 %v2269_v36, %v1517_v33  ;;  %vm1524_vm6 = vweird.f32 %v2269_v36 }
 0xe78   :  { %vm1525_vm8 = vmor %vm1523_vm7, %vm1524_vm6  ;;  %vm671_vm7 = vcmask 125952  }
 0xe79   :  { %v1520_v40 = vsub.f32 1.0, %v1519_v37 }
 0xe7b   :  { %v1521_v44 = vmul.f32 %v2269_v36, %v1520_v40 }
 0xe7d   :  { %v1522_v45 = vadd.f32 %v2269_v36, %v1521_v44 }
 0xe7f   :  { %v1526_v50 = vsel %vm1525_vm8, %v2269_v36, %v1522_v45 }
 0xe80   :  { %v1531_v54 = vsel %vm1528_vm9, %v1530_v52, %v1526_v50  ;;  %v2720_v52 = vld [vmem:[#allocation2 + $0x38] sm:$0xff] }
 0xe81   :  { %v1544_v20 = vsub.f32 1.0, %v1531_v54 }
 0xe98   :  { %v1445_v26 = vpop.f32.mrf.mxu0 }
 0xe99   :  { %v1446_v27 = vadd.f32 %v2672_v15, %v1445_v26 }
 0xe9b   :  { %1491 = vrot.lane.b32.xlu2 %v1446_v27, %s2294_s1  ;;  %v1470_v39 = vadd.f32 %v1467_v38, %v1446_v27 }
 0xe9d   :  { %v2090_v42 = vmul.f32 -1.442695, %v1470_v39 }
 0xe9f   :  { %2270 = vpow2.f32 %v2090_v42 }
 0xea0   :  { %v1447_v28 = vpop.f32.mrf.mxu0 }
 0xea5   :  { %v2271_v48 = vpop.eup %2270 }
 0xea6   :  { %v1474_v53 = vadd.f32 1.0, %v2271_v48 }
 0xea8   :  { %2272 = vrcp.f32 %v1474_v53  ;;  %v1486_v1 = vand.u32 2147483648, %v1474_v53  ;;  %vm1480_vm11 = vweird.f32 %v1474_v53  ;;  %v1484_v3 = vand.u32 2147483647, %v1474_v53 }
 0xeaa   :  { %v1487_v4 = vor.u32 1.1754944e-38, %v1486_v1  ;;  %vm1485_vm13 = vcmp.eq.f32.partialorder %v1484_v3, 8.507059e+37 }
 0xeae   :  { %v2273_v58 = vpop.eup %2272 }
 0xeaf   :  { %v1476_v61 = vmul.f32 %v2273_v58, %v1474_v53  ;;  %vm1481_vm10 = vweird.f32 %v2273_v58 }
 0xeb0   :  { %vm1482_vm12 = vmor %vm1480_vm11, %vm1481_vm10 }
 0xeb1   :  { %v1477_v5 = vsub.f32 1.0, %v1476_v61 }
 0xeb3   :  { %v1478_v63 = vmul.f32 %v2273_v58, %v1477_v5 }
 0xeb5   :  { %v1479_v0 = vadd.f32 %v2273_v58, %v1478_v63 }
 0xeb7   :  { %v1483_v12 = vsel %vm1482_vm12, %v2273_v58, %v1479_v0 }
 0xeb8   :  { %v1488_v8 = vsel %vm1485_vm13, %v1487_v4, %v1483_v12 }
 0xeb9   :  { %v1501_v26 = vsub.f32 1.0, %v1488_v8 }
 0xed5   :  { %v1535_v55 = vpop.permute.xlu0 %1534 }
 0xed6   :  { %v1537_v56 = vmul.f32 %v1535_v55, %v1531_v54 }
 0xed8   :  { %1539 = vrot.lane.b32.xlu1 %v1537_v56, %s2295_s9 }
 0xee0   :  { %1551 = vrot.lane.b32.xlu1 %v1431_v18, %s2293_s11 }
 0xef5   :  { %v1492_v6 = vpop.permute.xlu2 %1491 }
 0xef6   :  { %v1494_v7 = vmul.f32 %v1492_v6, %v1488_v8 }
 0xef8   :  { %1496 = vrot.lane.b32.xlu2 %v1494_v7, %s2295_s9 }
 0xf00   :  { %1508 = vrot.lane.b32.xlu2 %v1430_v21, %s2293_s11 }
 0xf4a   :  { %v1540_v11 = vpop.permute.xlu1 %1539 }
 0xf4b   :  { %v1542_v13 = vadd.f32 %v1540_v11, %v1469_v29 }
 0xf4d   :  { %2274 = vtanh.f32 %v1542_v13 }
 0xf52   :  { %v1497_v14 = vpop.permute.xlu2 %1496  ;;  %v1552_v60 = vpop.permute.xlu1 %1551 }
 0xf53   :  { %v2275_v62 = vpop.eup %2274  ;;  %v1499_v17 = vadd.f32 %v1497_v14, %v1467_v38  ;;  %v1554_v23 = vmul.f32 %v1552_v60, %v1531_v54 }
 0xf54   :  { %1546 = vrot.lane.b32.xlu0 %v2275_v62, %s2296_s0 }
 0xf55   :  { %2276 = vtanh.f32 %v1499_v17 }
 0xf5a   :  { %v1509_v21 = vpop.permute.xlu2 %1508 }
 0xf5b   :  { %v2277_v18 = vpop.eup %2276  ;;  %v1511_v28 = vmul.f32 %v1509_v21, %v1488_v8 }
 0xf5c   :  { %1503 = vrot.lane.b32.xlu1 %v2277_v18, %s2296_s0 }
 0xfc6   :  { %v1547_v22 = vpop.permute.xlu0 %1546 }
 0xfc7   :  { %v1549_v24 = vmul.f32 %v1547_v22, %v1544_v20 }
 0xfc9   :  { %v2704_v25 = vadd.f32 %v1554_v23, %v1549_v24 }
 0xfcb   :  { %1562 = vrot.lane.b32.xlu0 %v2704_v25, %s2296_s0 }
 0xfce   :  { %v1504_v27 = vpop.permute.xlu1 %1503 }
 0xfcf   :  { %v1506_v29 = vmul.f32 %v1504_v27, %v1501_v26  ;;  %v666_v26 = vpack.c.bf16 %v2555_v35, %v2555_v35  ;;  %v966_v27 = vpack.c.bf16 %v2608_v49, %v2608_v49  ;;  %v1573_v49 = vpack.c.bf16 %v2704_v25, %v2704_v25 }
 0xfd1   :  { %v2708_v19 = vadd.f32 %v1511_v28, %v1506_v29  ;;  %v1123_v28 = vpack.c.bf16 %v2628_v51, %v2628_v51  ;;  %v673_v29 = vpack.c.bf16 %v2551_v30, %v2551_v30  ;;  %v816_v51 = vpack.c.bf16 %v2584_v41, %v2584_v41 }
 0xfd2   :  { %v1273_v30 = vpack.c.bf16 %v2650_v59, %v2650_v59  ;;  %v1266_v41 = vpack.c.bf16 %v2654_v2, %v2654_v2  ;;  %v823_v59 = vpack.c.bf16 %v2580_v34, %v2580_v34  ;;  %v2178_v2 = vld [vmem:[%s2883_s14] sm:$0xff] }
 0xfd3   :  { %1557 = vrot.lane.b32.xlu0 %v2708_v19, %s2296_s0  ;;  %1791 = vmatpush.bf16.msrb.mxu0 %v2178_v2 }
0x103d   :  { %v1563_v31 = vpop.permute.xlu0 %1562 }
0x103e   :  { %1565 = vst.msk [vmem:[#allocation5] sm:$0xff] %vm121_vm0, %v1563_v31 }
0x1045   :  { %v1558_v32 = vpop.permute.xlu0 %1557  ;;  %v1581_v33 = vld [vmem:[#allocation5] sm:$0xff] }
0x1046   :  { %1560 = vst.msk [vmem:[#allocation4] sm:$0xff] %vm121_vm0, %v1558_v32  ;;  %v1599_v36 = vpack.c.bf16 %v1581_v33, %v1581_v33 }
0x1048   :  { %2093 = vmatmul.msk.bf16.vlgmr.msrb.gmra.mxu3 %vm121_vm0, %v1599_v36 }
0x104d   :  { %v1580_v37 = vld [vmem:[#allocation4] sm:$0xff] }
0x104e   :  { %v1582_v38 = vpack.c.bf16 %v1580_v37, %v1580_v37 }
0x1050   :  { %2092 = vmatmul.msk.bf16.vlgmr.msrb.gmra.mxu2 %vm121_vm0, %v1582_v38 }
0x10cb   :  { %v1612_v39 = vpop.f32.mrf.mxu3 }
0x10cc   :  { %v1613_v40 = vadd.f32 %v2665_v10, %v1612_v39 }
0x10ce   :  { %1683 = vrot.lane.b32.xlu1 %v1613_v40, %s2294_s1  ;;  %v1662_v48 = vadd.f32 %v1618_v47, %v1613_v40 }
0x10d0   :  { %v2095_v50 = vmul.f32 -1.442695, %v1662_v48 }
0x10d2   :  { %2278 = vpow2.f32 %v2095_v50 }
0x10d3   :  { %v1595_v42 = vpop.f32.mrf.mxu2  ;;  %v1614_v44 = vpop.f32.mrf.mxu3 }
0x10d4   :  { %v1596_v45 = vadd.f32 %v2672_v15, %v1595_v42 }
0x10d6   :  { %1640 = vrot.lane.b32.xlu0 %v1596_v45, %s2294_s1  ;;  %v1619_v53 = vadd.f32 %v2720_v52, %v1596_v45 }
0x10d8   :  { %v2094_v54 = vmul.f32 -1.442695, %v1619_v53  ;;  %v2279_v55 = vpop.eup %2278 }
0x10d9   :  { %v1666_v10 = vadd.f32 1.0, %v2279_v55  ;;  %v1423_v55 = vpack.c.bf16 %v2682_v9, %v2682_v9 }
0x10da   :  { %2280 = vpow2.f32 %v2094_v54 }
0x10db   :  { %v1597_v46 = vpop.f32.mrf.mxu2  ;;  %2282 = vrcp.f32 %v1666_v10  ;;  %v1678_v4 = vand.u32 2147483648, %v1666_v10  ;;  %vm1672_vm15 = vweird.f32 %v1666_v10  ;;  %v1676_v6 = vand.u32 2147483647, %v1666_v10 }
0x10dd   :  { %v1679_v11 = vor.u32 1.1754944e-38, %v1678_v4  ;;  %vm1677_vm2 = vcmp.eq.f32.partialorder %v1676_v6, 8.507059e+37 }
0x10e0   :  { %v2281_v56 = vpop.eup %2280 }
0x10e1   :  { %v1623_v58 = vadd.f32 1.0, %v2281_v56  ;;  %v2283_v61 = vpop.eup %2282  ;;  %v973_v56 = vpack.c.bf16 %v2604_v43, %v2604_v43 }
0x10e2   :  { %v1668_v15 = vmul.f32 %v2283_v61, %v1666_v10  ;;  %vm1673_vm14 = vweird.f32 %v2283_v61 }
0x10e3   :  { %2284 = vrcp.f32 %v1623_v58  ;;  %vm1674_vm1 = vmor %vm1672_vm15, %vm1673_vm14  ;;  %v1635_v18 = vand.u32 2147483648, %v1623_v58  ;;  %vm1629_vm4 = vweird.f32 %v1623_v58  ;;  %v1633_v60 = vand.u32 2147483647, %v1623_v58 }
0x10e4   :  { %v1669_v5 = vsub.f32 1.0, %v1668_v15 }
0x10e5   :  { %v1636_v22 = vor.u32 1.1754944e-38, %v1635_v18  ;;  %vm1634_vm6 = vcmp.eq.f32.partialorder %v1633_v60, 8.507059e+37 }
0x10e6   :  { %v1670_v0 = vmul.f32 %v2283_v61, %v1669_v5  ;;  %v1566_v5 = vpack.c.bf16 %v2708_v19, %v2708_v19 }
0x10e8   :  { %v1671_v3 = vadd.f32 %v2283_v61, %v1670_v0 }
0x10e9   :  { %v2285_v63 = vpop.eup %2284 }
0x10ea   :  { %v1625_v1 = vmul.f32 %v2285_v63, %v1623_v58  ;;  %v1675_v8 = vsel %vm1674_vm1, %v2283_v61, %v1671_v3  ;;  %vm1630_vm3 = vweird.f32 %v2285_v63  ;;  %v1416_v61 = vpack.c.bf16 %v2686_v16, %v2686_v16  ;;  %v2179_v16 = vld [vmem:[%s2884_s15] sm:$0xff] }
0x10eb   :  { %v2723_v13 = vsel %vm1677_vm2, %v1679_v11, %v1675_v8  ;;  %vm1631_vm5 = vmor %vm1629_vm4, %vm1630_vm3  ;;  %1872 = vmatpush.bf16.msrb.mxu1 %v2179_v16 }
0x10ec   :  { %v1626_v12 = vsub.f32 1.0, %v1625_v1  ;;  %v1693_v42 = vsub.f32 1.0, %v2723_v13 }
0x10ee   :  { %v1627_v7 = vmul.f32 %v2285_v63, %v1626_v12 }
0x10f0   :  { %v1628_v17 = vadd.f32 %v2285_v63, %v1627_v7 }
0x10f2   :  { %v1632_v20 = vsel %vm1631_vm5, %v2285_v63, %v1628_v17 }
0x10f3   :  { %v2727_v24 = vsel %vm1634_vm6, %v1636_v22, %v1632_v20 }
0x10f4   :  { %v1650_v0 = vsub.f32 1.0, %v2727_v24 }
0x1140   :  { %v1684_v14 = vpop.permute.xlu1 %1683 }
0x1141   :  { %v1686_v62 = vmul.f32 %v1684_v14, %v2723_v13 }
0x1143   :  { %1688 = vrot.lane.b32.xlu2 %v1686_v62, %s2295_s9 }
0x1148   :  { %v1641_v23 = vpop.permute.xlu0 %1640 }
0x1149   :  { %v1643_v21 = vmul.f32 %v1641_v23, %v2727_v24 }
0x114b   :  { %1645 = vrot.lane.b32.xlu0 %v1643_v21, %s2295_s9  ;;  %1700 = vrot.lane.b32.xlu2 %v1581_v33, %s2293_s11 }
0x1153   :  { %668 = vrot.lane.b32.xlu0 %v666_v26, %s2296_s0 }
0x115b   :  { %1657 = vrot.lane.b32.xlu0 %v1580_v37, %s2293_s11  ;;  %v1116_v37 = vpack.c.bf16 %v2632_v57, %v2632_v57 }
0x1163   :  { %968 = vrot.lane.b32.xlu0 %v966_v27, %s2296_s0  ;;  %v2193_v27 = vld [vmem:[%s2885_s16] ss:$0 sm:$0xff] }
0x116b   :  { %1125 = vrot.lane.b32.xlu0 %v1123_v28, %s2296_s0 }
0x1173   :  { %675 = vrot.lane.b32.xlu0 %v673_v29, %s2296_s0 }
0x119d   :  { %v1689_v35 = vpop.permute.xlu2 %1688 }
0x119e   :  { %v1691_v31 = vadd.f32 %v1689_v35, %v1618_v47 }
0x11a0   :  { %2286 = vtanh.f32 %v1691_v31 }
0x11a5   :  { %v1701_v40 = vpop.permute.xlu2 %1700 }
0x11a6   :  { %v2287_v32 = vpop.eup %2286  ;;  %v1703_v34 = vmul.f32 %v1701_v40, %v2723_v13 }
0x11a7   :  { %1695 = vrot.lane.b32.xlu1 %v2287_v32, %s2296_s0 }
0x11af   :  { %1575 = vrot.lane.b32.xlu1 %v1573_v49, %s2296_s0 }
0x11b7   :  { %818 = vrot.lane.b32.xlu1 %v816_v51, %s2296_s0 }
0x11bd   :  { %v1646_v33 = vpop.permute.xlu0 %1645 }
0x11be   :  { %v1648_v47 = vadd.f32 %v1646_v33, %v2720_v52 }
0x11bf   :  { %1275 = vrot.lane.b32.xlu1 %v1273_v30, %s2296_s0 }
0x11c0   :  { %2288 = vtanh.f32 %v1648_v47 }
0x11c5   :  { %v669_v36 = vpop.permute.xlu0 %668 }
0x11c6   :  { %672 = vst.msk [vmem:[#allocation6] sm:$0xf] %vm671_vm7, %v669_v36  ;;  %v2289_v53 = vpop.eup %2288 }
0x11c7   :  { %1118 = vrot.lane.b32.xlu1 %v1116_v37, %s2296_s0 }
0x11cd   :  { %v1658_v25 = vpop.permute.xlu0 %1657 }
0x11ce   :  { %v1660_v19 = vmul.f32 %v1658_v25, %v2727_v24 }
0x11cf   :  { %1268 = vrot.lane.b32.xlu1 %v1266_v41, %s2296_s0 }
0x11d5   :  { %v969_v38 = vpop.permute.xlu0 %968 }
0x11d6   :  { %972 = vst.msk [vmem:[#allocation6 + $0x8] sm:$0xf] %vm671_vm7, %v969_v38 }
0x11d7   :  { %825 = vrot.lane.b32.xlu1 %v823_v59, %s2296_s0 }
0x11dd   :  { %v1126_v39 = vpop.permute.xlu0 %1125 }
0x11de   :  { %1129 = vst.msk [vmem:[#allocation7 + $0x10] sm:$0xf] %vm671_vm7, %v1126_v39 }
0x11e5   :  { %v676_v57 = vpop.permute.xlu0 %675 }
0x11e6   :  { %679 = vst.msk [vmem:[#allocation7 + $0x1c] sm:$0xf] %vm671_vm7, %v676_v57 }
0x1219   :  { %v1696_v44 = vpop.permute.xlu1 %1695 }
0x121a   :  { %v1698_v45 = vmul.f32 %v1696_v44, %v1693_v42 }
0x121c   :  { %v1704_v46 = vadd.f32 %v1703_v34, %v1698_v45 }
0x121e   :  { %v1722_v48 = vpack.c.bf16 %v1704_v46, %v1704_v46 }
0x1220   :  { %1724 = vrot.lane.b32.xlu2 %v1722_v48, %s2296_s0 }
0x1221   :  { %v1576_v50 = vpop.permute.xlu1 %1575 }
0x1222   :  { %1579 = vst.msk [vmem:[#allocation7 + $0x4] sm:$0xf] %vm671_vm7, %v1576_v50 }
0x1228   :  { %1652 = vrot.lane.b32.xlu2 %v2289_v53, %s2296_s0 }
0x1229   :  { %v819_v54 = vpop.permute.xlu1 %818 }
0x122a   :  { %822 = vst.msk [vmem:[#allocation6 + $0x4] sm:$0xf] %vm671_vm7, %v819_v54 }
0x1230   :  { %1425 = vrot.lane.b32.xlu2 %v1423_v55, %s2296_s0 }
0x1231   :  { %v1276_v10 = vpop.permute.xlu1 %1275  ;;  %v2170_v52 = vld [vmem:[#allocation6] sm:$0xff] }
0x1232   :  { %1279 = vst.msk [vmem:[#allocation7 + $0xc] sm:$0xf] %vm671_vm7, %v1276_v10  ;;  %2116 = vmatmul.msk.bf16.vlgmr.msrb.gmra.mxu0 %vm121_vm0, %v2170_v52 }
0x1238   :  { %975 = vrot.lane.b32.xlu2 %v973_v56, %s2296_s0 }
0x1239   :  { %v1119_v58 = vpop.permute.xlu1 %1118 }
0x123a   :  { %1122 = vst.msk [vmem:[#allocation6 + $0xc] sm:$0xf] %vm671_vm7, %v1119_v58 }
0x1240   :  { %1418 = vrot.lane.b32.xlu2 %v1416_v61, %s2296_s0 }
0x1241   :  { %v1269_v9 = vpop.permute.xlu1 %1268  ;;  %v2171_v15 = vld [vmem:[#allocation6 + $0x8] sm:$0xff] }
0x1242   :  { %1272 = vst.msk [vmem:[#allocation6 + $0x10] sm:$0xf] %vm671_vm7, %v1269_v9  ;;  %2117 = vmatmul.msk.bf16.gmra.mxu0 %vm121_vm0, %v2171_v15 }
0x1248   :  { %1568 = vrot.lane.b32.xlu2 %v1566_v5, %s2296_s0 }
0x1249   :  { %v826_v43 = vpop.permute.xlu1 %825 }
0x124a   :  { %829 = vst.msk [vmem:[#allocation7 + $0x18] sm:$0xf] %vm671_vm7, %v826_v43 }
0x1250   :  { %1711 = vrot.lane.b32.xlu2 %v1704_v46, %s2296_s0 }
0x1251   :  { %v2177_v20 = vld [vmem:[#allocation7 + $0x18] sm:$0xff] }
0x127a   :  { %v1725_v63 = vpop.permute.xlu2 %1724 }
0x127b   :  { %1727 = vst.msk [vmem:[#allocation7] sm:$0xf] %vm671_vm7, %v1725_v63 }
0x1282   :  { %v1653_v1 = vpop.permute.xlu2 %1652  ;;  %v2174_v3 = vld [vmem:[#allocation7] sm:$0xff] }
0x1283   :  { %v1655_v12 = vmul.f32 %v1653_v1, %v1650_v0  ;;  %2140 = vmatmul.msk.bf16.vlgmr.msrb.gmra.mxu1 %vm121_vm0, %v2174_v3 }
0x1285   :  { %v1661_v4 = vadd.f32 %v1660_v19, %v1655_v12 }
0x1287   :  { %1706 = vrot.lane.b32.xlu1 %v1661_v4, %s2296_s0  ;;  %v1715_v6 = vpack.c.bf16 %v1661_v4, %v1661_v4 }
0x1289   :  { %1717 = vrot.lane.b32.xlu0 %v1715_v6, %s2296_s0 }
0x128a   :  { %v1426_v8 = vpop.permute.xlu2 %1425 }
0x128b   :  { %1429 = vst.msk [vmem:[#allocation7 + $0x8] sm:$0xf] %vm671_vm7, %v1426_v8 }
0x1292   :  { %v976_v7 = vpop.permute.xlu2 %975  ;;  %v2175_v11 = vld [vmem:[#allocation7 + $0x8] sm:$0xff] }
0x1293   :  { %979 = vst.msk [vmem:[#allocation7 + $0x14] sm:$0xf] %vm671_vm7, %v976_v7  ;;  %2141 = vmatmul.msk.bf16.gmra.mxu1 %vm121_vm0, %v2175_v11 }
0x129a   :  { %v1419_v13 = vpop.permute.xlu2 %1418  ;;  %v2176_v17 = vld [vmem:[#allocation7 + $0x10] sm:$0xff] }
0x129b   :  { %1422 = vst.msk [vmem:[#allocation6 + $0x14] sm:$0xf] %vm671_vm7, %v1419_v13 }
0x12a2   :  { %v1569_v14 = vpop.permute.xlu2 %1568  ;;  %v2172_v62 = vld [vmem:[#allocation6 + $0x10] sm:$0xff] }
0x12a3   :  { %1572 = vst.msk [vmem:[#allocation6 + $0x18] sm:$0xf] %vm671_vm7, %v1569_v14  ;;  %2118 = vmatmul.msk.bf16.gmra.mxu0 %vm121_vm0, %v2172_v62  ;;  %2142 = vmatmul.msk.bf16.gmra.mxu1 %vm121_vm0, %v2176_v17 }
0x12aa   :  { %v1712_v18 = vpop.permute.xlu2 %1711 }
0x12ab   :  { %1714 = vst.msk [vmem:[#allocation5] sm:$0xff] %vm121_vm0, %v1712_v18 }
0x12af   :  { %v1793_v60 = vpop.f32.mrf.mxu0 }
0x12b0   :  { %1813 = vst [vmem:[%s2886_s17] sm:$0xff] %v1793_v60 }
0x12b3   :  { %2143 = vmatmul.msk.bf16.gmra.mxu1 %vm121_vm0, %v2177_v20 }
0x12b7   :  { %v1795_v22 = vpop.f32.mrf.mxu0 }
0x12b8   :  { %1814 = vst [vmem:[%s2886_s17 + $0x8] sm:$0xff] %v1795_v22 }
0x12bf   :  { %v1798_v23 = vpop.f32.mrf.mxu0 }
0x12c0   :  { %1815 = vst [vmem:[%s2886_s17 + $0x10] sm:$0xff] %v1798_v23 }
0x12c7   :  { %v1800_v24 = vpop.f32.mrf.mxu0 }
0x12c8   :  { %1816 = vst [vmem:[%s2886_s17 + $0x18] sm:$0xff] %v1800_v24 }
0x12f9   :  { %v1707_v21 = vpop.permute.xlu1 %1706 }
0x12fa   :  { %1709 = vst.msk [vmem:[#allocation4] sm:$0xff] %vm121_vm0, %v1707_v21 }
0x12fb   :  { %v1718_v26 = vpop.permute.xlu0 %1717 }
0x12fc   :  { %1721 = vst.msk [vmem:[#allocation6 + $0x1c] sm:$0xf] %vm671_vm7, %v1718_v26 }
0x1300   :  { %v1874_v28 = vpop.f32.mrf.mxu1 }
0x1301   :  { %v1875_v29 = vadd.f32 %v2193_v27, %v1874_v28 }
0x1303   :  { %v2173_v35 = vld [vmem:[#allocation6 + $0x18] sm:$0xff]  ;;  %1894 = vst [vmem:[%s2887_s18] sm:$0xff] %v1875_v29 }
0x1304   :  { %2119 = vmatmul.msk.bf16.gmra.mxu0 %vm121_vm0, %v2173_v35 }
0x1308   :  { %v1876_v31 = vpop.f32.mrf.mxu1 }
0x1309   :  { %v1877_v32 = vadd.f32 %v2193_v27, %v1876_v31 }
0x130b   :  { %1895 = vst [vmem:[%s2887_s18 + $0x8] sm:$0xff] %v1877_v32 }
0x1310   :  { %v1879_v49 = vpop.f32.mrf.mxu1 }
0x1311   :  { %v1880_v51 = vadd.f32 %v2193_v27, %v1879_v49 }
0x1313   :  { %1896 = vst [vmem:[%s2887_s18 + $0x10] sm:$0xff] %v1880_v51 }
0x1318   :  { %v1881_v33 = vpop.f32.mrf.mxu1 }
0x1319   :  { %v1882_v30 = vadd.f32 %v2193_v27, %v1881_v33 }
0x131b   :  { %1897 = vst [vmem:[%s2887_s18 + $0x18] sm:$0xff] %v1882_v30 }
0x1320   :  { %v1803_v36 = vpop.f32.mrf.mxu0  ;;  %v1884_v37 = vpop.f32.mrf.mxu1 }
0x1321   :  { %1817 = vst [vmem:[%s2886_s17 + $0x20] sm:$0xff] %v1803_v36  ;;  %v1885_v25 = vadd.f32 %v2193_v27, %v1884_v37 }
0x1323   :  { %1898 = vst [vmem:[%s2887_s18 + $0x20] sm:$0xff] %v1885_v25 }
0x1328   :  { %v1805_v41 = vpop.f32.mrf.mxu0  ;;  %v1886_v38 = vpop.f32.mrf.mxu1 }
0x1329   :  { %1818 = vst [vmem:[%s2886_s17 + $0x28] sm:$0xff] %v1805_v41  ;;  %v1887_v59 = vadd.f32 %v2193_v27, %v1886_v38 }
0x132b   :  { %1899 = vst [vmem:[%s2887_s18 + $0x28] sm:$0xff] %v1887_v59 }
0x1330   :  { %v1889_v39 = vpop.f32.mrf.mxu1 }
0x1331   :  { %v1890_v57 = vadd.f32 %v2193_v27, %v1889_v39 }
0x1333   :  { %1900 = vst [vmem:[%s2887_s18 + $0x30] sm:$0xff] %v1890_v57 }
0x1338   :  { %v1891_v2 = vpop.f32.mrf.mxu1 }
0x1339   :  { %v1892_v40 = vadd.f32 %v2193_v27, %v1891_v2 }
0x133b   :  { %1901 = vst [vmem:[%s2887_s18 + $0x38] sm:$0xff] %v1892_v40 }
0x1381   :  { %v1808_v42 = vpop.f32.mrf.mxu0 }
0x1382   :  { %1819 = vst [vmem:[%s2886_s17 + $0x30] sm:$0xff] %v1808_v42 }
0x1389   :  { %v1810_v44 = vpop.f32.mrf.mxu0 }
0x138a   :  { %1820 = vst [vmem:[%s2886_s17 + $0x38] sm:$0xff] %v1810_v44 }

</bundles_post_ra>
